<compile_context>
chip_gen: v7x
topology: tpu7x:2x2x1
jax: 0.10.0
libtpu: 0.0.40
codegen_flags: <defaults>
</compile_context>

<pallas_src>
import numpy as np

import jax
import jax.numpy as jnp
from jax.experimental import pallas as pl
from jax.experimental.pallas import tpu as pltpu


POSITION_INPUT_DIMS = 3


def _round_up(x: int, m: int) -> int:
    return ((x + m - 1) // m) * m


def _build_scatter(num_pos_embs: int, in_dims_padded: int) -> np.ndarray:
    """(3, K_pad) matrix so that (pts @ S)[m, j] = freq(j) * pts[m, coord(j)].

    Identity lanes get frequency 1.0, sin/cos lanes get 2^k, pad lanes get 0.
    """
    E = num_pos_embs
    block = 2 * E + 1
    s = np.zeros((POSITION_INPUT_DIMS, in_dims_padded), np.float32)
    for c in range(POSITION_INPUT_DIMS):
        base = c * block
        s[c, base] = 1.0                                # identity lane
        for k in range(E):
            s[c, base + 1 + k] = 2.0 ** k               # sin lanes
            s[c, base + 1 + E + k] = 2.0 ** k           # cos lanes
    return s


def _make_kernel(num_layers: int, num_pos_embs: int, in_dims: int):
    """Fused (sinusoidal embedding + MLP) kernel body."""
    E = num_pos_embs
    block = 2 * E + 1

    def kernel(*refs):
        pts_ref = refs[0]             # (TM, 3)      f32
        s_ref = refs[1]               # (3, K_pad)   f32, resident
        out_ref = refs[-1]            # (TM, N_pad)  f32
        wb_refs = refs[2:-1]          # [W0, b0, W1, b1, ...], resident

        pts = pts_ref[...]                                        # (TM, 3)
        # Lane-dense sinusoidal embedding: one tiny MXU matmul scatters each
        # coordinate (already scaled by its frequency) into the lanes it owns.
        fp = jnp.dot(pts, s_ref[...],
                     preferred_element_type=jnp.float32)          # (TM, K_pad)

        lane = jax.lax.broadcasted_iota(jnp.int32, fp.shape, 1)
        is_id = lane >= in_dims          # pad lanes: fp == 0 there -> output 0
        is_sin = lane < 0                # all-False init
        for c in range(POSITION_INPUT_DIMS):
            base = c * block
            is_id = is_id | (lane == base)
            is_sin = is_sin | ((lane > base) & (lane <= base + E))
        h = jnp.where(is_id, fp,
                      jnp.where(is_sin, jnp.sin(fp), jnp.cos(fp)))

        # position_mlp: Linear (+ReLU on all but the last layer), MXU matmuls
        # with f32 accumulation; weights stay resident in VMEM.
        for l in range(num_layers):
            w = wb_refs[2 * l][...]                     # (d_in, d_out)
            b = wb_refs[2 * l + 1][...]                 # (1, d_out)
            h = jnp.dot(h, w, preferred_element_type=jnp.float32) + b
            if l < num_layers - 1:
                h = jnp.maximum(h, 0.0)                 # ReLU
        out_ref[...] = h.astype(out_ref.dtype)

    return kernel


def point2emb_forward(points, weights, biases, *, num_pos_embs,
                      text_rep_size, image_rep_size, tm=2048):
    """Fused Point2EmbModel forward.

    points:  (B, N, 3) float32
    weights: list of (d_in_l, d_out_l); weights[0] has d_in = 3*(2E+1)
    biases:  list of (d_out_l,)
    Returns (preds[:, :text_rep_size], preds[:, -image_rep_size:]) exactly like
    the PyTorch module (slices taken along the N axis).
    """
    B, N, P = points.shape
    assert P == POSITION_INPUT_DIMS
    num_layers = len(weights)
    E = num_pos_embs
    in_dims = POSITION_INPUT_DIMS * (2 * E + 1)
    in_dims_padded = _round_up(in_dims, 8)
    assert weights[0].shape[0] == in_dims
    out_dims = weights[-1].shape[-1]
    out_dims_padded = _round_up(out_dims, 128)          # lane-dense stores

    M = B * N
    # Row tile: multiple of 8.  Clamp so the grid keeps >= ~8 steps so the
    # "parallel" row axis can shard across v7x's two TensorCores and still
    # pipeline per core; for large M this leaves tm at the requested value.
    tm = max(8, min(tm, _round_up(pl.cdiv(M, 8), 8)))
    grid = (pl.cdiv(M, tm),)

    pts2d = points.reshape(M, P).astype(jnp.float32)
    scatter = jnp.asarray(_build_scatter(E, in_dims_padded))

    # Assemble (weight, bias) operands: first-layer K zero-padded to a multiple
    # of 8 (matches the zero pad lanes of fp), last-layer N zero-padded to a
    # multiple of 128 (sliced off after the call).
    wb = []
    in_specs = [
        pl.BlockSpec((tm, P), lambda i: (i, 0)),          # point rows
        pl.BlockSpec(scatter.shape, lambda i: (0, 0)),    # resident scatter
    ]
    for l, (w, b) in enumerate(zip(weights, biases)):
        w2 = w.astype(jnp.float32)
        b2 = b.reshape(1, -1).astype(jnp.float32)
        if l == 0 and in_dims_padded != in_dims:
            w2 = jnp.concatenate(
                [w2, jnp.zeros((in_dims_padded - in_dims, w2.shape[1]),
                               jnp.float32)], axis=0)
        if l == num_layers - 1 and out_dims_padded != out_dims:
            pad = out_dims_padded - out_dims
            w2 = jnp.concatenate(
                [w2, jnp.zeros((w2.shape[0], pad), jnp.float32)], axis=1)
            b2 = jnp.concatenate(
                [b2, jnp.zeros((1, pad), jnp.float32)], axis=1)
        wb += [w2, b2]
        # Whole-array blocks, constant index_map -> loaded once, kept resident.
        in_specs += [pl.BlockSpec(w2.shape, lambda i: (0, 0)),
                     pl.BlockSpec(b2.shape, lambda i: (0, 0))]

    preds2d = pl.pallas_call(
        _make_kernel(num_layers, E, in_dims),
        grid=grid,
        in_specs=in_specs,
        out_specs=pl.BlockSpec((tm, out_dims_padded), lambda i: (i, 0)),
        out_shape=jax.ShapeDtypeStruct((M, out_dims_padded), jnp.float32),
        compiler_params=pltpu.CompilerParams(
            dimension_semantics=("parallel",)),
    )(pts2d, scatter, *wb)

    preds = preds2d[:, :out_dims].reshape(B, N, out_dims)
    # Faithful to the PyTorch forward: these slice dim 1 (the point axis N).
    return preds[:, :text_rep_size], preds[:, -image_rep_size:]


if __name__ == "__main__":
    # Small, deterministic config.
    num_layers = 2
    hidden_dims = 64
    image_rep_size = 64
    text_rep_size = 64
    num_pos_embs = 6
    B, N = 2, 1024                                       # M = 2048 rows

    in_dims = POSITION_INPUT_DIMS * (2 * num_pos_embs + 1)   # 39
    out_dims = image_rep_size + text_rep_size                # 128

    key = jax.random.PRNGKey(0)
    k_pts, *k_ws = jax.random.split(key, 1 + num_layers)

    # Xavier-uniform weights, zero biases (matches init_weights in the spec).
    dims = [in_dims] + [hidden_dims] * (num_layers - 1) + [out_dims]
    weights, biases = [], []
    for l in range(num_layers):
        fan_in, fan_out = dims[l], dims[l + 1]
        bound = float(np.sqrt(6.0 / (fan_in + fan_out)))
        weights.append(jax.random.uniform(
            k_ws[l], (fan_in, fan_out), jnp.float32, -bound, bound))
        biases.append(jnp.zeros((fan_out,), jnp.float32))

    points = jax.random.normal(k_pts, (B, N, POSITION_INPUT_DIMS), jnp.float32)

    text_out, image_out = point2emb_forward(
        points, weights, biases, num_pos_embs=num_pos_embs,
        text_rep_size=text_rep_size, image_rep_size=image_rep_size)
    text_out, image_out = jax.block_until_ready((text_out, image_out))

    # ---- plain-JAX reference (mirrors the PyTorch forward exactly) ----
    freqs = 2.0 ** jnp.arange(num_pos_embs, dtype=jnp.float32)
    p = points[..., None]                                # (B, N, 3, 1)
    fp = freqs * p                                       # (B, N, 3, E)
    emb = jnp.concatenate([p, jnp.sin(fp), jnp.cos(fp)], axis=-1)
    emb = emb.reshape(B, N, in_dims)
    h = emb
    for l in range(num_layers):
        h = h @ weights[l] + biases[l]
        if l < num_layers - 1:
            h = jax.nn.relu(h)
    ref_text = h[:, :text_rep_size]
    ref_image = h[:, -image_rep_size:]

    assert text_out.shape == (B, text_rep_size, out_dims), text_out.shape
    assert image_out.shape == (B, image_rep_size, out_dims), image_out.shape
    # All-f32 path: tight tolerance (only sin/cos implementation differences
    # and f32 matmul rounding remain).
    assert jnp.allclose(text_out, ref_text, atol=1e-3, rtol=1e-3)
    assert jnp.allclose(image_out, ref_image, atol=1e-3, rtol=1e-3)

    print("KERNEL_OK")
</pallas_src>

<mosaic_0001>
module attributes {stable_mosaic.version = 11 : i64} {
  func.func @kernel(%arg0: i32, %arg1: memref<256x3xf32, #tpu.memory_space<vmem>>, %arg2: memref<3x40xf32, #tpu.memory_space<vmem>>, %arg3: memref<40x64xf32, #tpu.memory_space<vmem>>, %arg4: memref<1x64xf32, #tpu.memory_space<vmem>>, %arg5: memref<64x128xf32, #tpu.memory_space<vmem>>, %arg6: memref<1x128xf32, #tpu.memory_space<vmem>>, %arg7: memref<256x128xf32, #tpu.memory_space<vmem>>) attributes {dimension_semantics = [#tpu.dimension_semantics<parallel>], iteration_bounds = array<i64: 8>, scalar_prefetch = 0 : i64, scratch_operands = 0 : i64, tpu.core_type = #tpu.core_type<tc>, window_params = [{transform_indices = @transform_0, window_bounds = array<i64: 256, 3>}, {pipeline_mode = #tpu.pipeline_mode<synchronous>, transform_indices = @transform_1, window_bounds = array<i64: 3, 40>}, {pipeline_mode = #tpu.pipeline_mode<synchronous>, transform_indices = @transform_2, window_bounds = array<i64: 40, 64>}, {pipeline_mode = #tpu.pipeline_mode<synchronous>, transform_indices = @transform_3, window_bounds = array<i64: 1, 64>}, {pipeline_mode = #tpu.pipeline_mode<synchronous>, transform_indices = @transform_4, window_bounds = array<i64: 64, 128>}, {pipeline_mode = #tpu.pipeline_mode<synchronous>, transform_indices = @transform_5, window_bounds = array<i64: 1, 128>}, {transform_indices = @transform_6, window_bounds = array<i64: 256, 128>}]} {
    %c0 = arith.constant 0 : index
    %c0_0 = arith.constant 0 : index
    %0 = vector.load %arg1[%c0, %c0_0] : memref<256x3xf32, #tpu.memory_space<vmem>>, vector<256x3xf32>
    %c0_1 = arith.constant 0 : index
    %c0_2 = arith.constant 0 : index
    %1 = vector.load %arg2[%c0_1, %c0_2] : memref<3x40xf32, #tpu.memory_space<vmem>>, vector<3x40xf32>
    %cst = arith.constant dense<0.000000e+00> : vector<256x40xf32>
    %2 = tpu.matmul %0, %1, %cst {dimension_numbers = #tpu.dot_dimension_numbers<[1], [0], [0], [1], [0, 0, 1, 1], [], []>} : vector<256x3xf32>, vector<3x40xf32>, vector<256x40xf32> -> vector<256x40xf32>
    %3 = tpu.iota {dimensions = array<i32: 1>} : vector<256x40xi32>
    %c39_i32 = arith.constant 39 : i32
    %4 = vector.broadcast %c39_i32 : i32 to vector<256x40xi32>
    %5 = arith.cmpi sge, %3, %4 : vector<256x40xi32>
    %c0_i32 = arith.constant 0 : i32
    %6 = vector.broadcast %c0_i32 : i32 to vector<256x40xi32>
    %7 = arith.cmpi slt, %3, %6 : vector<256x40xi32>
    %c0_i32_3 = arith.constant 0 : i32
    %8 = vector.broadcast %c0_i32_3 : i32 to vector<256x40xi32>
    %9 = arith.cmpi eq, %3, %8 : vector<256x40xi32>
    %10 = arith.ori %5, %9 : vector<256x40xi1>
    %c0_i32_4 = arith.constant 0 : i32
    %11 = vector.broadcast %c0_i32_4 : i32 to vector<256x40xi32>
    %12 = arith.cmpi sgt, %3, %11 : vector<256x40xi32>
    %c6_i32 = arith.constant 6 : i32
    %13 = vector.broadcast %c6_i32 : i32 to vector<256x40xi32>
    %14 = arith.cmpi sle, %3, %13 : vector<256x40xi32>
    %15 = arith.andi %12, %14 : vector<256x40xi1>
    %16 = arith.ori %7, %15 : vector<256x40xi1>
    %c13_i32 = arith.constant 13 : i32
    %17 = vector.broadcast %c13_i32 : i32 to vector<256x40xi32>
    %18 = arith.cmpi eq, %3, %17 : vector<256x40xi32>
    %19 = arith.ori %10, %18 : vector<256x40xi1>
    %c13_i32_5 = arith.constant 13 : i32
    %20 = vector.broadcast %c13_i32_5 : i32 to vector<256x40xi32>
    %21 = arith.cmpi sgt, %3, %20 : vector<256x40xi32>
    %c19_i32 = arith.constant 19 : i32
    %22 = vector.broadcast %c19_i32 : i32 to vector<256x40xi32>
    %23 = arith.cmpi sle, %3, %22 : vector<256x40xi32>
    %24 = arith.andi %21, %23 : vector<256x40xi1>
    %25 = arith.ori %16, %24 : vector<256x40xi1>
    %c26_i32 = arith.constant 26 : i32
    %26 = vector.broadcast %c26_i32 : i32 to vector<256x40xi32>
    %27 = arith.cmpi eq, %3, %26 : vector<256x40xi32>
    %28 = arith.ori %19, %27 : vector<256x40xi1>
    %c26_i32_6 = arith.constant 26 : i32
    %29 = vector.broadcast %c26_i32_6 : i32 to vector<256x40xi32>
    %30 = arith.cmpi sgt, %3, %29 : vector<256x40xi32>
    %c32_i32 = arith.constant 32 : i32
    %31 = vector.broadcast %c32_i32 : i32 to vector<256x40xi32>
    %32 = arith.cmpi sle, %3, %31 : vector<256x40xi32>
    %33 = arith.andi %30, %32 : vector<256x40xi1>
    %34 = arith.ori %25, %33 : vector<256x40xi1>
    %35 = math.sin %2 : vector<256x40xf32>
    %36 = math.cos %2 : vector<256x40xf32>
    %37 = arith.select %34, %35, %36 : vector<256x40xi1>, vector<256x40xf32>
    %38 = arith.select %28, %2, %37 : vector<256x40xi1>, vector<256x40xf32>
    %c0_7 = arith.constant 0 : index
    %c0_8 = arith.constant 0 : index
    %39 = vector.load %arg3[%c0_7, %c0_8] : memref<40x64xf32, #tpu.memory_space<vmem>>, vector<40x64xf32>
    %c0_9 = arith.constant 0 : index
    %c0_10 = arith.constant 0 : index
    %40 = vector.load %arg4[%c0_9, %c0_10] : memref<1x64xf32, #tpu.memory_space<vmem>>, vector<1x64xf32>
    %cst_11 = arith.constant dense<0.000000e+00> : vector<256x64xf32>
    %41 = tpu.matmul %38, %39, %cst_11 {dimension_numbers = #tpu.dot_dimension_numbers<[1], [0], [0], [1], [0, 0, 1, 1], [], []>} : vector<256x40xf32>, vector<40x64xf32>, vector<256x64xf32> -> vector<256x64xf32>
    %42 = vector.broadcast %40 : vector<1x64xf32> to vector<256x64xf32>
    %43 = arith.addf %41, %42 : vector<256x64xf32>
    %cst_12 = arith.constant 0.000000e+00 : f32
    %44 = vector.broadcast %cst_12 : f32 to vector<256x64xf32>
    %45 = arith.maximumf %43, %44 : vector<256x64xf32>
    %c0_13 = arith.constant 0 : index
    %c0_14 = arith.constant 0 : index
    %46 = vector.load %arg5[%c0_13, %c0_14] : memref<64x128xf32, #tpu.memory_space<vmem>>, vector<64x128xf32>
    %c0_15 = arith.constant 0 : index
    %c0_16 = arith.constant 0 : index
    %47 = vector.load %arg6[%c0_15, %c0_16] : memref<1x128xf32, #tpu.memory_space<vmem>>, vector<1x128xf32>
    %cst_17 = arith.constant dense<0.000000e+00> : vector<256x128xf32>
    %48 = tpu.matmul %45, %46, %cst_17 {dimension_numbers = #tpu.dot_dimension_numbers<[1], [0], [0], [1], [0, 0, 1, 1], [], []>} : vector<256x64xf32>, vector<64x128xf32>, vector<256x128xf32> -> vector<256x128xf32>
    %49 = vector.broadcast %47 : vector<1x128xf32> to vector<256x128xf32>
    %50 = arith.addf %48, %49 : vector<256x128xf32>
    %c0_18 = arith.constant 0 : index
    %c0_19 = arith.constant 0 : index
    %51 = vector.load %arg7[%c0_18, %c0_19] : memref<256x128xf32, #tpu.memory_space<vmem>>, vector<256x128xf32>
    tpu.vector_store %arg7[%c0_18, %c0_19], %50 {strides = array<i32>} : memref<256x128xf32, #tpu.memory_space<vmem>>, vector<256x128xf32>,
    return
  }
  func.func @transform_0(%arg0: i32) -> (i32, i32) {
    %c0_i32 = arith.constant 0 : i32
    %c0_i32_0 = arith.constant 0 : i32
    return %arg0, %c0_i32 : i32, i32
  }
  func.func @transform_1(%arg0: i32) -> (i32, i32) {
    %c0_i32 = arith.constant 0 : i32
    %c0_i32_0 = arith.constant 0 : i32
    %c0_i32_1 = arith.constant 0 : i32
    return %c0_i32, %c0_i32_0 : i32, i32
  }
  func.func @transform_2(%arg0: i32) -> (i32, i32) {
    %c0_i32 = arith.constant 0 : i32
    %c0_i32_0 = arith.constant 0 : i32
    %c0_i32_1 = arith.constant 0 : i32
    return %c0_i32, %c0_i32_0 : i32, i32
  }
  func.func @transform_3(%arg0: i32) -> (i32, i32) {
    %c0_i32 = arith.constant 0 : i32
    %c0_i32_0 = arith.constant 0 : i32
    %c0_i32_1 = arith.constant 0 : i32
    return %c0_i32, %c0_i32_0 : i32, i32
  }
  func.func @transform_4(%arg0: i32) -> (i32, i32) {
    %c0_i32 = arith.constant 0 : i32
    %c0_i32_0 = arith.constant 0 : i32
    %c0_i32_1 = arith.constant 0 : i32
    return %c0_i32, %c0_i32_0 : i32, i32
  }
  func.func @transform_5(%arg0: i32) -> (i32, i32) {
    %c0_i32 = arith.constant 0 : i32
    %c0_i32_0 = arith.constant 0 : i32
    %c0_i32_1 = arith.constant 0 : i32
    return %c0_i32, %c0_i32_0 : i32, i32
  }
  func.func @transform_6(%arg0: i32) -> (i32, i32) {
    %c0_i32 = arith.constant 0 : i32
    %c0_i32_0 = arith.constant 0 : i32
    return %arg0, %c0_i32 : i32, i32
  }
}

</mosaic_0001>

<bundles_post_ra>
// kernel: tpu_custom_call.1
= control target key start
LH: loop header
LB: loop body
LE: loop exit
PB: predicated region body
PF: predicated region fallthrough
CT: control target
= control target key end

     0   :  { %11 = vsyncpa [#allocation3], 0  ;;  %s13108_s0 = inlined_call_operand.vmem [shape: f32[2048,3], index: 0, kind: input, shape index: {}]   ;;  %s13109_s1 = inlined_call_operand.vmem [shape: f32[3,40], index: 1, kind: input, shape index: {}]   ;;  %s13110_s2 = inlined_call_operand.vmem [shape: f32[40,64], index: 2, kind: input, shape index: {}]   ;;  %s13111_s3 = inlined_call_operand.vmem [shape: f32[1,64], index: 3, kind: input, shape index: {}]   ;;  %s13112_s4 = inlined_call_operand.vmem [shape: f32[64,128], index: 4, kind: input, shape index: {}]   ;;  %s13113_s5 = inlined_call_operand.vmem [shape: f32[1,128], index: 5, kind: input, shape index: {}]   ;;  %s13114_s6 = inlined_call_operand.hbm [shape: f32[2048,128], index: 6, kind: output, shape index: {}]  }
   0x1   :  { %13 = vsyncpa [#allocation3 + $0x1], 0  ;;  %s9220_s21 = smov 0   ;;  %s9222_s22 = smov 0  }
   0x2   :  { %s9224_s23 = smov 0   ;;  %s9226_s24 = smov 0  }
   0x3 LB: > { %s9241_s25 = sadd.s32 4294967295, %s9174_s24   ;;  %s8133_s26 = sadd.s32 4294967294, %s9174_s24   ;;  %s9174_s24 = sphi %s9226_s24, %s13649_s24   ;;  %s9170_s23 = sphi %s9224_s23, %s13648_s23   ;;  %s9166_s22 = sphi %s9222_s22, %s13647_s22   ;;  %s9162_s21 = sphi %s9220_s21, %s13646_s21  }
   0x4   : > { %s9245_s27 = sadd.s32 1, %s9174_s24   ;;  %s157_s28 = sadd.s32 1, %s9170_s23 }
   0x5   : > { %s154_s29 = ssub.s32 %s9174_s24, %s9245_s27  ;;  %p167_p0 = scmp.ne.s32.totalorder %s9170_s23, %s9166_s22 }
   0x6   : > { %p155_p1 = scmp.eq.s32.totalorder %s154_s29, 0  ;;  %p168_p2 = scmp.eq.s32.totalorder %s9241_s25, 7 }
   0x7   : > { %p173_p3 = scmp.ne.s32.totalorder %s9166_s22, %s9162_s21  ;;  %p174_p4 = scmp.eq.s32.totalorder %s8133_s26, 7 }
   0x8   : > { %s9256_s30 = scalar_select %p155_p1, %s9170_s23, %s157_s28  }
   0x9   : > { %p9258_p5 = por %p168_p2, %p167_p0  ;;  %p9262_p6 = por %p174_p4, %p173_p3 }
   0xa   : > { %p8136_p7 = scmp.ge.s32.totalorder %s9174_s24, 1  ;;  %p216_p8 = scmp.lt.s32.totalorder %s9174_s24, 9 }
   0xc   : > { %p217_p9 = pnand %p8136_p7, %p216_p8 }
   0xe   : > { %220 = sbr.rel (%p217_p9) target bundleno = 1574 (0x626), region = 44 }
  0x15   : > { %v285_v0 = vld [vmem:[%s13109_s1] sm:$0x7]  ;;  %vm383_vm0 = vcmask 1042432   ;;  %s8138_s11 = sshll.u32 %s9241_s25, 5  ;;  %vm286_vm1 = vcmask 23552   ;;  %s243_s14 = sand.u32 1, %s9166_s22  }
  0x16   : > { %8611 = vmatprep.subr.msk.mxu0 %vm383_vm0, %v285_v0  ;;  %8807 = vmatprep.subr.msk.mxu1 %vm383_vm0, %v285_v0  ;;  %p247_p10 = scmp.lt.s32.totalorder %s8138_s11, 255  ;;  %s8500_s19 = sshll.u32 %s9241_s25, 12 }
  0x17   : > { %8612 = vmatpush3.msk.msra.mxu0 %vm383_vm0, %v285_v0  ;;  %8808 = vmatpush3.msk.msra.mxu1 %vm383_vm0, %v285_v0  ;;  %s13058_s29 = scalar_lea.hbm %s13114_s6, %s8500_s19  ;;  %s13067_s25 = scalar_lea.sflag [#allocation3], %s243_s14 }
  0x18   : > { %s13651_s11 = smov (!%p247_p10, %s8138_s11), 255  ;;  %s9182_s10 = smov [#allocation2]  }
  0x19   : > { %s8139_s12 = sshll.u32 %s13651_s11, 3  ;;  %s9116_s11 = sshll.u32 %s9182_s10, 4  ;;  %s9117_s11 = int_to_ptr.vmem [resolvable:$false] %s9116_s11 }
  0x1a   : > { %s9275_s15 = scalar_lea.vmem %s13108_s0, %s8139_s12  ;;  %s9118_s12 = scalar_lea.vmem %s9117_s11, 8192 }
  0x1b   : > { %v253_v1 = vld [vmem:[%s9275_s15] sm:$0xff]  ;;  %v254_v3 = vld [vmem:[%s9275_s15 + $0x8] sm:$0xff]  ;;  %v255_v5 = vld [vmem:[%s9275_s15 + $0x10] sm:$0xff] }
  0x1c   : > { %v269_v2 = vld [vmem:[%s9275_s15 + $0x80] sm:$0xff]  ;;  %8613 = vmatprep.mubr.msk.f32.mxu0 %vm286_vm1, %v253_v1  ;;  %v270_v4 = vld [vmem:[%s9275_s15 + $0x88] sm:$0xff]  ;;  %v271_v6 = vld [vmem:[%s9275_s15 + $0x90] sm:$0xff] }
  0x1d   : > { %8637 = vmatprep.mubr.msk.f32.mxu1 %vm286_vm1, %v269_v2  ;;  %8614 = vmatmul.mubr.msk.f32.vlgmr.msra.gmra.mrb[0].mxu0 %vm286_vm1, %v254_v3  ;;  %v256_v7 = vld [vmem:[%s9275_s15 + $0x18] sm:$0xff]  ;;  %v257_v9 = vld [vmem:[%s9275_s15 + $0x20] sm:$0xff]  ;;  %v258_v11 = vld [vmem:[%s9275_s15 + $0x28] sm:$0xff]  ;;  %v13129_v3 = vmov 683565275  }
  0x1e   : > { %8638 = vmatmul.mubr.msk.f32.vlgmr.msra.gmra.mrb[0].mxu1 %vm286_vm1, %v270_v4  ;;  %8616 = vmatprep.mubr.msk.f32.mxu0 %vm286_vm1, %v255_v5  ;;  %v272_v8 = vld [vmem:[%s9275_s15 + $0x98] sm:$0xff]  ;;  %v273_v10 = vld [vmem:[%s9275_s15 + $0xa0] sm:$0xff]  ;;  %v274_v12 = vld [vmem:[%s9275_s15 + $0xa8] sm:$0xff]  ;;  %v13118_v5 = vmov 2475754826  }
  0x1f   : > { %8640 = vmatprep.mubr.msk.f32.mxu1 %vm286_vm1, %v271_v6  ;;  %v259_v13 = vld [vmem:[%s9275_s15 + $0x30] sm:$0xff]  ;;  %v260_v15 = vld [vmem:[%s9275_s15 + $0x38] sm:$0xff]  ;;  %v261_v17 = vld [vmem:[%s9275_s15 + $0x40] sm:$0xff] }
  0x20   : > { %v275_v14 = vld [vmem:[%s9275_s15 + $0xb0] sm:$0xff]  ;;  %v276_v16 = vld [vmem:[%s9275_s15 + $0xb8] sm:$0xff]  ;;  %v277_v18 = vld [vmem:[%s9275_s15 + $0xc0] sm:$0xff] }
  0x21   : > { %8617 = vmatmul.mubr.msk.f32.gmra.mrb[2].mxu0 %vm286_vm1, %v256_v7  ;;  %v262_v19 = vld [vmem:[%s9275_s15 + $0x48] sm:$0xff]  ;;  %v263_v21 = vld [vmem:[%s9275_s15 + $0x50] sm:$0xff]  ;;  %v264_v23 = vld [vmem:[%s9275_s15 + $0x58] sm:$0xff] }
  0x22   : > { %8641 = vmatmul.mubr.msk.f32.gmra.mrb[2].mxu1 %vm286_vm1, %v272_v8  ;;  %8619 = vmatprep.mubr.msk.f32.mxu0 %vm286_vm1, %v257_v9  ;;  %v278_v20 = vld [vmem:[%s9275_s15 + $0xc8] sm:$0xff]  ;;  %v279_v22 = vld [vmem:[%s9275_s15 + $0xd0] sm:$0xff]  ;;  %v280_v24 = vld [vmem:[%s9275_s15 + $0xd8] sm:$0xff]  ;;  %v13120_v8 = vmov 2131351028  }
  0x23   : > { %8643 = vmatprep.mubr.msk.f32.mxu1 %vm286_vm1, %v273_v10  ;;  %v265_v25 = vld [vmem:[%s9275_s15 + $0x60] sm:$0xff]  ;;  %v266_v27 = vld [vmem:[%s9275_s15 + $0x68] sm:$0xff]  ;;  %v267_v29 = vld [vmem:[%s9275_s15 + $0x70] sm:$0xff]  ;;  %v13127_v10 = vmov 2102212464  }
  0x24   : > { %v281_v26 = vld [vmem:[%s9275_s15 + $0xe0] sm:$0xff]  ;;  %v282_v28 = vld [vmem:[%s9275_s15 + $0xe8] sm:$0xff]  ;;  %v283_v30 = vld [vmem:[%s9275_s15 + $0xf0] sm:$0xff] }
  0x25   : > { %8620 = vmatmul.mubr.msk.f32.gmra.mrb[4].mxu0 %vm286_vm1, %v258_v11  ;;  %v268_v31 = vld [vmem:[%s9275_s15 + $0x78] sm:$0xff] }
  0x26   : > { %8644 = vmatmul.mubr.msk.f32.gmra.mrb[4].mxu1 %vm286_vm1, %v274_v12  ;;  %8622 = vmatprep.mubr.msk.f32.mxu0 %vm286_vm1, %v259_v13  ;;  %v284_v32 = vld [vmem:[%s9275_s15 + $0xf8] sm:$0xff]  ;;  %v13125_v12 = vmov 920167782   ;;  %s8137_s15 = sshll.u32 %s243_s14, 8 }
  0x27   : > { %8646 = vmatprep.mubr.msk.f32.mxu1 %vm286_vm1, %v275_v14  ;;  %s12992_s18 = scalar_lea.vmem [#allocation2], %s8137_s15 }
  0x28   : > { %s8071_s20 = sshll.u32 %s12992_s18, 4  ;;  %s13060_s20 = int_to_ptr.vmem [resolvable:$true] %s8071_s20 }
  0x29   : > { %8623 = vmatmul.mubr.msk.f32.gmra.mrb[6].mxu0 %vm286_vm1, %v260_v15  ;;  %s9112_s9 = scalar_lea.vmem %s13060_s20, 4096  ;;  %p9119_p0 = scmp.lt.s32.totalorder %s13060_s20, %s9117_s11 }
  0x2a   : > { %8647 = vmatmul.mubr.msk.f32.gmra.mrb[6].mxu1 %vm286_vm1, %v276_v16  ;;  %8625 = vmatprep.mubr.msk.f32.mxu0 %vm286_vm1, %v261_v17  ;;  %p9113_p11 = scmp.ne.s32.totalorder %s13060_s20, %s9112_s9  ;;  %p9120_p1 = scmp.lt.s32.totalorder %s9118_s12, %s9112_s9 }
  0x2b   : > { %8649 = vmatprep.mubr.msk.f32.mxu1 %vm286_vm1, %v277_v18 }
  0x2c   : > { %p9114_p12 = pnand %p9113_p11, %p9258_p5  ;;  %p9121_p2 = por %p9120_p1, %p9119_p0 }
  0x2d   : > { %8626 = vmatmul.mubr.msk.f32.gmra.mrb[8].mxu0 %vm286_vm1, %v262_v19  ;;  %v13122_v19 = vmov 1326507024  }
  0x2e   : > { %8650 = vmatmul.mubr.msk.f32.gmra.mrb[8].mxu1 %vm286_vm1, %v278_v20  ;;  %8628 = vmatprep.mubr.msk.f32.mxu0 %vm286_vm1, %v263_v21  ;;  %p9115_p13 = pneg %p9114_p12 }
  0x2f   : > { %8652 = vmatprep.mubr.msk.f32.mxu1 %vm286_vm1, %v279_v22 }
  0x30   : > { %p9122_p3 = pnand %p9121_p2, %p9115_p13 }
  0x31   : > { %8629 = vmatmul.mubr.msk.f32.gmra.mrb[10].mxu0 %vm286_vm1, %v264_v23 }
  0x32   : > { %8653 = vmatmul.mubr.msk.f32.gmra.mrb[10].mxu1 %vm286_vm1, %v280_v24  ;;  %8631 = vmatprep.mubr.msk.f32.mxu0 %vm286_vm1, %v265_v25 }
  0x33   : > { %8655 = vmatprep.mubr.msk.f32.mxu1 %vm286_vm1, %v281_v26 }
  0x35   : > { %8632 = vmatmul.mubr.msk.f32.gmra.mrb[12].mxu0 %vm286_vm1, %v266_v27 }
  0x36   : > { %8656 = vmatmul.mubr.msk.f32.gmra.mrb[12].mxu1 %vm286_vm1, %v282_v28  ;;  %8634 = vmatprep.mubr.msk.f32.mxu0 %vm286_vm1, %v267_v29 }
  0x37   : > { %8658 = vmatprep.mubr.msk.f32.mxu1 %vm286_vm1, %v283_v30 }
  0x39   : > { %8635 = vmatmul.mubr.msk.f32.gmra.mrb[14].mxu0 %vm286_vm1, %v268_v31 }
  0x3a   : > { %8659 = vmatmul.mubr.msk.f32.gmra.mrb[14].mxu1 %vm286_vm1, %v284_v32 }
  0xf0   : > { %v9341_v33 = vpop.f32.mrb[0].mxu0 }
  0xf1   : > { %13261 = vst [vmem:[#allocation5_spill] sm:$0xff] %v9341_v33  ;;  %v9343_v34 = vpop.f32.mrb[0].mxu1  ;;  %v738_v35 = vand.u32 2147483647, %v9341_v33  ;;  %v741_v36 = vand.u32 2139095040, %v9341_v33  ;;  %v9347_v37 = vpop.f32.mrb[1].mxu0 }
  0xf2   : > { %13262 = vst [vmem:[#allocation6_spill] sm:$0xff] %v9343_v34  ;;  %v9349_v38 = vpop.f32.mrb[1].mxu1  ;;  %v2402_v39 = vand.u32 2147483647, %v9343_v34  ;;  %v2405_v40 = vand.u32 2139095040, %v9343_v34  ;;  %v637_v45 = vand.u32 2139095040, %v9347_v37 }
  0xf3   : > { %13263 = vst [vmem:[#allocation7_spill] sm:$0xff] %v9349_v38  ;;  %v742_v41 = vshrl.u32 %v741_v36, 23  ;;  %v745_v42 = vand.u32 8388607, %v738_v35 }
  0xf4   : > { %v2406_v43 = vshrl.u32 %v2405_v40, 23  ;;  %v2409_v44 = vand.u32 8388607, %v2402_v39  ;;  %v638_v48 = vshrl.u32 %v637_v45, 23  ;;  %v9358_v49 = vpop.f32.mrb[2].mxu0 }
  0xf5   : > { %v8177_v46 = vadd.s32 4294967169, %v742_v41  ;;  %13264 = vst [vmem:[#allocation8_spill] sm:$0xff] %v9358_v49  ;;  %v9360_v51 = vpop.f32.mrb[2].mxu1  ;;  %v9362_v52 = vpop.f32.mrb[3].mxu0  ;;  %v746_v53 = vor.u32 8388608, %v745_v42 }
  0xf6   : > { %v8241_v47 = vadd.s32 4294967169, %v2406_v43  ;;  %13265 = vst [vmem:[#allocation9_spill] sm:$0xff] %v9360_v51  ;;  %13266 = vst [vmem:[#allocation10_spill] sm:$0xff] %v9362_v52  ;;  %v2410_v54 = vor.u32 8388608, %v2409_v44  ;;  %v8173_v56 = vadd.s32 4294967169, %v638_v48  ;;  %v9364_v57 = vpop.f32.mrb[3].mxu1 }
  0xf7   : > { %v748_v50 = vadd.s32 1, %v8177_v46  ;;  %13267 = vst [vmem:[#allocation11_spill] sm:$0xff] %v9364_v57  ;;  %v9366_v62 = vshll.u32 %v746_v53, 8 }
  0xf8   : > { %v2412_v55 = vadd.s32 1, %v8241_v47  ;;  %v9370_v0 = vshll.u32 %v2410_v54, 8  ;;  %v9372_v1 = vadd.s32 1, %v8173_v56  ;;  %v9396_v46 = vpop.f32.mrb[4].mxu0 }
  0xf9   : > { %vm749_vm2 = vcmp.gt.s32.totalorder %v748_v50, 0  ;;  %13268 = vst [vmem:[#allocation12_spill] sm:$0xff] %v9396_v46 }
  0xfa   : > { %v750_v58 = vsel %vm749_vm2, %v748_v50, 0  ;;  %vm2413_vm3 = vcmp.gt.s32.totalorder %v2412_v55, 0  ;;  %vm645_vm8 = vcmp.gt.s32.totalorder %v9372_v1, 0 }
  0xfb   : > { %v751_v59 = vshrl.u32 %v750_v58, 5  ;;  %v752_v60 = vand.u32 31, %v750_v58  ;;  %v2414_v61 = vsel %vm2413_vm3, %v2412_v55, 0 }
  0xfc   : > { %v9368_v63 = vshrl.u32 %v2414_v61, 5  ;;  %v2416_v7 = vand.u32 31, %v2414_v61 }
  0xfd   : > { %v753_v2 = vsub.s32 32, %v752_v60  ;;  %v755_v4 = vshll.u32 %v13129_v3, %v752_v60  ;;  %v758_v6 = vshll.u32 %v13118_v5, %v752_v60  ;;  %v761_v9 = vshll.u32 %v13120_v8, %v752_v60 }
  0xfe   : > { %v764_v11 = vshll.u32 %v13127_v10, %v752_v60  ;;  %v767_v13 = vshll.u32 %v13125_v12, %v752_v60  ;;  %vm770_vm4 = vcmp.lt.s32.totalorder %v751_v59, 1  ;;  %vm771_vm5 = vcmp.lt.s32.totalorder %v751_v59, 2 }
  0xff   : > { %v756_v14 = vshrl.u32 %v13118_v5, %v753_v2  ;;  %v759_v15 = vshrl.u32 %v13120_v8, %v753_v2  ;;  %v762_v16 = vshrl.u32 %v13127_v10, %v753_v2  ;;  %v754_v17 = vshrl.u32 %v13129_v3, %v753_v2 }
 0x100   : > { %v765_v18 = vshrl.u32 %v13125_v12, %v753_v2  ;;  %v768_v20 = vshrl.u32 %v13122_v19, %v753_v2  ;;  %vm772_vm6 = vcmp.lt.s32.totalorder %v751_v59, 3  ;;  %v2417_v24 = vsub.s32 32, %v2416_v7 }
 0x101   : > { %v757_v21 = vor.u32 %v756_v14, %v755_v4  ;;  %v760_v22 = vor.u32 %v759_v15, %v758_v6  ;;  %v763_v23 = vor.u32 %v762_v16, %v761_v9  ;;  %vm773_vm7 = vcmp.lt.s32.totalorder %v751_v59, 4 }
 0x102   : > { %v766_v25 = vor.u32 %v765_v18, %v764_v11  ;;  %v769_v26 = vor.u32 %v768_v20, %v767_v13  ;;  %v2419_v27 = vshll.u32 %v13129_v3, %v2416_v7  ;;  %v2422_v41 = vshll.u32 %v13118_v5, %v2416_v7 }
 0x103   : > { %v774_v28 = vsel %vm770_vm4, %v754_v17, %v757_v21  ;;  %v775_v29 = vsel %vm773_vm7, %v763_v23, 2102212464  ;;  %v778_v30 = vsel %vm770_vm4, %v757_v21, %v760_v22  ;;  %v782_v31 = vsel %vm770_vm4, %v760_v22, %v763_v23 }
 0x104   : > { %v776_v32 = vsel %vm772_vm6, %v760_v22, %v775_v29  ;;  %v779_v36 = vsel %vm773_vm7, %v766_v25, 920167782  ;;  %v783_v40 = vsel %vm773_vm7, %v769_v26, 1326507024  ;;  %v2418_v44 = vshrl.u32 %v13129_v3, %v2417_v24 }
 0x105   : > { %v780_v42 = vsel %vm772_vm6, %v763_v23, %v779_v36  ;;  %v784_v43 = vsel %vm772_vm6, %v766_v25, %v783_v40  ;;  %v2420_v45 = vshrl.u32 %v13118_v5, %v2417_v24  ;;  %v777_v47 = vsel %vm771_vm5, %v774_v28, %v776_v32 }
 0x106   : > { %v781_v48 = vsel %vm771_vm5, %v778_v30, %v780_v42  ;;  %v785_v50 = vsel %vm771_vm5, %v782_v31, %v784_v43  ;;  %v2423_v53 = vshrl.u32 %v13120_v8, %v2417_v24  ;;  %v2425_v2 = vshll.u32 %v13120_v8, %v2416_v7 }
 0x107   : > { %v9403_v54 = vmul.u32.u64.low %v9366_v62, %v785_v50  ;;  %v9404_v55 = vmul.u32.u64.high %v9366_v62, %v785_v50, %v9403_v54  ;;  %v9407_v56 = vmul.u32.u64.low %v9366_v62, %v781_v48  ;;  %v9408_v58 = vmul.u32.u64.high %v9366_v62, %v781_v48, %v9407_v56 }
 0x108   : > { %v2421_v60 = vor.u32 %v2420_v45, %v2419_v27  ;;  %v2424_v61 = vor.u32 %v2423_v53, %v2422_v41  ;;  %v2426_v4 = vshrl.u32 %v13127_v10, %v2417_v24  ;;  %v2428_v59 = vshll.u32 %v13127_v10, %v2416_v7 }
 0x109   : > { %v2429_v6 = vshrl.u32 %v13125_v12, %v2417_v24  ;;  %v2431_v9 = vshll.u32 %v13125_v12, %v2416_v7  ;;  %v2432_v11 = vshrl.u32 %v13122_v19, %v2417_v24  ;;  %v793_v13 = vmul.u32 %v9366_v62, %v777_v47 }
 0x10a   : > { %v2427_v14 = vor.u32 %v2426_v4, %v2425_v2  ;;  %vm2434_vm9 = vcmp.lt.s32.totalorder %v9368_v63, 1  ;;  %vm2435_vm10 = vcmp.lt.s32.totalorder %v9368_v63, 2  ;;  %vm795_vm11 = vc.u32 %v9404_v55, %v9407_v56  ;;  %v9461_v4 = vpop.f32.mrb[4].mxu1 }
 0x10b   : > { %v796_v15 = vadd.s32 1, %v9408_v58  ;;  %v2430_v16 = vor.u32 %v2429_v6, %v2428_v59  ;;  %vm2436_vm12 = vcmp.lt.s32.totalorder %v9368_v63, 3  ;;  %v2433_v17 = vor.u32 %v2432_v11, %v2431_v9  ;;  %13269 = vst [vmem:[#allocation13_spill] sm:$0xff] %v9461_v4 }
 0x10c   : > { %vm2437_vm13 = vcmp.lt.s32.totalorder %v9368_v63, 4  ;;  %v2438_v7 = vsel %vm2434_vm9, %v2418_v44, %v2421_v60  ;;  %v2442_v18 = vsel %vm2434_vm9, %v2421_v60, %v2424_v61  ;;  %v2446_v22 = vsel %vm2434_vm9, %v2424_v61, %v2427_v14 }
 0x10d   : > { %v797_v62 = vsel %vm795_vm11, %v796_v15, %v9408_v58  ;;  %v2439_v20 = vsel %vm2437_vm13, %v2427_v14, 2102212464  ;;  %v2443_v21 = vsel %vm2437_vm13, %v2430_v16, 920167782  ;;  %v2447_v26 = vsel %vm2437_vm13, %v2433_v17, 1326507024 }
 0x10e   : > { %v798_v23 = vadd.s32 %v797_v62, %v793_v13  ;;  %v2440_v24 = vsel %vm2436_vm12, %v2424_v61, %v2439_v20  ;;  %v2444_v25 = vsel %vm2436_vm12, %v2427_v14, %v2443_v21  ;;  %v2448_v29 = vsel %vm2436_vm12, %v2430_v16, %v2447_v26 }
 0x10f   : > { %v2441_v27 = vsel %vm2435_vm10, %v2438_v7, %v2440_v24  ;;  %v2445_v28 = vsel %vm2435_vm10, %v2442_v18, %v2444_v25  ;;  %v646_v30 = vsel %vm645_vm8, %v9372_v1, 0  ;;  %v2449_v32 = vsel %vm2435_vm10, %v2446_v22, %v2448_v29 }
 0x110   : > { %v799_v31 = vadd.s32 536870912, %v798_v23  ;;  %v9436_v36 = vmul.u32.u64.low %v9370_v0, %v2445_v28  ;;  %v9437_v40 = vmul.u32.u64.high %v9370_v0, %v2445_v28, %v9436_v36  ;;  %v634_v44 = vand.u32 2147483647, %v9347_v37 }
 0x111   : > { %v9441_v41 = vmul.u32.u64.low %v9370_v0, %v2449_v32  ;;  %v9442_v42 = vmul.u32.u64.high %v9370_v0, %v2449_v32, %v9441_v41  ;;  %v648_v45 = vand.u32 31, %v646_v30  ;;  %v2457_v1 = vmul.u32 %v9370_v0, %v2441_v27 }
 0x112   : > { %v9444_v43 = vshrl.u32 %v799_v31, 30  ;;  %v2460_v63 = vadd.s32 1, %v9437_v40  ;;  %v641_v54 = vand.u32 8388607, %v634_v44  ;;  %v2301_v60 = vand.u32 2139095040, %v9349_v38 }
 0x113   : > { %v649_v48 = vsub.s32 32, %v648_v45  ;;  %vm2459_vm14 = vc.u32 %v9442_v42, %v9436_v36  ;;  %v651_v13 = vshll.u32 %v13129_v3, %v648_v45  ;;  %v654_v14 = vshll.u32 %v13118_v5, %v648_v45 }
 0x114   : > { %v801_v47 = vshll.u32 %v9444_v43, 30  ;;  %v2461_v53 = vsel %vm2459_vm14, %v2460_v63, %v9437_v40  ;;  %v642_v11 = vor.u32 8388608, %v641_v54  ;;  %v647_v16 = vshrl.u32 %v646_v30, 5 }
 0x115   : > { %v2462_v58 = vadd.s32 %v2461_v53, %v2457_v1  ;;  %v652_v61 = vshrl.u32 %v13118_v5, %v649_v48  ;;  %v655_v2 = vshrl.u32 %v13120_v8, %v649_v48  ;;  %v658_v6 = vshrl.u32 %v13127_v10, %v649_v48 }
 0x116   : > { %v9452_v50 = vsub.s32 %v798_v23, %v801_v47  ;;  %v657_v17 = vshll.u32 %v13120_v8, %v648_v45  ;;  %v2302_v7 = vshrl.u32 %v2301_v60, 23  ;;  %v660_v23 = vshll.u32 %v13127_v10, %v648_v45 }
 0x117   : > { %v2463_v59 = vadd.s32 536870912, %v2462_v58  ;;  %v653_v62 = vor.u32 %v652_v61, %v651_v13  ;;  %v656_v20 = vor.u32 %v655_v2, %v654_v14  ;;  %v661_v24 = vshrl.u32 %v13125_v12, %v649_v48 }
 0x118   : > { %v804_v0 = vsub.s32 0, %v9452_v50  ;;  %v659_v22 = vor.u32 %v658_v6, %v657_v17  ;;  %v663_v26 = vshll.u32 %v13125_v12, %v648_v45  ;;  %v664_v27 = vshrl.u32 %v13122_v19, %v649_v48 }
 0x119   : > { %v9467_v15 = vshrl.u32 %v2463_v59, 30  ;;  %v682_v28 = vshll.u32 %v642_v11, 8  ;;  %v662_v30 = vor.u32 %v661_v24, %v660_v23  ;;  %vm666_vm15 = vcmp.lt.s32.totalorder %v647_v16, 1 }
 0x11a   : > { %v8178_v9 = vmin.u32 %v804_v0, %v9452_v50  ;;  %v8237_v31 = vadd.s32 4294967169, %v2302_v7  ;;  %v665_v32 = vor.u32 %v664_v27, %v663_v26  ;;  %vm667_vm1 = vcmp.lt.s32.totalorder %v647_v16, 2 }
 0x11b   : > { %v2465_v21 = vshll.u32 %v9467_v15, 30  ;;  %vm669_vm2 = vcmp.lt.s32.totalorder %v647_v16, 4  ;;  %v674_v47 = vsel %vm666_vm15, %v653_v62, %v656_v20  ;;  %v650_v45 = vshrl.u32 %v13129_v3, %v649_v48 }
 0x11c   : > { %v806_v18 = vclz %v8178_v9  ;;  %v671_v1 = vsel %vm669_vm2, %v659_v22, 2102212464  ;;  %vm668_vm3 = vcmp.lt.s32.totalorder %v647_v16, 3  ;;  %v675_v53 = vsel %vm669_vm2, %v662_v30, 920167782 }
 0x11d   : > { %v9475_v29 = vsub.s32 %v2462_v58, %v2465_v21  ;;  %v676_v58 = vsel %vm668_vm3, %v659_v22, %v675_v53  ;;  %v678_v60 = vsel %vm666_vm15, %v656_v20, %v659_v22  ;;  %v679_v0 = vsel %vm669_vm2, %v665_v32, 1326507024 }
 0x11e   : > { %v8179_v25 = vadd.s32 4294967294, %v806_v18  ;;  %v670_v61 = vsel %vm666_vm15, %v650_v45, %v653_v62  ;;  %v672_v2 = vsel %vm668_vm3, %v656_v20, %v671_v1  ;;  %v677_v59 = vsel %vm667_vm1, %v674_v47, %v676_v58 }
 0x11f   : > { %v2468_v41 = vsub.s32 0, %v9475_v29  ;;  %v680_v6 = vsel %vm668_vm3, %v662_v30, %v679_v0  ;;  %v9485_v13 = vmul.u32.u64.low %v682_v28, %v677_v59  ;;  %v9486_v14 = vmul.u32.u64.high %v682_v28, %v677_v59, %v9485_v13 }
 0x120   : > { %vm8180_vm0 = vcmp.lt.s32.totalorder %v8179_v25, 0  ;;  %v681_v11 = vsel %vm667_vm1, %v678_v60, %v680_v6  ;;  %v673_v21 = vsel %vm667_vm1, %v670_v61, %v672_v2  ;;  %v2308_v22 = vadd.s32 1, %v8237_v31 }
 0x121   : > { %v809_v40 = vsel %vm8180_vm0, 0, %v8179_v25  ;;  %v8242_v54 = vmin.u32 %v2468_v41, %v9475_v29  ;;  %v9489_v48 = vmul.u32.u64.low %v682_v28, %v681_v11  ;;  %v9490_v17 = vmul.u32.u64.high %v682_v28, %v681_v11, %v9489_v48 }
 0x122   : > { %v814_v63 = vsub.s32 4294967266, %v809_v40  ;;  %v810_v7 = vsub.s32 32, %v809_v40  ;;  %v794_v62 = vadd.s32 %v9407_v56, %v9404_v55  ;;  %v692_v23 = vadd.s32 1, %v9486_v14 }
 0x123   : > { %v2470_v9 = vclz %v8242_v54  ;;  %vm2309_vm4 = vcmp.gt.s32.totalorder %v2308_v22, 0  ;;  %v689_v24 = vmul.u32 %v682_v28, %v673_v21  ;;  %vm691_vm5 = vc.u32 %v9490_v17, %v9485_v13  ;;  %v9505_v54 = vpop.f32.mrb[5].mxu0 }
 0x124   : > { %v815_v18 = vadd.s32 127, %v814_v63  ;;  %v812_v25 = vshrl.u32 %v794_v62, %v810_v7  ;;  %v693_v27 = vsel %vm691_vm5, %v692_v23, %v9486_v14  ;;  %v2310_v32 = vsel %vm2309_vm4, %v2308_v22, 0  ;;  %13270 = vst [vmem:[#allocation14_spill] sm:$0xff] %v9505_v54 }
 0x125   : > { %v8243_v20 = vadd.s32 4294967294, %v2470_v9  ;;  %v694_v30 = vadd.s32 %v693_v27, %v689_v24  ;;  %v811_v16 = vshll.u32 %v9452_v50, %v809_v40  ;;  %v2312_v31 = vand.u32 31, %v2310_v32 }
 0x126   : > { %v816_v26 = vshll.u32 %v815_v18, 23  ;;  %v13117_v1 = vand.u32 2147483647, %v9349_v38  ;;  %v949_v63 = vand.u32 2139095040, %v9358_v49  ;;  %v9509_v0 = vshrl.u32 %v2310_v32, 5 }
 0x127   : > { %vm8244_vm6 = vcmp.lt.s32.totalorder %v8243_v20, 0  ;;  %v695_v41 = vadd.s32 536870912, %v694_v30  ;;  %v813_v55 = vor.u32 %v812_v25, %v811_v16  ;;  %v2313_v45 = vsub.s32 32, %v2312_v31 }
 0x128   : > { %v817_v56 = vor.u32 4788187, %v816_v26  ;;  %v2473_v47 = vsel %vm8244_vm6, 0, %v8243_v20  ;;  %v2305_v40 = vand.u32 8388607, %v13117_v1  ;;  %v2318_v61 = vshll.u32 %v13118_v5, %v2312_v31 }
 0x129   : > { %v9501_v28 = vshrl.u32 %v695_v41, 30  ;;  %v820_v60 = vcvt.s32.f32 %v813_v55  ;;  %v2478_v50 = vsub.s32 4294967266, %v2473_v47  ;;  %v2324_v2 = vshll.u32 %v13127_v10, %v2312_v31 }
 0x12a   : > { %v818_v58 = vand.u32 2147483647, %v817_v56  ;;  %v950_v59 = vshrl.u32 %v949_v63, 23  ;;  %v2319_v9 = vshrl.u32 %v13120_v8, %v2313_v45  ;;  %v2321_v11 = vshll.u32 %v13120_v8, %v2312_v31 }
 0x12b   : > { %v697_v53 = vshll.u32 %v9501_v28, 30  ;;  %v2322_v14 = vshrl.u32 %v13127_v10, %v2313_v45  ;;  %v2315_v48 = vshll.u32 %v13129_v3, %v2312_v31  ;;  %v2316_v7 = vshrl.u32 %v13118_v5, %v2313_v45 }
 0x12c   : > { %v2325_v18 = vshrl.u32 %v13125_v12, %v2313_v45  ;;  %v2327_v21 = vshll.u32 %v13125_v12, %v2312_v31  ;;  %v2458_v22 = vadd.s32 %v9436_v36, %v9442_v42  ;;  %v2474_v62 = vsub.s32 32, %v2473_v47 }
 0x12d   : > { %v9513_v6 = vsub.s32 %v694_v30, %v697_v53  ;;  %v2328_v20 = vshrl.u32 %v13122_v19, %v2313_v45  ;;  %v13116_v23 = vand.u32 2147483647, %v9358_v49  ;;  %v821_v24 = vmul.f32 %v820_v60, %v818_v58 }
 0x12e   : > { %v2479_v25 = vadd.s32 127, %v2478_v50  ;;  %v2326_v26 = vor.u32 %v2325_v18, %v2324_v2  ;;  %vm2333_vm7 = vcmp.lt.s32.totalorder %v9509_v0, 4  ;;  %v2320_v30 = vor.u32 %v2319_v9, %v2318_v61 }
 0x12f   : > { %v700_v27 = vsub.s32 0, %v9513_v6  ;;  %v2323_v32 = vor.u32 %v2322_v14, %v2321_v11  ;;  %v2329_v16 = vor.u32 %v2328_v20, %v2327_v21  ;;  %v2317_v41 = vor.u32 %v2316_v7, %v2315_v48 }
 0x130   : > { %vm2330_vm8 = vcmp.lt.s32.totalorder %v9509_v0, 1  ;;  %vm2332_vm9 = vcmp.lt.s32.totalorder %v9509_v0, 3  ;;  %v8185_v36 = vadd.s32 4294967169, %v950_v59  ;;  %v2475_v42 = vshll.u32 %v9475_v29, %v2473_v47 }
 0x131   : > { %v2476_v31 = vshrl.u32 %v2458_v22, %v2474_v62  ;;  %v2306_v55 = vor.u32 8388608, %v2305_v40  ;;  %v2339_v56 = vsel %vm2333_vm7, %v2326_v26, 920167782  ;;  %v822_v63 = vxor.u32 2147483648, %v821_v24 }
 0x132   : > { %v2480_v53 = vshll.u32 %v2479_v25, 23  ;;  %v2314_v58 = vshrl.u32 %v13129_v3, %v2313_v45  ;;  %v2343_v60 = vsel %vm2333_vm7, %v2329_v16, 1326507024  ;;  %v8174_v50 = vmin.u32 %v700_v27, %v9513_v6 }
 0x133   : > { %vm2331_vm10 = vcmp.lt.s32.totalorder %v9509_v0, 2  ;;  %v2342_v61 = vsel %vm2330_vm8, %v2320_v30, %v2323_v32  ;;  %v2344_v29 = vsel %vm2332_vm9, %v2326_v26, %v2343_v60  ;;  %v2335_v47 = vsel %vm2333_vm7, %v2323_v32, 2102212464  ;;  %v9570_v26 = vpop.f32.mrb[5].mxu1 }
 0x134   : > { %v2338_v40 = vsel %vm2330_vm8, %v2317_v41, %v2320_v30  ;;  %v2340_v45 = vsel %vm2332_vm9, %v2323_v32, %v2339_v56  ;;  %v956_v2 = vadd.s32 1, %v8185_v36  ;;  %vm740_vm11 = vcmp.lt.s32.totalorder %v9341_v33, 0  ;;  %13273 = vst [vmem:[#allocation15_spill] sm:$0xff] %v9570_v26 }
 0x135   : > { %v824_v59 = vsub.s32 4, %v9444_v43  ;;  %v2346_v9 = vshll.u32 %v2306_v55, 8  ;;  %v823_v11 = vsel %vm740_vm11, %v822_v63, %v821_v24  ;;  %v9552_v14 = vor.u32 %v2476_v31, %v2475_v42 }
 0x136   : > { %v2345_v48 = vsel %vm2331_vm10, %v2342_v61, %v2344_v29  ;;  %v953_v7 = vand.u32 8388607, %v13116_v23  ;;  %v2334_v18 = vsel %vm2330_vm8, %v2314_v58, %v2317_v41  ;;  %v2336_v21 = vsel %vm2332_vm9, %v2320_v30, %v2335_v47 }
 0x137   : > { %v2341_v22 = vsel %vm2331_vm10, %v2338_v40, %v2340_v45  ;;  %vm957_vm12 = vcmp.gt.s32.totalorder %v956_v2, 0  ;;  %vm9566_vm13 = vcmp.le.f32.partialorder %v738_v35, 0.7853982  ;;  %v2481_v20 = vor.u32 4788187, %v2480_v53 }
 0x138   : > { %v702_v24 = vclz %v8174_v50  ;;  %v958_v25 = vsel %vm957_vm12, %v956_v2, 0  ;;  %v9575_v27 = vsel %vm9566_vm13, %v9341_v33, %v823_v11  ;;  %v2337_v16 = vsel %vm2331_vm10, %v2334_v18, %v2336_v21 }
 0x139   : > { %v9577_v30 = vmul.u32.u64.low %v2346_v9, %v2345_v48  ;;  %v9578_v32 = vmul.u32.u64.high %v2346_v9, %v2345_v48, %v9577_v30  ;;  %v9582_v35 = vmul.u32.u64.low %v2346_v9, %v2341_v22  ;;  %v9583_v41 = vmul.u32.u64.high %v2346_v9, %v2341_v22, %v9582_v35 }
 0x13a   : > { %v960_v36 = vand.u32 31, %v958_v25  ;;  %v825_v42 = vsel %vm740_vm11, %v824_v59, %v9444_v43  ;;  %v2484_v31 = vcvt.s32.f32 %v9552_v14  ;;  %v954_v55 = vor.u32 8388608, %v953_v7 }
 0x13b   : > { %8984 = vcosq.f32 %v9575_v27  ;;  %v2482_v56 = vand.u32 2147483647, %v2481_v20  ;;  %v8175_v63 = vadd.s32 4294967294, %v702_v24  ;;  %v2353_v58 = vmul.u32 %v2346_v9, %v2337_v16 }
 0x13c   : > { %v961_v53 = vsub.s32 32, %v960_v36  ;;  %vm2355_vm14 = vc.u32 %v9578_v32, %v9582_v35  ;;  %v959_v0 = vshrl.u32 %v958_v25, 5  ;;  %v963_v60 = vshll.u32 %v13129_v3, %v960_v36 }
 0x13d   : > { %v2356_v50 = vadd.s32 1, %v9583_v41  ;;  %v966_v43 = vshll.u32 %v13118_v5, %v960_v36  ;;  %v969_v47 = vshll.u32 %v13120_v8, %v960_v36  ;;  %v972_v45 = vshll.u32 %v13127_v10, %v960_v36 }
 0x13e   : > { %v964_v61 = vshrl.u32 %v13118_v5, %v961_v53  ;;  %v967_v29 = vshrl.u32 %v13120_v8, %v961_v53  ;;  %v970_v40 = vshrl.u32 %v13127_v10, %v961_v53  ;;  %v973_v2 = vshrl.u32 %v13125_v12, %v961_v53 }
 0x13f   : > { %vm8176_vm15 = vcmp.lt.s32.totalorder %v8175_v63, 0  ;;  %v2357_v59 = vsel %vm2355_vm14, %v2356_v50, %v9583_v41  ;;  %vm978_vm0 = vcmp.lt.s32.totalorder %v959_v0, 1  ;;  %v975_v18 = vshll.u32 %v13125_v12, %v960_v36 }
 0x140   : > { %v965_v9 = vor.u32 %v964_v61, %v963_v60  ;;  %v968_v11 = vor.u32 %v967_v29, %v966_v43  ;;  %v2358_v14 = vadd.s32 %v2357_v59, %v2353_v58  ;;  %v971_v48 = vor.u32 %v970_v40, %v969_v47 }
 0x141   : > { %v974_v7 = vor.u32 %v973_v2, %v972_v45  ;;  %v976_v21 = vshrl.u32 %v13122_v19, %v961_v53  ;;  %vm981_vm1 = vcmp.lt.s32.totalorder %v959_v0, 4  ;;  %vm980_vm2 = vcmp.lt.s32.totalorder %v959_v0, 3 }
 0x142   : > { %v986_v22 = vsel %vm978_vm0, %v965_v9, %v968_v11  ;;  %v2359_v20 = vadd.s32 536870912, %v2358_v14  ;;  %v994_v25 = vshll.u32 %v954_v55, 8  ;;  %vm979_vm3 = vcmp.lt.s32.totalorder %v959_v0, 2 }
 0x143   : > { %v987_v24 = vsel %vm981_vm1, %v974_v7, 920167782  ;;  %v977_v30 = vor.u32 %v976_v21, %v975_v18  ;;  %v983_v16 = vsel %vm981_vm1, %v971_v48, 2102212464  ;;  %v962_v36 = vshrl.u32 %v13129_v3, %v961_v53 }
 0x144   : > { %v988_v41 = vsel %vm980_vm2, %v971_v48, %v987_v24  ;;  %v9609_v58 = vshrl.u32 %v2359_v20, 30  ;;  %v990_v50 = vsel %vm978_vm0, %v968_v11, %v971_v48  ;;  %v2485_v43 = vmul.f32 %v2484_v31, %v2482_v56 }
 0x145   : > { %v989_v60 = vsel %vm979_vm3, %v986_v22, %v988_v41  ;;  %v9614_v61 = vpop.eup %8984  ;;  %v991_v29 = vsel %vm981_vm1, %v977_v30, 1326507024  ;;  %v982_v45 = vsel %vm978_vm0, %v962_v36, %v965_v9  ;;  %v984_v2 = vsel %vm980_vm2, %v968_v11, %v983_v16 }
 0x146   : > { %v9617_v55 = vmul.u32.u64.low %v994_v25, %v989_v60  ;;  %v9618_v47 = vmul.u32.u64.high %v994_v25, %v989_v60, %v9617_v55  ;;  %v2361_v40 = vshll.u32 %v9609_v58, 30  ;;  %v992_v53 = vsel %vm980_vm2, %v974_v7, %v991_v29 }
 0x147   : > { %v9626_v59 = vsel %vm8176_vm15, 0, %v8175_v63  ;;  %v993_v48 = vsel %vm979_vm3, %v990_v50, %v992_v53  ;;  %v827_v31 = vsel %vm9566_vm13, 0, %v825_v42  ;;  %v2488_v22 = vsub.s32 4, %v9467_v15 }
 0x148   : > { %v9631_v56 = vsub.s32 %v2358_v14, %v2361_v40  ;;  %v9633_v18 = vmul.u32.u64.low %v994_v25, %v993_v48  ;;  %v9634_v21 = vmul.u32.u64.high %v994_v25, %v993_v48, %v9633_v18  ;;  %v720_v9 = vsub.s32 4, %v9501_v28 }
 0x149   : > { %v985_v11 = vsel %vm979_vm3, %v982_v45, %v984_v2  ;;  %v1004_v7 = vadd.s32 1, %v9618_v47  ;;  %8986 = vsinq.f32 %v9575_v27  ;;  %v2486_v63 = vxor.u32 2147483648, %v2485_v43 }
 0x14a   : > { %v710_v20 = vsub.s32 4294967266, %v9626_v59  ;;  %v2613_v62 = vand.u32 2139095040, %v9360_v51  ;;  %v831_v42 = vadd.s32 3, %v827_v31  ;;  %vm2404_vm4 = vcmp.lt.s32.totalorder %v9343_v34, 0 }
 0x14b   : > { %v2364_v14 = vsub.s32 0, %v9631_v56  ;;  %vm636_vm5 = vcmp.lt.s32.totalorder %v9347_v37, 0  ;;  %v1001_v24 = vmul.u32 %v994_v25, %v985_v11  ;;  %vm1003_vm6 = vc.u32 %v9634_v21, %v9617_v55 }
 0x14c   : > { %v2614_v0 = vshrl.u32 %v2613_v62, 23  ;;  %v2489_v30 = vsel %vm2404_vm4, %v2488_v22, %v9467_v15  ;;  %v721_v27 = vsel %vm636_vm5, %v720_v9, %v9501_v28  ;;  %v1005_v16 = vsel %vm1003_vm6, %v1004_v7, %v9618_v47 }
 0x14d   : > { %v2487_v41 = vsel %vm2404_vm4, %v2486_v63, %v2485_v43  ;;  %v711_v36 = vadd.s32 127, %v710_v20  ;;  %v1006_v60 = vadd.s32 %v1005_v16, %v1001_v24  ;;  %v9653_v29 = vand.u32 3, %v831_v42 }
 0x14e   : > { %v8249_v50 = vadd.s32 4294967169, %v2614_v0  ;;  %vm2403_vm7 = vcmp.le.f32.partialorder %v2402_v39, 0.7853982  ;;  %vm9659_vm8 = vcmp.le.f32.partialorder %v634_v44, 0.7853982  ;;  %v8238_v15 = vmin.u32 %v2364_v14, %v9631_v56  ;;  %v9694_v14 = vpop.f32.mrb[6].mxu0 }
 0x14f   : > { %v9664_v28 = vsel %vm2403_vm7, 0, %v2489_v30  ;;  %v706_v43 = vsub.s32 32, %v9626_v59  ;;  %v1007_v47 = vadd.s32 536870912, %v1006_v60  ;;  %v9668_v45 = vsel %vm2403_vm7, %v9343_v34, %v2487_v41  ;;  %13280 = vst [vmem:[#allocation20_spill] sm:$0xff] %v9694_v14 }
 0x150   : > { %13276 = vst [vmem:[#allocation16_spill] sm:$0xff] %v9664_v28  ;;  %v2620_v40 = vadd.s32 1, %v8249_v50  ;;  %v690_v39 = vadd.s32 %v9485_v13, %v9490_v17  ;;  %v9674_v44 = vsel %vm9659_vm8, 0, %v721_v27  ;;  %v845_v2 = vand.u32 2139095040, %v9362_v52 }
 0x151   : > { %13277 = vst [vmem:[#allocation17_spill] sm:$0xff] %v9674_v44  ;;  %v712_v53 = vshll.u32 %v711_v36, 23  ;;  %v9677_v48 = vshrl.u32 %v1007_v47, 30  ;;  %v13115_v18 = vand.u32 2147483647, %v9360_v51  ;;  %v838_v22 = vxor.u32 2147483648, %v9614_v61 }
 0x152   : > { %vm2621_vm9 = vcmp.gt.s32.totalorder %v2620_v40, 0  ;;  %v9681_v9 = vand.u32 3, %v827_v31  ;;  %v2366_v11 = vclz %v8238_v15  ;;  %vm837_vm10 = vcmp.eq.s32.totalorder %v9653_v29, 2 }
 0x153   : > { %v2622_v7 = vsel %vm2621_vm9, %v2620_v40, 0  ;;  %v9683_v63 = vpop.eup %8986  ;;  %v9687_v13 = vadd.s32 3, %v9664_v28  ;;  %v708_v17 = vshrl.u32 %v690_v39, %v706_v43  ;;  %v1009_v20 = vshll.u32 %v9677_v48, 30 }
 0x154   : > { %8988 = vcosq.f32 %v9668_v45  ;;  %v9692_v62 = vadd.s32 3, %v9674_v44  ;;  %v2624_v42 = vand.u32 31, %v2622_v7  ;;  %v846_v31 = vshrl.u32 %v845_v2, 23 }
 0x155   : > { %13278 = vst [vmem:[#allocation18_spill] sm:$0xff] %v9687_v13  ;;  %v707_v24 = vshll.u32 %v9513_v6, %v9626_v59  ;;  %v713_v0 = vor.u32 4788187, %v712_v53  ;;  %v9698_v30 = vsub.s32 %v1006_v60, %v1009_v20  ;;  %v2617_v27 = vand.u32 8388607, %v13115_v18 }
 0x156   : > { %13279 = vst [vmem:[#allocation19_spill] sm:$0xff] %v9692_v62  ;;  %v9706_v41 = vsel %vm837_vm10, %v838_v22, %v9683_v63  ;;  %v8239_v36 = vadd.s32 4294967294, %v2366_v11  ;;  %v2625_v50 = vsub.s32 32, %v2624_v42  ;;  %v2627_v6 = vshll.u32 %v13129_v3, %v2624_v42 }
 0x157   : > { %v709_v15 = vor.u32 %v708_v17, %v707_v24  ;;  %v1012_v43 = vsub.s32 0, %v9698_v30  ;;  %v2630_v59 = vshll.u32 %v13118_v5, %v2624_v42  ;;  %v2623_v60 = vshrl.u32 %v2622_v7, 5 }
 0x158   : > { %v2628_v47 = vshrl.u32 %v13118_v5, %v2625_v50  ;;  %v2631_v40 = vshrl.u32 %v13120_v8, %v2625_v50  ;;  %v8181_v39 = vadd.s32 4294967169, %v846_v31  ;;  %v714_v2 = vand.u32 2147483647, %v713_v0 }
 0x159   : > { %v2618_v53 = vor.u32 8388608, %v2617_v27  ;;  %v2633_v20 = vshll.u32 %v13120_v8, %v2624_v42  ;;  %v13124_v11 = vand.u32 2147483647, %v9362_v52  ;;  %vm8240_vm11 = vcmp.lt.s32.totalorder %v8239_v36, 0 }
 0x15a   : > { %v8186_v17 = vmin.u32 %v1012_v43, %v9698_v30  ;;  %v2634_v24 = vshrl.u32 %v13127_v10, %v2625_v50  ;;  %v2636_v18 = vshll.u32 %v13127_v10, %v2624_v42  ;;  %v2629_v23 = vor.u32 %v2628_v47, %v2627_v6 }
 0x15b   : > { %v2632_v7 = vor.u32 %v2631_v40, %v2630_v59  ;;  %v2637_v1 = vshrl.u32 %v13125_v12, %v2625_v50  ;;  %v2639_v5 = vshll.u32 %v13125_v12, %v2624_v42  ;;  %vm4163_vm12 = vcmp.eq.s32.totalorder %v9681_v9, 2 }
 0x15c   : > { %v2635_v31 = vor.u32 %v2634_v24, %v2633_v20  ;;  %v2640_v0 = vshrl.u32 %v13122_v19, %v2625_v50  ;;  %vm2642_vm13 = vcmp.lt.s32.totalorder %v2623_v60, 1  ;;  %v852_v27 = vadd.s32 1, %v8181_v39 }
 0x15d   : > { %vm834_vm14 = vcmp.eq.s32.totalorder %v9653_v29, 0  ;;  %v2626_v43 = vshrl.u32 %v13129_v3, %v2625_v50  ;;  %v2638_v8 = vor.u32 %v2637_v1, %v2636_v18  ;;  %vm2644_vm15 = vcmp.lt.s32.totalorder %v2623_v60, 3  ;;  %v9740_v3 = vpop.f32.mrb[6].mxu1 }
 0x15e   : > { %v849_v6 = vand.u32 8388607, %v13124_v11  ;;  %v9726_v59 = vpop.eup %8988  ;;  %v9729_v42 = vsel %vm8240_vm11, 0, %v8239_v36  ;;  %v1014_v47 = vclz %v8186_v17  ;;  %v2641_v40 = vor.u32 %v2640_v0, %v2639_v5  ;;  %13282 = vst [vmem:[#allocation22_spill] sm:$0xff] %v9740_v3 }
 0x15f   : > { %13281 = vst [vmem:[#allocation21_spill] sm:$0xff] %v9726_v59  ;;  %vm2645_vm0 = vcmp.lt.s32.totalorder %v2623_v60, 4  ;;  %vm2643_vm1 = vcmp.lt.s32.totalorder %v2623_v60, 2  ;;  %v2650_v39 = vsel %vm2642_vm13, %v2629_v23, %v2632_v7  ;;  %v716_v19 = vcvt.s32.f32 %v709_v15 }
 0x160   : > { %v2647_v20 = vsel %vm2645_vm0, %v2635_v31, 2102212464  ;;  %v2651_v24 = vsel %vm2645_vm0, %v2638_v8, 920167782  ;;  %v2658_v18 = vshll.u32 %v2618_v53, 8  ;;  %vm853_vm2 = vcmp.gt.s32.totalorder %v852_v27, 0 }
 0x161   : > { %v2652_v1 = vsel %vm2644_vm15, %v2635_v31, %v2651_v24  ;;  %v2374_v50 = vsub.s32 4294967266, %v9729_v42  ;;  %v2646_v11 = vsel %vm2642_vm13, %v2626_v43, %v2629_v23  ;;  %v2648_v36 = vsel %vm2644_vm15, %v2632_v7, %v2647_v20 }
 0x162   : > { %v2654_v17 = vsel %vm2642_vm13, %v2632_v7, %v2635_v31  ;;  %v9737_v5 = vmul.f32 %v716_v19, %v714_v2  ;;  %v2653_v0 = vsel %vm2643_vm1, %v2650_v39, %v2652_v1  ;;  %v2655_v12 = vsel %vm2645_vm0, %v2641_v40, 1326507024 }
 0x163   : > { %v850_v10 = vor.u32 8388608, %v849_v6  ;;  %v8187_v15 = vadd.s32 4294967294, %v1014_v47  ;;  %v2656_v53 = vsel %vm2644_vm15, %v2638_v8, %v2655_v12  ;;  %v854_v24 = vsel %vm853_vm2, %v852_v27, 0 }
 0x164   : > { %v2509_v16 = vand.u32 2139095040, %v9364_v57  ;;  %v2649_v23 = vsel %vm2643_vm1, %v2646_v11, %v2648_v36  ;;  %v2657_v43 = vsel %vm2643_vm1, %v2654_v17, %v2656_v53  ;;  %v9755_v19 = vsel %vm4163_vm12, %v838_v22, %v9683_v63 }
 0x165   : > { %v9746_v20 = vmul.u32.u64.low %v2658_v18, %v2653_v0  ;;  %v9747_v7 = vmul.u32.u64.high %v2658_v18, %v2653_v0, %v9746_v20  ;;  %v2375_v2 = vadd.s32 127, %v2374_v50  ;;  %v13283_v31 = vxor.u32 2147483648, %v9683_v63 }
 0x166   : > { %v9757_v8 = vmul.u32.u64.low %v2658_v18, %v2657_v43  ;;  %v9758_v12 = vmul.u32.u64.high %v2658_v18, %v2657_v43, %v9757_v8  ;;  %v2354_v27 = vadd.s32 %v9582_v35, %v9578_v32  ;;  %v856_v6 = vand.u32 31, %v854_v24 }
 0x167   : > { %v9765_v60 = vsel %vm834_vm14, %v9614_v61, %v13283_v31  ;;  %v2370_v22 = vsub.s32 32, %v9729_v42  ;;  %v2665_v47 = vmul.u32 %v2658_v18, %v2649_v23  ;;  %v9771_v40 = vshll.u32 %v850_v10, 8 }
 0x168   : > { %v2510_v39 = vshrl.u32 %v2509_v16, 23  ;;  %v2371_v1 = vshll.u32 %v9631_v56, %v9729_v42  ;;  %vm8188_vm3 = vcmp.lt.s32.totalorder %v8187_v15, 0  ;;  %v2668_v50 = vadd.s32 1, %v9747_v7 }
 0x169   : > { %v857_v36 = vsub.s32 32, %v856_v6  ;;  %v2376_v17 = vshll.u32 %v2375_v2, 23  ;;  %vm2667_vm4 = vc.u32 %v9758_v12, %v9746_v20  ;;  %v855_v0 = vshrl.u32 %v854_v24, 5 }
 0x16a   : > { %v13284_v32 = vmov 683565275   ;;  %v2669_v53 = vsel %vm2667_vm4, %v2668_v50, %v9747_v7  ;;  %v13285_v18 = vmov 2475754826   ;;  %v13286_v23 = vmov 2131351028  }
 0x16b   : > { %v859_v35 = vshll.u32 %v13284_v32, %v856_v6  ;;  %v860_v10 = vshrl.u32 %v13285_v18, %v857_v36  ;;  %v862_v16 = vshll.u32 %v13285_v18, %v856_v6  ;;  %v863_v43 = vshrl.u32 %v13286_v23, %v857_v36 }
 0x16c   : > { %v9783_v56 = vsel %vm8188_vm3, 0, %v8187_v15  ;;  %v2670_v42 = vadd.s32 %v2669_v53, %v2665_v47  ;;  %v865_v8 = vshll.u32 %v13286_v23, %v856_v6  ;;  %v13287_v2 = vmov 2102212464  }
 0x16d   : > { %v866_v31 = vshrl.u32 %v13287_v2, %v857_v36  ;;  %vm4160_vm6 = vcmp.eq.s32.totalorder %v9681_v9, 0  ;;  %v861_v24 = vor.u32 %v860_v10, %v859_v35  ;;  %v864_v11 = vor.u32 %v863_v43, %v862_v16 }
 0x16e   : > { %v868_v28 = vshll.u32 %v13287_v2, %v856_v6  ;;  %v13288_v7 = vmov 920167782   ;;  %v2671_v59 = vadd.s32 536870912, %v2670_v42  ;;  %v13289_v44 = vmov 1326507024  }
 0x16f   : > { %v869_v50 = vshrl.u32 %v13288_v7, %v857_v36  ;;  %v867_v13 = vor.u32 %v866_v31, %v865_v8  ;;  %v871_v34 = vshll.u32 %v13288_v7, %v856_v6  ;;  %v872_v15 = vshrl.u32 %v13289_v44, %v857_v36 }
 0x170   : > { %vm833_vm7 = vcmp.lt.s32.totalorder %v9653_v29, 2  ;;  %v2372_v47 = vshrl.u32 %v2354_v27, %v2370_v22  ;;  %v2377_v53 = vor.u32 4788187, %v2376_v17  ;;  %v1018_v62 = vsub.s32 32, %v9783_v56 }
 0x171   : > { %v870_v3 = vor.u32 %v869_v50, %v868_v28  ;;  %v9794_v14 = vshrl.u32 %v2671_v59, 30  ;;  %v873_v35 = vor.u32 %v872_v15, %v871_v34  ;;  %vm874_vm9 = vcmp.lt.s32.totalorder %v855_v0, 1 }
 0x172   : > { %vm877_vm10 = vcmp.lt.s32.totalorder %v855_v0, 4  ;;  %v1022_v10 = vsub.s32 4294967266, %v9783_v56  ;;  %v882_v43 = vsel %vm874_vm9, %v861_v24, %v864_v11  ;;  %v858_v31 = vshrl.u32 %v13284_v32, %v857_v36 }
 0x173   : > { %v879_v16 = vsel %vm877_vm10, %v867_v13, 2102212464  ;;  %v883_v6 = vsel %vm877_vm10, %v870_v3, 920167782  ;;  %v2673_v8 = vshll.u32 %v9794_v14, 30  ;;  %vm876_vm11 = vcmp.lt.s32.totalorder %v855_v0, 3 }
 0x174   : > { %v886_v27 = vsel %vm874_vm9, %v864_v11, %v867_v13  ;;  %vm830_vm12 = vweird.f32 %v9341_v33  ;;  %vm4159_vm13 = vcmp.lt.s32.totalorder %v9681_v9, 2  ;;  %vm875_vm14 = vcmp.lt.s32.totalorder %v855_v0, 2 }
 0x175   : > { %v884_v34 = vsel %vm876_vm11, %v867_v13, %v883_v6  ;;  %v887_v28 = vsel %vm877_vm10, %v873_v35, 1326507024  ;;  %v8245_v59 = vadd.s32 4294967169, %v2510_v39  ;;  %v878_v22 = vsel %vm874_vm9, %v858_v31, %v861_v24 }
 0x176   : > { %v880_v17 = vsel %vm876_vm11, %v864_v11, %v879_v16  ;;  %v885_v50 = vsel %vm875_vm14, %v882_v43, %v884_v34  ;;  %v888_v15 = vsel %vm876_vm11, %v870_v3, %v887_v28  ;;  %v1023_v52 = vadd.s32 127, %v1022_v10 }
 0x177   : > { %v889_v36 = vsel %vm875_vm14, %v886_v27, %v888_v15  ;;  %v9807_v26 = vmul.u32.u64.low %v9771_v40, %v885_v50  ;;  %v9808_v54 = vmul.u32.u64.high %v9771_v40, %v885_v50, %v9807_v26  ;;  %v13290_v4 = vxor.u32 2147483648, %v9683_v63 }
 0x178   : > { %v9816_v39 = vsub.s32 %v2670_v42, %v2673_v8  ;;  %v9819_v11 = vmul.u32.u64.low %v9771_v40, %v889_v36  ;;  %v9820_v24 = vmul.u32.u64.high %v9771_v40, %v889_v36, %v9819_v11  ;;  %v2373_v3 = vor.u32 %v2372_v47, %v2371_v1 }
 0x179   : > { %v4162_v13 = vsel %vm4160_vm6, %v9614_v61, %v13290_v4  ;;  %v1002_v35 = vadd.s32 %v9617_v55, %v9634_v21  ;;  %v881_v10 = vsel %vm875_vm14, %v878_v22, %v880_v17  ;;  %v2516_v16 = vadd.s32 1, %v8245_v59 }
 0x17a   : > { %v840_v63 = vsel %vm833_vm7, %v9765_v60, %v9706_v41  ;;  %v13291_v4 = vxor.u32 2147483648, %v9737_v5  ;;  %v2378_v42 = vand.u32 2147483647, %v2377_v53  ;;  %v13144_v1 = vand.u32 2147483647, %v9364_v57  ;;  %v9842_v53 = vpop.f32.mrb[7].mxu0 }
 0x17b   : > { %v1020_v47 = vshrl.u32 %v1002_v35, %v1018_v62  ;;  %v1024_v43 = vshll.u32 %v1023_v52, 23  ;;  %v900_v55 = vadd.s32 1, %v9808_v54  ;;  %vm2517_vm15 = vcmp.gt.s32.totalorder %v2516_v16, 0  ;;  %13292 = vst [vmem:[#allocation23_spill] sm:$0xff] %v9842_v53 }
 0x17c   : > { %v719_v61 = vsel %vm636_vm5, %v13291_v4, %v9737_v5  ;;  %v2676_v21 = vsub.s32 0, %v9816_v39  ;;  %v897_v0 = vmul.u32 %v9771_v40, %v881_v10  ;;  %vm899_vm0 = vc.u32 %v9820_v24, %v9807_v26 }
 0x17d   : > { %v2518_v29 = vsel %vm2517_vm15, %v2516_v16, 0  ;;  %8990 = vsinq.f32 %v9668_v45  ;;  %v2380_v41 = vcvt.s32.f32 %v2373_v3  ;;  %v901_v5 = vsel %vm899_vm0, %v900_v55, %v9808_v54 }
 0x17e   : > { %v2520_v60 = vand.u32 31, %v2518_v29  ;;  %v9846_v52 = vsel %vm830_vm12, nan, %v840_v63  ;;  %v9851_v62 = vsel %vm4159_vm13, %v4162_v13, %v9755_v19  ;;  %v1019_v40 = vshll.u32 %v9698_v30, %v9783_v56 }
 0x17f   : > { %13293 = vst [vmem:[#allocation24_spill] sm:$0xff] %v9846_v52  ;;  %v902_v6 = vadd.s32 %v901_v5, %v897_v0  ;;  %v9858_v54 = vsel %vm9659_vm8, %v9347_v37, %v719_v61  ;;  %v9860_v45 = vmul.f32 %v2380_v41, %v2378_v42  ;;  %v2513_v8 = vand.u32 8388607, %v13144_v1 }
 0x180   : > { %v2521_v31 = vsub.s32 32, %v2520_v60  ;;  %v1021_v27 = vor.u32 %v1020_v47, %v1019_v40  ;;  %v1025_v34 = vor.u32 4788187, %v1024_v43  ;;  %v8250_v9 = vmin.u32 %v2676_v21, %v9816_v39 }
 0x181   : > { %v903_v19 = vadd.s32 536870912, %v902_v6  ;;  %v2523_v28 = vshll.u32 %v13284_v32, %v2520_v60  ;;  %v2526_v56 = vshll.u32 %v13285_v18, %v2520_v60  ;;  %v2519_v22 = vshrl.u32 %v2518_v29, 5 }
 0x182   : > { %v2524_v30 = vshrl.u32 %v13285_v18, %v2521_v31  ;;  %v2527_v25 = vshrl.u32 %v13286_v23, %v2521_v31  ;;  %v2529_v17 = vshll.u32 %v13286_v23, %v2520_v60  ;;  %v2532_v50 = vshll.u32 %v13287_v2, %v2520_v60 }
 0x183   : > { %v9869_v59 = vshrl.u32 %v903_v19, 30  ;;  %v2530_v15 = vshrl.u32 %v13287_v2, %v2521_v31  ;;  %v2533_v36 = vshrl.u32 %v13288_v7, %v2521_v31  ;;  %v2535_v13 = vshll.u32 %v13288_v7, %v2520_v60 }
 0x184   : > { %v1157_v11 = vand.u32 2139095040, %v9396_v46  ;;  %v2382_v3 = vxor.u32 2147483648, %v9860_v45  ;;  %v2678_v35 = vclz %v8250_v9  ;;  %v2514_v16 = vor.u32 8388608, %v2513_v8 }
 0x185   : > { %v905_v10 = vshll.u32 %v9869_v59, 30  ;;  %v2522_v63 = vshrl.u32 %v13284_v32, %v2521_v31  ;;  %v2525_v4 = vor.u32 %v2524_v30, %v2523_v28  ;;  %v2528_v61 = vor.u32 %v2527_v25, %v2526_v56 }
 0x186   : > { %v2536_v42 = vshrl.u32 %v13289_v44, %v2521_v31  ;;  %vm2300_vm5 = vcmp.lt.s32.totalorder %v9349_v38, 0  ;;  %v2531_v43 = vor.u32 %v2530_v15, %v2529_v17  ;;  %v2534_v55 = vor.u32 %v2533_v36, %v2532_v50 }
 0x187   : > { %v9882_v47 = vsub.s32 %v902_v6, %v905_v10  ;;  %vm2538_vm8 = vcmp.lt.s32.totalorder %v2519_v22, 1  ;;  %v9884_v21 = vpop.eup %8990  ;;  %vm948_vm1 = vcmp.lt.s32.totalorder %v9358_v49, 0  ;;  %v1026_v0 = vand.u32 2147483647, %v1025_v34 }
 0x188   : > { %13294 = vst [vmem:[#allocation25_spill] sm:$0xff] %v9884_v21  ;;  %v1028_v29 = vcvt.s32.f32 %v1021_v27  ;;  %v2537_v41 = vor.u32 %v2536_v42, %v2535_v13  ;;  %v1158_v5 = vshrl.u32 %v1157_v11, 23  ;;  %v8251_v60 = vadd.s32 4294967294, %v2678_v35 }
 0x189   : > { %v908_v40 = vsub.s32 0, %v9882_v47  ;;  %vm2540_vm2 = vcmp.lt.s32.totalorder %v2519_v22, 3  ;;  %v2554_v8 = vshll.u32 %v2514_v16, 8  ;;  %v13295_v31 = vand.u32 2147483647, %v9349_v38 }
 0x18a   : > { %vm2539_vm4 = vcmp.lt.s32.totalorder %v2519_v22, 2  ;;  %vm2541_vm6 = vcmp.lt.s32.totalorder %v2519_v22, 4  ;;  %v2542_v9 = vsel %vm2538_vm8, %v2522_v63, %v2525_v4  ;;  %v2546_v34 = vsel %vm2538_vm8, %v2525_v4, %v2528_v61 }
 0x18b   : > { %vm9890_vm3 = vcmp.le.f32.partialorder %v13295_v31, 0.7853982  ;;  %v8182_v27 = vmin.u32 %v908_v40, %v9882_v47  ;;  %v2543_v19 = vsel %vm2541_vm6, %v2531_v43, 2102212464  ;;  %v2547_v28 = vsel %vm2541_vm6, %v2534_v55, 920167782 }
 0x18c   : > { %v2550_v30 = vsel %vm2538_vm8, %v2528_v61, %v2531_v43  ;;  %v13298_v56 = vand.u32 2147483647, %v9358_v49  ;;  %v2544_v17 = vsel %vm2540_vm2, %v2528_v61, %v2543_v19  ;;  %v2548_v50 = vsel %vm2540_vm2, %v2531_v43, %v2547_v28 }
 0x18d   : > { %v2551_v15 = vsel %vm2541_vm6, %v2537_v41, 1326507024  ;;  %v8193_v36 = vadd.s32 4294967169, %v1158_v5  ;;  %v2384_v13 = vsub.s32 4, %v9609_v58  ;;  %v1029_v11 = vmul.f32 %v1028_v29, %v1026_v0 }
 0x18e   : > { %vm9900_vm7 = vcmp.le.f32.partialorder %v13298_v56, 0.7853982  ;;  %v1032_v35 = vsub.s32 4, %v9677_v48  ;;  %v2549_v10 = vsel %vm2539_vm4, %v2546_v34, %v2548_v50  ;;  %vm8252_vm9 = vcmp.lt.s32.totalorder %v8251_v60, 0 }
 0x18f   : > { %v2552_v16 = vsel %vm2540_vm2, %v2534_v55, %v2551_v15  ;;  %v9910_v63 = vmul.u32.u64.low %v2554_v8, %v2549_v10  ;;  %v9911_v4 = vmul.u32.u64.high %v2554_v8, %v2549_v10, %v9910_v63  ;;  %v2545_v61 = vsel %vm2539_vm4, %v2542_v9, %v2544_v17 }
 0x190   : > { %v2553_v42 = vsel %vm2539_vm4, %v2550_v30, %v2552_v16  ;;  %v13143_v43 = vand.u32 2147483647, %v9396_v46  ;;  %v1164_v41 = vadd.s32 1, %v8193_v36  ;;  %v2383_v0 = vsel %vm2300_vm5, %v2382_v3, %v9860_v45 }
 0x191   : > { %v910_v29 = vclz %v8182_v27  ;;  %v9920_v5 = vmul.u32.u64.low %v2554_v8, %v2553_v42  ;;  %v9921_v40 = vmul.u32.u64.high %v2554_v8, %v2553_v42, %v9920_v5  ;;  %v2385_v55 = vsel %vm2300_vm5, %v2384_v13, %v9609_v58 }
 0x192   : > { %v1033_v22 = vsel %vm948_vm1, %v1032_v35, %v9677_v48  ;;  %v9929_v31 = vsel %vm8252_vm9, 0, %v8251_v60  ;;  %vm1165_vm10 = vcmp.gt.s32.totalorder %v1164_v41, 0  ;;  %v1030_v9 = vxor.u32 2147483648, %v1029_v11 }
 0x193   : > { %v2561_v34 = vmul.u32 %v2554_v8, %v2545_v61  ;;  %v2564_v19 = vadd.s32 1, %v9911_v4  ;;  %v1166_v45 = vsel %vm1165_vm10, %v1164_v41, 0  ;;  %v9935_v3 = vsel %vm830_vm12, nan, %v9851_v62  ;;  %v9949_v62 = vpop.f32.mrb[7].mxu1 }
 0x194   : > { %13301 = vst [vmem:[#allocation26_spill] sm:$0xff] %v9935_v3  ;;  %8992 = vcosq.f32 %v9858_v54  ;;  %v9941_v58 = vsel %vm9890_vm3, %v9349_v38, %v2383_v0  ;;  %v1161_v48 = vand.u32 8388607, %v13143_v43  ;;  %v2686_v60 = vsub.s32 4294967266, %v9929_v31  ;;  %13302 = vst [vmem:[#allocation27_spill] sm:$0xff] %v9949_v62 }
 0x195   : > { %8994 = vsinq.f32 %v9858_v54  ;;  %v8183_v8 = vadd.s32 4294967294, %v910_v29  ;;  %vm2563_vm11 = vc.u32 %v9921_v40, %v9910_v63  ;;  %v9953_v27 = vsel %vm9890_vm3, 0, %v2385_v55 }
 0x196   : > { %13303 = vst [vmem:[#allocation28_spill] sm:$0xff] %v9953_v27  ;;  %v9957_v28 = vsel %vm9900_vm7, 0, %v1033_v22  ;;  %v2565_v30 = vsel %vm2563_vm11, %v2564_v19, %v9911_v4  ;;  %v1168_v56 = vand.u32 31, %v1166_v45  ;;  %8996 = vcosq.f32 %v9941_v58 }
 0x197   : > { %13304 = vst [vmem:[#allocation29_spill] sm:$0xff] %v9957_v28  ;;  %v1031_v54 = vsel %vm948_vm1, %v1030_v9, %v1029_v11  ;;  %v2666_v17 = vadd.s32 %v9746_v20, %v9758_v12  ;;  %v2566_v50 = vadd.s32 %v2565_v30, %v2561_v34  ;;  %v2682_v6 = vsub.s32 32, %v9929_v31 }
 0x198   : > { %v1162_v36 = vor.u32 8388608, %v1161_v48  ;;  %v1169_v13 = vsub.s32 32, %v1168_v56  ;;  %v2687_v35 = vadd.s32 127, %v2686_v60  ;;  %vm8184_vm12 = vcmp.lt.s32.totalorder %v8183_v8, 0 }
 0x199   : > { %v2567_v10 = vadd.s32 536870912, %v2566_v50  ;;  %v1167_v16 = vshrl.u32 %v1166_v45, 5  ;;  %v1171_v4 = vshll.u32 %v13284_v32, %v1168_v56  ;;  %v1174_v11 = vshll.u32 %v13285_v18, %v1168_v56 }
 0x19a   : > { %v1172_v61 = vshrl.u32 %v13285_v18, %v1169_v13  ;;  %v1177_v42 = vshll.u32 %v13286_v23, %v1168_v56  ;;  %v1175_v12 = vshrl.u32 %v13286_v23, %v1169_v13  ;;  %v1178_v41 = vshrl.u32 %v13287_v2, %v1169_v13 }
 0x19b   : > { %v9971_v20 = vshrl.u32 %v2567_v10, 30  ;;  %v1181_v0 = vshrl.u32 %v13288_v7, %v1169_v13  ;;  %v1180_v5 = vshll.u32 %v13287_v2, %v1168_v56  ;;  %v1183_v55 = vshll.u32 %v13288_v7, %v1168_v56 }
 0x19c   : > { %v1173_v29 = vor.u32 %v1172_v61, %v1171_v4  ;;  %v1184_v22 = vshrl.u32 %v13289_v44, %v1169_v13  ;;  %v9979_v9 = vsel %vm8184_vm12, 0, %v8183_v8  ;;  %v1176_v19 = vor.u32 %v1175_v12, %v1174_v11  ;;  %v13305_v8 = vld [vmem:[#allocation13_spill] sm:$0xff] }
 0x19d   : > { %v2569_v34 = vshll.u32 %v9971_v20, 30  ;;  %v1179_v45 = vor.u32 %v1178_v41, %v1177_v42  ;;  %vm2612_vm13 = vcmp.lt.s32.totalorder %v9360_v51, 0  ;;  %v2688_v60 = vshll.u32 %v2687_v35, 23 }
 0x19e   : > { %v9982_v48 = vpop.eup %8992  ;;  %v1182_v30 = vor.u32 %v1181_v0, %v1180_v5  ;;  %v1185_v10 = vor.u32 %v1184_v22, %v1183_v55  ;;  %v1202_v4 = vshll.u32 %v1162_v36, 8  ;;  %vm1186_vm14 = vcmp.lt.s32.totalorder %v1167_v16, 1 }
 0x19f   : > { %v9985_v61 = vpop.eup %8994  ;;  %v9987_v43 = vsub.s32 %v2566_v50, %v2569_v34  ;;  %vm1189_vm15 = vcmp.lt.s32.totalorder %v1167_v16, 4  ;;  %v2821_v56 = vand.u32 2139095040, %v13305_v8  ;;  %v918_v1 = vsub.s32 4294967266, %v9979_v9 }
 0x1a0   : > { %v1170_v11 = vshrl.u32 %v13284_v32, %v1169_v13  ;;  %v1191_v42 = vsel %vm1189_vm15, %v1179_v45, 2102212464  ;;  %v1194_v12 = vsel %vm1186_vm14, %v1173_v29, %v1176_v19  ;;  %v9992_v41 = vpop.eup %8996  ;;  %vm1187_vm0 = vcmp.lt.s32.totalorder %v1167_v16, 2 }
 0x1a1   : > { %13306 = vst [vmem:[#allocation30_spill] sm:$0xff] %v9992_v41  ;;  %v2572_v35 = vsub.s32 0, %v9987_v43  ;;  %vm1188_vm5 = vcmp.lt.s32.totalorder %v1167_v16, 3  ;;  %v1195_v36 = vsel %vm1189_vm15, %v1182_v30, 920167782  ;;  %v1198_v22 = vsel %vm1186_vm14, %v1176_v19, %v1179_v45 }
 0x1a2   : > { %v13307_v50 = vand.u32 2147483647, %v9360_v51  ;;  %v1190_v5 = vsel %vm1186_vm14, %v1170_v11, %v1173_v29  ;;  %v1196_v55 = vsel %vm1188_vm5, %v1179_v45, %v1195_v36  ;;  %v1199_v34 = vsel %vm1189_vm15, %v1185_v10, 1326507024 }
 0x1a3   : > { %v8246_v13 = vmin.u32 %v2572_v35, %v9987_v43  ;;  %v1192_v15 = vsel %vm1188_vm5, %v1176_v19, %v1191_v42  ;;  %v1197_v21 = vsel %vm1187_vm0, %v1194_v12, %v1196_v55  ;;  %v1200_v41 = vsel %vm1188_vm5, %v1182_v30, %v1199_v34 }
 0x1a4   : > { %vm9997_vm8 = vcmp.le.f32.partialorder %v13307_v50, 0.7853982  ;;  %v2684_v38 = vshrl.u32 %v2666_v17, %v2682_v6  ;;  %v1201_v33 = vsel %vm1187_vm0, %v1198_v22, %v1200_v41  ;;  %v1034_v29 = vsel %vm9900_vm7, %v9358_v49, %v1031_v54  ;;  %v13315_v22 = vld [vmem:[#allocation14_spill] sm:$0xff] }
 0x1a5   : > { %v10004_v52 = vmul.u32.u64.low %v1202_v4, %v1197_v21  ;;  %v10005_v3 = vmul.u32.u64.high %v1202_v4, %v1197_v21, %v10004_v52  ;;  %v2683_v45 = vshll.u32 %v9816_v39, %v9929_v31  ;;  %v2689_v19 = vor.u32 4788187, %v2688_v60 }
 0x1a6   : > { %v10013_v10 = vmul.u32.u64.low %v1202_v4, %v1201_v33  ;;  %v10014_v11 = vmul.u32.u64.high %v1202_v4, %v1201_v33, %v10013_v10  ;;  %v2574_v42 = vclz %v8246_v13  ;;  %v1193_v17 = vsel %vm1187_vm0, %v1190_v5, %v1192_v15 }
 0x1a7   : > { %v2822_v6 = vshrl.u32 %v2821_v56, 23  ;;  %8998 = vsinq.f32 %v9941_v58  ;;  %v10019_v21 = vadd.s32 3, %v9953_v27  ;;  %v13311_v25 = vsub.s32 4, %v9794_v14 }
 0x1a8   : > { %v919_v39 = vadd.s32 127, %v918_v1  ;;  %v2685_v31 = vor.u32 %v2684_v38, %v2683_v45  ;;  %v1212_v33 = vadd.s32 1, %v10005_v3  ;;  %v13150_v60 = vand.u32 2147483647, %v13305_v8  ;;  %v10034_v1 = vpop.f32.mrb[8].mxu0 }
 0x1a9   : > { %13310 = vst [vmem:[#allocation31_spill] sm:$0xff] %v10019_v21  ;;  %v2697_v54 = vsel %vm2612_vm13, %v13311_v25, %v9794_v14  ;;  %v8257_v16 = vadd.s32 4294967169, %v2822_v6  ;;  %9000 = vcosq.f32 %v1034_v29  ;;  %v10029_v15 = vadd.s32 3, %v9957_v28  ;;  %13313 = vst [vmem:[#allocation33_spill] sm:$0xff] %v10034_v1 }
 0x1aa   : > { %v1209_v58 = vmul.u32 %v1202_v4, %v1193_v17  ;;  %vm1211_vm1 = vc.u32 %v10014_v11, %v10004_v52  ;;  %v2690_v30 = vand.u32 2147483647, %v2689_v19  ;;  %v8247_v56 = vadd.s32 4294967294, %v2574_v42 }
 0x1ab   : > { %13312 = vst [vmem:[#allocation32_spill] sm:$0xff] %v10029_v15  ;;  %v1213_v12 = vsel %vm1211_vm1, %v1212_v33, %v10005_v3  ;;  %v2828_v14 = vadd.s32 1, %v8257_v16  ;;  %v10038_v38 = vsel %vm9997_vm8, 0, %v2697_v54  ;;  %v914_v41 = vsub.s32 32, %v9979_v9 }
 0x1ac   : > { %13314 = vst [vmem:[#allocation34_spill] sm:$0xff] %v10038_v38  ;;  %v920_v35 = vshll.u32 %v919_v39, 23  ;;  %v1214_v36 = vadd.s32 %v1213_v12, %v1209_v58  ;;  %9002 = vsinq.f32 %v1034_v29  ;;  %v2692_v4 = vcvt.s32.f32 %v2685_v31 }
 0x1ad   : > { %v2825_v50 = vand.u32 8388607, %v13150_v60  ;;  %vm2829_vm2 = vcmp.gt.s32.totalorder %v2828_v14, 0  ;;  %v898_v3 = vadd.s32 %v9807_v26, %v9820_v24  ;;  %v1053_v34 = vand.u32 2139095040, %v13315_v22 }
 0x1ae   : > { %v1215_v5 = vadd.s32 536870912, %v1214_v36  ;;  %v2830_v55 = vsel %vm2829_vm2, %v2828_v14, 0  ;;  %v10046_v13 = vmul.f32 %v2692_v4, %v2690_v30  ;;  %v10049_v45 = vadd.s32 3, %v10038_v38 }
 0x1af   : > { %vm8248_vm3 = vcmp.lt.s32.totalorder %v8247_v56, 0  ;;  %v2832_v10 = vand.u32 31, %v2830_v55  ;;  %v915_v29 = vshll.u32 %v9882_v47, %v9979_v9  ;;  %v916_v19 = vshrl.u32 %v898_v3, %v914_v41 }
 0x1b0   : > { %13316 = vst [vmem:[#allocation35_spill] sm:$0xff] %v10049_v45  ;;  %v921_v42 = vor.u32 4788187, %v920_v35  ;;  %v10053_v17 = vshrl.u32 %v1215_v5, 30  ;;  %v2826_v6 = vor.u32 8388608, %v2825_v50  ;;  %v10059_v39 = vsel %vm8248_vm3, 0, %v8247_v56 }
 0x1b1   : > { %v2833_v26 = vsub.s32 32, %v2832_v10  ;;  %v2835_v24 = vshll.u32 %v13284_v32, %v2832_v10  ;;  %v2838_v25 = vshll.u32 %v13285_v18, %v2832_v10  ;;  %v10057_v54 = vpop.eup %8998  ;;  %v2831_v33 = vshrl.u32 %v2830_v55, 5 }
 0x1b2   : > { %13317 = vst [vmem:[#allocation36_spill] sm:$0xff] %v10057_v54  ;;  %v1217_v31 = vshll.u32 %v10053_v17, 30  ;;  %v1054_v16 = vshrl.u32 %v1053_v34, 23  ;;  %v2841_v58 = vshll.u32 %v13286_v23, %v2832_v10  ;;  %v917_v14 = vor.u32 %v916_v19, %v915_v29 }
 0x1b3   : > { %v2836_v47 = vshrl.u32 %v13285_v18, %v2833_v26  ;;  %v2839_v9 = vshrl.u32 %v13286_v23, %v2833_v26  ;;  %v2842_v30 = vshrl.u32 %v13287_v2, %v2833_v26  ;;  %v10066_v12 = vpop.eup %9000  ;;  %v922_v41 = vand.u32 2147483647, %v921_v42 }
 0x1b4   : > { %13318 = vst [vmem:[#allocation37_spill] sm:$0xff] %v10066_v12  ;;  %v10068_v35 = vsub.s32 %v1214_v36, %v1217_v31  ;;  %v2844_v56 = vshll.u32 %v13287_v2, %v2832_v10  ;;  %v10071_v3 = vshll.u32 %v2826_v6, 8  ;;  %v2582_v55 = vsub.s32 4294967266, %v10059_v39 }
 0x1b5   : > { %v2837_v4 = vor.u32 %v2836_v47, %v2835_v24  ;;  %v2840_v50 = vor.u32 %v2839_v9, %v2838_v25  ;;  %v2845_v60 = vshrl.u32 %v13288_v7, %v2833_v26  ;;  %v8189_v38 = vadd.s32 4294967169, %v1054_v16 }
 0x1b6   : > { %v1220_v34 = vsub.s32 0, %v10068_v35  ;;  %v10077_v45 = vpop.eup %9002  ;;  %v2843_v29 = vor.u32 %v2842_v30, %v2841_v58  ;;  %v2847_v36 = vshll.u32 %v13288_v7, %v2832_v10  ;;  %v2848_v19 = vshrl.u32 %v13289_v44, %v2833_v26 }
 0x1b7   : > { %13319 = vst [vmem:[#allocation38_spill] sm:$0xff] %v10077_v45  ;;  %vm2850_vm4 = vcmp.lt.s32.totalorder %v2831_v33, 1  ;;  %v2834_v6 = vshrl.u32 %v13284_v32, %v2833_v26  ;;  %v2846_v24 = vor.u32 %v2845_v60, %v2844_v56  ;;  %vm2852_vm6 = vcmp.lt.s32.totalorder %v2831_v33, 3 }
 0x1b8   : > { %v8194_v42 = vmin.u32 %v1220_v34, %v10068_v35  ;;  %v2849_v25 = vor.u32 %v2848_v19, %v2847_v36  ;;  %vm2851_vm7 = vcmp.lt.s32.totalorder %v2831_v33, 2  ;;  %vm2853_vm9 = vcmp.lt.s32.totalorder %v2831_v33, 4 }
 0x1b9   : > { %v2858_v31 = vsel %vm2850_vm4, %v2837_v4, %v2840_v50  ;;  %v2855_v47 = vsel %vm2853_vm9, %v2843_v29, 2102212464  ;;  %v2859_v9 = vsel %vm2853_vm9, %v2846_v24, 920167782  ;;  %v1060_v58 = vadd.s32 1, %v8189_v38 }
 0x1ba   : > { %v1222_v16 = vclz %v8194_v42  ;;  %v924_v30 = vcvt.s32.f32 %v917_v14  ;;  %v2583_v10 = vadd.s32 127, %v2582_v55  ;;  %v2860_v5 = vsel %vm2852_vm6, %v2843_v29, %v2859_v9 }
 0x1bb   : > { %v13320_v27 = vand.u32 2147483647, %v13315_v22  ;;  %v2854_v60 = vsel %vm2850_vm4, %v2834_v6, %v2837_v4  ;;  %v2861_v26 = vsel %vm2851_vm7, %v2858_v31, %v2860_v5  ;;  %v2862_v56 = vsel %vm2850_vm4, %v2840_v50, %v2843_v29 }
 0x1bc   : > { %v8195_v54 = vadd.s32 4294967294, %v1222_v16  ;;  %v2856_v36 = vsel %vm2852_vm6, %v2840_v50, %v2855_v47  ;;  %v2863_v19 = vsel %vm2853_vm9, %v2849_v25, 1326507024  ;;  %v10096_v14 = vmul.f32 %v924_v30, %v922_v41 }
 0x1bd   : > { %v1057_v34 = vand.u32 8388607, %v13320_v27  ;;  %v10092_v42 = vmul.u32.u64.low %v10071_v3, %v2861_v26  ;;  %v10093_v38 = vmul.u32.u64.high %v10071_v3, %v2861_v26, %v10092_v42  ;;  %v2864_v27 = vsel %vm2852_vm6, %v2846_v24, %v2863_v19  ;;  %v10123_v19 = vpop.f32.mrb[8].mxu1 }
 0x1be   : > { %vm8196_vm10 = vcmp.lt.s32.totalorder %v8195_v54, 0  ;;  %vm1061_vm11 = vcmp.gt.s32.totalorder %v1060_v58, 0  ;;  %v2578_v4 = vsub.s32 32, %v10059_v39  ;;  %v2865_v5 = vsel %vm2851_vm7, %v2862_v56, %v2864_v27  ;;  %v13321_v56 = vld [vmem:[#allocation15_spill] sm:$0xff]  ;;  %13322 = vst [vmem:[#allocation39_spill] sm:$0xff] %v10123_v19 }
 0x1bf   : > { %v1058_v55 = vor.u32 8388608, %v1057_v34  ;;  %v1062_v29 = vsel %vm1061_vm11, %v1060_v58, 0  ;;  %v2562_v6 = vadd.s32 %v9910_v63, %v9921_v40  ;;  %v2584_v25 = vshll.u32 %v2583_v10, 23 }
 0x1c0   : > { %v2857_v31 = vsel %vm2851_vm7, %v2854_v60, %v2856_v36  ;;  %v10105_v41 = vsel %vm8196_vm10, 0, %v8195_v54  ;;  %v10108_v16 = vmul.u32.u64.low %v10071_v3, %v2865_v5  ;;  %v10109_v24 = vmul.u32.u64.high %v10071_v3, %v2865_v5, %v10108_v16 }
 0x1c1   : > { %v1064_v47 = vand.u32 31, %v1062_v29  ;;  %v2579_v58 = vshll.u32 %v9987_v43, %v10059_v39  ;;  %v2876_v34 = vadd.s32 1, %v10093_v38  ;;  %v2580_v63 = vshrl.u32 %v2562_v6, %v2578_v4 }
 0x1c2   : > { %v2873_v40 = vmul.u32 %v10071_v3, %v2857_v31  ;;  %v10117_v54 = vshll.u32 %v1058_v55, 8  ;;  %v10119_v10 = vor.u32 4788187, %v2584_v25  ;;  %v1230_v60 = vsub.s32 4294967266, %v10105_v41 }
 0x1c3   : > { %v1065_v33 = vsub.s32 32, %v1064_v47  ;;  %v1063_v26 = vshrl.u32 %v1062_v29, 5  ;;  %v2717_v36 = vand.u32 2139095040, %v13321_v56  ;;  %vm2875_vm12 = vc.u32 %v10109_v24, %v10092_v42  ;;  %v13323_v29 = vld [vmem:[#allocation10_spill] sm:$0xff] }
 0x1c4   : > { %v1067_v43 = vshll.u32 %v13284_v32, %v1064_v47  ;;  %v1070_v3 = vshll.u32 %v13285_v18, %v1064_v47  ;;  %v2877_v27 = vsel %vm2875_vm12, %v2876_v34, %v10093_v38  ;;  %v1073_v5 = vshll.u32 %v13286_v23, %v1064_v47 }
 0x1c5   : > { %v1068_v39 = vshrl.u32 %v13285_v18, %v1065_v33  ;;  %v1071_v4 = vshrl.u32 %v13286_v23, %v1065_v33  ;;  %v1076_v55 = vshll.u32 %v13287_v2, %v1064_v47  ;;  %vm844_vm14 = vcmp.lt.s32.totalorder %v13323_v29, 0 }
 0x1c6   : > { %v2878_v6 = vadd.s32 %v2877_v27, %v2873_v40  ;;  %v1074_v31 = vshrl.u32 %v13287_v2, %v1065_v33  ;;  %v1077_v16 = vshrl.u32 %v13288_v7, %v1065_v33  ;;  %v1231_v30 = vadd.s32 127, %v1230_v60 }
 0x1c7   : > { %v1069_v25 = vor.u32 %v1068_v39, %v1067_v43  ;;  %v1072_v9 = vor.u32 %v1071_v4, %v1070_v3  ;;  %v1079_v50 = vshll.u32 %v13288_v7, %v1064_v47  ;;  %v1080_v38 = vshrl.u32 %v13289_v44, %v1065_v33 }
 0x1c8   : > { %v2879_v34 = vadd.s32 536870912, %v2878_v6  ;;  %v1075_v21 = vor.u32 %v1074_v31, %v1073_v5  ;;  %v1078_v28 = vor.u32 %v1077_v16, %v1076_v55  ;;  %vm1082_vm15 = vcmp.lt.s32.totalorder %v1063_v26, 1 }
 0x1c9   : > { %v1066_v12 = vshrl.u32 %v13284_v32, %v1065_v33  ;;  %v1081_v45 = vor.u32 %v1080_v38, %v1079_v50  ;;  %vm1085_vm0 = vcmp.lt.s32.totalorder %v1063_v26, 4  ;;  %v1090_v40 = vsel %vm1082_vm15, %v1069_v25, %v1072_v9 }
 0x1ca   : > { %v10141_v43 = vshrl.u32 %v2879_v34, 30  ;;  %vm1084_vm5 = vcmp.lt.s32.totalorder %v1063_v26, 3  ;;  %v1087_v39 = vsel %vm1085_vm0, %v1075_v21, 2102212464  ;;  %v1091_v60 = vsel %vm1085_vm0, %v1078_v28, 920167782 }
 0x1cb   : > { %vm1083_vm1 = vcmp.lt.s32.totalorder %v1063_v26, 2  ;;  %v1092_v3 = vsel %vm1084_vm5, %v1075_v21, %v1091_v60  ;;  %v1094_v47 = vsel %vm1082_vm15, %v1072_v9, %v1075_v21  ;;  %v1095_v27 = vsel %vm1085_vm0, %v1081_v45, 1326507024 }
 0x1cc   : > { %v13324_v4 = vand.u32 2147483647, %v13323_v29  ;;  %v1226_v50 = vsub.s32 32, %v10105_v41  ;;  %v2881_v33 = vshll.u32 %v10141_v43, 30  ;;  %v1086_v55 = vsel %vm1082_vm15, %v1066_v12, %v1069_v25 }
 0x1cd   : > { %v1093_v31 = vsel %vm1083_vm1, %v1090_v40, %v1092_v3  ;;  %vm2508_vm3 = vcmp.lt.s32.totalorder %v9364_v57, 0  ;;  %v1088_v16 = vsel %vm1084_vm5, %v1072_v9, %v1087_v39  ;;  %v1096_v38 = vsel %vm1084_vm5, %v1078_v28, %v1095_v27 }
 0x1ce   : > { %vm10146_vm2 = vcmp.le.f32.partialorder %v13324_v4, 0.7853982  ;;  %v10156_v21 = vmul.u32.u64.low %v10117_v54, %v1093_v31  ;;  %v10157_v45 = vmul.u32.u64.high %v10117_v54, %v1093_v31, %v10156_v21  ;;  %v1210_v34 = vadd.s32 %v10004_v52, %v10014_v11 }
 0x1cf   : > { %v1232_v60 = vshll.u32 %v1231_v30, 23  ;;  %v10162_v4 = vsub.s32 %v2878_v6, %v2881_v33  ;;  %v1097_v15 = vsel %vm1083_vm1, %v1094_v47, %v1096_v38  ;;  %v13327_v12 = vsub.s32 4, %v9869_v59 }
 0x1d0   : > { %v2581_v28 = vor.u32 %v2580_v63, %v2579_v58  ;;  %v10171_v25 = vmul.u32.u64.low %v10117_v54, %v1097_v15  ;;  %v10172_v40 = vmul.u32.u64.high %v10117_v54, %v1097_v15, %v10171_v25  ;;  %v13328_v39 = vxor.u32 2147483648, %v10046_v13 }
 0x1d1   : > { %v929_v9 = vsel %vm844_vm14, %v13327_v12, %v9869_v59  ;;  %v1228_v11 = vshrl.u32 %v1210_v34, %v1226_v50  ;;  %v2884_v30 = vsub.s32 0, %v10162_v4  ;;  %v1089_v6 = vsel %vm1083_vm1, %v1086_v55, %v1088_v16  ;;  %v13333_v34 = vld [vmem:[#allocation20_spill] sm:$0xff] }
 0x1d2   : > { %v2695_v52 = vsel %vm2612_vm13, %v13328_v39, %v10046_v13  ;;  %v13329_v3 = vand.u32 2147483647, %v9364_v57  ;;  %v2586_v15 = vand.u32 2147483647, %v10119_v10  ;;  %v2592_v58 = vsub.s32 4, %v9971_v20  ;;  %v10199_v10 = vpop.f32.mrb[9].mxu0 }
 0x1d3   : > { %v1108_v63 = vadd.s32 1, %v10157_v45  ;;  %v2718_v47 = vshrl.u32 %v2717_v36, 23  ;;  %v13332_v13 = vxor.u32 2147483648, %v10096_v14  ;;  %vm1156_vm13 = vcmp.lt.s32.totalorder %v9396_v46, 0 }
 0x1d4   : > { %vm10183_vm4 = vcmp.le.f32.partialorder %v13329_v3, 0.7853982  ;;  %v1227_v27 = vshll.u32 %v10068_v35, %v10105_v41  ;;  %v1233_v50 = vor.u32 4788187, %v1232_v60  ;;  %v8258_v33 = vmin.u32 %v2884_v30, %v10162_v4 }
 0x1d5   : > { %v927_v26 = vsel %vm844_vm14, %v13332_v13, %v10096_v14  ;;  %v2588_v55 = vcvt.s32.f32 %v2581_v28  ;;  %v1105_v31 = vmul.u32 %v10117_v54, %v1089_v6  ;;  %vm1107_vm6 = vc.u32 %v10172_v40, %v10156_v21 }
 0x1d6   : > { %v8253_v36 = vadd.s32 4294967169, %v2718_v47  ;;  %v1229_v16 = vor.u32 %v1228_v11, %v1227_v27  ;;  %v2886_v38 = vclz %v8258_v33  ;;  %v1109_v14 = vsel %vm1107_vm6, %v1108_v63, %v10157_v45 }
 0x1d7   : > { %v1365_v12 = vand.u32 2139095040, %v13333_v34  ;;  %v10208_v35 = vsel %vm10146_vm2, 0, %v929_v9  ;;  %v2589_v41 = vmul.f32 %v2588_v55, %v2586_v15  ;;  %v1110_v60 = vadd.s32 %v1109_v14, %v1105_v31 }
 0x1d8   : > { %13334 = vst [vmem:[#allocation40_spill] sm:$0xff] %v10208_v35  ;;  %v2724_v25 = vadd.s32 1, %v8253_v36  ;;  %v2698_v54 = vsel %vm9997_vm8, %v9360_v51, %v2695_v52  ;;  %v10216_v28 = vsel %vm10146_vm2, %v13323_v29, %v927_v26  ;;  %v2593_v45 = vsel %vm2508_vm3, %v2592_v58, %v9971_v20 }
 0x1d9   : > { %v1234_v39 = vand.u32 2147483647, %v1233_v50  ;;  %v1240_v9 = vsub.s32 4, %v10053_v17  ;;  %v1111_v11 = vadd.s32 536870912, %v1110_v60  ;;  %v13157_v30 = vand.u32 2147483647, %v13321_v56 }
 0x1da   : > { %vm2725_vm7 = vcmp.gt.s32.totalorder %v2724_v25, 0  ;;  %v1236_v6 = vcvt.s32.f32 %v1229_v16  ;;  %v8259_v3 = vadd.s32 4294967294, %v2886_v38  ;;  %v1366_v52 = vshrl.u32 %v1365_v12, 23 }
 0x1db   : > { %v2726_v0 = vsel %vm2725_vm7, %v2724_v25, 0  ;;  %9004 = vcosq.f32 %v2698_v54  ;;  %v2590_v15 = vxor.u32 2147483648, %v2589_v41  ;;  %v10223_v5 = vshrl.u32 %v1111_v11, 30 }
 0x1dc   : > { %v2728_v63 = vand.u32 31, %v2726_v0  ;;  %9006 = vsinq.f32 %v2698_v54  ;;  %v10226_v47 = vadd.s32 3, %v10208_v35  ;;  %v10230_v20 = vsel %vm10183_vm4, 0, %v2593_v45 }
 0x1dd   : > { %13336 = vst [vmem:[#allocation42_spill] sm:$0xff] %v10230_v20  ;;  %v10232_v58 = vmul.f32 %v1236_v6, %v1234_v39  ;;  %9008 = vcosq.f32 %v10216_v28  ;;  %v10238_v13 = vsel %vm1156_vm13, %v1240_v9, %v10053_v17  ;;  %v1113_v26 = vshll.u32 %v10223_v5, 30 }
 0x1de   : > { %13335 = vst [vmem:[#allocation41_spill] sm:$0xff] %v10226_v47  ;;  %v2729_v27 = vsub.s32 32, %v2728_v63  ;;  %vm8260_vm8 = vcmp.lt.s32.totalorder %v8259_v3, 0  ;;  %v2721_v50 = vand.u32 8388607, %v13157_v30  ;;  %v2731_v33 = vshll.u32 %v13284_v32, %v2728_v63 }
 0x1df   : > { %v8201_v55 = vadd.s32 4294967169, %v1366_v52  ;;  %v2591_v31 = vsel %vm2508_vm3, %v2590_v15, %v2589_v41  ;;  %v10246_v36 = vsub.s32 %v1110_v60, %v1113_v26  ;;  %v2734_v17 = vshll.u32 %v13285_v18, %v2728_v63 }
 0x1e0   : > { %v2732_v16 = vshrl.u32 %v13285_v18, %v2729_v27  ;;  %v1238_v38 = vxor.u32 2147483648, %v10232_v58  ;;  %v2727_v14 = vshrl.u32 %v2726_v0, 5  ;;  %v2735_v12 = vshrl.u32 %v13286_v23, %v2729_v27 }
 0x1e1   : > { %v2737_v25 = vshll.u32 %v13286_v23, %v2728_v63  ;;  %v10253_v54 = vsel %vm8260_vm8, 0, %v8259_v3  ;;  %v1116_v45 = vsub.s32 0, %v10246_v36  ;;  %v2738_v39 = vshrl.u32 %v13287_v2, %v2729_v27 }
 0x1e2   : > { %v2722_v60 = vor.u32 8388608, %v2721_v50  ;;  %v2733_v9 = vor.u32 %v2732_v16, %v2731_v33  ;;  %v2740_v11 = vshll.u32 %v13287_v2, %v2728_v63  ;;  %v1372_v6 = vadd.s32 1, %v8201_v55 }
 0x1e3   : > { %v8190_v52 = vmin.u32 %v1116_v45, %v10246_v36  ;;  %v2736_v0 = vor.u32 %v2735_v12, %v2734_v17  ;;  %v2741_v15 = vshrl.u32 %v13288_v7, %v2729_v27  ;;  %v2743_v26 = vshll.u32 %v13288_v7, %v2728_v63 }
 0x1e4   : > { %v2894_v3 = vsub.s32 4294967266, %v10253_v54  ;;  %v2739_v30 = vor.u32 %v2738_v39, %v2737_v25  ;;  %v2744_v51 = vshrl.u32 %v13289_v44, %v2729_v27  ;;  %vm2746_vm9 = vcmp.lt.s32.totalorder %v2727_v14, 1 }
 0x1e5   : > { %v10264_v49 = vpop.eup %9004  ;;  %v1118_v50 = vclz %v8190_v52  ;;  %v2742_v33 = vor.u32 %v2741_v15, %v2740_v11  ;;  %vm2748_vm10 = vcmp.lt.s32.totalorder %v2727_v14, 3  ;;  %vm2749_vm11 = vcmp.lt.s32.totalorder %v2727_v14, 4 }
 0x1e6   : > { %13337 = vst [vmem:[#allocation43_spill] sm:$0xff] %v10264_v49  ;;  %v10266_v55 = vpop.eup %9006  ;;  %v2730_v16 = vshrl.u32 %v13284_v32, %v2729_v27  ;;  %v2745_v17 = vor.u32 %v2744_v51, %v2743_v26  ;;  %vm2747_vm12 = vcmp.lt.s32.totalorder %v2727_v14, 2  ;;  %v2762_v12 = vshll.u32 %v2722_v60, 8 }
 0x1e7   : > { %13338 = vst [vmem:[#allocation44_spill] sm:$0xff] %v10266_v55  ;;  %v10269_v63 = vpop.eup %9008  ;;  %v8191_v45 = vadd.s32 4294967294, %v1118_v50  ;;  %v2751_v25 = vsel %vm2749_vm11, %v2739_v30, 2102212464  ;;  %v2754_v39 = vsel %vm2746_vm9, %v2733_v9, %v2736_v0  ;;  %v2755_v41 = vsel %vm2749_vm11, %v2742_v33, 920167782 }
 0x1e8   : > { %13339 = vst [vmem:[#allocation45_spill] sm:$0xff] %v10269_v63  ;;  %v2890_v11 = vsub.s32 32, %v10253_v54  ;;  %v2895_v52 = vadd.s32 127, %v2894_v3  ;;  %v2756_v15 = vsel %vm2748_vm10, %v2739_v30, %v2755_v41  ;;  %vm1373_vm14 = vcmp.gt.s32.totalorder %v1372_v6, 0 }
 0x1e9   : > { %vm8192_vm15 = vcmp.lt.s32.totalorder %v8191_v45, 0  ;;  %v2757_v51 = vsel %vm2747_vm12, %v2754_v39, %v2756_v15  ;;  %v2758_v27 = vsel %vm2746_vm9, %v2736_v0, %v2739_v30  ;;  %v2759_v60 = vsel %vm2749_vm11, %v2745_v17, 1326507024 }
 0x1ea   : > { %v10279_v26 = vsel %vm8192_vm15, 0, %v8191_v45  ;;  %v2750_v50 = vsel %vm2746_vm9, %v2730_v16, %v2733_v9  ;;  %v2752_v49 = vsel %vm2748_vm10, %v2736_v0, %v2751_v25  ;;  %v2760_v55 = vsel %vm2748_vm10, %v2742_v33, %v2759_v60 }
 0x1eb   : > { %v10287_v41 = vsel %vm10183_vm4, %v9364_v57, %v2591_v31  ;;  %v2874_v3 = vadd.s32 %v10092_v42, %v10109_v24  ;;  %v13340_v30 = vand.u32 2147483647, %v13333_v34  ;;  %v1374_v17 = vsel %vm1373_vm14, %v1372_v6, 0 }
 0x1ec   : > { %v2761_v9 = vsel %vm2747_vm12, %v2758_v27, %v2760_v55  ;;  %v10295_v16 = vmul.u32.u64.low %v2762_v12, %v2757_v51  ;;  %v10296_v0 = vmul.u32.u64.high %v2762_v12, %v2757_v51, %v10295_v16  ;;  %v2896_v25 = vshll.u32 %v2895_v52, 23  ;;  %v13341_v51 = vld [vmem:[#allocation22_spill] sm:$0xff] }
 0x1ed   : > { %v1369_v39 = vand.u32 8388607, %v13340_v30  ;;  %v2892_v33 = vshrl.u32 %v2874_v3, %v2890_v11  ;;  %v1126_v59 = vsub.s32 4294967266, %v10279_v26  ;;  %v2753_v31 = vsel %vm2747_vm12, %v2750_v50, %v2752_v49 }
 0x1ee   : > { %v10304_v42 = vsel %vm1156_vm13, %v1238_v38, %v10232_v58  ;;  %v10306_v24 = vmul.u32.u64.low %v2762_v12, %v2761_v9  ;;  %v10307_v6 = vmul.u32.u64.high %v2762_v12, %v2761_v9, %v10306_v24  ;;  %v1376_v15 = vand.u32 31, %v1374_v17 }
 0x1ef   : > { %v2891_v55 = vshll.u32 %v10162_v4, %v10253_v54  ;;  %v1106_v11 = vadd.s32 %v10156_v21, %v10172_v40  ;;  %v1370_v52 = vor.u32 8388608, %v1369_v39  ;;  %v2769_v14 = vmul.u32 %v2762_v12, %v2753_v31  ;;  %v10321_v54 = vpop.f32.mrb[9].mxu1 }
 0x1f0   : > { %v2772_v49 = vadd.s32 1, %v10296_v0  ;;  %v1377_v60 = vsub.s32 32, %v1376_v15  ;;  %v3029_v58 = vand.u32 2139095040, %v13341_v51  ;;  %v2897_v50 = vor.u32 4788187, %v2896_v25  ;;  %13342 = vst [vmem:[#allocation46_spill] sm:$0xff] %v10321_v54 }
 0x1f1   : > { %v2893_v38 = vor.u32 %v2892_v33, %v2891_v55  ;;  %v1127_v3 = vadd.s32 127, %v1126_v59  ;;  %v1375_v30 = vshrl.u32 %v1374_v17, 5  ;;  %vm2771_vm0 = vc.u32 %v10307_v6, %v10295_v16 }
 0x1f2   : > { %v1379_v4 = vshll.u32 %v13284_v32, %v1376_v15  ;;  %v1380_v21 = vshrl.u32 %v13285_v18, %v1377_v60  ;;  %v1382_v40 = vshll.u32 %v13285_v18, %v1376_v15  ;;  %v2773_v12 = vsel %vm2771_vm0, %v2772_v49, %v10296_v0 }
 0x1f3   : > { %v1383_v39 = vshrl.u32 %v13286_v23, %v1377_v60  ;;  %v1385_v9 = vshll.u32 %v13286_v23, %v1376_v15  ;;  %v1386_v33 = vshrl.u32 %v13287_v2, %v1377_v60  ;;  %v2774_v17 = vadd.s32 %v2773_v12, %v2769_v14 }
 0x1f4   : > { %v1381_v25 = vor.u32 %v1380_v21, %v1379_v4  ;;  %v1388_v59 = vshll.u32 %v13287_v2, %v1376_v15  ;;  %v1389_v31 = vshrl.u32 %v13288_v7, %v1377_v60  ;;  %v1391_v27 = vshll.u32 %v13288_v7, %v1376_v15 }
 0x1f5   : > { %v1384_v24 = vor.u32 %v1383_v39, %v1382_v40  ;;  %v1387_v55 = vor.u32 %v1386_v33, %v1385_v9  ;;  %v1392_v45 = vshrl.u32 %v13289_v44, %v1377_v60  ;;  %v2898_v57 = vand.u32 2147483647, %v2897_v50 }
 0x1f6   : > { %v1122_v0 = vsub.s32 32, %v10279_v26  ;;  %v2775_v49 = vadd.s32 536870912, %v2774_v17  ;;  %v1390_v29 = vor.u32 %v1389_v31, %v1388_v59  ;;  %v13343_v35 = vand.u32 2147483647, %v9396_v46 }
 0x1f7   : > { %v1393_v4 = vor.u32 %v1392_v45, %v1391_v27  ;;  %vm1394_vm1 = vcmp.lt.s32.totalorder %v1375_v30, 1  ;;  %vm1397_vm2 = vcmp.lt.s32.totalorder %v1375_v30, 4  ;;  %v1410_v21 = vshll.u32 %v1370_v52, 8 }
 0x1f8   : > { %vm10334_vm5 = vcmp.le.f32.partialorder %v13343_v35, 0.7853982  ;;  %vm2820_vm3 = vcmp.lt.s32.totalorder %v13305_v8, 0  ;;  %v10339_v15 = vshrl.u32 %v2775_v49, 30  ;;  %vm1396_vm4 = vcmp.lt.s32.totalorder %v1375_v30, 3 }
 0x1f9   : > { %v1402_v50 = vsel %vm1394_vm1, %v1381_v25, %v1384_v24  ;;  %v1403_v40 = vsel %vm1397_vm2, %v1390_v29, 920167782  ;;  %v1128_v12 = vshll.u32 %v1127_v3, 23  ;;  %vm1395_vm13 = vcmp.lt.s32.totalorder %v1375_v30, 2 }
 0x1fa   : > { %v1399_v35 = vsel %vm1397_vm2, %v1387_v55, 2102212464  ;;  %v1404_v39 = vsel %vm1396_vm4, %v1387_v55, %v1403_v40  ;;  %v2777_v45 = vshll.u32 %v10339_v15, 30  ;;  %v1378_v27 = vshrl.u32 %v13284_v32, %v1377_v60 }
 0x1fb   : > { %v1405_v52 = vsel %vm1395_vm13, %v1402_v50, %v1404_v39  ;;  %v1406_v9 = vsel %vm1394_vm1, %v1384_v24, %v1387_v55  ;;  %v1124_v33 = vshrl.u32 %v1106_v11, %v1122_v0  ;;  %v1407_v59 = vsel %vm1397_vm2, %v1393_v4, 1326507024 }
 0x1fc   : > { %v10350_v31 = vmul.u32.u64.low %v1410_v21, %v1405_v52  ;;  %v10351_v49 = vmul.u32.u64.high %v1410_v21, %v1405_v52, %v10350_v31  ;;  %v10354_v3 = vsub.s32 %v2774_v17, %v2777_v45  ;;  %v1398_v63 = vsel %vm1394_vm1, %v1378_v27, %v1381_v25 }
 0x1fd   : > { %v1400_v40 = vsel %vm1396_vm4, %v1384_v24, %v1399_v35  ;;  %v1408_v47 = vsel %vm1396_vm4, %v1390_v29, %v1407_v59  ;;  %v2900_v60 = vcvt.s32.f32 %v2893_v38  ;;  %v1123_v50 = vshll.u32 %v10246_v36, %v10279_v26 }
 0x1fe   : > { %v1409_v11 = vsel %vm1395_vm13, %v1406_v9, %v1408_v47  ;;  %v3030_v55 = vshrl.u32 %v3029_v58, 23  ;;  %v13346_v0 = vand.u32 2147483647, %v13305_v8  ;;  %v1129_v17 = vor.u32 4788187, %v1128_v12 }
 0x1ff   : > { %v2780_v25 = vsub.s32 0, %v10354_v3  ;;  %v10369_v39 = vmul.u32.u64.low %v1410_v21, %v1409_v11  ;;  %v10370_v24 = vmul.u32.u64.high %v1410_v21, %v1409_v11, %v10369_v39  ;;  %v2901_v29 = vmul.f32 %v2900_v60, %v2898_v57 }
 0x200   : > { %vm10364_vm6 = vcmp.le.f32.partialorder %v13346_v0, 0.7853982  ;;  %v1401_v38 = vsel %vm1395_vm13, %v1398_v63, %v1400_v40  ;;  %v1420_v36 = vadd.s32 1, %v10351_v49  ;;  %v8265_v26 = vadd.s32 4294967169, %v3030_v55 }
 0x201   : > { %9010 = vsinq.f32 %v10216_v28  ;;  %v10378_v47 = vsel %vm10334_vm5, 0, %v10238_v13  ;;  %v1125_v58 = vor.u32 %v1124_v33, %v1123_v50  ;;  %v8254_v12 = vmin.u32 %v2780_v25, %v10354_v3  ;;  %v10405_v50 = vpop.f32.mrb[10].mxu0 }
 0x202   : > { %13349 = vst [vmem:[#allocation47_spill] sm:$0xff] %v10378_v47  ;;  %9012 = vcosq.f32 %v10287_v41  ;;  %v10386_v57 = vsel %vm10334_vm5, %v9396_v46, %v10304_v42  ;;  %v13350_v63 = vsub.s32 4, %v10141_v43  ;;  %v3036_v30 = vadd.s32 1, %v8265_v26  ;;  %13354 = vst [vmem:[#allocation50_spill] sm:$0xff] %v10405_v50 }
 0x203   : > { %v1130_v13 = vand.u32 2147483647, %v1129_v17  ;;  %v2782_v35 = vclz %v8254_v12  ;;  %v1417_v45 = vmul.u32 %v1410_v21, %v1401_v38  ;;  %vm1419_vm7 = vc.u32 %v10370_v24, %v10350_v31 }
 0x204   : > { %v2905_v28 = vsel %vm2820_vm3, %v13350_v63, %v10141_v43  ;;  %v2902_v27 = vxor.u32 2147483648, %v2901_v29  ;;  %v1421_v52 = vsel %vm1419_vm7, %v1420_v36, %v10351_v49  ;;  %v13351_v14 = vand.u32 2147483647, %v13341_v51 }
 0x205   : > { %vm3037_vm8 = vcmp.gt.s32.totalorder %v3036_v30, 0  ;;  %v1132_v9 = vcvt.s32.f32 %v1125_v58  ;;  %v8255_v33 = vadd.s32 4294967294, %v2782_v35  ;;  %v1422_v59 = vadd.s32 %v1421_v52, %v1417_v45 }
 0x206   : > { %v3033_v42 = vand.u32 8388607, %v13351_v14  ;;  %v3038_v40 = vsel %vm3037_vm8, %v3036_v30, 0  ;;  %9014 = vsinq.f32 %v10287_v41  ;;  %v10400_v43 = vadd.s32 3, %v10230_v20 }
 0x207   : > { %v10403_v21 = vadd.s32 3, %v10378_v47  ;;  %v3040_v60 = vand.u32 31, %v3038_v40  ;;  %v10407_v49 = vmul.f32 %v1132_v9, %v1130_v13  ;;  %vm8256_vm9 = vcmp.lt.s32.totalorder %v8255_v33, 0 }
 0x208   : > { %13352 = vst [vmem:[#allocation48_spill] sm:$0xff] %v10400_v43  ;;  %v1423_v11 = vadd.s32 536870912, %v1422_v59  ;;  %v1261_v55 = vand.u32 2139095040, %v9842_v53  ;;  %9016 = vcosq.f32 %v10386_v57  ;;  %v10413_v41 = vsel %vm10364_vm6, 0, %v2905_v28 }
 0x209   : > { %13353 = vst [vmem:[#allocation49_spill] sm:$0xff] %v10403_v21  ;;  %13355 = vst [vmem:[#allocation51_spill] sm:$0xff] %v10413_v41  ;;  %v3041_v17 = vsub.s32 32, %v3040_v60  ;;  %v10418_v25 = vsel %vm2820_vm3, %v2902_v27, %v2901_v29  ;;  %v10420_v39 = vsel %vm8256_vm9, 0, %v8255_v33  ;;  %v3034_v36 = vor.u32 8388608, %v3033_v42 }
 0x20a   : > { %v10422_v38 = vshrl.u32 %v1423_v11, 30  ;;  %v3043_v26 = vshll.u32 %v13284_v32, %v3040_v60  ;;  %v3046_v12 = vshll.u32 %v13285_v18, %v3040_v60  ;;  %v1134_v30 = vxor.u32 2147483648, %v10407_v49 }
 0x20b   : > { %v3044_v58 = vshrl.u32 %v13285_v18, %v3041_v17  ;;  %v3047_v63 = vshrl.u32 %v13286_v23, %v3041_v17  ;;  %v10428_v28 = vpop.eup %9010  ;;  %v2770_v29 = vadd.s32 %v10295_v16, %v10307_v6  ;;  %v1262_v35 = vshrl.u32 %v1261_v55, 23 }
 0x20c   : > { %v1425_v13 = vshll.u32 %v10422_v38, 30  ;;  %v10434_v45 = vpop.eup %9012  ;;  %v3039_v27 = vshrl.u32 %v3038_v40, 5  ;;  %v3049_v52 = vshll.u32 %v13286_v23, %v3040_v60  ;;  %v3050_v14 = vshrl.u32 %v13287_v2, %v3041_v17 }
 0x20d   : > { %13356 = vst [vmem:[#allocation52_spill] sm:$0xff] %v10434_v45  ;;  %v3052_v42 = vshll.u32 %v13287_v2, %v3040_v60  ;;  %v2790_v9 = vsub.s32 4294967266, %v10420_v39  ;;  %v10442_v11 = vshll.u32 %v3034_v36, 8  ;;  %v3045_v6 = vor.u32 %v3044_v58, %v3043_v26 }
 0x20e   : > { %v10440_v33 = vsub.s32 %v1422_v59, %v1425_v13  ;;  %v3048_v0 = vor.u32 %v3047_v63, %v3046_v12  ;;  %v3053_v55 = vshrl.u32 %v13288_v7, %v3041_v17  ;;  %v3055_v40 = vshll.u32 %v13288_v7, %v3040_v60 }
 0x20f   : > { %vm1052_vm10 = vcmp.lt.s32.totalorder %v13315_v22, 0  ;;  %v2786_v20 = vsub.s32 32, %v10420_v39  ;;  %v3042_v43 = vshrl.u32 %v13284_v32, %v3041_v17  ;;  %v8197_v59 = vadd.s32 4294967169, %v1262_v35 }
 0x210   : > { %v1428_v45 = vsub.s32 0, %v10440_v33  ;;  %v10451_v13 = vpop.eup %9014  ;;  %v3051_v36 = vor.u32 %v3050_v14, %v3049_v52  ;;  %v3054_v47 = vor.u32 %v3053_v55, %v3052_v42  ;;  %v3056_v26 = vshrl.u32 %v13289_v44, %v3041_v17 }
 0x211   : > { %13357 = vst [vmem:[#allocation53_spill] sm:$0xff] %v10451_v13  ;;  %vm3058_vm11 = vcmp.lt.s32.totalorder %v3039_v27, 1  ;;  %v2791_v58 = vadd.s32 127, %v2790_v9  ;;  %vm3060_vm12 = vcmp.lt.s32.totalorder %v3039_v27, 3  ;;  %vm3061_vm14 = vcmp.lt.s32.totalorder %v3039_v27, 4 }
 0x212   : > { %v8202_v12 = vmin.u32 %v1428_v45, %v10440_v33  ;;  %v10455_v60 = vpop.eup %9016  ;;  %v3057_v63 = vor.u32 %v3056_v26, %v3055_v40  ;;  %vm3059_vm15 = vcmp.lt.s32.totalorder %v3039_v27, 2  ;;  %v3063_v16 = vsel %vm3061_vm14, %v3051_v36, 2102212464 }
 0x213   : > { %13358 = vst [vmem:[#allocation54_spill] sm:$0xff] %v10455_v60  ;;  %v3066_v46 = vsel %vm3058_vm11, %v3045_v6, %v3048_v0  ;;  %v3062_v13 = vsel %vm3058_vm11, %v3042_v43, %v3045_v6  ;;  %v3064_v52 = vsel %vm3060_vm12, %v3048_v0, %v3063_v16  ;;  %v3067_v14 = vsel %vm3061_vm14, %v3054_v47, 920167782 }
 0x214   : > { %v1430_v35 = vclz %v8202_v12  ;;  %v13359_v17 = vand.u32 2147483647, %v13315_v22  ;;  %v3068_v45 = vsel %vm3060_vm12, %v3051_v36, %v3067_v14  ;;  %v3070_v9 = vsel %vm3058_vm11, %v3048_v0, %v3051_v36 }
 0x215   : > { %v3071_v55 = vsel %vm3061_vm14, %v3057_v63, 1326507024  ;;  %v1268_v40 = vadd.s32 1, %v8197_v59  ;;  %v2788_v26 = vshrl.u32 %v2770_v29, %v2786_v20  ;;  %v3069_v12 = vsel %vm3059_vm15, %v3066_v46, %v3068_v45 }
 0x216   : > { %vm10462_vm0 = vcmp.le.f32.partialorder %v13359_v17, 0.7853982  ;;  %v8203_v60 = vadd.s32 4294967294, %v1430_v35  ;;  %v3072_v43 = vsel %vm3060_vm12, %v3054_v47, %v3071_v55  ;;  %v3065_v16 = vsel %vm3059_vm15, %v3062_v13, %v3064_v52  ;;  %v10498_v13 = vpop.f32.mrb[10].mxu1 }
 0x217   : > { %v3073_v6 = vsel %vm3059_vm15, %v3070_v9, %v3072_v43  ;;  %v10473_v17 = vmul.u32.u64.low %v10442_v11, %v3069_v12  ;;  %v10474_v21 = vmul.u32.u64.high %v10442_v11, %v3069_v12, %v10473_v17  ;;  %v2792_v14 = vshll.u32 %v2791_v58, 23  ;;  %13363 = vst [vmem:[#allocation55_spill] sm:$0xff] %v10498_v13 }
 0x218   : > { %v10478_v0 = vmul.u32.u64.low %v10442_v11, %v3073_v6  ;;  %v10479_v36 = vmul.u32.u64.high %v10442_v11, %v3073_v6, %v10478_v0  ;;  %v2925_v20 = vand.u32 2139095040, %v9949_v62  ;;  %9018 = vsinq.f32 %v10386_v57 }
 0x219   : > { %v13362_v46 = vsub.s32 4, %v10223_v5  ;;  %v2787_v29 = vshll.u32 %v10354_v3, %v10420_v39  ;;  %vm1269_vm5 = vcmp.gt.s32.totalorder %v1268_v40, 0  ;;  %v2906_v27 = vsel %vm10364_vm6, %v13305_v8, %v10418_v25 }
 0x21a   : > { %v1135_v59 = vsel %vm1052_vm10, %v1134_v30, %v10407_v49  ;;  %vm8204_vm1 = vcmp.lt.s32.totalorder %v8203_v60, 0  ;;  %v3081_v57 = vmul.u32 %v10442_v11, %v3065_v16  ;;  %v13364_v3 = vand.u32 2147483647, %v9842_v53 }
 0x21b   : > { %v1137_v47 = vsel %vm1052_vm10, %v13362_v46, %v10223_v5  ;;  %v2789_v58 = vor.u32 %v2788_v26, %v2787_v29  ;;  %v3084_v5 = vadd.s32 1, %v10474_v21  ;;  %v1270_v63 = vsel %vm1269_vm5, %v1268_v40, 0 }
 0x21c   : > { %v1265_v39 = vand.u32 8388607, %v13364_v3  ;;  %v10504_v35 = vadd.s32 3, %v10413_v41  ;;  %v2793_v4 = vor.u32 4788187, %v2792_v14  ;;  %vm3083_vm2 = vc.u32 %v10479_v36, %v10473_v17 }
 0x21d   : > { %v2926_v49 = vshrl.u32 %v2925_v20, 23  ;;  %9020 = vcosq.f32 %v2906_v27  ;;  %v10508_v25 = vsel %vm8204_vm1, 0, %v8203_v60  ;;  %v3085_v30 = vsel %vm3083_vm2, %v3084_v5, %v10474_v21 }
 0x21e   : > { %13365 = vst [vmem:[#allocation56_spill] sm:$0xff] %v10504_v35  ;;  %v1272_v11 = vand.u32 31, %v1270_v63  ;;  %9022 = vsinq.f32 %v2906_v27  ;;  %v10514_v52 = vsel %vm10462_vm0, %v13315_v22, %v1135_v59  ;;  %v10518_v45 = vsel %vm10462_vm0, 0, %v1137_v47 }
 0x21f   : > { %13366 = vst [vmem:[#allocation57_spill] sm:$0xff] %v10518_v45  ;;  %v3086_v9 = vadd.s32 %v3085_v30, %v3081_v57  ;;  %v2796_v55 = vcvt.s32.f32 %v2789_v58  ;;  %v1266_v26 = vor.u32 8388608, %v1265_v39  ;;  %v2794_v12 = vand.u32 2147483647, %v2793_v4 }
 0x220   : > { %v1273_v60 = vsub.s32 32, %v1272_v11  ;;  %v1438_v21 = vsub.s32 4294967266, %v10508_v25  ;;  %v8261_v16 = vadd.s32 4294967169, %v2926_v49  ;;  %v1275_v6 = vshll.u32 %v13284_v32, %v1272_v11 }
 0x221   : > { %v3087_v43 = vadd.s32 536870912, %v3086_v9  ;;  %v1278_v46 = vshll.u32 %v13285_v18, %v1272_v11  ;;  %v1281_v47 = vshll.u32 %v13286_v23, %v1272_v11  ;;  %v1271_v59 = vshrl.u32 %v1270_v63, 5 }
 0x222   : > { %v1276_v14 = vshrl.u32 %v13285_v18, %v1273_v60  ;;  %v1279_v0 = vshrl.u32 %v13286_v23, %v1273_v60  ;;  %v1282_v42 = vshrl.u32 %v13287_v2, %v1273_v60  ;;  %v1285_v29 = vshrl.u32 %v13288_v7, %v1273_v60  ;;  %v10531_v27 = vpop.eup %9018 }
 0x223   : > { %v10526_v20 = vshrl.u32 %v3087_v43, 30  ;;  %13367 = vst [vmem:[#allocation58_spill] sm:$0xff] %v10531_v27  ;;  %v1284_v57 = vshll.u32 %v13287_v2, %v1272_v11  ;;  %v1287_v58 = vshll.u32 %v13288_v7, %v1272_v11  ;;  %v1288_v5 = vshrl.u32 %v13289_v44, %v1273_v60 }
 0x224   : > { %v1277_v39 = vor.u32 %v1276_v14, %v1275_v6  ;;  %v1280_v4 = vor.u32 %v1279_v0, %v1278_v46  ;;  %v1283_v49 = vor.u32 %v1282_v42, %v1281_v47  ;;  %9024 = vcosq.f32 %v10514_v52 }
 0x225   : > { %v3089_v3 = vshll.u32 %v10526_v20, 30  ;;  %v1418_v30 = vadd.s32 %v10350_v31, %v10370_v24  ;;  %v1286_v43 = vor.u32 %v1285_v29, %v1284_v57  ;;  %v2797_v63 = vmul.f32 %v2796_v55, %v2794_v12 }
 0x226   : > { %v1289_v35 = vor.u32 %v1288_v5, %v1287_v58  ;;  %v1306_v11 = vshll.u32 %v1266_v26, 8  ;;  %vm2716_vm3 = vcmp.lt.s32.totalorder %v13321_v56, 0  ;;  %v1434_v6 = vsub.s32 32, %v10508_v25 }
 0x227   : > { %v10541_v41 = vsub.s32 %v3086_v9, %v3089_v3  ;;  %v10543_v8 = vpop.eup %9020  ;;  %v1439_v14 = vadd.s32 127, %v1438_v21  ;;  %vm1290_vm4 = vcmp.lt.s32.totalorder %v1271_v59, 1  ;;  %vm1293_vm13 = vcmp.lt.s32.totalorder %v1271_v59, 4 }
 0x228   : > { %13368 = vst [vmem:[#allocation59_spill] sm:$0xff] %v10543_v8  ;;  %v10547_v0 = vpop.eup %9022  ;;  %v1295_v24 = vsel %vm1293_vm13, %v1283_v49, 2102212464  ;;  %v1298_v42 = vsel %vm1290_vm4, %v1277_v39, %v1280_v4  ;;  %v2932_v55 = vadd.s32 1, %v8261_v16  ;;  %v1274_v9 = vshrl.u32 %v13284_v32, %v1273_v60 }
 0x229   : > { %13369 = vst [vmem:[#allocation60_spill] sm:$0xff] %v10547_v0  ;;  %v3092_v31 = vsub.s32 0, %v10541_v41  ;;  %vm1292_vm6 = vcmp.lt.s32.totalorder %v1271_v59, 3  ;;  %v1299_v26 = vsel %vm1293_vm13, %v1286_v43, 920167782  ;;  %v1302_v12 = vsel %vm1290_vm4, %v1280_v4, %v1283_v49 }
 0x22a   : > { %vm1291_vm7 = vcmp.lt.s32.totalorder %v1271_v59, 2  ;;  %v1300_v47 = vsel %vm1292_vm6, %v1283_v49, %v1299_v26  ;;  %v1303_v29 = vsel %vm1293_vm13, %v1289_v35, 1326507024  ;;  %v1294_v21 = vsel %vm1290_vm4, %v1274_v9, %v1277_v39 }
 0x22b   : > { %v8266_v46 = vmin.u32 %v3092_v31, %v10541_v41  ;;  %v1296_v57 = vsel %vm1292_vm6, %v1280_v4, %v1295_v24  ;;  %v1301_v58 = vsel %vm1291_vm7, %v1298_v42, %v1300_v47  ;;  %v1304_v5 = vsel %vm1292_vm6, %v1286_v43, %v1303_v29 }
 0x22c   : > { %v1305_v40 = vsel %vm1291_vm7, %v1302_v12, %v1304_v5  ;;  %v10552_v8 = vmul.u32.u64.low %v1306_v11, %v1301_v58  ;;  %v10553_v0 = vmul.u32.u64.high %v1306_v11, %v1301_v58, %v10552_v8  ;;  %v1436_v16 = vshrl.u32 %v1418_v30, %v1434_v6 }
 0x22d   : > { %v3094_v3 = vclz %v8266_v46  ;;  %v10556_v60 = vmul.u32.u64.low %v1306_v11, %v1305_v40  ;;  %v10557_v27 = vmul.u32.u64.high %v1306_v11, %v1305_v40, %v10556_v60  ;;  %vm2933_vm8 = vcmp.gt.s32.totalorder %v2932_v55, 0  ;;  %v10581_v46 = vpop.f32.mrb[11].mxu0 }
 0x22e   : > { %v1440_v22 = vshll.u32 %v1439_v14, 23  ;;  %v1297_v59 = vsel %vm1291_vm7, %v1294_v21, %v1296_v57  ;;  %v2934_v49 = vsel %vm2933_vm8, %v2932_v55, 0  ;;  %v10559_v35 = vpop.eup %9024  ;;  %9026 = vsinq.f32 %v10514_v52 }
 0x22f   : > { %v8267_v31 = vadd.s32 4294967294, %v3094_v3  ;;  %13370 = vst [vmem:[#allocation61_spill] sm:$0xff] %v10559_v35  ;;  %v10563_v39 = vadd.s32 3, %v10518_v45  ;;  %v2798_v4 = vxor.u32 2147483648, %v2797_v63  ;;  %v2936_v43 = vand.u32 31, %v2934_v49 }
 0x230   : > { %v13371_v30 = vsub.s32 4, %v10339_v15  ;;  %v1435_v6 = vshll.u32 %v10440_v33, %v10508_v25  ;;  %v1316_v14 = vadd.s32 1, %v10553_v0  ;;  %v1313_v24 = vmul.u32 %v1306_v11, %v1297_v59 }
 0x231   : > { %vm8268_vm9 = vcmp.lt.s32.totalorder %v8267_v31, 0  ;;  %vm1315_vm10 = vc.u32 %v10557_v27, %v10552_v8  ;;  %v2937_v42 = vsub.s32 32, %v2936_v43  ;;  %v1441_v9 = vor.u32 4788187, %v1440_v22 }
 0x232   : > { %v10570_v40 = vsel %vm2716_vm3, %v13371_v30, %v10339_v15  ;;  %v1437_v55 = vor.u32 %v1436_v16, %v1435_v6  ;;  %v1317_v26 = vsel %vm1315_vm10, %v1316_v14, %v10553_v0  ;;  %v13372_v15 = vand.u32 2147483647, %v9949_v62 }
 0x233   : > { %v10585_v33 = vsel %vm2716_vm3, %v2798_v4, %v2797_v63  ;;  %v10589_v25 = vadd.s32 %v10473_v17, %v10479_v36  ;;  %v10591_v11 = vsel %vm8268_vm9, 0, %v8267_v31  ;;  %v1318_v47 = vadd.s32 %v1317_v26, %v1313_v24 }
 0x234   : > { %v2929_v12 = vand.u32 8388607, %v13372_v15  ;;  %v2939_v22 = vshll.u32 %v13284_v32, %v2936_v43  ;;  %v2940_v0 = vshrl.u32 %v13285_v18, %v2937_v42  ;;  %v2942_v29 = vshll.u32 %v13285_v18, %v2936_v43 }
 0x235   : > { %v2943_v21 = vshrl.u32 %v13286_v23, %v2937_v42  ;;  %v1319_v57 = vadd.s32 536870912, %v1318_v47  ;;  %v2935_v58 = vshrl.u32 %v2934_v49, 5  ;;  %v2945_v63 = vshll.u32 %v13286_v23, %v2936_v43 }
 0x236   : > { %v2946_v5 = vshrl.u32 %v13287_v2, %v2937_v42  ;;  %v1442_v3 = vand.u32 2147483647, %v1441_v9  ;;  %v1444_v17 = vcvt.s32.f32 %v1437_v55  ;;  %v2930_v36 = vor.u32 8388608, %v2929_v12 }
 0x237   : > { %v2948_v16 = vshll.u32 %v13287_v2, %v2936_v43  ;;  %v3102_v60 = vsub.s32 4294967266, %v10591_v11  ;;  %v10601_v31 = vshrl.u32 %v1319_v57, 30  ;;  %v2949_v59 = vshrl.u32 %v13288_v7, %v2937_v42 }
 0x238   : > { %v2951_v4 = vshll.u32 %v13288_v7, %v2936_v43  ;;  %v13373_v30 = vand.u32 2147483647, %v13321_v56  ;;  %v2938_v6 = vshrl.u32 %v13284_v32, %v2937_v42  ;;  %v2941_v14 = vor.u32 %v2940_v0, %v2939_v22  ;;  %v10613_v9 = vpop.eup %9026 }
 0x239   : > { %v2944_v24 = vor.u32 %v2943_v21, %v2942_v29  ;;  %v2952_v55 = vshrl.u32 %v13289_v44, %v2937_v42  ;;  %vm1364_vm12 = vcmp.lt.s32.totalorder %v13333_v34, 0  ;;  %v1321_v26 = vshll.u32 %v10601_v31, 30 }
 0x23a   : > { %vm10607_vm11 = vcmp.le.f32.partialorder %v13373_v30, 0.7853982  ;;  %v2947_v15 = vor.u32 %v2946_v5, %v2945_v63  ;;  %v2950_v43 = vor.u32 %v2949_v59, %v2948_v16  ;;  %vm2954_vm14 = vcmp.lt.s32.totalorder %v2935_v58, 1 }
 0x23b   : > { %v1445_v12 = vmul.f32 %v1444_v17, %v1442_v3  ;;  %v2953_v57 = vor.u32 %v2952_v55, %v2951_v4  ;;  %vm2957_vm15 = vcmp.lt.s32.totalorder %v2935_v58, 4  ;;  %v3103_v52 = vadd.s32 127, %v3102_v60 }
 0x23c   : > { %v10618_v45 = vsub.s32 %v1318_v47, %v1321_v26  ;;  %vm2956_vm0 = vcmp.lt.s32.totalorder %v2935_v58, 3  ;;  %v2959_v42 = vsel %vm2957_vm15, %v2947_v15, 2102212464  ;;  %vm2955_vm5 = vcmp.lt.s32.totalorder %v2935_v58, 2 }
 0x23d   : > { %v2962_v22 = vsel %vm2954_vm14, %v2941_v14, %v2944_v24  ;;  %v2970_v0 = vshll.u32 %v2930_v36, 8  ;;  %v1573_v29 = vand.u32 2139095040, %v10034_v1  ;;  %v2958_v63 = vsel %vm2954_vm14, %v2938_v6, %v2941_v14 }
 0x23e   : > { %v1324_v21 = vsub.s32 0, %v10618_v45  ;;  %v2960_v5 = vsel %vm2956_vm0, %v2944_v24, %v2959_v42  ;;  %v2963_v3 = vsel %vm2957_vm15, %v2950_v43, 920167782  ;;  %v13376_v47 = vand.u32 2147483647, %v13333_v34 }
 0x23f   : > { %v3098_v16 = vsub.s32 32, %v10591_v11  ;;  %v2964_v36 = vsel %vm2956_vm0, %v2947_v15, %v2963_v3  ;;  %v2966_v60 = vsel %vm2954_vm14, %v2944_v24, %v2947_v15  ;;  %v2967_v59 = vsel %vm2957_vm15, %v2953_v57, 1326507024 }
 0x240   : > { %vm10629_vm1 = vcmp.le.f32.partialorder %v13376_v47, 0.7853982  ;;  %v3104_v4 = vshll.u32 %v3103_v52, 23  ;;  %v8198_v6 = vmin.u32 %v1324_v21, %v10618_v45  ;;  %v2965_v14 = vsel %vm2955_vm5, %v2962_v22, %v2964_v36 }
 0x241   : > { %v2968_v55 = vsel %vm2956_vm0, %v2950_v43, %v2967_v59  ;;  %v2961_v26 = vsel %vm2955_vm5, %v2958_v63, %v2960_v5  ;;  %v10642_v47 = vmul.u32.u64.low %v2970_v0, %v2965_v14  ;;  %v10643_v30 = vmul.u32.u64.high %v2970_v0, %v2965_v14, %v10642_v47 }
 0x242   : > { %v2969_v42 = vsel %vm2955_vm5, %v2966_v60, %v2968_v55  ;;  %v10649_v24 = vsel %vm10607_vm11, 0, %v10570_v40  ;;  %vm3028_vm2 = vcmp.lt.s32.totalorder %v13341_v51, 0  ;;  %v1326_v52 = vclz %v8198_v6 }
 0x243   : > { %13379 = vst [vmem:[#allocation62_spill] sm:$0xff] %v10649_v24  ;;  %v10652_v15 = vmul.u32.u64.low %v2970_v0, %v2969_v42  ;;  %v10653_v57 = vmul.u32.u64.high %v2970_v0, %v2969_v42, %v10652_v15  ;;  %v2802_v58 = vsel %vm10607_vm11, %v13321_v56, %v10585_v33  ;;  %v13380_v43 = vsub.s32 4, %v10422_v38 }
 0x244   : > { %v3100_v40 = vshrl.u32 %v10589_v25, %v3098_v16  ;;  %v1574_v21 = vshrl.u32 %v1573_v29, 23  ;;  %v1446_v63 = vxor.u32 2147483648, %v1445_v12  ;;  %v8199_v5 = vadd.s32 4294967294, %v1326_v52  ;;  %v10676_v25 = vpop.f32.mrb[11].mxu1 }
 0x245   : > { %v1449_v22 = vsel %vm1364_vm12, %v13380_v43, %v10422_v38  ;;  %v2977_v3 = vmul.u32 %v2970_v0, %v2961_v26  ;;  %v13381_v36 = vand.u32 2147483647, %v10034_v1  ;;  %v3099_v59 = vshll.u32 %v10541_v41, %v10591_v11  ;;  %13383 = vst [vmem:[#allocation64_spill] sm:$0xff] %v10676_v25 }
 0x246   : > { %v3105_v49 = vor.u32 4788187, %v3104_v4  ;;  %v2980_v33 = vadd.s32 1, %v10643_v30  ;;  %v8209_v6 = vadd.s32 4294967169, %v1574_v21  ;;  %v10671_v14 = vadd.s32 3, %v10649_v24 }
 0x247   : > { %v1577_v60 = vand.u32 8388607, %v13381_v36  ;;  %vm8200_vm3 = vcmp.lt.s32.totalorder %v8199_v5, 0  ;;  %vm2979_vm4 = vc.u32 %v10653_v57, %v10642_v47  ;;  %v3237_v38 = vand.u32 2139095040, %v10123_v19 }
 0x248   : > { %13382 = vst [vmem:[#allocation63_spill] sm:$0xff] %v10671_v14  ;;  %v3101_v0 = vor.u32 %v3100_v40, %v3099_v59  ;;  %v3112_v29 = vsub.s32 4, %v10526_v20  ;;  %v2981_v41 = vsel %vm2979_vm4, %v2980_v33, %v10643_v30  ;;  %v1580_v11 = vadd.s32 1, %v8209_v6 }
 0x249   : > { %9028 = vcosq.f32 %v2802_v58  ;;  %v1447_v16 = vsel %vm1364_vm12, %v1446_v63, %v1445_v12  ;;  %v10684_v4 = vsel %vm10629_vm1, 0, %v1449_v22  ;;  %v2982_v55 = vadd.s32 %v2981_v41, %v2977_v3 }
 0x24a   : > { %13384 = vst [vmem:[#allocation65_spill] sm:$0xff] %v10684_v4  ;;  %v3106_v26 = vand.u32 2147483647, %v3105_v49  ;;  %v1329_v42 = vsel %vm8200_vm3, 0, %v8199_v5  ;;  %v1578_v52 = vor.u32 8388608, %v1577_v60  ;;  %vm1581_vm13 = vcmp.gt.s32.totalorder %v1580_v11, 0 }
 0x24b   : > { %9030 = vsinq.f32 %v2802_v58  ;;  %v2983_v15 = vadd.s32 536870912, %v2982_v55  ;;  %v1582_v43 = vsel %vm1581_vm13, %v1580_v11, 0  ;;  %v3238_v40 = vshrl.u32 %v3237_v38, 23 }
 0x24c   : > { %v10689_v30 = vsel %vm10629_vm1, %v13333_v34, %v1447_v16  ;;  %v3108_v21 = vcvt.s32.f32 %v3101_v0  ;;  %v10694_v12 = vsel %vm3028_vm2, %v3112_v29, %v10526_v20  ;;  %v1584_v22 = vand.u32 31, %v1582_v43 }
 0x24d   : > { %v1314_v63 = vadd.s32 %v10552_v8, %v10557_v27  ;;  %v1334_v5 = vsub.s32 4294967266, %v1329_v42  ;;  %v10699_v3 = vshrl.u32 %v2983_v15, 30  ;;  %v10703_v60 = vshll.u32 %v1578_v52, 8 }
 0x24e   : > { %v10701_v36 = vmul.f32 %v3108_v21, %v3106_v26  ;;  %v1585_v17 = vsub.s32 32, %v1584_v22  ;;  %v13184_v59 = vand.u32 2147483647, %v10123_v19  ;;  %v1330_v49 = vsub.s32 32, %v1329_v42 }
 0x24f   : > { %v2985_v20 = vshll.u32 %v10699_v3, 30  ;;  %v1587_v33 = vshll.u32 %v13284_v32, %v1584_v22  ;;  %v8273_v6 = vadd.s32 4294967169, %v3238_v40  ;;  %v1590_v27 = vshll.u32 %v13285_v18, %v1584_v22 }
 0x250   : > { %v1588_v8 = vshrl.u32 %v13285_v18, %v1585_v17  ;;  %v1591_v38 = vshrl.u32 %v13286_v23, %v1585_v17  ;;  %v1594_v0 = vshrl.u32 %v13287_v2, %v1585_v17  ;;  %v1335_v29 = vadd.s32 127, %v1334_v5 }
 0x251   : > { %v10712_v41 = vsub.s32 %v2982_v55, %v2985_v20  ;;  %v1583_v11 = vshrl.u32 %v1582_v43, 5  ;;  %v1593_v16 = vshll.u32 %v13286_v23, %v1584_v22  ;;  %v1331_v26 = vshll.u32 %v10618_v45, %v1329_v42 }
 0x252   : > { %v1589_v52 = vor.u32 %v1588_v8, %v1587_v33  ;;  %v1592_v15 = vor.u32 %v1591_v38, %v1590_v27  ;;  %v3241_v40 = vand.u32 8388607, %v13184_v59  ;;  %v1596_v14 = vshll.u32 %v13287_v2, %v1584_v22 }
 0x253   : > { %v10718_v21 = vpop.eup %9028  ;;  %v2988_v58 = vsub.s32 0, %v10712_v41  ;;  %v1595_v24 = vor.u32 %v1594_v0, %v1593_v16  ;;  %v1597_v55 = vshrl.u32 %v13288_v7, %v1585_v17  ;;  %v1332_v5 = vshrl.u32 %v1314_v63, %v1330_v49 }
 0x254   : > { %13385 = vst [vmem:[#allocation66_spill] sm:$0xff] %v10718_v21  ;;  %v1599_v43 = vshll.u32 %v13288_v7, %v1584_v22  ;;  %v1600_v20 = vshrl.u32 %v13289_v44, %v1585_v17  ;;  %v3244_v45 = vadd.s32 1, %v8273_v6  ;;  %v1336_v33 = vshll.u32 %v1335_v29, 23 }
 0x255   : > { %v10725_v42 = vpop.eup %9030  ;;  %v8262_v8 = vmin.u32 %v2988_v58, %v10712_v41  ;;  %v1598_v27 = vor.u32 %v1597_v55, %v1596_v14  ;;  %vm1602_vm6 = vcmp.lt.s32.totalorder %v1583_v11, 1  ;;  %v1586_v38 = vshrl.u32 %v13284_v32, %v1585_v17 }
 0x256   : > { %13386 = vst [vmem:[#allocation67_spill] sm:$0xff] %v10725_v42  ;;  %v1601_v0 = vor.u32 %v1600_v20, %v1599_v43  ;;  %vm1605_vm7 = vcmp.lt.s32.totalorder %v1583_v11, 4  ;;  %v1610_v16 = vsel %vm1602_vm6, %v1589_v52, %v1592_v15  ;;  %vm1604_vm8 = vcmp.lt.s32.totalorder %v1583_v11, 3 }
 0x257   : > { %v2990_v59 = vclz %v8262_v8  ;;  %v1607_v63 = vsel %vm1605_vm7, %v1595_v24, 2102212464  ;;  %v1611_v22 = vsel %vm1605_vm7, %v1598_v27, 920167782  ;;  %v10730_v49 = vor.u32 %v1332_v5, %v1331_v26 }
 0x258   : > { %vm1603_vm9 = vcmp.lt.s32.totalorder %v1583_v11, 2  ;;  %v1612_v6 = vsel %vm1604_vm8, %v1595_v24, %v1611_v22  ;;  %v3242_v29 = vor.u32 8388608, %v3241_v40  ;;  %v1606_v14 = vsel %vm1602_vm6, %v1586_v38, %v1589_v52 }
 0x259   : > { %v8263_v21 = vadd.s32 4294967294, %v2990_v59  ;;  %v1613_v58 = vsel %vm1603_vm9, %v1610_v16, %v1612_v6  ;;  %v1614_v17 = vsel %vm1602_vm6, %v1592_v15, %v1595_v24  ;;  %v1608_v55 = vsel %vm1604_vm8, %v1592_v15, %v1607_v63 }
 0x25a   : > { %v1615_v43 = vsel %vm1605_vm7, %v1601_v0, 1326507024  ;;  %v10738_v20 = vmul.u32.u64.low %v10703_v60, %v1613_v58  ;;  %v10739_v8 = vmul.u32.u64.high %v10703_v60, %v1613_v58, %v10738_v20  ;;  %v10742_v26 = vor.u32 4788187, %v1336_v33 }
 0x25b   : > { %vm8264_vm10 = vcmp.lt.s32.totalorder %v8263_v21, 0  ;;  %v1616_v40 = vsel %vm1604_vm8, %v1598_v27, %v1615_v43  ;;  %vm3245_vm11 = vcmp.gt.s32.totalorder %v3244_v45, 0  ;;  %v2978_v59 = vadd.s32 %v10642_v47, %v10653_v57 }
 0x25c   : > { %v2993_v52 = vsel %vm8264_vm10, 0, %v8263_v21  ;;  %v1617_v24 = vsel %vm1603_vm9, %v1614_v17, %v1616_v40  ;;  %v3246_v5 = vsel %vm3245_vm11, %v3244_v45, 0  ;;  %v1609_v0 = vsel %vm1603_vm9, %v1606_v14, %v1608_v55 }
 0x25d   : > { %v2994_v15 = vsub.s32 32, %v2993_v52  ;;  %v2998_v38 = vsub.s32 4294967266, %v2993_v52  ;;  %v10749_v16 = vshrl.u32 %v3246_v5, 5  ;;  %v3248_v22 = vand.u32 31, %v3246_v5 }
 0x25e   : > { %v10752_v33 = vmul.u32.u64.low %v10703_v60, %v1617_v24  ;;  %v10753_v63 = vmul.u32.u64.high %v10703_v60, %v1617_v24, %v10752_v33  ;;  %v10755_v27 = vshll.u32 %v3242_v29, 8  ;;  %v1338_v6 = vand.u32 2147483647, %v10742_v26 }
 0x25f   : > { %v1340_v47 = vcvt.s32.f32 %v10730_v49  ;;  %v2999_v57 = vadd.s32 127, %v2998_v38  ;;  %v1628_v21 = vadd.s32 1, %v10739_v8  ;;  %v2995_v45 = vshll.u32 %v10712_v41, %v2993_v52  ;;  %v10782_v33 = vpop.f32.mrb[12].mxu0 }
 0x260   : > { %v1625_v11 = vmul.u32 %v10703_v60, %v1609_v0  ;;  %v3249_v14 = vsub.s32 32, %v3248_v22  ;;  %v3251_v58 = vshll.u32 %v13284_v32, %v3248_v22  ;;  %v2996_v17 = vshrl.u32 %v2978_v59, %v2994_v15  ;;  %13390 = vst [vmem:[#allocation68_spill] sm:$0xff] %v10782_v33 }
 0x261   : > { %v3000_v55 = vshll.u32 %v2999_v57, 23  ;;  %v3254_v43 = vshll.u32 %v13285_v18, %v3248_v22  ;;  %vm3266_vm12 = vcmp.lt.s32.totalorder %v10749_v16, 1  ;;  %vm1627_vm14 = vc.u32 %v10753_v63, %v10738_v20 }
 0x262   : > { %v3252_v49 = vshrl.u32 %v13285_v18, %v3249_v14  ;;  %v3257_v29 = vshll.u32 %v13286_v23, %v3248_v22  ;;  %v3260_v41 = vshll.u32 %v13287_v2, %v3248_v22  ;;  %v1629_v60 = vsel %vm1627_vm14, %v1628_v21, %v10739_v8 }
 0x263   : > { %v3250_v26 = vshrl.u32 %v13284_v32, %v3249_v14  ;;  %v3255_v40 = vshrl.u32 %v13286_v23, %v3249_v14  ;;  %v3263_v59 = vshll.u32 %v13288_v7, %v3248_v22  ;;  %v13387_v52 = vand.u32 2147483647, %v13341_v51 }
 0x264   : > { %v1630_v5 = vadd.s32 %v1629_v60, %v1625_v11  ;;  %v3253_v15 = vor.u32 %v3252_v49, %v3251_v58  ;;  %v3258_v38 = vshrl.u32 %v13287_v2, %v3249_v14  ;;  %v3261_v0 = vshrl.u32 %v13288_v7, %v3249_v14 }
 0x265   : > { %vm10776_vm15 = vcmp.le.f32.partialorder %v13387_v52, 0.7853982  ;;  %vm1260_vm0 = vcmp.lt.s32.totalorder %v9842_v53, 0  ;;  %v3001_v8 = vor.u32 4788187, %v3000_v55  ;;  %v3256_v57 = vor.u32 %v3255_v40, %v3254_v43 }
 0x266   : > { %v3264_v22 = vshrl.u32 %v13289_v44, %v3249_v14  ;;  %vm3268_vm5 = vcmp.lt.s32.totalorder %v10749_v16, 3  ;;  %v1631_v21 = vadd.s32 536870912, %v1630_v5  ;;  %v3259_v52 = vor.u32 %v3258_v38, %v3257_v29 }
 0x267   : > { %v3262_v42 = vor.u32 %v3261_v0, %v3260_v41  ;;  %vm3269_vm1 = vcmp.lt.s32.totalorder %v10749_v16, 4  ;;  %v2997_v11 = vor.u32 %v2996_v17, %v2995_v45  ;;  %vm3267_vm3 = vcmp.lt.s32.totalorder %v10749_v16, 2 }
 0x268   : > { %v3265_v58 = vor.u32 %v3264_v22, %v3263_v59  ;;  %v3274_v49 = vsel %vm3266_vm12, %v3253_v15, %v3256_v57  ;;  %v13391_v60 = vand.u32 2147483647, %v9842_v53  ;;  %v10797_v14 = vshrl.u32 %v1631_v21, 30 }
 0x269   : > { %v3270_v43 = vsel %vm3266_vm12, %v3250_v26, %v3253_v15  ;;  %v3271_v29 = vsel %vm3269_vm1, %v3259_v52, 2102212464  ;;  %v3275_v41 = vsel %vm3269_vm1, %v3262_v42, 920167782  ;;  %v3278_v40 = vsel %vm3266_vm12, %v3256_v57, %v3259_v52 }
 0x26a   : > { %vm10793_vm4 = vcmp.le.f32.partialorder %v13391_v60, 0.7853982  ;;  %v3272_v45 = vsel %vm3268_vm5, %v3256_v57, %v3271_v29  ;;  %v3276_v17 = vsel %vm3268_vm5, %v3259_v52, %v3275_v41  ;;  %v3279_v59 = vsel %vm3269_vm1, %v3265_v58, 1326507024 }
 0x26b   : > { %v3110_v38 = vxor.u32 2147483648, %v10701_v36  ;;  %v3002_v0 = vand.u32 2147483647, %v3001_v8  ;;  %v1633_v22 = vshll.u32 %v10797_v14, 30  ;;  %v3277_v26 = vsel %vm3267_vm3, %v3274_v49, %v3276_v17 }
 0x26c   : > { %v1341_v15 = vmul.f32 %v1340_v47, %v1338_v6  ;;  %v3280_v21 = vsel %vm3268_vm5, %v3262_v42, %v3279_v59  ;;  %v10814_v60 = vmul.u32.u64.low %v10755_v27, %v3277_v26  ;;  %v10815_v29 = vmul.u32.u64.high %v10755_v27, %v3277_v26, %v10814_v60 }
 0x26d   : > { %v3004_v41 = vcvt.s32.f32 %v2997_v11  ;;  %v10818_v57 = vsub.s32 %v1630_v5, %v1633_v22  ;;  %v3273_v8 = vsel %vm3267_vm3, %v3270_v43, %v3272_v45  ;;  %v3281_v52 = vsel %vm3267_vm3, %v3278_v40, %v3280_v21 }
 0x26e   : > { %9032 = vcosq.f32 %v10689_v30  ;;  %v10828_v42 = vsel %vm10776_vm15, 0, %v10694_v12  ;;  %vm2924_vm13 = vcmp.lt.s32.totalorder %v9949_v62, 0  ;;  %v3111_v5 = vsel %vm3028_vm2, %v3110_v38, %v10701_v36 }
 0x26f   : > { %13394 = vst [vmem:[#allocation69_spill] sm:$0xff] %v10828_v42  ;;  %v10832_v6 = vmul.u32.u64.low %v10755_v27, %v3281_v52  ;;  %v10833_v47 = vmul.u32.u64.high %v10755_v27, %v3281_v52, %v10832_v6  ;;  %v13395_v16 = vsub.s32 4, %v10601_v31  ;;  %v3005_v58 = vmul.f32 %v3004_v41, %v3002_v0 }
 0x270   : > { %v1636_v12 = vsub.s32 0, %v10818_v57  ;;  %v1342_v49 = vxor.u32 2147483648, %v1341_v15  ;;  %v3289_v43 = vmul.u32 %v10755_v27, %v3273_v8  ;;  %v3292_v45 = vadd.s32 1, %v10815_v29 }
 0x271   : > { %v1345_v11 = vsel %vm1260_vm0, %v13395_v16, %v10601_v31  ;;  %v1469_v17 = vand.u32 2139095040, %v10199_v10  ;;  %9034 = vsinq.f32 %v10689_v30  ;;  %v10849_v36 = vadd.s32 3, %v10684_v4 }
 0x272   : > { %v10852_v40 = vadd.s32 3, %v10828_v42  ;;  %v8210_v31 = vmin.u32 %v1636_v12, %v10818_v57  ;;  %v3114_v59 = vsel %vm10776_vm15, %v13341_v51, %v3111_v5  ;;  %v10860_v27 = vsel %vm10793_vm4, 0, %v1345_v11  ;;  %v10879_v11 = vpop.f32.mrb[12].mxu1 }
 0x273   : > { %13396 = vst [vmem:[#allocation70_spill] sm:$0xff] %v10849_v36  ;;  %13398 = vst [vmem:[#allocation72_spill] sm:$0xff] %v10860_v27  ;;  %vm3291_vm2 = vc.u32 %v10833_v47, %v10814_v60  ;;  %v1470_v30 = vshrl.u32 %v1469_v17, 23  ;;  %v13399_v38 = vand.u32 2147483647, %v9949_v62  ;;  %v3006_v22 = vxor.u32 2147483648, %v3005_v58 }
 0x274   : > { %13397 = vst [vmem:[#allocation71_spill] sm:$0xff] %v10852_v40  ;;  %vm1572_vm7 = vcmp.lt.s32.totalorder %v10034_v1, 0  ;;  %v1638_v26 = vclz %v8210_v31  ;;  %v3293_v24 = vsel %vm3291_vm2, %v3292_v45, %v10815_v29  ;;  %v1343_v21 = vsel %vm1260_vm0, %v1342_v49, %v1341_v15  ;;  %13403 = vst [vmem:[#allocation74_spill] sm:$0xff] %v10879_v11 }
 0x275   : > { %vm10866_vm6 = vcmp.le.f32.partialorder %v13399_v38, 0.7853982  ;;  %v3294_v41 = vadd.s32 %v3293_v24, %v3289_v43  ;;  %v13187_v8 = vand.u32 2147483647, %v10199_v10  ;;  %v8205_v52 = vadd.s32 4294967169, %v1470_v30 }
 0x276   : > { %9036 = vcosq.f32 %v3114_v59  ;;  %v10876_v6 = vadd.s32 3, %v10860_v27  ;;  %v8211_v5 = vadd.s32 4294967294, %v1638_v26  ;;  %v3133_v16 = vand.u32 2139095040, %v10321_v54 }
 0x277   : > { %9038 = vsinq.f32 %v3114_v59  ;;  %v3008_v12 = vsub.s32 4, %v10699_v3  ;;  %v3295_v29 = vadd.s32 536870912, %v3294_v41  ;;  %v1476_v45 = vadd.s32 1, %v8205_v52 }
 0x278   : > { %13402 = vst [vmem:[#allocation73_spill] sm:$0xff] %v10876_v6  ;;  %v1346_v15 = vsel %vm10793_vm4, %v9842_v53, %v1343_v21  ;;  %v3007_v49 = vsel %vm2924_vm13, %v3006_v22, %v3005_v58  ;;  %vm8212_vm8 = vcmp.lt.s32.totalorder %v8211_v5, 0  ;;  %v1656_v43 = vsub.s32 4, %v10797_v14  ;;  %v10888_v17 = vpop.eup %9032 }
 0x279   : > { %13404 = vst [vmem:[#allocation75_spill] sm:$0xff] %v10888_v17  ;;  %v1641_v31 = vsel %vm8212_vm8, 0, %v8211_v5  ;;  %v10890_v30 = vshrl.u32 %v3295_v29, 30  ;;  %v10894_v59 = vand.u32 8388607, %v13187_v8  ;;  %vm1477_vm9 = vcmp.gt.s32.totalorder %v1476_v45, 0 }
 0x27a   : > { %v1646_v38 = vsub.s32 4294967266, %v1641_v31  ;;  %v1478_v26 = vsel %vm1477_vm9, %v1476_v45, 0  ;;  %v3134_v24 = vshrl.u32 %v3133_v16, 23  ;;  %9040 = vcosq.f32 %v1346_v15 }
 0x27b   : > { %v10900_v58 = vsel %vm2924_vm13, %v3008_v12, %v10699_v3  ;;  %v3297_v22 = vshll.u32 %v10890_v30, 30  ;;  %v1480_v21 = vand.u32 31, %v1478_v26  ;;  %v10903_v52 = vpop.eup %9034  ;;  %9042 = vsinq.f32 %v1346_v15 }
 0x27c   : > { %13405 = vst [vmem:[#allocation76_spill] sm:$0xff] %v10903_v52  ;;  %v1626_v5 = vadd.s32 %v10738_v20, %v10753_v63  ;;  %v1642_v29 = vsub.s32 32, %v1641_v31  ;;  %v1647_v45 = vadd.s32 127, %v1646_v38  ;;  %v10910_v16 = vsel %vm10866_vm6, %v9949_v62, %v3007_v49 }
 0x27d   : > { %v10915_v3 = vsel %vm1572_vm7, %v1656_v43, %v10797_v14  ;;  %v10917_v12 = vsub.s32 %v3294_v41, %v3297_v22  ;;  %v1481_v8 = vsub.s32 32, %v1480_v21  ;;  %v1474_v15 = vor.u32 8388608, %v10894_v59 }
 0x27e   : > { %v1648_v55 = vshll.u32 %v1647_v45, 23  ;;  %v8269_v42 = vadd.s32 4294967169, %v3134_v24  ;;  %v13406_v20 = vand.u32 2147483647, %v10321_v54  ;;  %v1643_v38 = vshll.u32 %v10818_v57, %v1641_v31 }
 0x27f   : > { %v3300_v49 = vsub.s32 0, %v10917_v12  ;;  %v10926_v40 = vshrl.u32 %v1478_v26, 5  ;;  %v1484_v14 = vshrl.u32 %v13285_v18, %v1481_v8  ;;  %v1644_v41 = vshrl.u32 %v1626_v5, %v1642_v29 }
 0x280   : > { %v10922_v63 = vand.u32 8388607, %v13406_v20  ;;  %v10929_v43 = vpop.eup %9036  ;;  %v1483_v22 = vshll.u32 %v13284_v32, %v1480_v21  ;;  %v1486_v59 = vshll.u32 %v13285_v18, %v1480_v21  ;;  %v1487_v24 = vshrl.u32 %v13286_v23, %v1481_v8 }
 0x281   : > { %13407 = vst [vmem:[#allocation77_spill] sm:$0xff] %v10929_v43  ;;  %v10934_v45 = vpop.eup %9038  ;;  %v1649_v20 = vor.u32 4788187, %v1648_v55  ;;  %v8274_v57 = vmin.u32 %v3300_v49, %v10917_v12  ;;  %v1489_v31 = vshll.u32 %v13286_v23, %v1480_v21  ;;  %v1490_v26 = vshrl.u32 %v13287_v2, %v1481_v8 }
 0x282   : > { %13408 = vst [vmem:[#allocation78_spill] sm:$0xff] %v10934_v45  ;;  %v1485_v51 = vor.u32 %v1484_v14, %v1483_v22  ;;  %v1488_v62 = vor.u32 %v1487_v24, %v1486_v59  ;;  %v1492_v43 = vshll.u32 %v13287_v2, %v1480_v21  ;;  %v1493_v5 = vshrl.u32 %v13288_v7, %v1481_v8 }
 0x283   : > { %v3302_v29 = vclz %v8274_v57  ;;  %v1491_v56 = vor.u32 %v1490_v26, %v1489_v31  ;;  %v1496_v4 = vshrl.u32 %v13289_v44, %v1481_v8  ;;  %v3140_v17 = vadd.s32 1, %v8269_v42 }
 0x284   : > { %v1645_v52 = vor.u32 %v1644_v41, %v1643_v38  ;;  %v1482_v55 = vshrl.u32 %v13284_v32, %v1481_v8  ;;  %v1494_v45 = vor.u32 %v1493_v5, %v1492_v43  ;;  %v1495_v49 = vshll.u32 %v13288_v7, %v1480_v21  ;;  %v10944_v36 = vpop.eup %9040 }
 0x285   : > { %13409 = vst [vmem:[#allocation79_spill] sm:$0xff] %v10944_v36  ;;  %v13410_v14 = vand.u32 2147483647, %v10034_v1  ;;  %v1650_v59 = vand.u32 2147483647, %v1649_v20  ;;  %v8275_v24 = vadd.s32 4294967294, %v3302_v29  ;;  %v10954_v42 = vpop.eup %9042  ;;  %9044 = vcosq.f32 %v10910_v16 }
 0x286   : > { %vm1498_vm11 = vcmp.lt.s32.totalorder %v10926_v40, 1  ;;  %vm1501_vm12 = vcmp.lt.s32.totalorder %v10926_v40, 4  ;;  %13413 = vst [vmem:[#allocation80_spill] sm:$0xff] %v10954_v42  ;;  %v1497_v8 = vor.u32 %v1496_v4, %v1495_v49  ;;  %vm1500_vm14 = vcmp.lt.s32.totalorder %v10926_v40, 3 }
 0x287   : > { %vm10948_vm10 = vcmp.le.f32.partialorder %v13410_v14, 0.7853982  ;;  %v1506_v21 = vsel %vm1498_vm11, %v1485_v51, %v1488_v62  ;;  %v1507_v38 = vsel %vm1501_vm12, %v1494_v45, 920167782  ;;  %vm8276_vm15 = vcmp.lt.s32.totalorder %v8275_v24, 0 }
 0x288   : > { %vm1499_vm0 = vcmp.lt.s32.totalorder %v10926_v40, 2  ;;  %v1503_v43 = vsel %vm1501_vm12, %v1491_v56, 2102212464  ;;  %v1508_v41 = vsel %vm1500_vm14, %v1491_v56, %v1507_v38  ;;  %v10966_v20 = vsel %vm8276_vm15, 0, %v8275_v24 }
 0x289   : > { %v1509_v4 = vsel %vm1499_vm0, %v1506_v21, %v1508_v41  ;;  %v1514_v57 = vshll.u32 %v1474_v15, 8  ;;  %vm3141_vm5 = vcmp.gt.s32.totalorder %v3140_v17, 0  ;;  %v1652_v31 = vcvt.s32.f32 %v1645_v52  ;;  %v10983_v15 = vpop.f32.mrb[13].mxu0 }
 0x28a   : > { %v3310_v26 = vsub.s32 4294967266, %v10966_v20  ;;  %v1502_v5 = vsel %vm1498_vm11, %v1482_v55, %v1485_v51  ;;  %v1510_v29 = vsel %vm1498_vm11, %v1488_v62, %v1491_v56  ;;  %v1504_v49 = vsel %vm1500_vm14, %v1488_v62, %v1503_v43 }
 0x28b   : > { %v1511_v14 = vsel %vm1501_vm12, %v1497_v8, 1326507024  ;;  %v10979_v24 = vmul.u32.u64.low %v1514_v57, %v1509_v4  ;;  %v10980_v38 = vmul.u32.u64.high %v1514_v57, %v1509_v4, %v10979_v24  ;;  %v10985_v52 = vmul.f32 %v1652_v31, %v1650_v59 }
 0x28c   : > { %v1512_v51 = vsel %vm1500_vm14, %v1494_v45, %v1511_v14  ;;  %v3138_v55 = vor.u32 8388608, %v10922_v63  ;;  %v1781_v56 = vand.u32 2139095040, %v10405_v50  ;;  %v10994_v62 = vsel %vm10866_vm6, 0, %v10900_v58 }
 0x28d   : > { %13414 = vst [vmem:[#allocation81_spill] sm:$0xff] %v10994_v62  ;;  %v1513_v8 = vsel %vm1499_vm0, %v1510_v29, %v1512_v51  ;;  %v3142_v59 = vsel %vm3141_vm5, %v3140_v17, 0  ;;  %v3311_v21 = vadd.s32 127, %v3310_v26  ;;  %v1505_v45 = vsel %vm1499_vm0, %v1502_v5, %v1504_v49 }
 0x28e   : > { %v11002_v43 = vmul.u32.u64.low %v1514_v57, %v1513_v8  ;;  %v11003_v63 = vmul.u32.u64.high %v1514_v57, %v1513_v8, %v11002_v43  ;;  %v11008_v0 = vsel %vm10948_vm10, 0, %v10915_v3  ;;  %v3290_v58 = vadd.s32 %v10814_v60, %v10833_v47 }
 0x28f   : > { %13415 = vst [vmem:[#allocation82_spill] sm:$0xff] %v11008_v0  ;;  %v1524_v41 = vadd.s32 1, %v10980_v38  ;;  %v3144_v4 = vand.u32 31, %v3142_v59  ;;  %v1654_v17 = vxor.u32 2147483648, %v10985_v52  ;;  %v3306_v31 = vsub.s32 32, %v10966_v20  ;;  %v11032_v53 = vpop.eup %9044 }
 0x290   : > { %v11015_v40 = vshll.u32 %v3138_v55, 8  ;;  %v1782_v26 = vshrl.u32 %v1781_v56, 23  ;;  %v1521_v5 = vmul.u32 %v1514_v57, %v1505_v45  ;;  %v3312_v14 = vshll.u32 %v3311_v21, 23  ;;  %13416 = vst [vmem:[#allocation83_spill] sm:$0xff] %v11032_v53 }
 0x291   : > { %v3145_v29 = vsub.s32 32, %v3144_v4  ;;  %v3147_v49 = vshll.u32 %v13284_v32, %v3144_v4  ;;  %v3150_v3 = vshll.u32 %v13285_v18, %v3144_v4  ;;  %vm1523_vm1 = vc.u32 %v11003_v63, %v10979_v24 }
 0x292   : > { %v3143_v60 = vshrl.u32 %v3142_v59, 5  ;;  %v3156_v47 = vshll.u32 %v13287_v2, %v3144_v4  ;;  %v1525_v51 = vsel %vm1523_vm1, %v1524_v41, %v10980_v38  ;;  %v3153_v57 = vshll.u32 %v13286_v23, %v3144_v4 }
 0x293   : > { %v3148_v8 = vshrl.u32 %v13285_v18, %v3145_v29  ;;  %v3151_v55 = vshrl.u32 %v13286_v23, %v3145_v29  ;;  %v3307_v56 = vshll.u32 %v10917_v12, %v10966_v20  ;;  %v1526_v45 = vadd.s32 %v1525_v51, %v1521_v5 }
 0x294   : > { %v3154_v21 = vshrl.u32 %v13287_v2, %v3145_v29  ;;  %v3157_v43 = vshrl.u32 %v13288_v7, %v3145_v29  ;;  %v3159_v27 = vshll.u32 %v13288_v7, %v3144_v4  ;;  %v3160_v38 = vshrl.u32 %v13289_v44, %v3145_v29 }
 0x295   : > { %v3149_v34 = vor.u32 %v3148_v8, %v3147_v49  ;;  %v3152_v59 = vor.u32 %v3151_v55, %v3150_v3  ;;  %v3308_v41 = vshrl.u32 %v3290_v58, %v3306_v31  ;;  %v1527_v36 = vadd.s32 536870912, %v1526_v45 }
 0x296   : > { %v3158_v42 = vor.u32 %v3157_v43, %v3156_v47  ;;  %v8217_v6 = vadd.s32 4294967169, %v1782_v26  ;;  %v3313_v35 = vor.u32 4788187, %v3312_v14  ;;  %v3146_v12 = vshrl.u32 %v13284_v32, %v3145_v29 }
 0x297   : > { %v3155_v20 = vor.u32 %v3154_v21, %v3153_v57  ;;  %vm3162_vm3 = vcmp.lt.s32.totalorder %v3143_v60, 1  ;;  %v11035_v5 = vshrl.u32 %v1527_v36, 30  ;;  %v3161_v51 = vor.u32 %v3160_v38, %v3159_v27 }
 0x298   : > { %vm3164_vm4 = vcmp.lt.s32.totalorder %v3143_v60, 3  ;;  %vm3165_vm13 = vcmp.lt.s32.totalorder %v3143_v60, 4  ;;  %vm3163_vm2 = vcmp.lt.s32.totalorder %v3143_v60, 2  ;;  %v3170_v58 = vsel %vm3162_vm3, %v3149_v34, %v3152_v59 }
 0x299   : > { %v3167_v4 = vsel %vm3165_vm13, %v3155_v20, 2102212464  ;;  %v3171_v31 = vsel %vm3165_vm13, %v3158_v42, 920167782  ;;  %v3309_v26 = vor.u32 %v3308_v41, %v3307_v56  ;;  %v1529_v49 = vshll.u32 %v11035_v5, 30 }
 0x29a   : > { %v13205_v3 = vand.u32 2147483647, %v10405_v50  ;;  %v1788_v29 = vadd.s32 1, %v8217_v6  ;;  %v3166_v14 = vsel %vm3162_vm3, %v3146_v12, %v3149_v34  ;;  %v3168_v36 = vsel %vm3164_vm4, %v3152_v59, %v3167_v4 }
 0x29b   : > { %v3172_v27 = vsel %vm3164_vm4, %v3155_v20, %v3171_v31  ;;  %v3174_v47 = vsel %vm3162_vm3, %v3152_v59, %v3155_v20  ;;  %v1655_v8 = vsel %vm1572_vm7, %v1654_v17, %v10985_v52  ;;  %v11049_v55 = vsub.s32 %v1526_v45, %v1529_v49 }
 0x29c   : > { %v3173_v57 = vsel %vm3163_vm2, %v3170_v58, %v3172_v27  ;;  %v3175_v56 = vsel %vm3165_vm13, %v3161_v51, 1326507024  ;;  %v3314_v21 = vand.u32 2147483647, %v3313_v35  ;;  %v3320_v59 = vsub.s32 4, %v10890_v30  ;;  %v11095_v27 = vpop.f32.mrb[13].mxu1 }
 0x29d   : > { %v3176_v6 = vsel %vm3164_vm4, %v3158_v42, %v3175_v56  ;;  %v11055_v34 = vmul.u32.u64.low %v11015_v40, %v3173_v57  ;;  %v11056_v43 = vmul.u32.u64.high %v11015_v40, %v3173_v57, %v11055_v34  ;;  %v1532_v38 = vsub.s32 0, %v11049_v55  ;;  %13419 = vst [vmem:[#allocation86_spill] sm:$0xff] %v11095_v27 }
 0x29e   : > { %v3169_v52 = vsel %vm3163_vm2, %v3166_v14, %v3168_v36  ;;  %v3177_v17 = vsel %vm3163_vm2, %v3174_v47, %v3176_v6  ;;  %v3316_v45 = vcvt.s32.f32 %v3309_v26  ;;  %vm1789_vm6 = vcmp.gt.s32.totalorder %v1788_v29, 0 }
 0x29f   : > { %v11064_v41 = vmul.u32.u64.low %v11015_v40, %v3177_v17  ;;  %v11065_v12 = vmul.u32.u64.high %v11015_v40, %v3177_v17, %v11064_v41  ;;  %v11070_v35 = vsel %vm10948_vm10, %v10034_v1, %v1655_v8  ;;  %v8206_v42 = vmin.u32 %v1532_v38, %v11049_v55 }
 0x2a0   : > { %v1785_v20 = vand.u32 8388607, %v13205_v3  ;;  %v1790_v51 = vsel %vm1789_vm6, %v1788_v29, 0  ;;  %v3317_v4 = vmul.f32 %v3316_v45, %v3314_v21  ;;  %v3185_v60 = vmul.u32 %v11015_v40, %v3169_v52 }
 0x2a1   : > { %v3188_v58 = vadd.s32 1, %v11056_v43  ;;  %v1792_v31 = vand.u32 31, %v1790_v51  ;;  %9046 = vsinq.f32 %v10910_v16  ;;  %v11079_v26 = vadd.s32 3, %v10994_v62 }
 0x2a2   : > { %vm3236_vm7 = vcmp.lt.s32.totalorder %v10123_v19, 0  ;;  %v1534_v22 = vclz %v8206_v42  ;;  %v11083_v49 = vadd.s32 3, %v11008_v0  ;;  %vm1468_vm8 = vcmp.lt.s32.totalorder %v10199_v10, 0 }
 0x2a3   : > { %13417 = vst [vmem:[#allocation84_spill] sm:$0xff] %v11079_v26  ;;  %v11088_v29 = vsel %vm3236_vm7, %v3320_v59, %v10890_v30  ;;  %vm3187_vm9 = vc.u32 %v11065_v12, %v11055_v34  ;;  %v1793_v16 = vsub.s32 32, %v1792_v31  ;;  %9048 = vcosq.f32 %v11070_v35 }
 0x2a4   : > { %13418 = vst [vmem:[#allocation85_spill] sm:$0xff] %v11083_v49  ;;  %v8207_v40 = vadd.s32 4294967294, %v1534_v22  ;;  %v3189_v14 = vsel %vm3187_vm9, %v3188_v58, %v11056_v43  ;;  %v1786_v36 = vor.u32 8388608, %v1785_v20  ;;  %v3318_v47 = vxor.u32 2147483648, %v3317_v4 }
 0x2a5   : > { %v1522_v8 = vadd.s32 %v10979_v24, %v11003_v63  ;;  %v1552_v30 = vsub.s32 4, %v11035_v5  ;;  %v3190_v57 = vadd.s32 %v3189_v14, %v3185_v60  ;;  %v1796_v56 = vshrl.u32 %v13285_v18, %v1793_v16 }
 0x2a6   : > { %vm8208_vm10 = vcmp.lt.s32.totalorder %v8207_v40, 0  ;;  %v1799_v21 = vshrl.u32 %v13286_v23, %v1793_v16  ;;  %v3445_v6 = vand.u32 2139095040, %v10498_v13  ;;  %v1802_v38 = vshrl.u32 %v13287_v2, %v1793_v16 }
 0x2a7   : > { %v11103_v59 = vsel %vm8208_vm10, 0, %v8207_v40  ;;  %v3191_v43 = vadd.s32 536870912, %v3190_v57  ;;  %v1805_v52 = vshrl.u32 %v13288_v7, %v1793_v16  ;;  %v1791_v24 = vshrl.u32 %v1790_v51, 5 }
 0x2a8   : > { %v1542_v17 = vsub.s32 4294967266, %v11103_v59  ;;  %v1795_v63 = vshll.u32 %v13284_v32, %v1792_v31  ;;  %v1798_v45 = vshll.u32 %v13285_v18, %v1792_v31  ;;  %v1801_v42 = vshll.u32 %v13286_v23, %v1792_v31 }
 0x2a9   : > { %v11110_v41 = vshrl.u32 %v3191_v43, 30  ;;  %v1804_v20 = vshll.u32 %v13287_v2, %v1792_v31  ;;  %v1808_v60 = vshrl.u32 %v13289_v44, %v1793_v16  ;;  %v1538_v58 = vsub.s32 32, %v11103_v59 }
 0x2aa   : > { %v1797_v22 = vor.u32 %v1796_v56, %v1795_v63  ;;  %v1800_v40 = vor.u32 %v1799_v21, %v1798_v45  ;;  %v1807_v14 = vshll.u32 %v13288_v7, %v1792_v31  ;;  %v13420_v51 = vand.u32 2147483647, %v10123_v19 }
 0x2ab   : > { %v3319_v43 = vsel %vm3236_vm7, %v3318_v47, %v3317_v4  ;;  %v3193_v62 = vshll.u32 %v11110_v41, 30  ;;  %v1803_v53 = vor.u32 %v1802_v38, %v1801_v42  ;;  %v1806_v26 = vor.u32 %v1805_v52, %v1804_v20  ;;  %v11126_v0 = vpop.eup %9046 }
 0x2ac   : > { %vm11119_vm11 = vcmp.le.f32.partialorder %v13420_v51, 0.7853982  ;;  %13423 = vst [vmem:[#allocation87_spill] sm:$0xff] %v11126_v0  ;;  %v1543_v49 = vadd.s32 127, %v1542_v17  ;;  %v1553_v31 = vsel %vm1468_vm8, %v1552_v30, %v11035_v5  ;;  %v1809_v56 = vor.u32 %v1808_v60, %v1807_v14 }
 0x2ad   : > { %v1826_v21 = vshll.u32 %v1786_v36, 8  ;;  %v13424_v63 = vand.u32 2147483647, %v10199_v10  ;;  %v11137_v4 = vsub.s32 %v3190_v57, %v3193_v62  ;;  %v1794_v47 = vshrl.u32 %v13284_v32, %v1793_v16  ;;  %v11140_v52 = vpop.eup %9048 }
 0x2ae   : > { %vm1810_vm14 = vcmp.lt.s32.totalorder %v1791_v24, 1  ;;  %v3446_v38 = vshrl.u32 %v3445_v6, 23  ;;  %13427 = vst [vmem:[#allocation88_spill] sm:$0xff] %v11140_v52  ;;  %v1540_v17 = vshrl.u32 %v1522_v8, %v1538_v58  ;;  %vm1811_vm15 = vcmp.lt.s32.totalorder %v1791_v24, 2 }
 0x2af   : > { %vm11133_vm12 = vcmp.le.f32.partialorder %v13424_v63, 0.7853982  ;;  %vm1813_vm0 = vcmp.lt.s32.totalorder %v1791_v24, 4  ;;  %v1818_v5 = vsel %vm1810_vm14, %v1797_v22, %v1800_v40  ;;  %v3196_v36 = vsub.s32 0, %v11137_v4 }
 0x2b0   : > { %vm1812_vm5 = vcmp.lt.s32.totalorder %v1791_v24, 3  ;;  %v1815_v30 = vsel %vm1813_vm0, %v1803_v53, 2102212464  ;;  %v1819_v42 = vsel %vm1813_vm0, %v1806_v26, 920167782  ;;  %v1544_v20 = vshll.u32 %v1543_v49, 23 }
 0x2b1   : > { %v1820_v60 = vsel %vm1812_vm5, %v1803_v53, %v1819_v42  ;;  %v1822_v62 = vsel %vm1810_vm14, %v1800_v40, %v1803_v53  ;;  %v1823_v57 = vsel %vm1813_vm0, %v1809_v56, 1326507024  ;;  %v8270_v16 = vmin.u32 %v3196_v36, %v11137_v4 }
 0x2b2   : > { %v1814_v6 = vsel %vm1810_vm14, %v1794_v47, %v1797_v22  ;;  %v1821_v8 = vsel %vm1811_vm15, %v1818_v5, %v1820_v60  ;;  %v1824_v58 = vsel %vm1812_vm5, %v1806_v26, %v1823_v57  ;;  %v1816_v14 = vsel %vm1812_vm5, %v1800_v40, %v1815_v30 }
 0x2b3   : > { %v1825_v51 = vsel %vm1811_vm15, %v1822_v62, %v1824_v58  ;;  %v11149_v63 = vmul.u32.u64.low %v1826_v21, %v1821_v8  ;;  %v11150_v0 = vmul.u32.u64.high %v1826_v21, %v1821_v8, %v11149_v63  ;;  %vm3132_vm1 = vcmp.lt.s32.totalorder %v10321_v54, 0 }
 0x2b4   : > { %v3198_v49 = vclz %v8270_v16  ;;  %v11154_v42 = vmul.u32.u64.low %v1826_v21, %v1825_v51  ;;  %v11155_v53 = vmul.u32.u64.high %v1826_v21, %v1825_v51, %v11154_v42  ;;  %v8281_v56 = vadd.s32 4294967169, %v3446_v38 }
 0x2b5   : > { %9050 = vsinq.f32 %v11070_v35  ;;  %v11161_v26 = vsel %vm11119_vm11, 0, %v11088_v29  ;;  %v1539_v22 = vshll.u32 %v11049_v55, %v11103_v59  ;;  %v13210_v40 = vand.u32 2147483647, %v10498_v13 }
 0x2b6   : > { %13428 = vst [vmem:[#allocation89_spill] sm:$0xff] %v11161_v26  ;;  %v1545_v47 = vor.u32 4788187, %v1544_v20  ;;  %v8271_v5 = vadd.s32 4294967294, %v3198_v49  ;;  %v1817_v36 = vsel %vm1811_vm15, %v1814_v6, %v1816_v14  ;;  %v3452_v30 = vadd.s32 1, %v8281_v56  ;;  %v11188_v6 = vpop.f32.mrb[14].mxu0 }
 0x2b7   : > { %v3322_v38 = vsel %vm11119_vm11, %v10123_v19, %v3319_v43  ;;  %v11172_v35 = vsel %vm11133_vm12, 0, %v1553_v31  ;;  %v3216_v29 = vsub.s32 4, %v11110_v41  ;;  %v1836_v60 = vadd.s32 1, %v11150_v0 }
 0x2b8   : > { %13429 = vst [vmem:[#allocation90_spill] sm:$0xff] %v11172_v35  ;;  %v1541_v55 = vor.u32 %v1540_v17, %v1539_v22  ;;  %vm8272_vm3 = vcmp.lt.s32.totalorder %v8271_v5, 0  ;;  %vm1835_vm4 = vc.u32 %v11155_v53, %v11149_v63  ;;  %v1677_v59 = vand.u32 2139095040, %v10581_v46 }
 0x2b9   : > { %v11179_v24 = vsel %vm8272_vm3, 0, %v8271_v5  ;;  %v1833_v20 = vmul.u32 %v1826_v21, %v1817_v36  ;;  %v1837_v3 = vsel %vm1835_vm4, %v1836_v60, %v11150_v0  ;;  %vm3453_vm13 = vcmp.gt.s32.totalorder %v3452_v30, 0 }
 0x2ba   : > { %9052 = vcosq.f32 %v3322_v38  ;;  %v1546_v43 = vand.u32 2147483647, %v1545_v47  ;;  %v3206_v31 = vsub.s32 4294967266, %v11179_v24  ;;  %v3449_v62 = vand.u32 8388607, %v13210_v40 }
 0x2bb   : > { %9054 = vsinq.f32 %v3322_v38  ;;  %v11186_v17 = vadd.s32 3, %v11161_v26  ;;  %v1838_v57 = vadd.s32 %v1837_v3, %v1833_v20  ;;  %v3454_v16 = vsel %vm3453_vm13, %v3452_v30, 0 }
 0x2bc   : > { %v1548_v8 = vcvt.s32.f32 %v1541_v55  ;;  %v11191_v21 = vadd.s32 3, %v11172_v35  ;;  %v3456_v0 = vand.u32 31, %v3454_v16  ;;  %v1678_v58 = vshrl.u32 %v1677_v59, 23 }
 0x2bd   : > { %13430 = vst [vmem:[#allocation91_spill] sm:$0xff] %v11186_v17  ;;  %v3186_v14 = vadd.s32 %v11055_v34, %v11065_v12  ;;  %v11198_v51 = vsel %vm3132_vm1, %v3216_v29, %v11110_v41  ;;  %v1839_v49 = vadd.s32 536870912, %v1838_v57  ;;  %v3207_v22 = vadd.s32 127, %v3206_v31 }
 0x2be   : > { %v11201_v56 = vmul.f32 %v1548_v8, %v1546_v43  ;;  %v3450_v47 = vor.u32 8388608, %v3449_v62  ;;  %v3457_v5 = vsub.s32 32, %v3456_v0  ;;  %v3202_v30 = vsub.s32 32, %v11179_v24 }
 0x2bf   : > { %v11203_v36 = vpop.eup %9050  ;;  %v11206_v38 = vshrl.u32 %v1839_v49, 30  ;;  %v3459_v34 = vshll.u32 %v13284_v32, %v3456_v0  ;;  %v3462_v12 = vshll.u32 %v13285_v18, %v3456_v0  ;;  %v3455_v41 = vshrl.u32 %v3454_v16, 5 }
 0x2c0   : > { %13431 = vst [vmem:[#allocation92_spill] sm:$0xff] %v11203_v36  ;;  %v3460_v29 = vshrl.u32 %v13285_v18, %v3457_v5  ;;  %v3468_v60 = vshll.u32 %v13287_v2, %v3456_v0  ;;  %v8213_v55 = vadd.s32 4294967169, %v1678_v58  ;;  %v3463_v20 = vshrl.u32 %v13286_v23, %v3457_v5 }
 0x2c1   : > { %v1841_v59 = vshll.u32 %v11206_v38, 30  ;;  %v3465_v3 = vshll.u32 %v13286_v23, %v3456_v0  ;;  %v3466_v43 = vshrl.u32 %v13287_v2, %v3457_v5  ;;  %v1550_v31 = vxor.u32 2147483648, %v11201_v56 }
 0x2c2   : > { %v3208_v62 = vshll.u32 %v3207_v22, 23  ;;  %v3469_v8 = vshrl.u32 %v13288_v7, %v3457_v5  ;;  %v3471_v16 = vshll.u32 %v13288_v7, %v3456_v0  ;;  %v3461_v40 = vor.u32 %v3460_v29, %v3459_v34 }
 0x2c3   : > { %v11219_v49 = vsub.s32 %v1838_v57, %v1841_v59  ;;  %v3464_v42 = vor.u32 %v3463_v20, %v3462_v12  ;;  %v11221_v58 = vshll.u32 %v3450_v47, 8  ;;  %v3204_v17 = vshrl.u32 %v3186_v14, %v3202_v30 }
 0x2c4   : > { %v11223_v26 = vpop.eup %9052  ;;  %v3458_v19 = vshrl.u32 %v13284_v32, %v3457_v5  ;;  %v3470_v52 = vor.u32 %v3469_v8, %v3468_v60  ;;  %v3472_v36 = vshrl.u32 %v13289_v44, %v3457_v5  ;;  %v3467_v35 = vor.u32 %v3466_v43, %v3465_v3 }
 0x2c5   : > { %13432 = vst [vmem:[#allocation93_spill] sm:$0xff] %v11223_v26  ;;  %v11227_v1 = vpop.eup %9054  ;;  %v1844_v22 = vsub.s32 0, %v11219_v49  ;;  %vm3474_vm2 = vcmp.lt.s32.totalorder %v3455_v41, 1  ;;  %v1684_v57 = vadd.s32 1, %v8213_v55  ;;  %v3209_v0 = vor.u32 4788187, %v3208_v62 }
 0x2c6   : > { %13433 = vst [vmem:[#allocation94_spill] sm:$0xff] %v11227_v1  ;;  %v3473_v34 = vor.u32 %v3472_v36, %v3471_v16  ;;  %vm3476_vm6 = vcmp.lt.s32.totalorder %v3455_v41, 3  ;;  %vm3477_vm7 = vcmp.lt.s32.totalorder %v3455_v41, 4  ;;  %vm3475_vm9 = vcmp.lt.s32.totalorder %v3455_v41, 2 }
 0x2c7   : > { %v8218_v47 = vmin.u32 %v1844_v22, %v11219_v49  ;;  %v3479_v14 = vsel %vm3477_vm7, %v3467_v35, 2102212464  ;;  %v3482_v30 = vsel %vm3474_vm2, %v3461_v40, %v3464_v42  ;;  %v3203_v5 = vshll.u32 %v11137_v4, %v11179_v24 }
 0x2c8   : > { %v3478_v12 = vsel %vm3474_vm2, %v3458_v19, %v3461_v40  ;;  %v3480_v29 = vsel %vm3476_vm6, %v3464_v42, %v3479_v14  ;;  %v3483_v60 = vsel %vm3477_vm7, %v3470_v52, 920167782  ;;  %v3486_v59 = vsel %vm3474_vm2, %v3464_v42, %v3467_v35 }
 0x2c9   : > { %v1846_v55 = vclz %v8218_v47  ;;  %v3484_v36 = vsel %vm3476_vm6, %v3467_v35, %v3483_v60  ;;  %v13434_v20 = vand.u32 2147483647, %v10581_v46  ;;  %v3205_v43 = vor.u32 %v3204_v17, %v3203_v5 }
 0x2ca   : > { %v3210_v62 = vand.u32 2147483647, %v3209_v0  ;;  %v3485_v8 = vsel %vm3475_vm9, %v3482_v30, %v3484_v36  ;;  %v3487_v4 = vsel %vm3477_vm7, %v3473_v34, 1326507024  ;;  %v3481_v19 = vsel %vm3475_vm9, %v3478_v12, %v3480_v29  ;;  %v11263_v29 = vpop.f32.mrb[14].mxu1 }
 0x2cb   : > { %v1681_v3 = vand.u32 8388607, %v13434_v20  ;;  %v8219_v24 = vadd.s32 4294967294, %v1846_v55  ;;  %v3488_v40 = vsel %vm3476_vm6, %v3470_v52, %v3487_v4  ;;  %vm1685_vm10 = vcmp.gt.s32.totalorder %v1684_v57, 0 }
 0x2cc   : > { %v3489_v16 = vsel %vm3475_vm9, %v3486_v59, %v3488_v40  ;;  %v11248_v22 = vmul.u32.u64.low %v11221_v58, %v3485_v8  ;;  %v11249_v35 = vmul.u32.u64.high %v11221_v58, %v3485_v8, %v11248_v22  ;;  %v1686_v42 = vsel %vm1685_vm10, %v1684_v57, 0 }
 0x2cd   : > { %vm8220_vm11 = vcmp.lt.s32.totalorder %v8219_v24, 0  ;;  %v11253_v17 = vmul.u32.u64.low %v11221_v58, %v3489_v16  ;;  %v11254_v0 = vmul.u32.u64.high %v11221_v58, %v3489_v16, %v11253_v17  ;;  %v1551_v52 = vsel %vm1468_vm8, %v1550_v31, %v11201_v56 }
 0x2ce   : > { %v3212_v47 = vcvt.s32.f32 %v3205_v43  ;;  %v1849_v41 = vsel %vm8220_vm11, 0, %v8219_v24  ;;  %v1688_v14 = vand.u32 31, %v1686_v42  ;;  %v1834_v30 = vadd.s32 %v11149_v63, %v11155_v53 }
 0x2cf   : > { %v1850_v5 = vsub.s32 32, %v1849_v41  ;;  %v1854_v12 = vsub.s32 4294967266, %v1849_v41  ;;  %v3497_v57 = vmul.u32 %v11221_v58, %v3481_v19  ;;  %v3500_v55 = vadd.s32 1, %v11249_v35 }
 0x2d0   : > { %v11265_v60 = vmul.f32 %v3212_v47, %v3210_v62  ;;  %v1682_v36 = vor.u32 8388608, %v1681_v3  ;;  %v1689_v59 = vsub.s32 32, %v1688_v14  ;;  %v1851_v56 = vshll.u32 %v11219_v49, %v1849_v41 }
 0x2d1   : > { %v1852_v31 = vshrl.u32 %v1834_v30, %v1850_v5  ;;  %v1855_v20 = vadd.s32 127, %v1854_v12  ;;  %vm3499_vm8 = vc.u32 %v11254_v0, %v11248_v22  ;;  %v1691_v53 = vshll.u32 %v13284_v32, %v1688_v14 }
 0x2d2   : > { %v3501_v63 = vsel %vm3499_vm8, %v3500_v55, %v11249_v35  ;;  %v1692_v58 = vshrl.u32 %v13285_v18, %v1689_v59  ;;  %v1695_v43 = vshrl.u32 %v13286_v23, %v1689_v59  ;;  %v1687_v4 = vshrl.u32 %v1686_v42, 5 }
 0x2d3   : > { %v1856_v62 = vshll.u32 %v1855_v20, 23  ;;  %v3502_v8 = vadd.s32 %v3501_v63, %v3497_v57  ;;  %v1694_v3 = vshll.u32 %v13285_v18, %v1688_v14  ;;  %v1853_v24 = vor.u32 %v1852_v31, %v1851_v56 }
 0x2d4   : > { %v1693_v49 = vor.u32 %v1692_v58, %v1691_v53  ;;  %v1697_v19 = vshll.u32 %v13286_v23, %v1688_v14  ;;  %v1698_v40 = vshrl.u32 %v13287_v2, %v1689_v59  ;;  %v1700_v35 = vshll.u32 %v13287_v2, %v1688_v14 }
 0x2d5   : > { %v1857_v16 = vor.u32 4788187, %v1856_v62  ;;  %v3503_v17 = vadd.s32 536870912, %v3502_v8  ;;  %v1701_v47 = vshrl.u32 %v13288_v7, %v1689_v59  ;;  %v1696_v41 = vor.u32 %v1695_v43, %v1694_v3 }
 0x2d6   : > { %v1699_v30 = vor.u32 %v1698_v40, %v1697_v19  ;;  %v1703_v5 = vshll.u32 %v13288_v7, %v1688_v14  ;;  %v1704_v42 = vshrl.u32 %v13289_v44, %v1689_v59  ;;  %v1554_v12 = vsel %vm11133_vm12, %v10199_v10, %v1551_v52 }
 0x2d7   : > { %v11285_v57 = vshrl.u32 %v3503_v17, 30  ;;  %v1702_v55 = vor.u32 %v1701_v47, %v1700_v35  ;;  %v1722_v56 = vshll.u32 %v1682_v36, 8  ;;  %v13435_v31 = vand.u32 2147483647, %v10321_v54 }
 0x2d8   : > { %v3214_v63 = vxor.u32 2147483648, %v11265_v60  ;;  %v1858_v53 = vand.u32 2147483647, %v1857_v16  ;;  %v1705_v14 = vor.u32 %v1704_v42, %v1703_v5  ;;  %v3341_v58 = vand.u32 2139095040, %v10676_v25 }
 0x2d9   : > { %vm11289_vm14 = vcmp.le.f32.partialorder %v13435_v31, 0.7853982  ;;  %vm1780_vm15 = vcmp.lt.s32.totalorder %v10405_v50, 0  ;;  %v1860_v45 = vcvt.s32.f32 %v1853_v24  ;;  %v3505_v52 = vshll.u32 %v11285_v57, 30 }
 0x2da   : > { %vm1706_vm12 = vcmp.lt.s32.totalorder %v1687_v4, 1  ;;  %vm1709_vm0 = vcmp.lt.s32.totalorder %v1687_v4, 4  ;;  %v1690_v40 = vshrl.u32 %v13284_v32, %v1689_v59  ;;  %vm1708_vm5 = vcmp.lt.s32.totalorder %v1687_v4, 3 }
 0x2db   : > { %v1711_v36 = vsel %vm1709_vm0, %v1699_v30, 2102212464  ;;  %v1714_v43 = vsel %vm1706_vm12, %v1693_v49, %v1696_v41  ;;  %v1715_v62 = vsel %vm1709_vm0, %v1702_v55, 920167782  ;;  %v1719_v3 = vsel %vm1709_vm0, %v1705_v14, 1326507024 }
 0x2dc   : > { %v11298_v19 = vsub.s32 %v3502_v8, %v3505_v52  ;;  %v1718_v16 = vsel %vm1706_vm12, %v1696_v41, %v1699_v30  ;;  %v13438_v17 = vand.u32 2147483647, %v10405_v50  ;;  %v1861_v35 = vmul.f32 %v1860_v45, %v1858_v53 }
 0x2dd   : > { %vm1707_vm4 = vcmp.lt.s32.totalorder %v1687_v4, 2  ;;  %v1716_v47 = vsel %vm1708_vm5, %v1699_v30, %v1715_v62  ;;  %v1720_v5 = vsel %vm1708_vm5, %v1702_v55, %v1719_v3  ;;  %v1710_v8 = vsel %vm1706_vm12, %v1690_v40, %v1693_v49 }
 0x2de   : > { %vm11304_vm3 = vcmp.le.f32.partialorder %v13438_v17, 0.7853982  ;;  %v3508_v42 = vsub.s32 0, %v11298_v19  ;;  %v1712_v31 = vsel %vm1708_vm5, %v1696_v41, %v1711_v36  ;;  %v1717_v59 = vsel %vm1707_vm4, %v1714_v43, %v1716_v47 }
 0x2df   : > { %v1864_v14 = vsub.s32 4, %v11206_v38  ;;  %vm3444_vm13 = vcmp.lt.s32.totalorder %v10498_v13, 0  ;;  %v1721_v52 = vsel %vm1707_vm4, %v1718_v16, %v1720_v5  ;;  %v3215_v30 = vsel %vm3132_vm1, %v3214_v63, %v11265_v60  ;;  %v11346_v5 = vpop.f32.mrb[15].mxu0 }
 0x2e0   : > { %v11314_v17 = vmul.u32.u64.low %v1722_v56, %v1717_v59  ;;  %v11315_v34 = vmul.u32.u64.high %v1722_v56, %v1717_v59, %v11314_v17  ;;  %v8282_v55 = vmin.u32 %v3508_v42, %v11298_v19  ;;  %9056 = vcosq.f32 %v1554_v12 }
 0x2e1   : > { %v11321_v53 = vmul.u32.u64.low %v1722_v56, %v1721_v52  ;;  %v11322_v49 = vmul.u32.u64.high %v1722_v56, %v1721_v52, %v11321_v53  ;;  %v1862_v41 = vxor.u32 2147483648, %v1861_v35  ;;  %v1713_v45 = vsel %vm1707_vm4, %v1710_v8, %v1712_v31 }
 0x2e2   : > { %v3342_v36 = vshrl.u32 %v3341_v58, 23  ;;  %9058 = vsinq.f32 %v1554_v12  ;;  %v11328_v43 = vsel %vm11289_vm14, 0, %v11198_v51  ;;  %v13442_v62 = vand.u32 2147483647, %v10498_v13 }
 0x2e3   : > { %13441 = vst [vmem:[#allocation95_spill] sm:$0xff] %v11328_v43  ;;  %v3510_v63 = vclz %v8282_v55  ;;  %v1989_v3 = vand.u32 2139095040, %v10782_v33  ;;  %v3218_v4 = vsel %vm11289_vm14, %v10321_v54, %v3215_v30  ;;  %v1865_v12 = vsel %vm1780_vm15, %v1864_v14, %v11206_v38 }
 0x2e4   : > { %vm11332_vm2 = vcmp.le.f32.partialorder %v13442_v62, 0.7853982  ;;  %v1732_v51 = vadd.s32 1, %v11315_v34  ;;  %v8277_v58 = vadd.s32 4294967169, %v3342_v36  ;;  %v3528_v16 = vsub.s32 4, %v11285_v57 }
 0x2e5   : > { %v8283_v40 = vadd.s32 4294967294, %v3510_v63  ;;  %v1729_v47 = vmul.u32 %v1722_v56, %v1713_v45  ;;  %vm1731_vm1 = vc.u32 %v11322_v49, %v11314_v17  ;;  %v1863_v42 = vsel %vm1780_vm15, %v1862_v41, %v1861_v35 }
 0x2e6   : > { %v1733_v20 = vsel %vm1731_vm1, %v1732_v51, %v11315_v34  ;;  %v13445_v8 = vand.u32 2147483647, %v10676_v25  ;;  %v3348_v38 = vadd.s32 1, %v8277_v58  ;;  %v11355_v59 = vsel %vm11304_vm3, 0, %v1865_v12 }
 0x2e7   : > { %13446 = vst [vmem:[#allocation96_spill] sm:$0xff] %v11355_v59  ;;  %vm8284_vm6 = vcmp.lt.s32.totalorder %v8283_v40, 0  ;;  %v1734_v14 = vadd.s32 %v1733_v20, %v1729_v47  ;;  %v1990_v56 = vshrl.u32 %v1989_v3, 23  ;;  %9060 = vcosq.f32 %v3218_v4 }
 0x2e8   : > { %v3345_v31 = vand.u32 8388607, %v13445_v8  ;;  %v11358_v52 = vadd.s32 3, %v11328_v43  ;;  %v3513_v30 = vsel %vm8284_vm6, 0, %v8283_v40  ;;  %vm3349_vm7 = vcmp.gt.s32.totalorder %v3348_v38, 0 }
 0x2e9   : > { %v11363_v34 = vsel %vm11304_vm3, %v10405_v50, %v1863_v42  ;;  %v3518_v35 = vsub.s32 4294967266, %v3513_v30  ;;  %v3529_v55 = vsel %vm3444_vm13, %v3528_v16, %v11285_v57  ;;  %v1735_v53 = vadd.s32 536870912, %v1734_v14 }
 0x2ea   : > { %13447 = vst [vmem:[#allocation97_spill] sm:$0xff] %v11358_v52  ;;  %9062 = vsinq.f32 %v3218_v4  ;;  %v11369_v41 = vadd.s32 3, %v11355_v59  ;;  %v3346_v45 = vor.u32 8388608, %v3345_v31  ;;  %v3350_v36 = vsel %vm3349_vm7, %v3348_v38, 0  ;;  %v11373_v24 = vpop.eup %9056 }
 0x2eb   : > { %v3514_v62 = vsub.s32 32, %v3513_v30  ;;  %v3519_v63 = vadd.s32 127, %v3518_v35  ;;  %v11371_v3 = vshrl.u32 %v1735_v53, 30  ;;  %v8225_v12 = vadd.s32 4294967169, %v1990_v56 }
 0x2ec   : > { %13448 = vst [vmem:[#allocation98_spill] sm:$0xff] %v11369_v41  ;;  %9064 = vcosq.f32 %v11363_v34  ;;  %v3498_v51 = vadd.s32 %v11248_v22, %v11254_v0  ;;  %v11380_v57 = vsel %vm11332_vm2, 0, %v3529_v55  ;;  %v3352_v4 = vand.u32 31, %v3350_v36  ;;  %v11382_v58 = vpop.eup %9058 }
 0x2ed   : > { %13449 = vst [vmem:[#allocation99_spill] sm:$0xff] %v11380_v57  ;;  %v3520_v40 = vshll.u32 %v3519_v63, 23  ;;  %v11385_v16 = vadd.s32 %v11314_v17, %v11322_v49  ;;  %v1737_v47 = vshll.u32 %v11371_v3, 30  ;;  %v11391_v0 = vshll.u32 %v3346_v45, 8 }
 0x2ee   : > { %v3353_v20 = vsub.s32 32, %v3352_v4  ;;  %v3355_v8 = vshll.u32 %v13284_v32, %v3352_v4  ;;  %v3358_v22 = vshll.u32 %v13285_v18, %v3352_v4  ;;  %v3515_v31 = vshll.u32 %v11298_v19, %v3513_v30 }
 0x2ef   : > { %v3516_v38 = vshrl.u32 %v3498_v51, %v3514_v62  ;;  %v11394_v56 = vsub.s32 %v1734_v14, %v1737_v47  ;;  %v1996_v35 = vadd.s32 1, %v8225_v12  ;;  %v3351_v55 = vshrl.u32 %v3350_v36, 5 }
 0x2f0   : > { %v3356_v17 = vshrl.u32 %v13285_v18, %v3353_v20  ;;  %v3359_v49 = vshrl.u32 %v13286_v23, %v3353_v20  ;;  %v3361_v53 = vshll.u32 %v13286_v23, %v3352_v4  ;;  %v3521_v63 = vor.u32 4788187, %v3520_v40 }
 0x2f1   : > { %v1740_v42 = vsub.s32 0, %v11394_v56  ;;  %v3362_v26 = vshrl.u32 %v13287_v2, %v3353_v20  ;;  %v3653_v45 = vand.u32 2139095040, %v10879_v11  ;;  %v11402_v1 = vpop.eup %9060  ;;  %v3364_v30 = vshll.u32 %v13287_v2, %v3352_v4 }
 0x2f2   : > { %13450 = vst [vmem:[#allocation100_spill] sm:$0xff] %v11402_v1  ;;  %v3357_v19 = vor.u32 %v3356_v17, %v3355_v8  ;;  %v3360_v14 = vor.u32 %v3359_v49, %v3358_v22  ;;  %v3365_v36 = vshrl.u32 %v13288_v7, %v3353_v20  ;;  %v3517_v62 = vor.u32 %v3516_v38, %v3515_v31 }
 0x2f3   : > { %v8214_v12 = vmin.u32 %v1740_v42, %v11394_v56  ;;  %v3354_v51 = vshrl.u32 %v13284_v32, %v3353_v20  ;;  %v3367_v40 = vshll.u32 %v13288_v7, %v3352_v4  ;;  %v3363_v43 = vor.u32 %v3362_v26, %v3361_v53 }
 0x2f4   : > { %v11409_v47 = vpop.eup %9062  ;;  %v3366_v52 = vor.u32 %v3365_v36, %v3364_v30  ;;  %v3368_v54 = vshrl.u32 %v13289_v44, %v3353_v20  ;;  %vm3370_vm9 = vcmp.lt.s32.totalorder %v3351_v55, 1  ;;  %v3522_v8 = vand.u32 2147483647, %v3521_v63 }
 0x2f5   : > { %13451 = vst [vmem:[#allocation101_spill] sm:$0xff] %v11409_v47  ;;  %v1742_v22 = vclz %v8214_v12  ;;  %vm3372_vm10 = vcmp.lt.s32.totalorder %v3351_v55, 3  ;;  %vm3373_vm11 = vcmp.lt.s32.totalorder %v3351_v55, 4  ;;  %vm3371_vm8 = vcmp.lt.s32.totalorder %v3351_v55, 2 }
 0x2f6   : > { %v11412_v17 = vpop.eup %9064  ;;  %v3369_v31 = vor.u32 %v3368_v54, %v3367_v40  ;;  %v3375_v42 = vsel %vm3373_vm11, %v3363_v43, 2102212464  ;;  %v3378_v38 = vsel %vm3370_vm9, %v3357_v19, %v3360_v14  ;;  %v3524_v4 = vcvt.s32.f32 %v3517_v62 }
 0x2f7   : > { %13452 = vst [vmem:[#allocation102_spill] sm:$0xff] %v11412_v17  ;;  %v8215_v49 = vadd.s32 4294967294, %v1742_v22  ;;  %v3379_v26 = vsel %vm3373_vm11, %v3366_v52, 920167782  ;;  %v13453_v53 = vand.u32 2147483647, %v10782_v33  ;;  %v3374_v63 = vsel %vm3370_vm9, %v3354_v51, %v3357_v19 }
 0x2f8   : > { %v3376_v30 = vsel %vm3372_vm10, %v3360_v14, %v3375_v42  ;;  %v3380_v36 = vsel %vm3372_vm10, %v3363_v43, %v3379_v26  ;;  %v3382_v54 = vsel %vm3370_vm9, %v3360_v14, %v3363_v43  ;;  %v3383_v62 = vsel %vm3373_vm11, %v3369_v31, 1326507024 }
 0x2f9   : > { %v11419_v20 = vand.u32 8388607, %v13453_v53  ;;  %vm8216_vm14 = vcmp.lt.s32.totalorder %v8215_v49, 0  ;;  %v3381_v12 = vsel %vm3371_vm8, %v3378_v38, %v3380_v36  ;;  %vm1997_vm15 = vcmp.gt.s32.totalorder %v1996_v35, 0 }
 0x2fa   : > { %v3525_v40 = vmul.f32 %v3524_v4, %v3522_v8  ;;  %v1745_v22 = vsel %vm8216_vm14, 0, %v8215_v49  ;;  %v3384_v1 = vsel %vm3372_vm10, %v3366_v52, %v3383_v62  ;;  %v3654_v53 = vshrl.u32 %v3653_v45, 23 }
 0x2fb   : > { %v1746_v47 = vsub.s32 32, %v1745_v22  ;;  %v1750_v59 = vsub.s32 4294967266, %v1745_v22  ;;  %v3377_v19 = vsel %vm3371_vm8, %v3374_v63, %v3376_v30  ;;  %v3385_v51 = vsel %vm3371_vm8, %v3382_v54, %v3384_v1 }
 0x2fc   : > { %v11431_v42 = vmul.u32.u64.low %v11391_v0, %v3385_v51  ;;  %v11432_v43 = vmul.u32.u64.high %v11391_v0, %v3385_v51, %v11431_v42  ;;  %v11435_v14 = vmul.u32.u64.low %v11391_v0, %v3381_v12  ;;  %v11436_v38 = vmul.u32.u64.high %v11391_v0, %v3381_v12, %v11435_v14 }
 0x2fd   : > { %v1747_v8 = vshll.u32 %v11394_v56, %v1745_v22  ;;  %v1748_v52 = vshrl.u32 %v11385_v16, %v1746_v47  ;;  %v1751_v45 = vadd.s32 127, %v1750_v59  ;;  %v1998_v31 = vsel %vm1997_vm15, %v1996_v35, 0 }
 0x2fe   : > { %9066 = vsinq.f32 %v11363_v34  ;;  %v11443_v55 = vadd.s32 3, %v11380_v57  ;;  %vm1676_vm12 = vcmp.lt.s32.totalorder %v10581_v46, 0  ;;  %v2000_v1 = vand.u32 31, %v1998_v31 }
 0x2ff   : > { %v1749_v49 = vor.u32 %v1748_v52, %v1747_v8  ;;  %v1752_v26 = vshll.u32 %v1751_v45, 23  ;;  %v3393_v63 = vmul.u32 %v11391_v0, %v3377_v19  ;;  %v1994_v56 = vor.u32 8388608, %v11419_v20 }
 0x300   : > { %13454 = vst [vmem:[#allocation103_spill] sm:$0xff] %v11443_v55  ;;  %v1760_v16 = vsub.s32 4, %v11371_v3  ;;  %vm3395_vm0 = vc.u32 %v11432_v43, %v11435_v14  ;;  %v3396_v59 = vadd.s32 1, %v11436_v38  ;;  %v2001_v34 = vsub.s32 32, %v2000_v1 }
 0x301   : > { %v3526_v35 = vxor.u32 2147483648, %v3525_v40  ;;  %v1753_v47 = vor.u32 4788187, %v1752_v26  ;;  %v1756_v30 = vcvt.s32.f32 %v1749_v49  ;;  %v8289_v36 = vadd.s32 4294967169, %v3654_v53 }
 0x302   : > { %v3397_v54 = vsel %vm3395_vm0, %v3396_v59, %v11436_v38  ;;  %v2003_v12 = vshll.u32 %v13284_v32, %v2000_v1  ;;  %v2004_v0 = vshrl.u32 %v13285_v18, %v2001_v34  ;;  %v2007_v20 = vshrl.u32 %v13286_v23, %v2001_v34 }
 0x303   : > { %v1754_v62 = vand.u32 2147483647, %v1753_v47  ;;  %v3398_v22 = vadd.s32 %v3397_v54, %v3393_v63  ;;  %v2006_v19 = vshll.u32 %v13285_v18, %v2000_v1  ;;  %v2010_v51 = vshrl.u32 %v13287_v2, %v2001_v34  ;;  %v11464_v54 = vpop.f32.mrb[15].mxu1 }
 0x304   : > { %v1999_v42 = vshrl.u32 %v1998_v31, 5  ;;  %v2009_v8 = vshll.u32 %v13286_v23, %v2000_v1  ;;  %v2012_v52 = vshll.u32 %v13287_v2, %v2000_v1  ;;  %v2013_v53 = vshrl.u32 %v13288_v7, %v2001_v34 }
 0x305   : > { %v1757_v38 = vmul.f32 %v1756_v30, %v1754_v62  ;;  %v3399_v45 = vadd.s32 536870912, %v3398_v22  ;;  %v2005_v49 = vor.u32 %v2004_v0, %v2003_v12  ;;  %v2008_v26 = vor.u32 %v2007_v20, %v2006_v19 }
 0x306   : > { %v2011_v59 = vor.u32 %v2010_v51, %v2009_v8  ;;  %v2014_v4 = vor.u32 %v2013_v53, %v2012_v52  ;;  %v2015_v47 = vshll.u32 %v13288_v7, %v2000_v1  ;;  %v2016_v63 = vshrl.u32 %v13289_v44, %v2001_v34 }
 0x307   : > { %v13455_v31 = vand.u32 2147483647, %v10581_v46  ;;  %v1761_v30 = vsel %vm1676_vm12, %v1760_v16, %v11371_v3  ;;  %v11475_v12 = vshrl.u32 %v3399_v45, 30  ;;  %v2034_v0 = vshll.u32 %v1994_v56, 8 }
 0x308   : > { %v13458_v20 = vand.u32 2147483647, %v10879_v11  ;;  %v11481_v62 = vpop.eup %9066  ;;  %v3527_v19 = vsel %vm3444_vm13, %v3526_v35, %v3525_v40  ;;  %v2017_v51 = vor.u32 %v2016_v63, %v2015_v47  ;;  %vm2018_vm3 = vcmp.lt.s32.totalorder %v1999_v42, 1 }
 0x309   : > { %vm11468_vm5 = vcmp.le.f32.partialorder %v13455_v31, 0.7853982  ;;  %13459 = vst [vmem:[#allocation104_spill] sm:$0xff] %v11481_v62  ;;  %v3660_v8 = vadd.s32 1, %v8289_v36  ;;  %v1758_v52 = vxor.u32 2147483648, %v1757_v38  ;;  %v3401_v53 = vshll.u32 %v11475_v12, 30 }
 0x30a   : > { %v11479_v1 = vand.u32 8388607, %v13458_v20  ;;  %vm2021_vm4 = vcmp.lt.s32.totalorder %v1999_v42, 4  ;;  %v2026_v3 = vsel %vm2018_vm3, %v2005_v49, %v2008_v26  ;;  %v2002_v16 = vshrl.u32 %v13284_v32, %v2001_v34 }
 0x30b   : > { %vm2020_vm1 = vcmp.lt.s32.totalorder %v1999_v42, 3  ;;  %v2023_v56 = vsel %vm2021_vm4, %v2011_v59, 2102212464  ;;  %v2027_v45 = vsel %vm2021_vm4, %v2014_v4, 920167782  ;;  %v11487_v31 = vsub.s32 %v3398_v22, %v3401_v53 }
 0x30c   : > { %vm2019_vm6 = vcmp.lt.s32.totalorder %v1999_v42, 2  ;;  %v2028_v20 = vsel %vm2020_vm1, %v2011_v59, %v2027_v45  ;;  %v2030_v55 = vsel %vm2018_vm3, %v2008_v26, %v2011_v59  ;;  %v11492_v40 = vsel %vm11332_vm2, %v10498_v13, %v3527_v19 }
 0x30d   : > { %v2022_v35 = vsel %vm2018_vm3, %v2002_v16, %v2005_v49  ;;  %v2029_v36 = vsel %vm2019_vm6, %v2026_v3, %v2028_v20  ;;  %v2031_v47 = vsel %vm2021_vm4, %v2017_v51, 1326507024  ;;  %v1759_v34 = vsel %vm1676_vm12, %v1758_v52, %v1757_v38 }
 0x30e   : > { %v3404_v63 = vsub.s32 0, %v11487_v31  ;;  %v2024_v17 = vsel %vm2020_vm1, %v2008_v26, %v2023_v56  ;;  %v2032_v22 = vsel %vm2020_vm1, %v2014_v4, %v2031_v47  ;;  %vm3661_vm13 = vcmp.gt.s32.totalorder %v3660_v8, 0 }
 0x30f   : > { %v2033_v53 = vsel %vm2019_vm6, %v2030_v55, %v2032_v22  ;;  %v11499_v45 = vmul.u32.u64.low %v2034_v0, %v2029_v36  ;;  %v11500_v59 = vmul.u32.u64.high %v2034_v0, %v2029_v36, %v11499_v45  ;;  %v3662_v51 = vsel %vm3661_vm13, %v3660_v8, 0 }
 0x310   : > { %v8278_v60 = vmin.u32 %v3404_v63, %v11487_v31  ;;  %v11504_v49 = vmul.u32.u64.low %v2034_v0, %v2033_v53  ;;  %v11505_v19 = vmul.u32.u64.high %v2034_v0, %v2033_v53, %v11504_v49  ;;  %9068 = vcosq.f32 %v11492_v40 }
 0x311   : > { %v11510_v38 = vsel %vm11468_vm5, 0, %v1761_v30  ;;  %v2025_v4 = vsel %vm2019_vm6, %v2022_v35, %v2024_v17  ;;  %v3664_v55 = vand.u32 31, %v3662_v51  ;;  %v3394_v26 = vadd.s32 %v11435_v14, %v11432_v43 }
 0x312   : > { %v3406_v52 = vclz %v8278_v60  ;;  %v3658_v3 = vor.u32 8388608, %v11479_v1  ;;  %v11520_v8 = vsel %vm11468_vm5, %v10581_v46, %v1759_v34  ;;  %v3424_v56 = vsub.s32 4, %v11475_v12 }
 0x313   : > { %v2044_v30 = vadd.s32 1, %v11500_v59  ;;  %v3665_v42 = vsub.s32 32, %v3664_v55  ;;  %v2041_v20 = vmul.u32 %v2034_v0, %v2025_v4  ;;  %vm2043_vm2 = vc.u32 %v11505_v19, %v11499_v45 }
 0x314   : > { %v8279_v17 = vadd.s32 4294967294, %v3406_v52  ;;  %v11526_v43 = vshrl.u32 %v3662_v51, 5  ;;  %v3667_v1 = vshll.u32 %v13284_v32, %v3664_v55  ;;  %v3670_v35 = vshll.u32 %v13285_v18, %v3664_v55 }
 0x315   : > { %v2045_v14 = vsel %vm2043_vm2, %v2044_v30, %v11500_v59  ;;  %v3668_v57 = vshrl.u32 %v13285_v18, %v3665_v42  ;;  %v3671_v47 = vshrl.u32 %v13286_v23, %v3665_v42  ;;  %v3676_v34 = vshll.u32 %v13287_v2, %v3664_v55 }
 0x316   : > { %vm8280_vm7 = vcmp.lt.s32.totalorder %v8279_v17, 0  ;;  %v2046_v36 = vadd.s32 %v2045_v14, %v2041_v20  ;;  %vm3340_vm9 = vcmp.lt.s32.totalorder %v10676_v25, 0  ;;  %v3673_v63 = vshll.u32 %v13286_v23, %v3664_v55 }
 0x317   : > { %v3409_v0 = vsel %vm8280_vm7, 0, %v8279_v17  ;;  %v3674_v22 = vshrl.u32 %v13287_v2, %v3665_v42  ;;  %v3677_v53 = vshrl.u32 %v13288_v7, %v3665_v42  ;;  %v1885_v51 = vand.u32 2139095040, %v10983_v15 }
 0x318   : > { %v3410_v59 = vsub.s32 32, %v3409_v0  ;;  %v3414_v60 = vsub.s32 4294967266, %v3409_v0  ;;  %v2047_v49 = vadd.s32 536870912, %v2046_v36  ;;  %v3669_v4 = vor.u32 %v3668_v57, %v3667_v1 }
 0x319   : > { %v3678_v52 = vor.u32 %v3677_v53, %v3676_v34  ;;  %v3679_v30 = vshll.u32 %v13288_v7, %v3664_v55  ;;  %v3680_v20 = vshrl.u32 %v13289_v44, %v3665_v42  ;;  %v3672_v13 = vor.u32 %v3671_v47, %v3670_v35 }
 0x31a   : > { %v3412_v14 = vshrl.u32 %v3394_v26, %v3410_v59  ;;  %v3415_v16 = vadd.s32 127, %v3414_v60  ;;  %v2048_v17 = vshrl.u32 %v2047_v49, 30  ;;  %v11541_v62 = vpop.eup %9068  ;;  %v3666_v41 = vshrl.u32 %v13284_v32, %v3665_v42 }
 0x31b   : > { %13460 = vst [vmem:[#allocation105_spill] sm:$0xff] %v11541_v62  ;;  %v3675_v50 = vor.u32 %v3674_v22, %v3673_v63  ;;  %vm3682_vm10 = vcmp.lt.s32.totalorder %v11526_v43, 1  ;;  %vm3685_vm11 = vcmp.lt.s32.totalorder %v11526_v43, 4  ;;  %v3411_v1 = vshll.u32 %v11487_v31, %v3409_v0 }
 0x31c   : > { %v3416_v57 = vshll.u32 %v3415_v16, 23  ;;  %vm1988_vm8 = vcmp.lt.s32.totalorder %v10782_v33, 0  ;;  %v2049_v55 = vshll.u32 %v2048_v17, 30  ;;  %vm3684_vm14 = vcmp.lt.s32.totalorder %v11526_v43, 3 }
 0x31d   : > { %v3681_v26 = vor.u32 %v3680_v20, %v3679_v30  ;;  %vm3683_vm15 = vcmp.lt.s32.totalorder %v11526_v43, 2  ;;  %v3687_v35 = vsel %vm3685_vm11, %v3675_v50, 2102212464  ;;  %v3691_v42 = vsel %vm3685_vm11, %v3678_v52, 920167782 }
 0x31e   : > { %v13461_v47 = vand.u32 2147483647, %v10676_v25  ;;  %v3413_v31 = vor.u32 %v3412_v14, %v3411_v1  ;;  %v3417_v16 = vor.u32 4788187, %v3416_v57  ;;  %v11560_v0 = vsub.s32 %v2046_v36, %v2049_v55 }
 0x31f   : > { %v3690_v63 = vsel %vm3682_vm10, %v3669_v4, %v3672_v13  ;;  %v13464_v22 = vand.u32 2147483647, %v10782_v33  ;;  %v3686_v59 = vsel %vm3682_vm10, %v3666_v41, %v3669_v4  ;;  %v3688_v60 = vsel %vm3684_vm14, %v3672_v13, %v3687_v35 }
 0x320   : > { %vm11556_vm12 = vcmp.le.f32.partialorder %v13461_v47, 0.7853982  ;;  %v3692_v49 = vsel %vm3684_vm14, %v3675_v50, %v3691_v42  ;;  %v3698_v36 = vshll.u32 %v3658_v3, 8  ;;  %v3425_v30 = vsel %vm3340_vm9, %v3424_v56, %v11475_v12 }
 0x321   : > { %vm11566_vm0 = vcmp.le.f32.partialorder %v13464_v22, 0.7853982  ;;  %v2052_v20 = vsub.s32 0, %v11560_v0  ;;  %v2072_v14 = vsub.s32 4, %v2048_v17  ;;  %v3694_v1 = vsel %vm3682_vm10, %v3672_v13, %v3675_v50 }
 0x322   : > { %v3418_v57 = vand.u32 2147483647, %v3417_v16  ;;  %v3693_v41 = vsel %vm3683_vm15, %v3690_v63, %v3692_v49  ;;  %v3695_v4 = vsel %vm3685_vm11, %v3681_v26, 1326507024  ;;  %v1886_v55 = vshrl.u32 %v1885_v51, 23 }
 0x323   : > { %v3420_v35 = vcvt.s32.f32 %v3413_v31  ;;  %v8226_v3 = vmin.u32 %v2052_v20, %v11560_v0  ;;  %v3689_v12 = vsel %vm3683_vm15, %v3686_v59, %v3688_v60  ;;  %v3696_v56 = vsel %vm3684_vm14, %v3678_v52, %v3695_v4 }
 0x324   : > { %v3697_v50 = vsel %vm3683_vm15, %v3694_v1, %v3696_v56  ;;  %v11593_v13 = vmul.u32.u64.low %v3698_v36, %v3693_v41  ;;  %v11594_v42 = vmul.u32.u64.high %v3698_v36, %v3693_v41, %v11593_v13  ;;  %v8221_v47 = vadd.s32 4294967169, %v1886_v55 }
 0x325   : > { %v2054_v16 = vclz %v8226_v3  ;;  %v11597_v26 = vmul.u32.u64.low %v3698_v36, %v3697_v50  ;;  %v11598_v51 = vmul.u32.u64.high %v3698_v36, %v3697_v50, %v11597_v26  ;;  %v13467_v31 = vand.u32 2147483647, %v10983_v15 }
 0x326   : > { %9070 = vsinq.f32 %v11492_v40  ;;  %v3421_v22 = vmul.f32 %v3420_v35, %v3418_v57  ;;  %v2073_v52 = vsel %vm1988_vm8, %v2072_v14, %v2048_v17  ;;  %v1892_v43 = vadd.s32 1, %v8221_v47 }
 0x327   : > { %v1889_v63 = vand.u32 8388607, %v13467_v31  ;;  %9072 = vcosq.f32 %v11520_v8  ;;  %v11607_v59 = vadd.s32 3, %v11510_v38  ;;  %v8227_v60 = vadd.s32 4294967294, %v2054_v16 }
 0x328   : > { %v3705_v49 = vmul.u32 %v3698_v36, %v3689_v12  ;;  %v11611_v20 = vsel %vm11556_vm12, 0, %v3425_v30  ;;  %v3708_v1 = vadd.s32 1, %v11594_v42  ;;  %vm1893_vm5 = vcmp.gt.s32.totalorder %v1892_v43, 0 }
 0x329   : > { %13468 = vst [vmem:[#allocation106_spill] sm:$0xff] %v11611_v20  ;;  %v13234_v40 = vand.u32 2147483647, %v11095_v27  ;;  %vm8228_vm3 = vcmp.lt.s32.totalorder %v8227_v60, 0  ;;  %v11617_v17 = vsel %vm11566_vm0, 0, %v2073_v52  ;;  %vm3707_vm4 = vc.u32 %v11598_v51, %v11593_v13 }
 0x32a   : > { %13469 = vst [vmem:[#allocation107_spill] sm:$0xff] %v11617_v17  ;;  %v1890_v14 = vor.u32 8388608, %v1889_v63  ;;  %v3422_v57 = vxor.u32 2147483648, %v3421_v22  ;;  %v2057_v36 = vsel %vm8228_vm3, 0, %v8227_v60  ;;  %v3709_v41 = vsel %vm3707_vm4, %v3708_v1, %v11594_v42 }
 0x32b   : > { %v1894_v30 = vsel %vm1893_vm5, %v1892_v43, 0  ;;  %v2042_v4 = vadd.s32 %v11499_v45, %v11505_v19  ;;  %v2058_v55 = vsub.s32 32, %v2057_v36  ;;  %v2062_v35 = vsub.s32 4294967266, %v2057_v36 }
 0x32c   : > { %v3710_v3 = vadd.s32 %v3709_v41, %v3705_v49  ;;  %9074 = vsinq.f32 %v11520_v8  ;;  %v11626_v12 = vadd.s32 3, %v11611_v20  ;;  %v11629_v56 = vadd.s32 3, %v11617_v17 }
 0x32d   : > { %v1896_v50 = vand.u32 31, %v1894_v30  ;;  %v2059_v47 = vshll.u32 %v11560_v0, %v2057_v36  ;;  %v2060_v16 = vshrl.u32 %v2042_v4, %v2058_v55  ;;  %v2063_v42 = vadd.s32 127, %v2062_v35 }
 0x32e   : > { %13470 = vst [vmem:[#allocation108_spill] sm:$0xff] %v11626_v12  ;;  %13471 = vst [vmem:[#allocation109_spill] sm:$0xff] %v11629_v56  ;;  %v3711_v26 = vadd.s32 536870912, %v3710_v3  ;;  %v3423_v45 = vsel %vm3340_vm9, %v3422_v57, %v3421_v22  ;;  %v11634_v31 = vshll.u32 %v1890_v14, 8  ;;  %v3549_v8 = vand.u32 2139095040, %v11095_v27 }
 0x32f   : > { %v1897_v19 = vsub.s32 32, %v1896_v50  ;;  %v2061_v63 = vor.u32 %v2060_v16, %v2059_v47  ;;  %v2064_v52 = vshll.u32 %v2063_v42, 23  ;;  %v11641_v60 = vand.u32 8388607, %v13234_v40 }
 0x330   : > { %v11637_v43 = vshrl.u32 %v3711_v26, 30  ;;  %v11643_v0 = vpop.eup %9070  ;;  %v11645_v49 = vshrl.u32 %v1894_v30, 5  ;;  %v1899_v4 = vshll.u32 %v13284_v32, %v1896_v50  ;;  %v1902_v55 = vshll.u32 %v13285_v18, %v1896_v50 }
 0x331   : > { %13472 = vst [vmem:[#allocation110_spill] sm:$0xff] %v11643_v0  ;;  %v1900_v1 = vshrl.u32 %v13285_v18, %v1897_v19  ;;  %v1903_v22 = vshrl.u32 %v13286_v23, %v1897_v19  ;;  %v1906_v14 = vshrl.u32 %v13287_v2, %v1897_v19  ;;  %v11650_v57 = vpop.eup %9072  ;;  %v2065_v36 = vor.u32 4788187, %v2064_v52 }
 0x332   : > { %v3713_v41 = vshll.u32 %v11637_v43, 30  ;;  %v2068_v35 = vcvt.s32.f32 %v2061_v63  ;;  %v1905_v47 = vshll.u32 %v13286_v23, %v1896_v50  ;;  %v1908_v30 = vshll.u32 %v13287_v2, %v1896_v50 }
 0x333   : > { %v1909_v16 = vshrl.u32 %v13288_v7, %v1897_v19  ;;  %v2066_v42 = vand.u32 2147483647, %v2065_v36  ;;  %v1901_v40 = vor.u32 %v1900_v1, %v1899_v4  ;;  %v1904_v62 = vor.u32 %v1903_v22, %v1902_v55 }
 0x334   : > { %v11658_v26 = vsub.s32 %v3710_v3, %v3713_v41  ;;  %v1907_v0 = vor.u32 %v1906_v14, %v1905_v47  ;;  %v1911_v20 = vshll.u32 %v13288_v7, %v1896_v50  ;;  %v1912_v12 = vshrl.u32 %v13289_v44, %v1897_v19 }
 0x335   : > { %v1910_v52 = vor.u32 %v1909_v16, %v1908_v30  ;;  %v3426_v63 = vsel %vm11556_vm12, %v10676_v25, %v3423_v45  ;;  %vm3652_vm1 = vcmp.lt.s32.totalorder %v10879_v11, 0  ;;  %v3550_v56 = vshrl.u32 %v3549_v8, 23 }
 0x336   : > { %v3716_v17 = vsub.s32 0, %v11658_v26  ;;  %v11668_v36 = vpop.eup %9074  ;;  %v2069_v1 = vmul.f32 %v2068_v35, %v2066_v42  ;;  %v1898_v22 = vshrl.u32 %v13284_v32, %v1897_v19  ;;  %v1913_v14 = vor.u32 %v1912_v12, %v1911_v20 }
 0x337   : > { %vm1914_vm6 = vcmp.lt.s32.totalorder %v11645_v49, 1  ;;  %vm1916_vm13 = vcmp.lt.s32.totalorder %v11645_v49, 3  ;;  %vm1917_vm2 = vcmp.lt.s32.totalorder %v11645_v49, 4  ;;  %v13473_v55 = vand.u32 2147483647, %v10879_v11 }
 0x338   : > { %v8290_v50 = vmin.u32 %v3716_v17, %v11658_v26  ;;  %v1922_v34 = vsel %vm1914_vm6, %v1901_v40, %v1904_v62  ;;  %v1919_v45 = vsel %vm1917_vm2, %v1907_v0, 2102212464  ;;  %v1923_v41 = vsel %vm1917_vm2, %v1910_v52, 920167782 }
 0x339   : > { %v1926_v8 = vsel %vm1914_vm6, %v1904_v62, %v1907_v0  ;;  %v1927_v4 = vsel %vm1917_vm2, %v1913_v14, 1326507024  ;;  %vm11677_vm7 = vcmp.le.f32.partialorder %v13473_v55, 0.7853982  ;;  %v3736_v12 = vsub.s32 4, %v11637_v43 }
 0x33a   : > { %v3718_v20 = vclz %v8290_v50  ;;  %vm1915_vm9 = vcmp.lt.s32.totalorder %v11645_v49, 2  ;;  %v1924_v17 = vsel %vm1916_vm13, %v1907_v0, %v1923_v41  ;;  %v2070_v19 = vxor.u32 2147483648, %v2069_v1 }
 0x33b   : > { %v1918_v47 = vsel %vm1914_vm6, %v1898_v22, %v1901_v40  ;;  %v1925_v30 = vsel %vm1915_vm9, %v1922_v34, %v1924_v17  ;;  %v1928_v16 = vsel %vm1916_vm13, %v1910_v52, %v1927_v4  ;;  %v1920_v14 = vsel %vm1916_vm13, %v1904_v62, %v1919_v45 }
 0x33c   : > { %v8291_v42 = vadd.s32 4294967294, %v3718_v20  ;;  %v1929_v50 = vsel %vm1915_vm9, %v1926_v8, %v1928_v16  ;;  %v8285_v55 = vadd.s32 4294967169, %v3550_v56  ;;  %9076 = vcosq.f32 %v3426_v63 }
 0x33d   : > { %v3706_v0 = vadd.s32 %v11593_v13, %v11598_v51  ;;  %v11696_v40 = vmul.u32.u64.low %v11634_v31, %v1929_v50  ;;  %v11697_v22 = vmul.u32.u64.high %v11634_v31, %v1929_v50, %v11696_v40  ;;  %v2071_v62 = vsel %vm1988_vm8, %v2070_v19, %v2069_v1 }
 0x33e   : > { %vm8292_vm10 = vcmp.lt.s32.totalorder %v8291_v42, 0  ;;  %v11700_v34 = vmul.u32.u64.low %v11634_v31, %v1925_v30  ;;  %v11701_v52 = vmul.u32.u64.high %v11634_v31, %v1925_v30, %v11700_v34  ;;  %v3556_v41 = vadd.s32 1, %v8285_v55 }
 0x33f   : > { %v3721_v45 = vsel %vm8292_vm10, 0, %v8291_v42  ;;  %v3737_v56 = vsel %vm3652_vm1, %v3736_v12, %v11637_v43  ;;  %v1921_v13 = vsel %vm1915_vm9, %v1918_v47, %v1920_v14  ;;  %v2197_v4 = vand.u32 2139095040, %v11188_v6 }
 0x340   : > { %v3722_v51 = vsub.s32 32, %v3721_v45  ;;  %v3726_v8 = vsub.s32 4294967266, %v3721_v45  ;;  %vm3557_vm11 = vcmp.gt.s32.totalorder %v3556_v41, 0  ;;  %9078 = vsinq.f32 %v3426_v63 }
 0x341   : > { %vm1939_vm14 = vc.u32 %v11697_v22, %v11700_v34  ;;  %v3554_v20 = vor.u32 8388608, %v11641_v60  ;;  %v3558_v1 = vsel %vm3557_vm11, %v3556_v41, 0  ;;  %v3723_v17 = vshll.u32 %v11658_v26, %v3721_v45 }
 0x342   : > { %v3724_v19 = vshrl.u32 %v3706_v0, %v3722_v51  ;;  %v3727_v30 = vadd.s32 127, %v3726_v8  ;;  %v1940_v43 = vadd.s32 1, %v11701_v52  ;;  %v11720_v49 = vsel %vm11566_vm0, %v10782_v33, %v2071_v62 }
 0x343   : > { %v11724_v63 = vsel %vm11677_vm7, 0, %v3737_v56  ;;  %v1937_v12 = vmul.u32 %v11634_v31, %v1921_v13  ;;  %v3560_v47 = vand.u32 31, %v3558_v1  ;;  %v2198_v42 = vshrl.u32 %v2197_v4, 23 }
 0x344   : > { %13476 = vst [vmem:[#allocation111_spill] sm:$0xff] %v11724_v63  ;;  %v3725_v60 = vor.u32 %v3724_v19, %v3723_v17  ;;  %v3728_v16 = vshll.u32 %v3727_v30, 23  ;;  %v1941_v26 = vsel %vm1939_vm14, %v1940_v43, %v11701_v52  ;;  %v3559_v40 = vshrl.u32 %v3558_v1, 5 }
 0x345   : > { %v1942_v14 = vadd.s32 %v1941_v26, %v1937_v12  ;;  %v3561_v50 = vsub.s32 32, %v3560_v47  ;;  %v3563_v55 = vshll.u32 %v13284_v32, %v3560_v47  ;;  %v3566_v53 = vshll.u32 %v13285_v18, %v3560_v47 }
 0x346   : > { %v3729_v0 = vor.u32 4788187, %v3728_v16  ;;  %v3569_v41 = vshll.u32 %v13286_v23, %v3560_v47  ;;  %v3572_v62 = vshll.u32 %v13287_v2, %v3560_v47  ;;  %v11732_v45 = vpop.eup %9076  ;;  %v3732_v31 = vcvt.s32.f32 %v3725_v60 }
 0x347   : > { %13477 = vst [vmem:[#allocation112_spill] sm:$0xff] %v11732_v45  ;;  %v1943_v56 = vadd.s32 536870912, %v1942_v14  ;;  %v3564_v13 = vshrl.u32 %v13285_v18, %v3561_v50  ;;  %v3567_v52 = vshrl.u32 %v13286_v23, %v3561_v50  ;;  %vm1884_vm8 = vcmp.lt.s32.totalorder %v10983_v15, 0 }
 0x348   : > { %v3730_v51 = vand.u32 2147483647, %v3729_v0  ;;  %v3570_v8 = vshrl.u32 %v13287_v2, %v3561_v50  ;;  %v3573_v4 = vshrl.u32 %v13288_v7, %v3561_v50  ;;  %v3575_v1 = vshll.u32 %v13288_v7, %v3560_v47 }
 0x349   : > { %v1944_v17 = vshrl.u32 %v1943_v56, 30  ;;  %v3565_v19 = vor.u32 %v3564_v13, %v3563_v55  ;;  %v3568_v30 = vor.u32 %v3567_v52, %v3566_v53  ;;  %v3576_v43 = vshrl.u32 %v13289_v44, %v3561_v50 }
 0x34a   : > { %v3562_v12 = vshrl.u32 %v13284_v32, %v3561_v50  ;;  %v3571_v60 = vor.u32 %v3570_v8, %v3569_v41  ;;  %v3574_v16 = vor.u32 %v3573_v4, %v3572_v62  ;;  %vm3578_vm15 = vcmp.lt.s32.totalorder %v3559_v40, 1  ;;  %v11742_v26 = vpop.eup %9078 }
 0x34b   : > { %13478 = vst [vmem:[#allocation113_spill] sm:$0xff] %v11742_v26  ;;  %v3733_v0 = vmul.f32 %v3732_v31, %v3730_v51  ;;  %v13479_v3 = vand.u32 2147483647, %v10983_v15  ;;  %v1945_v47 = vshll.u32 %v1944_v17, 30  ;;  %vm3580_vm0 = vcmp.lt.s32.totalorder %v3559_v40, 3 }
 0x34c   : > { %v3594_v55 = vshll.u32 %v3554_v20, 8  ;;  %v1968_v53 = vsub.s32 4, %v1944_v17  ;;  %v3577_v56 = vor.u32 %v3576_v43, %v3575_v1  ;;  %vm3579_vm5 = vcmp.lt.s32.totalorder %v3559_v40, 2 }
 0x34d   : > { %vm11746_vm12 = vcmp.le.f32.partialorder %v13479_v3, 0.7853982  ;;  %vm3581_vm3 = vcmp.lt.s32.totalorder %v3559_v40, 4  ;;  %v11750_v50 = vsub.s32 %v1942_v14, %v1945_v47  ;;  %v3586_v62 = vsel %vm3578_vm15, %v3565_v19, %v3568_v30 }
 0x34e   : > { %v3583_v41 = vsel %vm3581_vm3, %v3571_v60, 2102212464  ;;  %v3587_v31 = vsel %vm3581_vm3, %v3574_v16, 920167782  ;;  %v3582_v3 = vsel %vm3578_vm15, %v3562_v12, %v3565_v19  ;;  %v8233_v51 = vadd.s32 4294967169, %v2198_v42 }
 0x34f   : > { %v3584_v13 = vsel %vm3580_vm0, %v3568_v30, %v3583_v41  ;;  %v3588_v52 = vsel %vm3580_vm0, %v3571_v60, %v3587_v31  ;;  %9080 = vcosq.f32 %v11720_v49  ;;  %v11760_v20 = vadd.s32 3, %v11724_v63 }
 0x350   : > { %v1948_v14 = vsub.s32 0, %v11750_v50  ;;  %v13483_v8 = vand.u32 2147483647, %v11188_v6  ;;  %v3734_v1 = vxor.u32 2147483648, %v3733_v0  ;;  %v3589_v43 = vsel %vm3579_vm5, %v3586_v62, %v3588_v52 }
 0x351   : > { %13482 = vst [vmem:[#allocation114_spill] sm:$0xff] %v11760_v20  ;;  %v3590_v19 = vsel %vm3578_vm15, %v3568_v30, %v3571_v60  ;;  %v3591_v12 = vsel %vm3581_vm3, %v3577_v56, 1326507024  ;;  %v1969_v42 = vsel %vm1884_vm8, %v1968_v53, %v1944_v17  ;;  %v3585_v41 = vsel %vm3579_vm5, %v3582_v3, %v3584_v13 }
 0x352   : > { %v2201_v4 = vand.u32 8388607, %v13483_v8  ;;  %v8222_v47 = vmin.u32 %v1948_v14, %v11750_v50  ;;  %v3592_v31 = vsel %vm3580_vm0, %v3574_v16, %v3591_v12  ;;  %v2204_v62 = vadd.s32 1, %v8233_v51 }
 0x353   : > { %v3593_v63 = vsel %vm3579_vm5, %v3590_v19, %v3592_v31  ;;  %v11774_v20 = vmul.u32.u64.low %v3594_v55, %v3589_v43  ;;  %v11775_v8 = vmul.u32.u64.high %v3594_v55, %v3589_v43, %v11774_v20  ;;  %9082 = vsinq.f32 %v11720_v49 }
 0x354   : > { %v1950_v30 = vclz %v8222_v47  ;;  %v11779_v60 = vmul.u32.u64.low %v3594_v55, %v3593_v63  ;;  %v11780_v56 = vmul.u32.u64.high %v3594_v55, %v3593_v63, %v11779_v60  ;;  %v3735_v17 = vsel %vm3652_vm1, %v3734_v1, %v3733_v0 }
 0x355   : > { %v11786_v53 = vsel %vm11746_vm12, 0, %v1969_v42  ;;  %v2202_v40 = vor.u32 8388608, %v2201_v4  ;;  %vm2205_vm4 = vcmp.gt.s32.totalorder %v2204_v62, 0  ;;  %v3601_v3 = vmul.u32 %v3594_v55, %v3585_v41 }
 0x356   : > { %13484 = vst [vmem:[#allocation115_spill] sm:$0xff] %v11786_v53  ;;  %v8223_v16 = vadd.s32 4294967294, %v1950_v30  ;;  %v2206_v13 = vsel %vm2205_vm4, %v2204_v62, 0  ;;  %v13241_v52 = vand.u32 2147483647, %v11263_v29  ;;  %v1938_v49 = vadd.s32 %v11700_v34, %v11697_v22 }
 0x357   : > { %v3604_v63 = vadd.s32 1, %v11775_v8  ;;  %v2208_v51 = vand.u32 31, %v2206_v13  ;;  %v3861_v14 = vand.u32 2139095040, %v11263_v29  ;;  %v11796_v0 = vsel %vm11677_vm7, %v10879_v11, %v3735_v17 }
 0x358   : > { %vm8224_vm1 = vcmp.lt.s32.totalorder %v8223_v16, 0  ;;  %v11799_v4 = vadd.s32 3, %v11786_v53  ;;  %vm3603_vm6 = vc.u32 %v11780_v56, %v11774_v20  ;;  %v11804_v1 = vshll.u32 %v2202_v40, 8 }
 0x359   : > { %v1953_v55 = vsel %vm8224_vm1, 0, %v8223_v16  ;;  %v3605_v22 = vsel %vm3603_vm6, %v3604_v63, %v11775_v8  ;;  %v2209_v34 = vsub.s32 32, %v2208_v51  ;;  %v11806_v43 = vpop.eup %9080  ;;  %v11810_v47 = vand.u32 8388607, %v13241_v52 }
 0x35a   : > { %13485 = vst [vmem:[#allocation116_spill] sm:$0xff] %v11799_v4  ;;  %13486 = vst [vmem:[#allocation117_spill] sm:$0xff] %v11806_v43  ;;  %v1954_v19 = vsub.s32 32, %v1953_v55  ;;  %v1958_v12 = vsub.s32 4294967266, %v1953_v55  ;;  %v3606_v35 = vadd.s32 %v3605_v22, %v3601_v3  ;;  %v1955_v42 = vshll.u32 %v11750_v50, %v1953_v55 }
 0x35b   : > { %v2207_v41 = vshrl.u32 %v2206_v13, 5  ;;  %v2212_v31 = vshrl.u32 %v13285_v18, %v2209_v34  ;;  %v3862_v62 = vshrl.u32 %v3861_v14, 23  ;;  %v2215_v17 = vshrl.u32 %v13286_v23, %v2209_v34 }
 0x35c   : > { %v1956_v30 = vshrl.u32 %v1938_v49, %v1954_v19  ;;  %v1959_v8 = vadd.s32 127, %v1958_v12  ;;  %v3607_v60 = vadd.s32 536870912, %v3606_v35  ;;  %v2211_v40 = vshll.u32 %v13284_v32, %v2208_v51 }
 0x35d   : > { %v2214_v16 = vshll.u32 %v13285_v18, %v2208_v51  ;;  %v2217_v3 = vshll.u32 %v13286_v23, %v2208_v51  ;;  %v2218_v63 = vshrl.u32 %v13287_v2, %v2209_v34  ;;  %v11819_v22 = vpop.eup %9082  ;;  %v2221_v14 = vshrl.u32 %v13288_v7, %v2209_v34 }
 0x35e   : > { %13487 = vst [vmem:[#allocation118_spill] sm:$0xff] %v11819_v22  ;;  %v1957_v50 = vor.u32 %v1956_v30, %v1955_v42  ;;  %v1960_v13 = vshll.u32 %v1959_v8, 23  ;;  %v3608_v55 = vshrl.u32 %v3607_v60, 30  ;;  %vm3548_vm13 = vcmp.lt.s32.totalorder %v11095_v27, 0 }
 0x35f   : > { %v2219_v49 = vor.u32 %v2218_v63, %v2217_v3  ;;  %v2220_v19 = vshll.u32 %v13287_v2, %v2208_v51  ;;  %v2223_v12 = vshll.u32 %v13288_v7, %v2208_v51  ;;  %v2224_v52 = vshrl.u32 %v13289_v44, %v2209_v34 }
 0x360   : > { %v1961_v11 = vor.u32 4788187, %v1960_v13  ;;  %v3609_v26 = vshll.u32 %v3608_v55, 30  ;;  %v2213_v25 = vor.u32 %v2212_v31, %v2211_v40  ;;  %v2216_v43 = vor.u32 %v2215_v17, %v2214_v16 }
 0x361   : > { %v2210_v22 = vshrl.u32 %v13284_v32, %v2209_v34  ;;  %v2222_v42 = vor.u32 %v2221_v14, %v2220_v19  ;;  %v2225_v30 = vor.u32 %v2224_v52, %v2223_v12  ;;  %vm2226_vm2 = vcmp.lt.s32.totalorder %v2207_v41, 1 }
 0x362   : > { %v1962_v8 = vand.u32 2147483647, %v1961_v11  ;;  %v1964_v60 = vcvt.s32.f32 %v1957_v50  ;;  %v13488_v33 = vand.u32 2147483647, %v11095_v27  ;;  %v11833_v51 = vsub.s32 %v3606_v35, %v3609_v26 }
 0x363   : > { %vm2229_vm9 = vcmp.lt.s32.totalorder %v2207_v41, 4  ;;  %v3632_v63 = vsub.s32 4, %v3608_v55  ;;  %vm2227_vm10 = vcmp.lt.s32.totalorder %v2207_v41, 2  ;;  %vm2228_vm11 = vcmp.lt.s32.totalorder %v2207_v41, 3 }
 0x364   : > { %vm11829_vm7 = vcmp.le.f32.partialorder %v13488_v33, 0.7853982  ;;  %v2231_v31 = vsel %vm2229_vm9, %v2219_v49, 2102212464  ;;  %v1965_v17 = vmul.f32 %v1964_v60, %v1962_v8  ;;  %v3612_v34 = vsub.s32 0, %v11833_v51 }
 0x365   : > { %v2230_v52 = vsel %vm2226_vm2, %v2210_v22, %v2213_v25  ;;  %v2234_v11 = vsel %vm2226_vm2, %v2213_v25, %v2216_v43  ;;  %v2232_v40 = vsel %vm2228_vm11, %v2216_v43, %v2231_v31  ;;  %v2235_v16 = vsel %vm2229_vm9, %v2222_v42, 920167782 }
 0x366   : > { %v2238_v33 = vsel %vm2226_vm2, %v2216_v43, %v2219_v49  ;;  %v2239_v50 = vsel %vm2229_vm9, %v2225_v30, 1326507024  ;;  %v1966_v13 = vxor.u32 2147483648, %v1965_v17  ;;  %v8286_v26 = vmin.u32 %v3612_v34, %v11833_v51 }
 0x367   : > { %v2236_v35 = vsel %vm2228_vm11, %v2219_v49, %v2235_v16  ;;  %v2240_v14 = vsel %vm2228_vm11, %v2222_v42, %v2239_v50  ;;  %9084 = vcosq.f32 %v11796_v0  ;;  %v8297_v8 = vadd.s32 4294967169, %v3862_v62 }
 0x368   : > { %v2237_v19 = vsel %vm2227_vm10, %v2234_v11, %v2236_v35  ;;  %v2241_v12 = vsel %vm2227_vm10, %v2238_v33, %v2240_v14  ;;  %v3614_v22 = vclz %v8286_v26  ;;  %v3633_v25 = vsel %vm3548_vm13, %v3632_v63, %v3608_v55 }
 0x369   : > { %v11846_v60 = vmul.u32.u64.low %v11804_v1, %v2241_v12  ;;  %v11847_v43 = vmul.u32.u64.high %v11804_v1, %v2241_v12, %v11846_v60  ;;  %v2233_v30 = vsel %vm2227_vm10, %v2230_v52, %v2232_v40  ;;  %v3868_v31 = vadd.s32 1, %v8297_v8 }
 0x36a   : > { %v11851_v49 = vmul.u32.u64.low %v11804_v1, %v2237_v19  ;;  %v11852_v42 = vmul.u32.u64.high %v11804_v1, %v2237_v19, %v11851_v49  ;;  %9086 = vsinq.f32 %v11796_v0  ;;  %v1967_v62 = vsel %vm1884_vm8, %v1966_v13, %v1965_v17 }
 0x36b   : > { %v8287_v34 = vadd.s32 4294967294, %v3614_v22  ;;  %v3866_v55 = vor.u32 8388608, %v11810_v47  ;;  %v3602_v63 = vadd.s32 %v11774_v20, %v11780_v56  ;;  %v11863_v41 = vsel %vm11829_vm7, 0, %v3633_v25 }
 0x36c   : > { %13491 = vst [vmem:[#allocation119_spill] sm:$0xff] %v11863_v41  ;;  %vm3869_vm14 = vcmp.gt.s32.totalorder %v3868_v31, 0  ;;  %v2249_v11 = vmul.u32 %v11804_v1, %v2233_v30  ;;  %vm2251_vm0 = vc.u32 %v11847_v43, %v11851_v49  ;;  %v11872_v47 = vsel %vm11746_vm12, %v10983_v15, %v1967_v62 }
 0x36d   : > { %vm8288_vm15 = vcmp.lt.s32.totalorder %v8287_v34, 0  ;;  %v3870_v0 = vsel %vm3869_vm14, %v3868_v31, 0  ;;  %v2252_v56 = vadd.s32 1, %v11852_v42  ;;  %v11877_v50 = vshll.u32 %v3866_v55, 8 }
 0x36e   : > { %v3617_v20 = vsel %vm8288_vm15, 0, %v8287_v34  ;;  %v3872_v17 = vand.u32 31, %v3870_v0  ;;  %v11875_v33 = vshrl.u32 %v3870_v0, 5  ;;  %vm2196_vm8 = vcmp.lt.s32.totalorder %v11188_v6, 0 }
 0x36f   : > { %v3618_v40 = vsub.s32 32, %v3617_v20  ;;  %v3622_v16 = vsub.s32 4294967266, %v3617_v20  ;;  %v3619_v1 = vshll.u32 %v11833_v51, %v3617_v20  ;;  %v2253_v13 = vsel %vm2251_vm0, %v2252_v56, %v11852_v42 }
 0x370   : > { %v3873_v26 = vsub.s32 32, %v3872_v17  ;;  %v3875_v35 = vshll.u32 %v13284_v32, %v3872_v17  ;;  %v2254_v19 = vadd.s32 %v2253_v13, %v2249_v11  ;;  %v3878_v12 = vshll.u32 %v13285_v18, %v3872_v17 }
 0x371   : > { %v3620_v45 = vshrl.u32 %v3602_v63, %v3618_v40  ;;  %v3623_v14 = vadd.s32 127, %v3622_v16  ;;  %v11884_v8 = vpop.eup %9084  ;;  %v3881_v51 = vshll.u32 %v13286_v23, %v3872_v17  ;;  %v3884_v62 = vshll.u32 %v13287_v2, %v3872_v17 }
 0x372   : > { %13492 = vst [vmem:[#allocation120_spill] sm:$0xff] %v11884_v8  ;;  %v3876_v22 = vshrl.u32 %v13285_v18, %v3873_v26  ;;  %v3879_v25 = vshrl.u32 %v13286_v23, %v3873_v26  ;;  %v3882_v60 = vshrl.u32 %v13287_v2, %v3873_v26  ;;  %v2255_v31 = vadd.s32 536870912, %v2254_v19 }
 0x373   : > { %v3621_v30 = vor.u32 %v3620_v45, %v3619_v1  ;;  %v3624_v42 = vshll.u32 %v3623_v14, 23  ;;  %v13493_v34 = vand.u32 2147483647, %v11188_v6  ;;  %v3874_v63 = vshrl.u32 %v13284_v32, %v3873_v26 }
 0x374   : > { %v3877_v11 = vor.u32 %v3876_v22, %v3875_v35  ;;  %v3885_v0 = vshrl.u32 %v13288_v7, %v3873_v26  ;;  %v2093_v20 = vand.u32 2139095040, %v11346_v5  ;;  %v11900_v56 = vpop.eup %9086  ;;  %v2256_v16 = vshrl.u32 %v2255_v31, 30 }
 0x375   : > { %vm11893_vm12 = vcmp.le.f32.partialorder %v13493_v34, 0.7853982  ;;  %13496 = vst [vmem:[#allocation121_spill] sm:$0xff] %v11900_v56  ;;  %v3625_v40 = vor.u32 4788187, %v3624_v42  ;;  %v3880_v1 = vor.u32 %v3879_v25, %v3878_v12  ;;  %v3887_v13 = vshll.u32 %v13288_v7, %v3872_v17 }
 0x376   : > { %v3628_v45 = vcvt.s32.f32 %v3621_v30  ;;  %v3883_v14 = vor.u32 %v3882_v60, %v3881_v51  ;;  %v3886_v34 = vor.u32 %v3885_v0, %v3884_v62  ;;  %v3888_v52 = vshrl.u32 %v13289_v44, %v3873_v26 }
 0x377   : > { %v3626_v8 = vand.u32 2147483647, %v3625_v40  ;;  %v2257_v53 = vshll.u32 %v2256_v16, 30  ;;  %v2280_v4 = vsub.s32 4, %v2256_v16  ;;  %vm3890_vm5 = vcmp.lt.s32.totalorder %v11875_v33, 1 }
 0x378   : > { %v3889_v35 = vor.u32 %v3888_v52, %v3887_v13  ;;  %vm3891_vm3 = vcmp.lt.s32.totalorder %v11875_v33, 2  ;;  %vm3893_vm4 = vcmp.lt.s32.totalorder %v11875_v33, 4  ;;  %v2094_v22 = vshrl.u32 %v2093_v20, 23  ;;  %v7322_v13 = vld [vmem:[%s13110_s2] sm:$0xff] }
 0x379   : > { %v3629_v42 = vmul.f32 %v3628_v45, %v3626_v8  ;;  %v11907_v12 = vsub.s32 %v2254_v19, %v2257_v53  ;;  %vm3892_vm1 = vcmp.lt.s32.totalorder %v11875_v33, 3  ;;  %v3895_v17 = vsel %vm3893_vm4, %v3883_v14, 2102212464  ;;  %v7323_v45 = vld [vmem:[%s13110_s2 + $0x8] sm:$0xff] }
 0x37a   : > { %v2281_v26 = vsel %vm2196_vm8, %v2280_v4, %v2256_v16  ;;  %v3894_v25 = vsel %vm3890_vm5, %v3874_v63, %v3877_v11  ;;  %v3898_v52 = vsel %vm3890_vm5, %v3877_v11, %v3880_v1  ;;  %v3899_v51 = vsel %vm3893_vm4, %v3886_v34, 920167782 }
 0x37b   : > { %v3630_v8 = vxor.u32 2147483648, %v3629_v42  ;;  %v2260_v53 = vsub.s32 0, %v11907_v12  ;;  %v3896_v19 = vsel %vm3892_vm1, %v3880_v1, %v3895_v17  ;;  %v3902_v60 = vsel %vm3890_vm5, %v3880_v1, %v3883_v14 }
 0x37c   : > { %9088 = vcosq.f32 %v11872_v47  ;;  %v3900_v4 = vsel %vm3892_vm1, %v3883_v14, %v3899_v51  ;;  %v3903_v30 = vsel %vm3893_vm4, %v3889_v35, 1326507024  ;;  %v8229_v31 = vadd.s32 4294967169, %v2094_v22 }
 0x37d   : > { %v8234_v62 = vmin.u32 %v2260_v53, %v11907_v12  ;;  %v11933_v63 = vsel %vm11893_vm12, 0, %v2281_v26  ;;  %v3901_v11 = vsel %vm3891_vm3, %v3898_v52, %v3900_v4  ;;  %v3904_v0 = vsel %vm3892_vm1, %v3886_v34, %v3903_v30 }
 0x37e   : > { %13497 = vst [vmem:[#allocation122_spill] sm:$0xff] %v11933_v63  ;;  %v3897_v20 = vsel %vm3891_vm3, %v3894_v25, %v3896_v19  ;;  %v3905_v40 = vsel %vm3891_vm3, %v3902_v60, %v3904_v0  ;;  %v11944_v16 = vmul.u32.u64.low %v11877_v50, %v3901_v11  ;;  %v11945_v1 = vmul.u32.u64.high %v11877_v50, %v3901_v11, %v11944_v16 }
 0x37f   : > { %v3631_v14 = vsel %vm3548_vm13, %v3630_v8, %v3629_v42  ;;  %v2262_v34 = vclz %v8234_v62  ;;  %v11957_v33 = vmul.u32.u64.low %v11877_v50, %v3905_v40  ;;  %v11958_v35 = vmul.u32.u64.high %v11877_v50, %v3905_v40, %v11957_v33 }
 0x380   : > { %9090 = vsinq.f32 %v11872_v47  ;;  %v11962_v22 = vadd.s32 3, %v11863_v41  ;;  %v2250_v17 = vadd.s32 %v11851_v49, %v11847_v43  ;;  %v2100_v26 = vadd.s32 1, %v8229_v31 }
 0x381   : > { %v8235_v25 = vadd.s32 4294967294, %v2262_v34  ;;  %v3913_v52 = vmul.u32 %v11877_v50, %v3897_v20  ;;  %v13499_v51 = vand.u32 2147483647, %v11346_v5  ;;  %v8783_v8 = vpack.c.bf16 %v7323_v45, %v7322_v13 }
 0x382   : > { %13498 = vst [vmem:[#allocation123_spill] sm:$0xff] %v11962_v22  ;;  %v11974_v53 = vsel %vm11829_vm7, %v11095_v27, %v3631_v14  ;;  %v11977_v47 = vadd.s32 3, %v11933_v63  ;;  %v3916_v19 = vadd.s32 1, %v11945_v1  ;;  %vm2101_vm6 = vcmp.gt.s32.totalorder %v2100_v26, 0 }
 0x383   : > { %v11969_v42 = vand.u32 8388607, %v13499_v51  ;;  %vm8236_vm13 = vcmp.lt.s32.totalorder %v8235_v25, 0  ;;  %vm3915_vm2 = vc.u32 %v11958_v35, %v11944_v16  ;;  %v2102_v43 = vsel %vm2101_vm6, %v2100_v26, 0  ;;  %8784 = vmatprep.subr.bf16.mxu1 %v8783_v8 }
 0x384   : > { %13500 = vst [vmem:[#allocation124_spill] sm:$0xff] %v11977_v47  ;;  %v2265_v50 = vsel %vm8236_vm13, 0, %v8235_v25  ;;  %vm3860_vm9 = vcmp.lt.s32.totalorder %v11263_v29, 0  ;;  %v3917_v3 = vsel %vm3915_vm2, %v3916_v19, %v11945_v1  ;;  %v2104_v60 = vand.u32 31, %v2102_v43  ;;  %8786 = vmatpush3.bf16.msra.mxu1 %v8783_v8 }
 0x385   : > { %v3757_v4 = vand.u32 2139095040, %v11464_v54  ;;  %v2266_v30 = vsub.s32 32, %v2265_v50  ;;  %v2270_v31 = vsub.s32 4294967266, %v2265_v50  ;;  %v3918_v62 = vadd.s32 %v3917_v3, %v3913_v52 }
 0x386   : > { %v2098_v11 = vor.u32 8388608, %v11969_v42  ;;  %v11987_v0 = vpop.eup %9088  ;;  %v2267_v20 = vshll.u32 %v11907_v12, %v2265_v50  ;;  %v13501_v40 = vand.u32 2147483647, %v11263_v29  ;;  %v11996_v1 = vshrl.u32 %v2102_v43, 5 }
 0x387   : > { %v2105_v45 = vsub.s32 32, %v2104_v60  ;;  %v2107_v14 = vshll.u32 %v13284_v32, %v2104_v60  ;;  %v2268_v34 = vshrl.u32 %v2250_v17, %v2266_v30  ;;  %v2271_v33 = vadd.s32 127, %v2270_v31 }
 0x388   : > { %vm11992_vm7 = vcmp.le.f32.partialorder %v13501_v40, 0.7853982  ;;  %v3919_v26 = vadd.s32 536870912, %v3918_v62  ;;  %v2110_v25 = vshll.u32 %v13285_v18, %v2104_v60  ;;  %v2113_v51 = vshll.u32 %v13286_v23, %v2104_v60 }
 0x389   : > { %v2108_v52 = vshrl.u32 %v13285_v18, %v2105_v45  ;;  %v2111_v12 = vshrl.u32 %v13286_v23, %v2105_v45  ;;  %v2114_v42 = vshrl.u32 %v13287_v2, %v2105_v45  ;;  %v2269_v8 = vor.u32 %v2268_v34, %v2267_v20 }
 0x38a   : > { %v2272_v19 = vshll.u32 %v2271_v33, 23  ;;  %v3920_v43 = vshrl.u32 %v3919_v26, 30  ;;  %v2117_v50 = vshrl.u32 %v13288_v7, %v2105_v45  ;;  %v12005_v3 = vpop.eup %9090  ;;  %v2106_v17 = vshrl.u32 %v13284_v32, %v2105_v45 }
 0x38b   : > { %v2109_v30 = vor.u32 %v2108_v52, %v2107_v14  ;;  %v2112_v31 = vor.u32 %v2111_v12, %v2110_v25  ;;  %v2116_v40 = vshll.u32 %v13287_v2, %v2104_v60  ;;  %v2115_v22 = vor.u32 %v2114_v42, %v2113_v51 }
 0x38c   : > { %v2273_v49 = vor.u32 4788187, %v2272_v19  ;;  %v3921_v56 = vshll.u32 %v3920_v43, 30  ;;  %v3944_v41 = vsub.s32 4, %v3920_v43  ;;  %v2276_v27 = vcvt.s32.f32 %v2269_v8 }
 0x38d   : > { %v2118_v63 = vor.u32 %v2117_v50, %v2116_v40  ;;  %v2119_v20 = vshll.u32 %v13288_v7, %v2104_v60  ;;  %v2120_v34 = vshrl.u32 %v13289_v44, %v2105_v45  ;;  %vm2122_vm10 = vcmp.lt.s32.totalorder %v11996_v1, 1 }
 0x38e   : > { %v2274_v33 = vand.u32 2147483647, %v2273_v49  ;;  %v12011_v26 = vsub.s32 %v3918_v62, %v3921_v56  ;;  %v3945_v47 = vsel %vm3860_vm9, %v3944_v41, %v3920_v43  ;;  %vm2123_vm11 = vcmp.lt.s32.totalorder %v11996_v1, 2 }
 0x38f   : > { %v2121_v14 = vor.u32 %v2120_v34, %v2119_v20  ;;  %vm2124_vm14 = vcmp.lt.s32.totalorder %v11996_v1, 3  ;;  %vm2125_vm15 = vcmp.lt.s32.totalorder %v11996_v1, 4  ;;  %v12022_v49 = vsel %vm11992_vm7, 0, %v3945_v47 }
 0x390   : > { %v2277_v25 = vmul.f32 %v2276_v27, %v2274_v33  ;;  %v3924_v60 = vsub.s32 0, %v12011_v26  ;;  %v2127_v56 = vsel %vm2125_vm15, %v2115_v22, 2102212464  ;;  %v2126_v41 = vsel %vm2122_vm10, %v2106_v17, %v2109_v30 }
 0x391   : > { %v2128_v62 = vsel %vm2124_vm14, %v2112_v31, %v2127_v56  ;;  %v2130_v45 = vsel %vm2122_vm10, %v2109_v30, %v2112_v31  ;;  %v2131_v52 = vsel %vm2125_vm15, %v2118_v63, 920167782  ;;  %v2134_v47 = vsel %vm2122_vm10, %v2112_v31, %v2115_v22 }
 0x392   : > { %v2278_v12 = vxor.u32 2147483648, %v2277_v25  ;;  %v8298_v27 = vmin.u32 %v3924_v60, %v12011_v26  ;;  %v2132_v51 = vsel %vm2124_vm14, %v2115_v22, %v2131_v52  ;;  %v2135_v8 = vsel %vm2125_vm15, %v2121_v14, 1326507024 }
 0x393   : > { %v2133_v42 = vsel %vm2123_vm11, %v2130_v45, %v2132_v51  ;;  %v2138_v19 = vshll.u32 %v2098_v11, 8  ;;  %v3758_v43 = vshrl.u32 %v3757_v4, 23  ;;  %v2136_v30 = vsel %vm2124_vm14, %v2118_v63, %v2135_v8  ;;  %v7324_v4 = vld [vmem:[%s13110_s2 + $0x10] sm:$0xff]  ;;  %v7325_v63 = vld [vmem:[%s13110_s2 + $0x18] sm:$0xff] }
 0x394   : > { %v2279_v50 = vsel %vm2196_vm8, %v2278_v12, %v2277_v25  ;;  %v3926_v17 = vclz %v8298_v27  ;;  %v13504_v40 = vand.u32 2147483647, %v11464_v54  ;;  %v2137_v31 = vsel %vm2123_vm11, %v2134_v47, %v2136_v30 }
 0x395   : > { %v2282_v22 = vsel %vm11893_vm12, %v11188_v6, %v2279_v50  ;;  %v12048_v34 = vmul.u32.u64.low %v2138_v19, %v2133_v42  ;;  %v12049_v11 = vmul.u32.u64.high %v2138_v19, %v2133_v42, %v12048_v34  ;;  %9092 = vcosq.f32 %v11974_v53 }
 0x396   : > { %v3761_v20 = vand.u32 8388607, %v13504_v40  ;;  %v8299_v33 = vadd.s32 4294967294, %v3926_v17  ;;  %v12058_v14 = vmul.u32.u64.low %v2138_v19, %v2137_v31  ;;  %v12059_v55 = vmul.u32.u64.high %v2138_v19, %v2137_v31, %v12058_v14 }
 0x397   : > { %9094 = vsinq.f32 %v11974_v53  ;;  %v3914_v25 = vadd.s32 %v11944_v16, %v11958_v35  ;;  %v12065_v60 = vadd.s32 3, %v12022_v49  ;;  %v8293_v56 = vadd.s32 4294967169, %v3758_v43  ;;  %v7326_v53 = vld [vmem:[%s13110_s2 + $0x20] sm:$0xff] }
 0x398   : > { %9096 = vcosq.f32 %v2282_v22  ;;  %vm8300_vm0 = vcmp.lt.s32.totalorder %v8299_v33, 0  ;;  %v2129_v45 = vsel %vm2123_vm11, %v2126_v41, %v2128_v62  ;;  %v8787_v52 = vpack.c.bf16 %v7325_v63, %v7324_v4 }
 0x399   : > { %v3929_v12 = vsel %vm8300_vm0, 0, %v8299_v33  ;;  %v2148_v27 = vadd.s32 1, %v12049_v11  ;;  %v3762_v51 = vor.u32 8388608, %v3761_v20  ;;  %v3764_v47 = vadd.s32 1, %v8293_v56 }
 0x39a   : > { %9098 = vsinq.f32 %v2282_v22  ;;  %v3930_v16 = vsub.s32 32, %v3929_v12  ;;  %v3934_v35 = vsub.s32 4294967266, %v3929_v12  ;;  %8788 = vmatprep.subr.bf16.mxu1 %v8787_v52  ;;  %v612_v42 = vlaneseq }
 0x39b   : > { %v3931_v8 = vshll.u32 %v12011_v26, %v3929_v12  ;;  %v2145_v43 = vmul.u32 %v2138_v19, %v2129_v45  ;;  %vm2147_vm8 = vc.u32 %v12059_v55, %v12048_v34  ;;  %vm3765_vm12 = vcmp.gt.s32.totalorder %v3764_v47, 0  ;;  %8790 = vmatpush3.bf16.msra.mxu1 %v8787_v52 }
 0x39c   : > { %v3932_v1 = vshrl.u32 %v3914_v25, %v3930_v16  ;;  %v3935_v41 = vadd.s32 127, %v3934_v35  ;;  %vm13258_vm5 = vcmp.lt.s32.totalorder %v11346_v5, 0  ;;  %v2149_v62 = vsel %vm2147_vm8, %v2148_v27, %v12049_v11  ;;  %8669 = vmatprep.subr.mxu1 %v7326_v53  ;;  %v13508_v11 = vld [vmem:[#allocation19_spill] sm:$0xff] }
 0x39d   : > { %v3766_v50 = vsel %vm3765_vm12, %v3764_v47, 0  ;;  %v13505_v17 = vand.u32 2147483647, %v11346_v5  ;;  %v12084_v26 = vadd.s32 %v12048_v34, %v12059_v55  ;;  %v2150_v19 = vadd.s32 %v2149_v62, %v2145_v43 }
 0x39e   : > { %v3768_v40 = vand.u32 31, %v3766_v50  ;;  %v12086_v20 = vshll.u32 %v3762_v51, 8  ;;  %v3933_v22 = vor.u32 %v3932_v1, %v3931_v8  ;;  %v3936_v31 = vshll.u32 %v3935_v41, 23 }
 0x39f   : > { %vm12079_vm3 = vcmp.le.f32.partialorder %v13505_v17, 0.7853982  ;;  %v12088_v4 = vand.u32 127, %v612_v42  ;;  %v12091_v63 = vand.u32 3, %v13508_v11  ;;  %v2151_v33 = vadd.s32 536870912, %v2150_v19  ;;  %8670 = vmatpush3.msra.mxu1 %v7326_v53  ;;  %v12096_v34 = vpop.eup %9092 }
 0x3a0   : > { %v12093_v14 = vshrl.u32 %v3766_v50, 5  ;;  %v3769_v25 = vsub.s32 32, %v3768_v40  ;;  %v3771_v56 = vshll.u32 %v13284_v32, %v3768_v40  ;;  %v3937_v55 = vor.u32 4788187, %v3936_v31 }
 0x3a1   : > { %v3940_v45 = vcvt.s32.f32 %v3933_v22  ;;  %v3774_v52 = vshll.u32 %v13285_v18, %v3768_v40  ;;  %v3780_v12 = vshll.u32 %v13287_v2, %v3768_v40  ;;  %v12100_v27 = vpop.eup %9094  ;;  %v2152_v51 = vshrl.u32 %v2151_v33, 30 }
 0x3a2   : > { %v3772_v47 = vshrl.u32 %v13285_v18, %v3769_v25  ;;  %v3775_v16 = vshrl.u32 %v13286_v23, %v3769_v25  ;;  %v3777_v35 = vshll.u32 %v13286_v23, %v3768_v40  ;;  %v12105_v42 = vpop.eup %9096  ;;  %v3938_v53 = vand.u32 2147483647, %v3937_v55 }
 0x3a3   : > { %v3770_v8 = vshrl.u32 %v13284_v32, %v3769_v25  ;;  %v3778_v43 = vshrl.u32 %v13287_v2, %v3769_v25  ;;  %v3781_v1 = vshrl.u32 %v13288_v7, %v3769_v25  ;;  %vm618_vm4 = vcmp.gt.s32.totalorder %v12088_v4, 0 }
 0x3a4   : > { %v2153_v41 = vshll.u32 %v2152_v51, 30  ;;  %v2176_v62 = vsub.s32 4, %v2152_v51  ;;  %v3773_v50 = vor.u32 %v3772_v47, %v3771_v56  ;;  %v3783_v18 = vshll.u32 %v13288_v7, %v3768_v40  ;;  %v12114_v23 = vpop.eup %9098 }
 0x3a5   : > { %vm614_vm1 = vcmp.ge.s32.totalorder %v12088_v4, 39  ;;  %vm616_vm6 = vcmp.eq.s32.totalorder %v12088_v4, 0  ;;  %v3941_v17 = vmul.f32 %v3940_v45, %v3938_v53  ;;  %v3776_v22 = vor.u32 %v3775_v16, %v3774_v52 }
 0x3a6   : > { %v3782_v32 = vor.u32 %v3781_v1, %v3780_v12  ;;  %v3784_v2 = vshrl.u32 %v13289_v44, %v3769_v25  ;;  %v12117_v31 = vsub.s32 %v2150_v19, %v2153_v41  ;;  %v2177_v11 = vsel %vm13258_vm5, %v2176_v62, %v2152_v51  ;;  %vm12184_vm15 = vmor %vm614_vm1, %vm616_vm6 }
 0x3a7   : > { %v3779_v33 = vor.u32 %v3778_v43, %v3777_v35  ;;  %vm3786_vm13 = vcmp.lt.s32.totalorder %v12093_v14, 1  ;;  %v3942_v7 = vxor.u32 2147483648, %v3941_v17  ;;  %v12124_v40 = vsel %vm12079_vm3, 0, %v2177_v11 }
 0x3a8   : > { %vm3787_vm2 = vcmp.lt.s32.totalorder %v12093_v14, 2  ;;  %vm3788_vm10 = vcmp.lt.s32.totalorder %v12093_v14, 3  ;;  %v2156_v56 = vsub.s32 0, %v12117_v31  ;;  %v3785_v44 = vor.u32 %v3784_v2, %v3783_v18 }
 0x3a9   : > { %vm3789_vm11 = vcmp.lt.s32.totalorder %v12093_v14, 4  ;;  %v3790_v19 = vsel %vm3786_vm13, %v3770_v8, %v3773_v50  ;;  %v3943_v25 = vsel %vm3860_vm9, %v3942_v7, %v3941_v17  ;;  %v3794_v45 = vsel %vm3786_vm13, %v3773_v50, %v3776_v22 }
 0x3aa   : > { %v3791_v55 = vsel %vm3789_vm11, %v3779_v33, 2102212464  ;;  %v3795_v52 = vsel %vm3789_vm11, %v3782_v32, 920167782  ;;  %v3946_v12 = vsel %vm11992_vm7, %v11263_v29, %v3943_v25  ;;  %v8230_v51 = vmin.u32 %v2156_v56, %v12117_v31 }
 0x3ab   : > { %v3792_v47 = vsel %vm3788_vm10, %v3776_v22, %v3791_v55  ;;  %v3796_v16 = vsel %vm3788_vm10, %v3779_v33, %v3795_v52  ;;  %9100 = vcosq.f32 %v3946_v12  ;;  %v3798_v8 = vsel %vm3786_vm13, %v3776_v22, %v3779_v33 }
 0x3ac   : > { %v3793_v35 = vsel %vm3787_vm2, %v3790_v19, %v3792_v47  ;;  %v3797_v53 = vsel %vm3787_vm2, %v3794_v45, %v3796_v16  ;;  %9102 = vsinq.f32 %v3946_v12  ;;  %v2158_v13 = vclz %v8230_v51  ;;  %v13519_v16 = vld [vmem:[#allocation17_spill] sm:$0xff] }
 0x3ad   : > { %v12155_v43 = vadd.s32 3, %v12124_v40  ;;  %v3799_v1 = vsel %vm3789_vm11, %v3785_v44, 1326507024  ;;  %v12162_v62 = vmul.u32.u64.low %v12086_v20, %v3797_v53  ;;  %v12163_v50 = vmul.u32.u64.high %v12086_v20, %v3797_v53, %v12162_v62 }
 0x3ae   : > { %v3800_v41 = vsel %vm3788_vm10, %v3782_v32, %v3799_v1  ;;  %vm619_vm9 = vcmp.le.s32.totalorder %v12088_v4, 6  ;;  %v8231_v18 = vadd.s32 4294967294, %v2158_v13  ;;  %v3809_v22 = vmul.u32 %v12086_v20, %v3793_v35 }
 0x3af   : > { %v3801_v17 = vsel %vm3787_vm2, %v3798_v8, %v3800_v41  ;;  %vm12171_vm7 = vmand %vm618_vm4, %vm619_vm9  ;;  %vm624_vm14 = vcmp.gt.s32.totalorder %v12088_v4, 13  ;;  %vm622_vm0 = vcmp.eq.s32.totalorder %v12088_v4, 13  ;;  %vm625_vm8 = vcmp.le.s32.totalorder %v12088_v4, 19 }
 0x3b0   : > { %v12177_v32 = vmul.u32.u64.low %v12086_v20, %v3801_v17  ;;  %v12178_v11 = vmul.u32.u64.high %v12086_v20, %v3801_v17, %v12177_v32  ;;  %vm8232_vm4 = vcmp.lt.s32.totalorder %v8231_v18, 0  ;;  %vm12191_vm13 = vmand %vm624_vm14, %vm625_vm8  ;;  %vm628_vm2 = vcmp.eq.s32.totalorder %v12088_v4, 26 }
 0x3b1   : > { %vm630_vm10 = vcmp.gt.s32.totalorder %v12088_v4, 26  ;;  %vm631_vm1 = vcmp.le.s32.totalorder %v12088_v4, 32  ;;  %v2161_v20 = vsel %vm8232_vm4, 0, %v8231_v18  ;;  %v3812_v7 = vadd.s32 1, %v12163_v50  ;;  %vm627_vm6 = vmor %vm12171_vm7, %vm12191_vm13  ;;  %v13525_v32 = vld [vmem:[#allocation26_spill] sm:$0xff] }
 0x3b2   : > { %vm729_vm11 = vcmp.lt.s32.totalorder %v12091_v63, 2  ;;  %v731_v56 = vxor.u32 2147483648, %v9985_v61  ;;  %v2162_v44 = vsub.s32 32, %v2161_v20  ;;  %v2163_v19 = vshll.u32 %v12117_v31, %v2161_v20  ;;  %vm12210_vm9 = vmor %vm12184_vm15, %vm622_vm0 }
 0x3b3   : > { %v2166_v25 = vsub.s32 4294967266, %v2161_v20  ;;  %vm730_vm14 = vcmp.eq.s32.totalorder %v12091_v63, 0  ;;  %vm3811_vm8 = vc.u32 %v12178_v11, %v12162_v62  ;;  %vm632_vm4 = vmand %vm630_vm10, %vm631_vm1  ;;  %vm733_vm5 = vcmp.eq.s32.totalorder %v12091_v63, 2 }
 0x3b4   : > { %v732_v45 = vsel %vm730_vm14, %v9982_v48, %v731_v56  ;;  %v734_v31 = vxor.u32 2147483648, %v9982_v48  ;;  %v2164_v52 = vshrl.u32 %v12084_v26, %v2162_v44  ;;  %vm3756_vm12 = vcmp.lt.s32.totalorder %v11464_v54, 0  ;;  %vm12227_vm15 = vmor %vm627_vm6, %vm632_vm4 }
 0x3b5   : > { %v2167_v12 = vadd.s32 127, %v2166_v25  ;;  %v3813_v51 = vsel %vm3811_vm8, %v3812_v7, %v12163_v50  ;;  %v4055_v35 = vand.u32 3, %v13519_v16  ;;  %v12232_v53 = vpop.eup %9100  ;;  %v13520_v26 = vand.u32 2147483647, %v11464_v54  ;;  %vm12250_vm13 = vmor %vm12210_vm9, %vm628_vm2  ;;  %v13528_v25 = vld [vmem:[#allocation5_spill] sm:$0xff] }
 0x3b6   : > { %v12241_v13 = vadd.s32 %v12162_v62, %v12178_v11  ;;  %v3814_v1 = vadd.s32 %v3813_v51, %v3809_v22  ;;  %v735_v41 = vsel %vm733_vm5, %v734_v31, %v9985_v61  ;;  %vm7334_vm7 = vcmask 326656   ;;  %v12244_v50 = vpop.eup %9102  ;;  %v13526_v22 = vld [vmem:[#allocation24_spill] sm:$0xff] }
 0x3b7   : > { %vm12236_vm0 = vcmp.le.f32.partialorder %v13520_v26, 0.7853982  ;;  %v2165_v18 = vor.u32 %v2164_v52, %v2163_v19  ;;  %v2168_v17 = vshll.u32 %v2167_v12, 23  ;;  %v736_v62 = vsel %vm729_vm11, %v732_v45, %v735_v41  ;;  %v13530_v12 = vld [vmem:[#allocation41_spill] sm:$0xff] }
 0x3b8   : > { %v7259_v11 = vsel %vm12227_vm15, %v13526_v22, %v13525_v32  ;;  %v3815_v14 = vadd.s32 536870912, %v3814_v1  ;;  %vm4056_vm5 = vcmp.lt.s32.totalorder %v4055_v35, 2  ;;  %vm4057_vm10 = vcmp.eq.s32.totalorder %v4055_v35, 0 }
 0x3b9   : > { %vm4060_vm1 = vcmp.eq.s32.totalorder %v4055_v35, 2  ;;  %v2169_v33 = vor.u32 4788187, %v2168_v17  ;;  %vm13527_vm6 = vweird.f32 %v9347_v37  ;;  %v4059_v20 = vsel %vm4057_vm10, %v9982_v48, %v731_v56 }
 0x3ba   : > { %v737_v4 = vsel %vm13527_vm6, nan, %v736_v62  ;;  %v4062_v7 = vsel %vm4060_vm1, %v734_v31, %v9985_v61  ;;  %v2172_v44 = vcvt.s32.f32 %v2165_v18  ;;  %v3816_v63 = vshrl.u32 %v3815_v14, 30  ;;  %vm13529_vm2 = vmmov %vm13527_vm6  ;;  %v13531_v61 = vld [vmem:[#allocation45_spill] sm:$0xff] }
 0x3bb   : > { %v4063_v19 = vsel %vm4056_vm5, %v4059_v20, %v4062_v7  ;;  %v7291_v55 = vsel %vm12250_vm13, %v13528_v25, %v7259_v11  ;;  %v2170_v45 = vand.u32 2147483647, %v2169_v33  ;;  %v936_v51 = vand.u32 3, %v13530_v12  ;;  %v13532_v11 = vld [vmem:[#allocation40_spill] sm:$0xff] }
 0x3bc   : > { %v4064_v52 = vsel %vm13529_vm2, nan, %v4063_v19  ;;  %v939_v16 = vxor.u32 2147483648, %v10428_v28  ;;  %v3817_v35 = vshll.u32 %v3816_v63, 30  ;;  %v3840_v26 = vsub.s32 4, %v3816_v63 }
 0x3bd   : > { %v7258_v48 = vsel %vm12227_vm15, %v737_v4, %v4064_v52  ;;  %v942_v56 = vxor.u32 2147483648, %v13531_v61  ;;  %v2173_v31 = vmul.f32 %v2172_v44, %v2170_v45  ;;  %vm937_vm11 = vcmp.lt.s32.totalorder %v936_v51, 2  ;;  %v13533_v4 = vld [vmem:[#allocation10_spill] sm:$0xff]  ;;  %v13536_v52 = vld [vmem:[#allocation32_spill] sm:$0xff] }
 0x3be   : > { %v7290_v41 = vsel %vm12250_vm13, %v9347_v37, %v7258_v48  ;;  %vm938_vm9 = vcmp.eq.s32.totalorder %v936_v51, 0  ;;  %v12277_v18 = vsub.s32 %v3814_v1, %v3817_v35  ;;  %v3841_v17 = vsel %vm3756_vm12, %v3840_v26, %v3816_v63  ;;  %v13535_v63 = vld [vmem:[#allocation8_spill] sm:$0xff] }
 0x3bf   : > { %8671 = vmatprep.mubr.msk.f32.mxu1 %vm7334_vm7, %v7290_v41  ;;  %v940_v62 = vsel %vm938_vm9, %v13531_v61, %v939_v16  ;;  %vm941_vm14 = vcmp.eq.s32.totalorder %v936_v51, 2  ;;  %v2174_v32 = vxor.u32 2147483648, %v2173_v31  ;;  %v12285_v22 = vsel %vm12236_vm0, 0, %v3841_v17  ;;  %v13537_v51 = vld [vmem:[#allocation38_spill] sm:$0xff] }
 0x3c0   : > { %8672 = vmatmul.mubr.msk.f32.vlgmr.msra.gmra.mrb[16].mxu1 %vm7334_vm7, %v7291_v55  ;;  %v943_v37 = vsel %vm941_vm14, %v942_v56, %v10428_v28  ;;  %v4261_v1 = vand.u32 3, %v13532_v11  ;;  %v3820_v14 = vsub.s32 0, %v12277_v18  ;;  %v12292_v33 = vadd.s32 3, %v12285_v22 }
 0x3c1   : > { %vm934_vm8 = vweird.f32 %v13533_v4  ;;  %v944_v20 = vsel %vm937_vm11, %v940_v62, %v943_v37  ;;  %vm13534_vm4 = vcmp.lt.s32.totalorder %v11346_v5, 0  ;;  %vm1038_vm10 = vweird.f32 %v13535_v63 }
 0x3c2   : > { %v2175_v7 = vsel %vm13534_vm4, %v2174_v32, %v2173_v31  ;;  %v945_v44 = vsel %vm934_vm8, nan, %v944_v20  ;;  %vm4263_vm5 = vcmp.eq.s32.totalorder %v4261_v1, 0  ;;  %v8294_v25 = vmin.u32 %v3820_v14, %v12277_v18  ;;  %v13538_v31 = vld [vmem:[#allocation37_spill] sm:$0xff] }
 0x3c3   : > { %v2178_v19 = vsel %vm12079_vm3, %v11346_v5, %v2175_v7  ;;  %v4265_v55 = vsel %vm4263_vm5, %v13531_v61, %v939_v16  ;;  %vm4266_vm1 = vcmp.eq.s32.totalorder %v4261_v1, 2  ;;  %vm4262_vm6 = vcmp.lt.s32.totalorder %v4261_v1, 2  ;;  %v13539_v32 = vld [vmem:[#allocation29_spill] sm:$0xff]  ;;  %v13540_v1 = vld [vmem:[#allocation14_spill] sm:$0xff] }
 0x3c4   : > { %v4268_v45 = vsel %vm4266_vm1, %v942_v56, %v10428_v28  ;;  %v1040_v12 = vand.u32 3, %v13536_v52  ;;  %v1043_v35 = vxor.u32 2147483648, %v13537_v51  ;;  %9104 = vcosq.f32 %v2178_v19 }
 0x3c5   : > { %v3822_v26 = vclz %v8294_v25  ;;  %v4269_v48 = vsel %vm4262_vm6, %v4265_v55, %v4268_v45  ;;  %v1046_v41 = vxor.u32 2147483648, %v13538_v31  ;;  %9106 = vsinq.f32 %v2178_v19 }
 0x3c6   : > { %v4270_v30 = vsel %vm934_vm8, nan, %v4269_v48  ;;  %vm1041_vm3 = vcmp.lt.s32.totalorder %v1040_v12, 2  ;;  %vm1042_vm2 = vcmp.eq.s32.totalorder %v1040_v12, 0  ;;  %vm1045_vm11 = vcmp.eq.s32.totalorder %v1040_v12, 2 }
 0x3c7   : > { %v8295_v16 = vadd.s32 4294967294, %v3822_v26  ;;  %v7260_v61 = vsel %vm12227_vm15, %v945_v44, %v4270_v30  ;;  %v1044_v28 = vsel %vm1042_vm2, %v13538_v31, %v1043_v35  ;;  %v1047_v56 = vsel %vm1045_vm11, %v1046_v41, %v13537_v51  ;;  %v13541_v26 = vld [vmem:[#allocation61_spill] sm:$0xff] }
 0x3c8   : > { %v7292_v17 = vsel %vm12250_vm13, %v13533_v4, %v7260_v61  ;;  %v1048_v62 = vsel %vm1041_vm3, %v1044_v28, %v1047_v56  ;;  %v4364_v37 = vand.u32 3, %v13539_v32  ;;  %vm1142_vm14 = vweird.f32 %v13540_v1 }
 0x3c9   : > { %vm8296_vm9 = vcmp.lt.s32.totalorder %v8295_v16, 0  ;;  %8674 = vmatprep.mubr.msk.f32.mxu1 %vm7334_vm7, %v7292_v17  ;;  %v1049_v11 = vsel %vm1038_vm10, nan, %v1048_v62  ;;  %v1144_v14 = vand.u32 3, %v10563_v39  ;;  %v1147_v7 = vxor.u32 2147483648, %v10613_v9  ;;  %v13544_v17 = vld [vmem:[#allocation12_spill] sm:$0xff] }
 0x3ca   : > { %v3825_v20 = vsel %vm8296_vm9, 0, %v8295_v16  ;;  %vm4365_vm8 = vcmp.lt.s32.totalorder %v4364_v37, 2  ;;  %vm4366_vm4 = vcmp.eq.s32.totalorder %v4364_v37, 0  ;;  %vm4369_vm5 = vcmp.eq.s32.totalorder %v4364_v37, 2 }
 0x3cb   : > { %v3826_v44 = vsub.s32 32, %v3825_v20  ;;  %v3830_v4 = vsub.s32 4294967266, %v3825_v20  ;;  %v4368_v19 = vsel %vm4366_vm4, %v13538_v31, %v1043_v35  ;;  %v3827_v25 = vshll.u32 %v12277_v18, %v3825_v20  ;;  %v13542_v35 = vld [vmem:[#allocation57_spill] sm:$0xff] }
 0x3cc   : > { %v4371_v55 = vsel %vm4369_vm5, %v1046_v41, %v13537_v51  ;;  %vm1145_vm1 = vcmp.lt.s32.totalorder %v1144_v14, 2  ;;  %vm1146_vm6 = vcmp.eq.s32.totalorder %v1144_v14, 0  ;;  %vm1149_vm3 = vcmp.eq.s32.totalorder %v1144_v14, 2  ;;  %v13546_v14 = vld [vmem:[#allocation54_spill] sm:$0xff] }
 0x3cd   : > { %v3828_v45 = vshrl.u32 %v12241_v13, %v3826_v44  ;;  %v3831_v52 = vadd.s32 127, %v3830_v4  ;;  %v4372_v39 = vsel %vm4365_vm8, %v4368_v19, %v4371_v55  ;;  %v1148_v48 = vsel %vm1146_vm6, %v13541_v26, %v1147_v7  ;;  %v13543_v13 = vld [vmem:[#allocation49_spill] sm:$0xff]  ;;  %v13545_v19 = vld [vmem:[#allocation58_spill] sm:$0xff] }
 0x3ce   : > { %v4373_v12 = vsel %vm1038_vm10, nan, %v4372_v39  ;;  %v1150_v30 = vxor.u32 2147483648, %v13541_v26  ;;  %v4467_v31 = vand.u32 3, %v13542_v35  ;;  %v12334_v16 = vpop.eup %9104  ;;  %v1248_v61 = vand.u32 3, %v13543_v13  ;;  %v13549_v35 = vld [vmem:[#allocation73_spill] sm:$0xff] }
 0x3cf   : > { %v3829_v18 = vor.u32 %v3828_v45, %v3827_v25  ;;  %v3832_v51 = vshll.u32 %v3831_v52, 23  ;;  %v7261_v41 = vsel %vm12227_vm15, %v1049_v11, %v4373_v12  ;;  %vm1246_vm2 = vweird.f32 %v13544_v17  ;;  %v12347_v11 = vpop.eup %9106  ;;  %v13547_v52 = vld [vmem:[#allocation47_spill] sm:$0xff] }
 0x3d0   : > { %v7293_v28 = vsel %vm12250_vm13, %v13535_v63, %v7261_v41  ;;  %v1151_v56 = vsel %vm1149_vm3, %v1150_v30, %v10613_v9  ;;  %vm4469_vm10 = vcmp.eq.s32.totalorder %v4467_v31, 0  ;;  %vm4468_vm11 = vcmp.lt.s32.totalorder %v4467_v31, 2 }
 0x3d1   : > { %v3833_v62 = vor.u32 4788187, %v3832_v51  ;;  %8675 = vmatmul.mubr.msk.f32.gmra.mrb[18].mxu1 %vm7334_vm7, %v7293_v28  ;;  %v1152_v32 = vsel %vm1145_vm1, %v1148_v48, %v1151_v56  ;;  %v4471_v37 = vsel %vm4469_vm10, %v13541_v26, %v1147_v7  ;;  %v3836_v20 = vcvt.s32.f32 %v3829_v18  ;;  %v13548_v48 = vld [vmem:[#allocation23_spill] sm:$0xff] }
 0x3d2   : > { %v1153_v44 = vsel %vm1142_vm14, nan, %v1152_v32  ;;  %vm4472_vm9 = vcmp.eq.s32.totalorder %v4467_v31, 2  ;;  %vm1249_vm8 = vcmp.lt.s32.totalorder %v1248_v61, 2  ;;  %vm1250_vm4 = vcmp.eq.s32.totalorder %v1248_v61, 0  ;;  %v13550_v32 = vld [vmem:[#allocation80_spill] sm:$0xff] }
 0x3d3   : > { %v3834_v63 = vand.u32 2147483647, %v3833_v62  ;;  %v4474_v4 = vsel %vm4472_vm9, %v1150_v30, %v10613_v9  ;;  %v1251_v25 = vxor.u32 2147483648, %v13545_v19  ;;  %vm1253_vm5 = vcmp.eq.s32.totalorder %v1248_v61, 2 }
 0x3d4   : > { %v4475_v55 = vsel %vm4468_vm11, %v4471_v37, %v4474_v4  ;;  %v1254_v45 = vxor.u32 2147483648, %v13546_v14  ;;  %v4570_v7 = vand.u32 3, %v13547_v52  ;;  %vm1350_vm1 = vweird.f32 %v13548_v48 }
 0x3d5   : > { %v3837_v39 = vmul.f32 %v3836_v20, %v3834_v63  ;;  %v4476_v12 = vsel %vm1142_vm14, nan, %v4475_v55  ;;  %v1252_v26 = vsel %vm1250_vm4, %v13546_v14, %v1251_v25  ;;  %v1352_v31 = vand.u32 3, %v13549_v35  ;;  %v13551_v20 = vld [vmem:[#allocation79_spill] sm:$0xff]  ;;  %v13552_v63 = vld [vmem:[#allocation72_spill] sm:$0xff] }
 0x3d6   : > { %v7262_v9 = vsel %vm12227_vm15, %v1153_v44, %v4476_v12  ;;  %v1255_v30 = vsel %vm1253_vm5, %v1254_v45, %v13545_v19  ;;  %vm4571_vm6 = vcmp.lt.s32.totalorder %v4570_v7, 2  ;;  %vm4572_vm3 = vcmp.eq.s32.totalorder %v4570_v7, 0 }
 0x3d7   : > { %v3838_v18 = vxor.u32 2147483648, %v3837_v39  ;;  %v7294_v51 = vsel %vm12250_vm13, %v13540_v1, %v7262_v9  ;;  %v1256_v41 = vsel %vm1249_vm8, %v1252_v26, %v1255_v30  ;;  %v4574_v13 = vsel %vm4572_vm3, %v13546_v14, %v1251_v25  ;;  %v13554_v26 = vld [vmem:[#allocation70_spill] sm:$0xff]  ;;  %v13555_v30 = vld [vmem:[#allocation76_spill] sm:$0xff] }
 0x3d8   : > { %8677 = vmatprep.mubr.msk.f32.mxu1 %vm7334_vm7, %v7294_v51  ;;  %v1257_v28 = vsel %vm1246_vm2, nan, %v1256_v41  ;;  %vm4575_vm14 = vcmp.eq.s32.totalorder %v4570_v7, 2  ;;  %vm1353_vm10 = vcmp.lt.s32.totalorder %v1352_v31, 2  ;;  %vm1354_vm11 = vcmp.eq.s32.totalorder %v1352_v31, 0  ;;  %v13556_v51 = vld [vmem:[#allocation75_spill] sm:$0xff] }
 0x3d9   : > { %v3839_v56 = vsel %vm3756_vm12, %v3838_v18, %v3837_v39  ;;  %v4577_v62 = vsel %vm4575_vm14, %v1254_v45, %v13545_v19  ;;  %v1355_v37 = vxor.u32 2147483648, %v13550_v32  ;;  %vm1357_vm9 = vcmp.eq.s32.totalorder %v1352_v31, 2  ;;  %v13553_v19 = vld [vmem:[#allocation20_spill] sm:$0xff]  ;;  %v13557_v31 = vld [vmem:[#allocation65_spill] sm:$0xff] }
 0x3da   : > { %v3842_v1 = vsel %vm12236_vm0, %v11464_v54, %v3839_v56  ;;  %v4578_v61 = vsel %vm4571_vm6, %v4574_v13, %v4577_v62  ;;  %v1358_v44 = vxor.u32 2147483648, %v13551_v20  ;;  %v4673_v4 = vand.u32 3, %v13552_v63 }
 0x3db   : > { %9108 = vcosq.f32 %v3842_v1  ;;  %v4579_v25 = vsel %vm1246_vm2, nan, %v4578_v61  ;;  %v1356_v55 = vsel %vm1354_vm11, %v13551_v20, %v1355_v37  ;;  %vm1454_vm12 = vweird.f32 %v13553_v19 }
 0x3dc   : > { %9110 = vsinq.f32 %v3842_v1  ;;  %v7263_v14 = vsel %vm12227_vm15, %v1257_v28, %v4579_v25  ;;  %v1359_v8 = vsel %vm1357_vm9, %v1358_v44, %v13550_v32  ;;  %vm4674_vm0 = vcmp.lt.s32.totalorder %v4673_v4, 2 }
 0x3dd   : > { %v7295_v45 = vsel %vm12250_vm13, %v13544_v17, %v7263_v14  ;;  %v1360_v52 = vsel %vm1353_vm10, %v1356_v55, %v1359_v8  ;;  %vm4675_vm8 = vcmp.eq.s32.totalorder %v4673_v4, 0  ;;  %vm4678_vm4 = vcmp.eq.s32.totalorder %v4673_v4, 2  ;;  %v13558_v14 = vld [vmem:[#allocation90_spill] sm:$0xff] }
 0x3de   : > { %8678 = vmatmul.mubr.msk.f32.gmra.mrb[20].mxu1 %vm7334_vm7, %v7295_v45  ;;  %v1361_v7 = vsel %vm1350_vm1, nan, %v1360_v52  ;;  %v4677_v39 = vsel %vm4675_vm8, %v13551_v20, %v1355_v37  ;;  %v4680_v12 = vsel %vm4678_vm4, %v1358_v44, %v13550_v32  ;;  %v1456_v35 = vand.u32 3, %v13554_v26  ;;  %v13559_v45 = vld [vmem:[#allocation33_spill] sm:$0xff] }
 0x3df   : > { %v4681_v9 = vsel %vm4674_vm0, %v4677_v39, %v4680_v12  ;;  %v1459_v18 = vxor.u32 2147483648, %v13555_v30  ;;  %v1462_v17 = vxor.u32 2147483648, %v13556_v51  ;;  %v4776_v41 = vand.u32 3, %v13557_v31  ;;  %v13560_v52 = vld [vmem:[#allocation85_spill] sm:$0xff] }
 0x3e0   : > { %v4682_v13 = vsel %vm1350_vm1, nan, %v4681_v9  ;;  %vm1457_vm2 = vcmp.lt.s32.totalorder %v1456_v35, 2  ;;  %vm1458_vm5 = vcmp.eq.s32.totalorder %v1456_v35, 0  ;;  %vm1461_vm6 = vcmp.eq.s32.totalorder %v1456_v35, 2 }
 0x3e1   : > { %v7264_v28 = vsel %vm12227_vm15, %v1361_v7, %v4682_v13  ;;  %v1460_v56 = vsel %vm1458_vm5, %v13556_v51, %v1459_v18  ;;  %v1463_v62 = vsel %vm1461_vm6, %v1462_v17, %v13555_v30  ;;  %vm4777_vm3 = vcmp.lt.s32.totalorder %v4776_v41, 2 }
 0x3e2   : > { %v7296_v32 = vsel %vm12250_vm13, %v13548_v48, %v7264_v28  ;;  %v1464_v37 = vsel %vm1457_vm2, %v1460_v56, %v1463_v62  ;;  %vm4778_vm14 = vcmp.eq.s32.totalorder %v4776_v41, 0  ;;  %vm4781_vm10 = vcmp.eq.s32.totalorder %v4776_v41, 2  ;;  %v13562_v41 = vld [vmem:[#allocation88_spill] sm:$0xff]  ;;  %v13563_v56 = vld [vmem:[#allocation82_spill] sm:$0xff] }
 0x3e3   : > { %8680 = vmatprep.mubr.msk.f32.mxu1 %vm7334_vm7, %v7296_v32  ;;  %v1465_v1 = vsel %vm1454_vm12, nan, %v1464_v37  ;;  %v4780_v61 = vsel %vm4778_vm14, %v13556_v51, %v1459_v18  ;;  %v4783_v20 = vsel %vm4781_vm10, %v1462_v17, %v13555_v30  ;;  %vm1558_vm1 = vweird.f32 %v10199_v10  ;;  %v13561_v17 = vld [vmem:[#allocation92_spill] sm:$0xff] }
 0x3e4   : > { %v4784_v44 = vsel %vm4777_vm3, %v4780_v61, %v4783_v20  ;;  %v1560_v63 = vand.u32 3, %v11191_v21  ;;  %v1563_v4 = vxor.u32 2147483648, %v11382_v58  ;;  %v1566_v48 = vxor.u32 2147483648, %v11373_v24 }
 0x3e5   : > { %v12419_v25 = vpop.eup %9108  ;;  %v4785_v55 = vsel %vm1454_vm12, nan, %v4784_v44  ;;  %v4879_v8 = vand.u32 3, %v13558_v14  ;;  %vm1662_vm11 = vweird.f32 %v13559_v45  ;;  %v1664_v7 = vand.u32 3, %v13560_v52  ;;  %v13564_v14 = vld [vmem:[#allocation50_spill] sm:$0xff] }
 0x3e6   : > { %v12426_v39 = vpop.eup %9110  ;;  %v7265_v21 = vsel %vm12227_vm15, %v1465_v1, %v4785_v55  ;;  %vm1561_vm9 = vcmp.lt.s32.totalorder %v1560_v63, 2  ;;  %vm1562_vm0 = vcmp.eq.s32.totalorder %v1560_v63, 0  ;;  %vm1565_vm8 = vcmp.eq.s32.totalorder %v1560_v63, 2 }
 0x3e7   : > { %v7297_v12 = vsel %vm12250_vm13, %v13553_v19, %v7265_v21  ;;  %v1564_v26 = vsel %vm1562_vm0, %v11373_v24, %v1563_v4  ;;  %v1567_v35 = vsel %vm1565_vm8, %v1566_v48, %v11382_v58  ;;  %vm4880_vm12 = vcmp.lt.s32.totalorder %v4879_v8, 2 }
 0x3e8   : > { %8681 = vmatmul.mubr.msk.f32.gmra.mrb[22].mxu1 %vm7334_vm7, %v7297_v12  ;;  %v1568_v9 = vsel %vm1561_vm9, %v1564_v26, %v1567_v35  ;;  %vm4881_vm4 = vcmp.eq.s32.totalorder %v4879_v8, 0  ;;  %vm4884_vm2 = vcmp.eq.s32.totalorder %v4879_v8, 2  ;;  %vm1665_vm5 = vcmp.lt.s32.totalorder %v1664_v7, 2  ;;  %v13566_v12 = vld [vmem:[#allocation104_spill] sm:$0xff] }
 0x3e9   : > { %v1569_v30 = vsel %vm1558_vm1, nan, %v1568_v9  ;;  %v4883_v18 = vsel %vm4881_vm4, %v11373_v24, %v1563_v4  ;;  %v4886_v51 = vsel %vm4884_vm2, %v1566_v48, %v11382_v58  ;;  %vm1666_vm6 = vcmp.eq.s32.totalorder %v1664_v7, 0 }
 0x3ea   : > { %v4887_v19 = vsel %vm4880_vm12, %v4883_v18, %v4886_v51  ;;  %v1667_v31 = vxor.u32 2147483648, %v13561_v17  ;;  %vm1669_vm3 = vcmp.eq.s32.totalorder %v1664_v7, 2  ;;  %v1670_v13 = vxor.u32 2147483648, %v13562_v41  ;;  %v13565_v7 = vld [vmem:[#allocation98_spill] sm:$0xff] }
 0x3eb   : > { %v4888_v28 = vsel %vm1558_vm1, nan, %v4887_v19  ;;  %v4982_v62 = vand.u32 3, %v13563_v56  ;;  %vm1766_vm14 = vweird.f32 %v10581_v46  ;;  %v1768_v32 = vand.u32 3, %v11607_v59 }
 0x3ec   : > { %v7266_v24 = vsel %vm12227_vm15, %v1569_v30, %v4888_v28  ;;  %v1668_v58 = vsel %vm1666_vm6, %v13562_v41, %v1667_v31  ;;  %v1671_v37 = vsel %vm1669_vm3, %v1670_v13, %v13561_v17  ;;  %v1771_v1 = vxor.u32 2147483648, %v11668_v36 }
 0x3ed   : > { %v7298_v61 = vsel %vm12250_vm13, %v10199_v10, %v7266_v24  ;;  %v1672_v20 = vsel %vm1665_vm5, %v1668_v58, %v1671_v37  ;;  %vm4983_vm10 = vcmp.lt.s32.totalorder %v4982_v62, 2  ;;  %vm4984_vm1 = vcmp.eq.s32.totalorder %v4982_v62, 0 }
 0x3ee   : > { %8683 = vmatprep.mubr.msk.f32.mxu1 %vm7334_vm7, %v7298_v61  ;;  %v1673_v59 = vsel %vm1662_vm11, nan, %v1672_v20  ;;  %v4986_v44 = vsel %vm4984_vm1, %v13562_v41, %v1667_v31  ;;  %vm4987_vm9 = vcmp.eq.s32.totalorder %v4982_v62, 2  ;;  %vm1769_vm0 = vcmp.lt.s32.totalorder %v1768_v32, 2 }
 0x3ef   : > { %v4989_v63 = vsel %vm4987_vm9, %v1670_v13, %v13561_v17  ;;  %vm1770_vm8 = vcmp.eq.s32.totalorder %v1768_v32, 0  ;;  %vm1773_vm12 = vcmp.eq.s32.totalorder %v1768_v32, 2  ;;  %v1774_v4 = vxor.u32 2147483648, %v11650_v57  ;;  %v13567_v17 = vld [vmem:[#allocation102_spill] sm:$0xff]  ;;  %v13568_v13 = vld [vmem:[#allocation96_spill] sm:$0xff] }
 0x3f0   : > { %v4990_v10 = vsel %vm4983_vm10, %v4986_v44, %v4989_v63  ;;  %v1772_v48 = vsel %vm1770_vm8, %v11650_v57, %v1771_v1  ;;  %v5085_v55 = vand.u32 3, %v11510_v38  ;;  %vm1870_vm4 = vweird.f32 %v13564_v14  ;;  %v13570_v63 = vld [vmem:[#allocation115_spill] sm:$0xff] }
 0x3f1   : > { %v4991_v8 = vsel %vm1662_vm11, nan, %v4990_v10  ;;  %v1775_v52 = vsel %vm1773_vm12, %v1774_v4, %v11668_v36  ;;  %v1872_v21 = vand.u32 3, %v13565_v7  ;;  %v1875_v26 = vxor.u32 2147483648, %v13566_v12  ;;  %v13571_v10 = vld [vmem:[#allocation68_spill] sm:$0xff]  ;;  %v13573_v7 = vld [vmem:[#allocation118_spill] sm:$0xff] }
 0x3f2   : > { %v7267_v35 = vsel %vm12227_vm15, %v1673_v59, %v4991_v8  ;;  %v1776_v9 = vsel %vm1769_vm0, %v1772_v48, %v1775_v52  ;;  %vm5086_vm2 = vcmp.lt.s32.totalorder %v5085_v55, 2  ;;  %vm5087_vm5 = vcmp.eq.s32.totalorder %v5085_v55, 0  ;;  %v13572_v48 = vld [vmem:[#allocation109_spill] sm:$0xff] }
 0x3f3   : > { %v7299_v38 = vsel %vm12250_vm13, %v13559_v45, %v7267_v35  ;;  %v1777_v30 = vsel %vm1766_vm14, nan, %v1776_v9  ;;  %v5089_v18 = vsel %vm5087_vm5, %v11650_v57, %v1771_v1  ;;  %vm5090_vm11 = vcmp.eq.s32.totalorder %v5085_v55, 2  ;;  %v13569_v57 = vld [vmem:[#allocation116_spill] sm:$0xff] }
 0x3f4   : > { %8684 = vmatmul.mubr.msk.f32.gmra.mrb[24].mxu1 %vm7334_vm7, %v7299_v38  ;;  %v5092_v51 = vsel %vm5090_vm11, %v1774_v4, %v11668_v36  ;;  %vm1873_vm6 = vcmp.lt.s32.totalorder %v1872_v21, 2  ;;  %vm1874_vm3 = vcmp.eq.s32.totalorder %v1872_v21, 0  ;;  %vm1877_vm10 = vcmp.eq.s32.totalorder %v1872_v21, 2 }
 0x3f5   : > { %v5093_v19 = vsel %vm5086_vm2, %v5089_v18, %v5092_v51  ;;  %v1876_v31 = vsel %vm1874_vm3, %v13567_v17, %v1875_v26  ;;  %v1878_v41 = vxor.u32 2147483648, %v13567_v17  ;;  %v5188_v45 = vand.u32 3, %v13568_v13  ;;  %v13575_v51 = vld [vmem:[#allocation107_spill] sm:$0xff] }
 0x3f6   : > { %v5094_v28 = vsel %vm1766_vm14, nan, %v5093_v19  ;;  %vm1974_vm1 = vweird.f32 %v10983_v15  ;;  %v1976_v56 = vand.u32 3, %v13569_v57  ;;  %v1979_v62 = vxor.u32 2147483648, %v12005_v3 }
 0x3f7   : > { %v7268_v36 = vsel %vm12227_vm15, %v1777_v30, %v5094_v28  ;;  %v1879_v32 = vsel %vm1877_vm10, %v1878_v41, %v13566_v12  ;;  %vm5189_vm9 = vcmp.lt.s32.totalorder %v5188_v45, 2  ;;  %vm5190_vm0 = vcmp.eq.s32.totalorder %v5188_v45, 0 }
 0x3f8   : > { %v7300_v24 = vsel %vm12250_vm13, %v10581_v46, %v7268_v36  ;;  %v1880_v58 = vsel %vm1873_vm6, %v1876_v31, %v1879_v32  ;;  %v5192_v37 = vsel %vm5190_vm0, %v13567_v17, %v1875_v26  ;;  %vm5193_vm14 = vcmp.eq.s32.totalorder %v5188_v45, 2 }
 0x3f9   : > { %8686 = vmatprep.mubr.msk.f32.mxu1 %vm7334_vm7, %v7300_v24  ;;  %v1881_v1 = vsel %vm1870_vm4, nan, %v1880_v58  ;;  %v5195_v61 = vsel %vm5193_vm14, %v1878_v41, %v13566_v12  ;;  %vm1977_vm8 = vcmp.lt.s32.totalorder %v1976_v56, 2  ;;  %vm1978_vm12 = vcmp.eq.s32.totalorder %v1976_v56, 0  ;;  %v13574_v12 = vld [vmem:[#allocation117_spill] sm:$0xff] }
 0x3fa   : > { %v5196_v20 = vsel %vm5189_vm9, %v5192_v37, %v5195_v61  ;;  %v1980_v59 = vsel %vm1978_vm12, %v11987_v0, %v1979_v62  ;;  %vm1981_vm2 = vcmp.eq.s32.totalorder %v1976_v56, 2  ;;  %v1982_v46 = vxor.u32 2147483648, %v11987_v0 }
 0x3fb   : > { %v5197_v44 = vsel %vm1870_vm4, nan, %v5196_v20  ;;  %v5291_v4 = vand.u32 3, %v13570_v63  ;;  %vm2078_vm5 = vweird.f32 %v13571_v10  ;;  %v2080_v55 = vand.u32 3, %v13572_v48 }
 0x3fc   : > { %v7269_v8 = vsel %vm12227_vm15, %v1881_v1, %v5197_v44  ;;  %v1983_v52 = vsel %vm1981_vm2, %v1982_v46, %v12005_v3  ;;  %v2083_v21 = vxor.u32 2147483648, %v13573_v7  ;;  %v2086_v26 = vxor.u32 2147483648, %v13574_v12 }
 0x3fd   : > { %v7301_v35 = vsel %vm12250_vm13, %v13564_v14, %v7269_v8  ;;  %v1984_v9 = vsel %vm1977_vm8, %v1980_v59, %v1983_v52  ;;  %vm5292_vm4 = vcmp.lt.s32.totalorder %v5291_v4, 2  ;;  %vm5293_vm11 = vcmp.eq.s32.totalorder %v5291_v4, 0 }
 0x3fe   : > { %8687 = vmatmul.mubr.msk.f32.gmra.mrb[26].mxu1 %vm7334_vm7, %v7301_v35  ;;  %v1985_v38 = vsel %vm1974_vm1, nan, %v1984_v9  ;;  %v5295_v30 = vsel %vm5293_vm11, %v11987_v0, %v1979_v62  ;;  %vm5296_vm6 = vcmp.eq.s32.totalorder %v5291_v4, 2  ;;  %vm2081_vm3 = vcmp.lt.s32.totalorder %v2080_v55, 2  ;;  %v13578_v9 = vld [vmem:[#allocation7_spill] sm:$0xff] }
 0x3ff   : > { %v5298_v18 = vsel %vm5296_vm6, %v1982_v46, %v12005_v3  ;;  %vm2082_vm10 = vcmp.eq.s32.totalorder %v2080_v55, 0  ;;  %vm2085_vm9 = vcmp.eq.s32.totalorder %v2080_v55, 2  ;;  %v5394_v19 = vand.u32 3, %v13575_v51  ;;  %v13576_v46 = vld [vmem:[#allocation124_spill] sm:$0xff] }
 0x400   : > { %v5299_v17 = vsel %vm5292_vm4, %v5295_v30, %v5298_v18  ;;  %v2084_v14 = vsel %vm2082_vm10, %v13574_v12, %v2083_v21  ;;  %v2087_v31 = vsel %vm2085_vm9, %v2086_v26, %v13573_v7  ;;  %vm2182_vm0 = vweird.f32 %v11346_v5  ;;  %v13579_v30 = vld [vmem:[#allocation31_spill] sm:$0xff]  ;;  %v13580_v51 = vld [vmem:[#allocation36_spill] sm:$0xff] }
 0x401   : > { %v5300_v41 = vsel %vm1974_vm1, nan, %v5299_v17  ;;  %v2088_v13 = vsel %vm2081_vm3, %v2084_v14, %v2087_v31  ;;  %vm5395_vm14 = vcmp.lt.s32.totalorder %v5394_v19, 2  ;;  %vm5396_vm8 = vcmp.eq.s32.totalorder %v5394_v19, 0  ;;  %v13582_v31 = vld [vmem:[#allocation28_spill] sm:$0xff] }
 0x402   : > { %v7270_v0 = vsel %vm12227_vm15, %v1985_v38, %v5300_v41  ;;  %v2089_v3 = vsel %vm2078_vm5, nan, %v2088_v13  ;;  %v5398_v45 = vsel %vm5396_vm8, %v13574_v12, %v2083_v21  ;;  %vm5399_vm12 = vcmp.eq.s32.totalorder %v5394_v19, 2  ;;  %v13583_v13 = vld [vmem:[#allocation6_spill] sm:$0xff] }
 0x403   : > { %v7302_v28 = vsel %vm12250_vm13, %v10983_v15, %v7270_v0  ;;  %v5401_v57 = vsel %vm5399_vm12, %v2086_v26, %v13573_v7  ;;  %v2184_v56 = vand.u32 3, %v12155_v43  ;;  %v2187_v62 = vxor.u32 2147483648, %v12347_v11  ;;  %v13584_v0 = vld [vmem:[#allocation18_spill] sm:$0xff] }
 0x404   : > { %8689 = vmatprep.mubr.msk.f32.mxu1 %vm7334_vm7, %v7302_v28  ;;  %v5402_v36 = vsel %vm5395_vm14, %v5398_v45, %v5401_v57  ;;  %v2190_v32 = vxor.u32 2147483648, %v12334_v16  ;;  %v5497_v24 = vand.u32 3, %v12124_v40  ;;  %vm2286_vm1 = vweird.f32 %v11188_v6 }
 0x405   : > { %v5403_v58 = vsel %vm2078_vm5, nan, %v5402_v36  ;;  %vm2185_vm2 = vcmp.lt.s32.totalorder %v2184_v56, 2  ;;  %vm2186_vm4 = vcmp.eq.s32.totalorder %v2184_v56, 0  ;;  %vm2189_vm11 = vcmp.eq.s32.totalorder %v2184_v56, 2 }
 0x406   : > { %v7271_v15 = vsel %vm12227_vm15, %v2089_v3, %v5403_v58  ;;  %v2188_v43 = vsel %vm2186_vm4, %v12334_v16, %v2187_v62  ;;  %v2191_v37 = vsel %vm2189_vm11, %v2190_v32, %v12347_v11  ;;  %vm5498_vm6 = vcmp.lt.s32.totalorder %v5497_v24, 2  ;;  %v13586_v58 = vld [vmem:[#allocation21_spill] sm:$0xff] }
 0x407   : > { %v7303_v40 = vsel %vm12250_vm13, %v13571_v10, %v7271_v15  ;;  %v2192_v1 = vsel %vm2185_vm2, %v2188_v43, %v2191_v37  ;;  %vm5499_vm3 = vcmp.eq.s32.totalorder %v5497_v24, 0  ;;  %vm5502_vm10 = vcmp.eq.s32.totalorder %v5497_v24, 2  ;;  %v13577_v10 = vld [vmem:[#allocation122_spill] sm:$0xff]  ;;  %v13587_v37 = vld [vmem:[#allocation16_spill] sm:$0xff] }
 0x408   : > { %8690 = vmatmul.mubr.msk.f32.gmra.mrb[28].mxu1 %vm7334_vm7, %v7303_v40  ;;  %v2193_v61 = vsel %vm2182_vm0, nan, %v2192_v1  ;;  %v5501_v20 = vsel %vm5499_vm3, %v12334_v16, %v2187_v62  ;;  %v5504_v59 = vsel %vm5502_vm10, %v2190_v32, %v12347_v11  ;;  %v2288_v44 = vand.u32 3, %v13576_v46  ;;  %v13585_v32 = vld [vmem:[#allocation25_spill] sm:$0xff]  ;;  %v13588_v1 = vld [vmem:[#allocation11_spill] sm:$0xff] }
 0x409   : > { %v5505_v63 = vsel %vm5498_vm6, %v5501_v20, %v5504_v59  ;;  %v2291_v4 = vxor.u32 2147483648, %v12114_v23  ;;  %v2294_v48 = vxor.u32 2147483648, %v12105_v42  ;;  %v5600_v55 = vand.u32 3, %v13577_v10 }
 0x40a   : > { %v5506_v8 = vsel %vm2182_vm0, nan, %v5505_v63  ;;  %vm2289_vm5 = vcmp.lt.s32.totalorder %v2288_v44, 2  ;;  %vm2290_vm9 = vcmp.eq.s32.totalorder %v2288_v44, 0  ;;  %vm2293_vm14 = vcmp.eq.s32.totalorder %v2288_v44, 2  ;;  %v13590_v63 = vld [vmem:[#allocation53_spill] sm:$0xff] }
 0x40b   : > { %v7272_v16 = vsel %vm12227_vm15, %v2193_v61, %v5506_v8  ;;  %v2292_v11 = vsel %vm2290_vm9, %v12105_v42, %v2291_v4  ;;  %v2295_v52 = vsel %vm2293_vm14, %v2294_v48, %v12114_v23  ;;  %vm5601_vm8 = vcmp.lt.s32.totalorder %v5600_v55, 2  ;;  %v13589_v61 = vld [vmem:[#allocation48_spill] sm:$0xff] }
 0x40c   : > { %v7304_v7 = vsel %vm12250_vm13, %v11346_v5, %v7272_v16  ;;  %v2296_v21 = vsel %vm2289_vm5, %v2292_v11, %v2295_v52  ;;  %vm5602_vm12 = vcmp.eq.s32.totalorder %v5600_v55, 0  ;;  %vm5605_vm2 = vcmp.eq.s32.totalorder %v5600_v55, 2  ;;  %v13581_v5 = vld [vmem:[#allocation30_spill] sm:$0xff]  ;;  %v13591_v11 = vld [vmem:[#allocation52_spill] sm:$0xff] }
 0x40d   : > { %8692 = vmatprep.mubr.msk.f32.mxu1 %vm7334_vm7, %v7304_v7  ;;  %v2297_v12 = vsel %vm2286_vm1, nan, %v2296_v21  ;;  %v5604_v26 = vsel %vm5602_vm12, %v12105_v42, %v2291_v4  ;;  %v5607_v35 = vsel %vm5605_vm2, %v2294_v48, %v12114_v23  ;;  %vm2390_vm0 = vweird.f32 %v13578_v9 }
 0x40e   : > { %v5608_v38 = vsel %vm5601_vm8, %v5604_v26, %v5607_v35  ;;  %v2392_v18 = vand.u32 3, %v13579_v30  ;;  %v2395_v19 = vxor.u32 2147483648, %v13580_v51  ;;  %v2398_v17 = vxor.u32 2147483648, %v13581_v5  ;;  %v13593_v35 = vld [vmem:[#allocation9_spill] sm:$0xff]  ;;  %v13594_v30 = vld [vmem:[#allocation35_spill] sm:$0xff] }
 0x40f   : > { %v5609_v14 = vsel %vm2286_vm1, nan, %v5608_v38  ;;  %v5703_v41 = vand.u32 3, %v13582_v31  ;;  %vm2494_vm4 = vweird.f32 %v13583_v13  ;;  %v2496_v42 = vand.u32 3, %v13584_v0 }
 0x410   : > { %v7273_v23 = vsel %vm12227_vm15, %v2297_v12, %v5609_v14  ;;  %vm2393_vm11 = vcmp.lt.s32.totalorder %v2392_v18, 2  ;;  %vm2394_vm6 = vcmp.eq.s32.totalorder %v2392_v18, 0  ;;  %vm2397_vm3 = vcmp.eq.s32.totalorder %v2392_v18, 2  ;;  %v13592_v12 = vld [vmem:[#allocation42_spill] sm:$0xff] }
 0x411   : > { %v7305_v3 = vsel %vm12250_vm13, %v11188_v6, %v7273_v23  ;;  %v2396_v45 = vsel %vm2394_vm6, %v13581_v5, %v2395_v19  ;;  %v2399_v28 = vsel %vm2397_vm3, %v2398_v17, %v13580_v51  ;;  %vm5704_vm1 = vcmp.lt.s32.totalorder %v5703_v41, 2  ;;  %v13596_v23 = vld [vmem:[#allocation43_spill] sm:$0xff] }
 0x412   : > { %8693 = vmatmul.mubr.msk.f32.gmra.mrb[30].mxu1 %vm7334_vm7, %v7305_v3  ;;  %v2400_v57 = vsel %vm2393_vm11, %v2396_v45, %v2399_v28  ;;  %vm5705_vm10 = vcmp.eq.s32.totalorder %v5703_v41, 0  ;;  %vm5708_vm5 = vcmp.eq.s32.totalorder %v5703_v41, 2  ;;  %vm2497_vm9 = vcmp.lt.s32.totalorder %v2496_v42, 2  ;;  %v13597_v28 = vld [vmem:[#allocation34_spill] sm:$0xff] }
 0x413   : > { %v2401_v56 = vsel %vm2390_vm0, nan, %v2400_v57  ;;  %v5707_v62 = vsel %vm5705_vm10, %v13581_v5, %v2395_v19  ;;  %v5710_v36 = vsel %vm5708_vm5, %v2398_v17, %v13580_v51  ;;  %vm2498_vm14 = vcmp.eq.s32.totalorder %v2496_v42, 0  ;;  %v13595_v51 = vld [vmem:[#allocation44_spill] sm:$0xff] }
 0x414   : > { %v5711_v6 = vsel %vm5704_vm1, %v5707_v62, %v5710_v36  ;;  %v2499_v24 = vxor.u32 2147483648, %v13585_v32  ;;  %vm2501_vm8 = vcmp.eq.s32.totalorder %v2496_v42, 2  ;;  %v2502_v15 = vxor.u32 2147483648, %v13586_v58  ;;  %v13599_v62 = vld [vmem:[#allocation63_spill] sm:$0xff] }
 0x415   : > { %v5712_v43 = vsel %vm2390_vm0, nan, %v5711_v6  ;;  %v5806_v40 = vand.u32 3, %v13587_v37  ;;  %vm2598_vm12 = vweird.f32 %v13588_v1  ;;  %v2600_v20 = vand.u32 3, %v13589_v61  ;;  %v13600_v6 = vld [vmem:[#allocation67_spill] sm:$0xff] }
 0x416   : > { %v7274_v59 = vsel %vm12227_vm15, %v2401_v56, %v5712_v43  ;;  %v2500_v46 = vsel %vm2498_vm14, %v13586_v58, %v2499_v24  ;;  %v2503_v44 = vsel %vm2501_vm8, %v2502_v15, %v13585_v32  ;;  %v2603_v4 = vxor.u32 2147483648, %v13590_v63  ;;  %v13598_v56 = vld [vmem:[#allocation15_spill] sm:$0xff] }
 0x417   : > { %v7306_v48 = vsel %vm12250_vm13, %v13578_v9, %v7274_v59  ;;  %v2504_v10 = vsel %vm2497_vm9, %v2500_v46, %v2503_v44  ;;  %vm5807_vm2 = vcmp.lt.s32.totalorder %v5806_v40, 2  ;;  %vm5808_vm0 = vcmp.eq.s32.totalorder %v5806_v40, 0  ;;  %v13601_v59 = vld [vmem:[#allocation66_spill] sm:$0xff] }
 0x418   : > { %8695 = vmatprep.mubr.msk.f32.mxu1 %vm7334_vm7, %v7306_v48  ;;  %v2505_v55 = vsel %vm2494_vm4, nan, %v2504_v10  ;;  %v5810_v8 = vsel %vm5808_vm0, %v13586_v58, %v2499_v24  ;;  %vm5811_vm11 = vcmp.eq.s32.totalorder %v5806_v40, 2  ;;  %vm2601_vm6 = vcmp.lt.s32.totalorder %v2600_v20, 2  ;;  %v13603_v48 = vld [vmem:[#allocation13_spill] sm:$0xff]  ;;  %v13604_v10 = vld [vmem:[#allocation56_spill] sm:$0xff] }
 0x419   : > { %v5813_v16 = vsel %vm5811_vm11, %v2502_v15, %v13585_v32  ;;  %vm2602_vm3 = vcmp.eq.s32.totalorder %v2600_v20, 0  ;;  %vm2605_vm1 = vcmp.eq.s32.totalorder %v2600_v20, 2  ;;  %v2606_v52 = vxor.u32 2147483648, %v13591_v11 }
 0x41a   : > { %v5814_v7 = vsel %vm5807_vm2, %v5810_v8, %v5813_v16  ;;  %v2604_v21 = vsel %vm2602_vm3, %v13591_v11, %v2603_v4  ;;  %v5909_v26 = vand.u32 3, %v13592_v12  ;;  %vm2702_vm10 = vweird.f32 %v13593_v35 }
 0x41b   : > { %v5815_v9 = vsel %vm2494_vm4, nan, %v5814_v7  ;;  %v2607_v38 = vsel %vm2605_vm1, %v2606_v52, %v13590_v63  ;;  %v2704_v18 = vand.u32 3, %v13594_v30  ;;  %v2707_v19 = vxor.u32 2147483648, %v13595_v51  ;;  %v13606_v7 = vld [vmem:[#allocation59_spill] sm:$0xff] }
 0x41c   : > { %v7275_v5 = vsel %vm12227_vm15, %v2505_v55, %v5815_v9  ;;  %v2608_v17 = vsel %vm2601_vm6, %v2604_v21, %v2607_v38  ;;  %vm5910_vm5 = vcmp.lt.s32.totalorder %v5909_v26, 2  ;;  %vm5911_vm9 = vcmp.eq.s32.totalorder %v5909_v26, 0 }
 0x41d   : > { %v7307_v14 = vsel %vm12250_vm13, %v13583_v13, %v7275_v5  ;;  %v2609_v31 = vsel %vm2598_vm12, nan, %v2608_v17  ;;  %v5913_v41 = vsel %vm5911_vm9, %v13591_v11, %v2603_v4  ;;  %vm5914_vm4 = vcmp.eq.s32.totalorder %v5909_v26, 2  ;;  %v13605_v11 = vld [vmem:[#allocation60_spill] sm:$0xff]  ;;  %v13608_v17 = vld [vmem:[#allocation27_spill] sm:$0xff] }
 0x41e   : > { %8696 = vmatmul.mubr.msk.f32.gmra.mrb[32].mxu1 %vm7334_vm7, %v7307_v14  ;;  %v5916_v0 = vsel %vm5914_vm4, %v2606_v52, %v13590_v63  ;;  %vm2705_vm14 = vcmp.lt.s32.totalorder %v2704_v18, 2  ;;  %vm2706_vm8 = vcmp.eq.s32.totalorder %v2704_v18, 0  ;;  %vm2709_vm2 = vcmp.eq.s32.totalorder %v2704_v18, 2  ;;  %v13602_v63 = vld [vmem:[#allocation62_spill] sm:$0xff]  ;;  %v13607_v18 = vld [vmem:[#allocation51_spill] sm:$0xff] }
 0x41f   : > { %v5917_v42 = vsel %vm5910_vm5, %v5913_v41, %v5916_v0  ;;  %v2708_v3 = vsel %vm2706_vm8, %v13596_v23, %v2707_v19  ;;  %v2710_v45 = vxor.u32 2147483648, %v13596_v23  ;;  %v6012_v13 = vand.u32 3, %v13597_v28 }
 0x420   : > { %v5918_v57 = vsel %vm2598_vm12, nan, %v5917_v42  ;;  %vm2806_vm0 = vweird.f32 %v13598_v56  ;;  %v2808_v36 = vand.u32 3, %v13599_v62  ;;  %v2811_v32 = vxor.u32 2147483648, %v13600_v6 }
 0x421   : > { %v7276_v24 = vsel %vm12227_vm15, %v2609_v31, %v5918_v57  ;;  %v2711_v58 = vsel %vm2709_vm2, %v2710_v45, %v13595_v51  ;;  %vm6013_vm11 = vcmp.lt.s32.totalorder %v6012_v13, 2  ;;  %vm6014_vm6 = vcmp.eq.s32.totalorder %v6012_v13, 0 }
 0x422   : > { %v7308_v15 = vsel %vm12250_vm13, %v13588_v1, %v7276_v24  ;;  %v2712_v43 = vsel %vm2705_vm14, %v2708_v3, %v2711_v58  ;;  %v6016_v37 = vsel %vm6014_vm6, %v13596_v23, %v2707_v19  ;;  %vm6017_vm12 = vcmp.eq.s32.totalorder %v6012_v13, 2  ;;  %v13610_v13 = vld [vmem:[#allocation87_spill] sm:$0xff]  ;;  %v13613_v58 = vld [vmem:[#allocation22_spill] sm:$0xff] }
 0x423   : > { %8698 = vmatprep.mubr.msk.f32.mxu1 %vm7334_vm7, %v7308_v15  ;;  %v2713_v40 = vsel %vm2702_vm10, nan, %v2712_v43  ;;  %v6019_v61 = vsel %vm6017_vm12, %v2710_v45, %v13595_v51  ;;  %vm2809_vm3 = vcmp.lt.s32.totalorder %v2808_v36, 2  ;;  %vm2810_vm1 = vcmp.eq.s32.totalorder %v2808_v36, 0  ;;  %v13609_v45 = vld [vmem:[#allocation84_spill] sm:$0xff] }
 0x424   : > { %v6020_v20 = vsel %vm6013_vm11, %v6016_v37, %v6019_v61  ;;  %v2812_v46 = vsel %vm2810_vm1, %v13601_v59, %v2811_v32  ;;  %vm2813_vm5 = vcmp.eq.s32.totalorder %v2808_v36, 2  ;;  %v2814_v1 = vxor.u32 2147483648, %v13601_v59  ;;  %v13611_v36 = vld [vmem:[#allocation83_spill] sm:$0xff] }
 0x425   : > { %v6021_v44 = vsel %vm2702_vm10, nan, %v6020_v20  ;;  %v6115_v4 = vand.u32 3, %v13602_v63  ;;  %vm2910_vm9 = vweird.f32 %v13603_v48  ;;  %v2912_v55 = vand.u32 3, %v13604_v10 }
 0x426   : > { %v7277_v8 = vsel %vm12227_vm15, %v2713_v40, %v6021_v44  ;;  %v2815_v16 = vsel %vm2813_vm5, %v2814_v1, %v13600_v6  ;;  %v2915_v52 = vxor.u32 2147483648, %v13605_v11  ;;  %v2918_v21 = vxor.u32 2147483648, %v13606_v7 }
 0x427   : > { %v7309_v12 = vsel %vm12250_vm13, %v13593_v35, %v7277_v8  ;;  %v2816_v26 = vsel %vm2809_vm3, %v2812_v46, %v2815_v16  ;;  %vm6116_vm10 = vcmp.lt.s32.totalorder %v6115_v4, 2  ;;  %vm6117_vm4 = vcmp.eq.s32.totalorder %v6115_v4, 0 }
 0x428   : > { %8699 = vmatmul.mubr.msk.f32.gmra.mrb[34].mxu1 %vm7334_vm7, %v7309_v12  ;;  %v2817_v9 = vsel %vm2806_vm0, nan, %v2816_v26  ;;  %v6119_v38 = vsel %vm6117_vm4, %v13601_v59, %v2811_v32  ;;  %vm6120_vm14 = vcmp.eq.s32.totalorder %v6115_v4, 2  ;;  %vm2913_vm8 = vcmp.lt.s32.totalorder %v2912_v55, 2  ;;  %v13612_v32 = vld [vmem:[#allocation81_spill] sm:$0xff]  ;;  %v13615_v4 = vld [vmem:[#allocation78_spill] sm:$0xff] }
 0x429   : > { %v6122_v30 = vsel %vm6120_vm14, %v2814_v1, %v13600_v6  ;;  %vm2914_vm2 = vcmp.eq.s32.totalorder %v2912_v55, 0  ;;  %vm2917_vm11 = vcmp.eq.s32.totalorder %v2912_v55, 2  ;;  %v6218_v51 = vand.u32 3, %v13607_v18  ;;  %v13614_v1 = vld [vmem:[#allocation71_spill] sm:$0xff]  ;;  %v13616_v55 = vld [vmem:[#allocation77_spill] sm:$0xff]  ;;  %v13618_v18 = vld [vmem:[#allocation46_spill] sm:$0xff] }
 0x42a   : > { %v6123_v19 = vsel %vm6116_vm10, %v6119_v38, %v6122_v30  ;;  %v2916_v35 = vsel %vm2914_vm2, %v13606_v7, %v2915_v52  ;;  %v2919_v5 = vsel %vm2917_vm11, %v2918_v21, %v13605_v11  ;;  %vm3014_vm6 = vweird.f32 %v13608_v17 }
 0x42b   : > { %v6124_v14 = vsel %vm2806_vm0, nan, %v6123_v19  ;;  %v2920_v31 = vsel %vm2913_vm8, %v2916_v35, %v2919_v5  ;;  %vm6219_vm12 = vcmp.lt.s32.totalorder %v6218_v51, 2  ;;  %vm6220_vm3 = vcmp.eq.s32.totalorder %v6218_v51, 0  ;;  %v13619_v19 = vld [vmem:[#allocation97_spill] sm:$0xff] }
 0x42c   : > { %v7278_v41 = vsel %vm12227_vm15, %v2817_v9, %v6124_v14  ;;  %v2921_v0 = vsel %vm2910_vm9, nan, %v2920_v31  ;;  %v6222_v42 = vsel %vm6220_vm3, %v13606_v7, %v2915_v52  ;;  %vm6223_vm1 = vcmp.eq.s32.totalorder %v6218_v51, 2  ;;  %v13620_v5 = vld [vmem:[#allocation101_spill] sm:$0xff] }
 0x42d   : > { %v7310_v23 = vsel %vm12250_vm13, %v13598_v56, %v7278_v41  ;;  %v6225_v3 = vsel %vm6223_vm1, %v2918_v21, %v13605_v11  ;;  %v3016_v28 = vand.u32 3, %v13609_v45  ;;  %v3019_v57 = vxor.u32 2147483648, %v13610_v13 }
 0x42e   : > { %8701 = vmatprep.mubr.msk.f32.mxu1 %vm7334_vm7, %v7310_v23  ;;  %v6226_v62 = vsel %vm6219_vm12, %v6222_v42, %v6225_v3  ;;  %v3022_v6 = vxor.u32 2147483648, %v13611_v36  ;;  %v6321_v24 = vand.u32 3, %v13612_v32  ;;  %vm3118_vm0 = vweird.f32 %v13613_v58  ;;  %v13623_v23 = vld [vmem:[#allocation39_spill] sm:$0xff] }
 0x42f   : > { %v6227_v15 = vsel %vm2910_vm9, nan, %v6226_v62  ;;  %vm3017_vm5 = vcmp.lt.s32.totalorder %v3016_v28, 2  ;;  %vm3018_vm10 = vcmp.eq.s32.totalorder %v3016_v28, 0  ;;  %vm3021_vm4 = vcmp.eq.s32.totalorder %v3016_v28, 2  ;;  %v13624_v3 = vld [vmem:[#allocation91_spill] sm:$0xff] }
 0x430   : > { %v7279_v56 = vsel %vm12227_vm15, %v2921_v0, %v6227_v15  ;;  %v3020_v43 = vsel %vm3018_vm10, %v13611_v36, %v3019_v57  ;;  %v3023_v37 = vsel %vm3021_vm4, %v3022_v6, %v13610_v13  ;;  %vm6322_vm14 = vcmp.lt.s32.totalorder %v6321_v24, 2  ;;  %v13622_v0 = vld [vmem:[#allocation95_spill] sm:$0xff]  ;;  %v13625_v15 = vld [vmem:[#allocation94_spill] sm:$0xff] }
 0x431   : > { %v7311_v40 = vsel %vm12250_vm13, %v13603_v48, %v7279_v56  ;;  %v3024_v61 = vsel %vm3017_vm5, %v3020_v43, %v3023_v37  ;;  %vm6323_vm8 = vcmp.eq.s32.totalorder %v6321_v24, 0  ;;  %vm6326_vm2 = vcmp.eq.s32.totalorder %v6321_v24, 2  ;;  %v13617_v48 = vld [vmem:[#allocation69_spill] sm:$0xff] }
 0x432   : > { %8702 = vmatmul.mubr.msk.f32.gmra.mrb[36].mxu1 %vm7334_vm7, %v7311_v40  ;;  %v3025_v20 = vsel %vm3014_vm6, nan, %v3024_v61  ;;  %v6325_v59 = vsel %vm6323_vm8, %v13611_v36, %v3019_v57  ;;  %v6328_v46 = vsel %vm6326_vm2, %v3022_v6, %v13610_v13  ;;  %v3120_v44 = vand.u32 3, %v13614_v1  ;;  %v13626_v43 = vld [vmem:[#allocation93_spill] sm:$0xff] }
 0x433   : > { %v6329_v63 = vsel %vm6322_vm14, %v6325_v59, %v6328_v46  ;;  %v3123_v10 = vxor.u32 2147483648, %v13615_v4  ;;  %v3126_v8 = vxor.u32 2147483648, %v13616_v55  ;;  %v6424_v16 = vand.u32 3, %v13617_v48  ;;  %v13627_v61 = vld [vmem:[#allocation89_spill] sm:$0xff]  ;;  %v13628_v59 = vld [vmem:[#allocation64_spill] sm:$0xff] }
 0x434   : > { %v6330_v11 = vsel %vm3014_vm6, nan, %v6329_v63  ;;  %vm3121_vm9 = vcmp.lt.s32.totalorder %v3120_v44, 2  ;;  %vm3122_vm11 = vcmp.eq.s32.totalorder %v3120_v44, 0  ;;  %vm3125_vm12 = vcmp.eq.s32.totalorder %v3120_v44, 2  ;;  %v13629_v46 = vld [vmem:[#allocation108_spill] sm:$0xff] }
 0x435   : > { %v7280_v52 = vsel %vm12227_vm15, %v3025_v20, %v6330_v11  ;;  %v3124_v7 = vsel %vm3122_vm11, %v13616_v55, %v3123_v10  ;;  %v3127_v21 = vsel %vm3125_vm12, %v3126_v8, %v13615_v4  ;;  %vm6425_vm3 = vcmp.lt.s32.totalorder %v6424_v16, 2 }
 0x436   : > { %v7312_v12 = vsel %vm12250_vm13, %v13608_v17, %v7280_v52  ;;  %v3128_v26 = vsel %vm3121_vm9, %v3124_v7, %v3127_v21  ;;  %vm6426_vm1 = vcmp.eq.s32.totalorder %v6424_v16, 0  ;;  %vm6429_vm5 = vcmp.eq.s32.totalorder %v6424_v16, 2  ;;  %v13621_v17 = vld [vmem:[#allocation100_spill] sm:$0xff] }
 0x437   : > { %8704 = vmatprep.mubr.msk.f32.mxu1 %vm7334_vm7, %v7312_v12  ;;  %v3129_v9 = vsel %vm3118_vm0, nan, %v3128_v26  ;;  %v6428_v38 = vsel %vm6426_vm1, %v13616_v55, %v3123_v10  ;;  %v6431_v30 = vsel %vm6429_vm5, %v3126_v8, %v13615_v4  ;;  %vm3222_vm6 = vweird.f32 %v13618_v18  ;;  %v13630_v10 = vld [vmem:[#allocation113_spill] sm:$0xff]  ;;  %v13631_v7 = vld [vmem:[#allocation112_spill] sm:$0xff] }
 0x438   : > { %v6432_v51 = vsel %vm6425_vm3, %v6428_v38, %v6431_v30  ;;  %v3224_v35 = vand.u32 3, %v13619_v19  ;;  %v3227_v14 = vxor.u32 2147483648, %v13620_v5  ;;  %v3230_v31 = vxor.u32 2147483648, %v13621_v17  ;;  %v13633_v30 = vld [vmem:[#allocation55_spill] sm:$0xff] }
 0x439   : > { %v6433_v41 = vsel %vm3118_vm0, nan, %v6432_v51  ;;  %v6527_v42 = vand.u32 3, %v13622_v0  ;;  %vm3326_vm10 = vweird.f32 %v13623_v23  ;;  %v3328_v45 = vand.u32 3, %v13624_v3  ;;  %v13634_v19 = vld [vmem:[#allocation103_spill] sm:$0xff] }
 0x43a   : > { %v7281_v28 = vsel %vm12227_vm15, %v3129_v9, %v6433_v41  ;;  %vm3225_vm4 = vcmp.lt.s32.totalorder %v3224_v35, 2  ;;  %vm3226_vm14 = vcmp.eq.s32.totalorder %v3224_v35, 0  ;;  %vm3229_vm8 = vcmp.eq.s32.totalorder %v3224_v35, 2  ;;  %v13632_v9 = vld [vmem:[#allocation106_spill] sm:$0xff] }
 0x43b   : > { %v7313_v13 = vsel %vm12250_vm13, %v13613_v58, %v7281_v28  ;;  %v3228_v57 = vsel %vm3226_vm14, %v13621_v17, %v3227_v14  ;;  %v3231_v62 = vsel %vm3229_vm8, %v3230_v31, %v13620_v5  ;;  %vm6528_vm0 = vcmp.lt.s32.totalorder %v6527_v42, 2  ;;  %v13636_v28 = vld [vmem:[#allocation105_spill] sm:$0xff] }
 0x43c   : > { %8705 = vmatmul.mubr.msk.f32.gmra.mrb[38].mxu1 %vm7334_vm7, %v7313_v13  ;;  %v3232_v36 = vsel %vm3225_vm4, %v3228_v57, %v3231_v62  ;;  %vm6529_vm2 = vcmp.eq.s32.totalorder %v6527_v42, 0  ;;  %vm6532_vm9 = vcmp.eq.s32.totalorder %v6527_v42, 2  ;;  %vm3329_vm11 = vcmp.lt.s32.totalorder %v3328_v45, 2  ;;  %v13637_v62 = vld [vmem:[#allocation99_spill] sm:$0xff] }
 0x43d   : > { %v3233_v6 = vsel %vm3222_vm6, nan, %v3232_v36  ;;  %v6531_v32 = vsel %vm6529_vm2, %v13621_v17, %v3227_v14  ;;  %v6534_v24 = vsel %vm6532_vm9, %v3230_v31, %v13620_v5  ;;  %vm3330_vm12 = vcmp.eq.s32.totalorder %v3328_v45, 0  ;;  %v13635_v5 = vld [vmem:[#allocation110_spill] sm:$0xff] }
 0x43e   : > { %v6535_v58 = vsel %vm6528_vm0, %v6531_v32, %v6534_v24  ;;  %v3331_v56 = vxor.u32 2147483648, %v13625_v15  ;;  %vm3333_vm3 = vcmp.eq.s32.totalorder %v3328_v45, 2  ;;  %v3334_v37 = vxor.u32 2147483648, %v13626_v43  ;;  %v13639_v32 = vld [vmem:[#allocation123_spill] sm:$0xff] }
 0x43f   : > { %v6536_v40 = vsel %vm3222_vm6, nan, %v6535_v58  ;;  %v6630_v20 = vand.u32 3, %v13627_v61  ;;  %vm3430_vm1 = vweird.f32 %v13628_v59  ;;  %v3432_v1 = vand.u32 3, %v13629_v46 }
 0x440   : > { %v7282_v44 = vsel %vm12227_vm15, %v3233_v6, %v6536_v40  ;;  %v3332_v63 = vsel %vm3330_vm12, %v13626_v43, %v3331_v56  ;;  %v3335_v4 = vsel %vm3333_vm3, %v3334_v37, %v13625_v15  ;;  %v3435_v55 = vxor.u32 2147483648, %v13630_v10  ;;  %v13638_v6 = vld [vmem:[#allocation86_spill] sm:$0xff] }
 0x441   : > { %v7314_v8 = vsel %vm12250_vm13, %v13618_v18, %v7282_v44  ;;  %v3336_v48 = vsel %vm3329_vm11, %v3332_v63, %v3335_v4  ;;  %vm6631_vm5 = vcmp.lt.s32.totalorder %v6630_v20, 2  ;;  %vm6632_vm6 = vcmp.eq.s32.totalorder %v6630_v20, 0  ;;  %v13640_v63 = vld [vmem:[#allocation119_spill] sm:$0xff] }
 0x442   : > { %8707 = vmatprep.mubr.msk.f32.mxu1 %vm7334_vm7, %v7314_v8  ;;  %v3337_v16 = vsel %vm3326_vm10, nan, %v3336_v48  ;;  %v6634_v11 = vsel %vm6632_vm6, %v13626_v43, %v3331_v56  ;;  %vm6635_vm4 = vcmp.eq.s32.totalorder %v6630_v20, 2  ;;  %vm3433_vm14 = vcmp.lt.s32.totalorder %v3432_v1, 2 }
 0x443   : > { %v6637_v52 = vsel %vm6635_vm4, %v3334_v37, %v13625_v15  ;;  %vm3434_vm8 = vcmp.eq.s32.totalorder %v3432_v1, 0  ;;  %vm3437_vm0 = vcmp.eq.s32.totalorder %v3432_v1, 2  ;;  %v3438_v21 = vxor.u32 2147483648, %v13631_v7 }
 0x444   : > { %v6638_v12 = vsel %vm6631_vm5, %v6634_v11, %v6637_v52  ;;  %v3436_v26 = vsel %vm3434_vm8, %v13631_v7, %v3435_v55  ;;  %v6733_v38 = vand.u32 3, %v13632_v9  ;;  %vm3534_vm2 = vweird.f32 %v13633_v30  ;;  %v13643_v11 = vld [vmem:[#allocation121_spill] sm:$0xff] }
 0x445   : > { %v6639_v18 = vsel %vm3326_vm10, nan, %v6638_v12  ;;  %v3439_v51 = vsel %vm3437_vm0, %v3438_v21, %v13630_v10  ;;  %v3536_v35 = vand.u32 3, %v13634_v19  ;;  %v3539_v14 = vxor.u32 2147483648, %v13635_v5 }
 0x446   : > { %v7283_v17 = vsel %vm12227_vm15, %v3337_v16, %v6639_v18  ;;  %v3440_v31 = vsel %vm3433_vm14, %v3436_v26, %v3439_v51  ;;  %vm6734_vm9 = vcmp.lt.s32.totalorder %v6733_v38, 2  ;;  %vm6735_vm11 = vcmp.eq.s32.totalorder %v6733_v38, 0  ;;  %v13645_v51 = vld [vmem:[#allocation111_spill] sm:$0xff] }
 0x447   : > { %v7315_v41 = vsel %vm12250_vm13, %v13623_v23, %v7283_v17  ;;  %v3441_v0 = vsel %vm3430_vm1, nan, %v3440_v31  ;;  %v6737_v42 = vsel %vm6735_vm11, %v13631_v7, %v3435_v55  ;;  %vm6738_vm10 = vcmp.eq.s32.totalorder %v6733_v38, 2  ;;  %v13642_v55 = vld [vmem:[#allocation114_spill] sm:$0xff]  ;;  %v13644_v7 = vld [vmem:[#allocation120_spill] sm:$0xff] }
 0x448   : > { %8708 = vmatmul.mubr.msk.f32.gmra.mrb[40].mxu1 %vm7334_vm7, %v7315_v41  ;;  %v6740_v3 = vsel %vm6738_vm10, %v3438_v21, %v13630_v10  ;;  %vm3537_vm12 = vcmp.lt.s32.totalorder %v3536_v35, 2  ;;  %vm3538_vm3 = vcmp.eq.s32.totalorder %v3536_v35, 0  ;;  %vm3541_vm5 = vcmp.eq.s32.totalorder %v3536_v35, 2  ;;  %v13641_v10 = vld [vmem:[#allocation74_spill] sm:$0xff] }
 0x449   : > { %v6741_v45 = vsel %vm6734_vm9, %v6737_v42, %v6740_v3  ;;  %v3540_v13 = vsel %vm3538_vm3, %v13636_v28, %v3539_v14  ;;  %v3542_v57 = vxor.u32 2147483648, %v13636_v28  ;;  %v6836_v23 = vand.u32 3, %v13637_v62 }
 0x44a   : > { %v6742_v36 = vsel %vm3430_vm1, nan, %v6741_v45  ;;  %vm3638_vm6 = vweird.f32 %v13638_v6  ;;  %v3640_v24 = vand.u32 3, %v13639_v32  ;;  %v3643_v58 = vxor.u32 2147483648, %v12100_v27 }
 0x44b   : > { %v7284_v15 = vsel %vm12227_vm15, %v3441_v0, %v6742_v36  ;;  %v3543_v56 = vsel %vm3541_vm5, %v3542_v57, %v13635_v5  ;;  %vm6837_vm4 = vcmp.lt.s32.totalorder %v6836_v23, 2  ;;  %vm6838_vm14 = vcmp.eq.s32.totalorder %v6836_v23, 0 }
 0x44c   : > { %v7316_v43 = vsel %vm12250_vm13, %v13628_v59, %v7284_v15  ;;  %v3544_v37 = vsel %vm3537_vm12, %v3540_v13, %v3543_v56  ;;  %v6840_v40 = vsel %vm6838_vm14, %v13636_v28, %v3539_v14  ;;  %vm6841_vm1 = vcmp.eq.s32.totalorder %v6836_v23, 2 }
 0x44d   : > { %8710 = vmatprep.mubr.msk.f32.mxu1 %vm7334_vm7, %v7316_v43  ;;  %v3545_v61 = vsel %vm3534_vm2, nan, %v3544_v37  ;;  %v6843_v20 = vsel %vm6841_vm1, %v3542_v57, %v13635_v5  ;;  %vm3641_vm8 = vcmp.lt.s32.totalorder %v3640_v24, 2  ;;  %vm3642_vm0 = vcmp.eq.s32.totalorder %v3640_v24, 0 }
 0x44e   : > { %v6844_v46 = vsel %vm6837_vm4, %v6840_v40, %v6843_v20  ;;  %v3644_v1 = vsel %vm3642_vm0, %v12096_v34, %v3643_v58  ;;  %vm3645_vm9 = vcmp.eq.s32.totalorder %v3640_v24, 2  ;;  %v3646_v59 = vxor.u32 2147483648, %v12096_v34  ;;  %v7690_v20 = vld [vmem:[%s13112_s4 + $0x10] sm:$0xff] }
 0x44f   : > { %v6845_v44 = vsel %vm3534_vm2, nan, %v6844_v46  ;;  %v6939_v4 = vand.u32 3, %v13640_v63  ;;  %vm3742_vm11 = vweird.f32 %v13641_v10  ;;  %v3744_v8 = vand.u32 3, %v13642_v55  ;;  %v7691_v46 = vld [vmem:[%s13112_s4 + $0x18] sm:$0xff] }
 0x450   : > { %v7285_v48 = vsel %vm12227_vm15, %v3545_v61, %v6845_v44  ;;  %v3647_v16 = vsel %vm3645_vm9, %v3646_v59, %v12100_v27  ;;  %v3747_v52 = vxor.u32 2147483648, %v13643_v11  ;;  %v3750_v21 = vxor.u32 2147483648, %v13644_v7 }
 0x451   : > { %v7317_v12 = vsel %vm12250_vm13, %v13633_v30, %v7285_v48  ;;  %v3648_v26 = vsel %vm3641_vm8, %v3644_v1, %v3647_v16  ;;  %vm6940_vm2 = vcmp.lt.s32.totalorder %v6939_v4, 2  ;;  %vm6941_vm10 = vcmp.eq.s32.totalorder %v6939_v4, 0  ;;  %v7692_v48 = vld [vmem:[%s13112_s4 + $0x20] sm:$0xff] }
 0x452   : > { %8711 = vmatmul.mubr.msk.f32.gmra.mrb[42].mxu1 %vm7334_vm7, %v7317_v12  ;;  %v3649_v9 = vsel %vm3638_vm6, nan, %v3648_v26  ;;  %v6943_v38 = vsel %vm6941_vm10, %v12096_v34, %v3643_v58  ;;  %vm6944_vm12 = vcmp.eq.s32.totalorder %v6939_v4, 2  ;;  %vm3745_vm3 = vcmp.lt.s32.totalorder %v3744_v8, 2 }
 0x453   : > { %v6946_v18 = vsel %vm6944_vm12, %v3646_v59, %v12100_v27  ;;  %vm3746_vm5 = vcmp.eq.s32.totalorder %v3744_v8, 0  ;;  %vm3749_vm4 = vcmp.eq.s32.totalorder %v3744_v8, 2  ;;  %v7042_v19 = vand.u32 3, %v13645_v51 }
 0x454   : > { %v6947_v35 = vsel %vm6940_vm2, %v6943_v38, %v6946_v18  ;;  %v3748_v30 = vsel %vm3746_vm5, %v13644_v7, %v3747_v52  ;;  %v3751_v5 = vsel %vm3749_vm4, %v3750_v21, %v13643_v11  ;;  %vm3846_vm14 = vweird.f32 %v11464_v54 }
 0x455   : > { %v6948_v14 = vsel %vm3638_vm6, nan, %v6947_v35  ;;  %v3752_v17 = vsel %vm3745_vm3, %v3748_v30, %v3751_v5  ;;  %vm7043_vm1 = vcmp.lt.s32.totalorder %v7042_v19, 2  ;;  %vm7044_vm8 = vcmp.eq.s32.totalorder %v7042_v19, 0 }
 0x456   : > { %v7286_v34 = vsel %vm12227_vm15, %v3649_v9, %v6948_v14  ;;  %v3753_v27 = vsel %vm3742_vm11, nan, %v3752_v17  ;;  %v7046_v31 = vsel %vm7044_vm8, %v13644_v7, %v3747_v52  ;;  %vm7047_vm0 = vcmp.eq.s32.totalorder %v7042_v19, 2  ;;  %v7694_v52 = vld [vmem:[%s13112_s4 + $0x30] sm:$0xff]  ;;  %v7695_v7 = vld [vmem:[%s13112_s4 + $0x38] sm:$0xff] }
 0x457   : > { %v7318_v41 = vsel %vm12250_vm13, %v13638_v6, %v7286_v34  ;;  %v7049_v0 = vsel %vm7047_vm0, %v3750_v21, %v13643_v11  ;;  %v3848_v42 = vand.u32 3, %v12292_v33  ;;  %v3851_v3 = vxor.u32 2147483648, %v12426_v39 }
 0x458   : > { %8713 = vmatprep.mubr.msk.f32.mxu1 %vm7334_vm7, %v7318_v41  ;;  %v7050_v45 = vsel %vm7043_vm1, %v7046_v31, %v7049_v0  ;;  %v3854_v28 = vxor.u32 2147483648, %v12419_v25  ;;  %v7145_v13 = vand.u32 3, %v12285_v22  ;;  %vm3950_vm6 = vweird.f32 %v11263_v29 }
 0x459   : > { %v7051_v57 = vsel %vm3742_vm11, nan, %v7050_v45  ;;  %vm3849_vm9 = vcmp.lt.s32.totalorder %v3848_v42, 2  ;;  %vm3850_vm2 = vcmp.eq.s32.totalorder %v3848_v42, 0  ;;  %vm3853_vm10 = vcmp.eq.s32.totalorder %v3848_v42, 2 }
 0x45a   : > { %v7287_v33 = vsel %vm12227_vm15, %v3753_v27, %v7051_v57  ;;  %v3852_v62 = vsel %vm3850_vm2, %v12419_v25, %v3851_v3  ;;  %v3855_v23 = vsel %vm3853_vm10, %v3854_v28, %v12426_v39  ;;  %vm7146_vm12 = vcmp.lt.s32.totalorder %v7145_v13, 2 }
 0x45b   : > { %v7319_v22 = vsel %vm12250_vm13, %v13641_v10, %v7287_v33  ;;  %v3856_v36 = vsel %vm3849_vm9, %v3852_v62, %v3855_v23  ;;  %vm7147_vm3 = vcmp.eq.s32.totalorder %v7145_v13, 0  ;;  %vm7150_vm5 = vcmp.eq.s32.totalorder %v7145_v13, 2 }
 0x45c   : > { %8714 = vmatmul.mubr.msk.f32.gmra.mrb[44].mxu1 %vm7334_vm7, %v7319_v22  ;;  %v3857_v6 = vsel %vm3846_vm14, nan, %v3856_v36  ;;  %v7149_v32 = vsel %vm7147_vm3, %v12419_v25, %v3851_v3  ;;  %v7152_v24 = vsel %vm7150_vm5, %v3854_v28, %v12426_v39  ;;  %v3952_v58 = vand.u32 3, %v12065_v60  ;;  %v7688_v25 = vld [vmem:[%s13112_s4] sm:$0xff]  ;;  %v7689_v60 = vld [vmem:[%s13112_s4 + $0x8] sm:$0xff] }
 0x45d   : > { %v7153_v15 = vsel %vm7146_vm12, %v7149_v32, %v7152_v24  ;;  %v3955_v56 = vxor.u32 2147483648, %v12244_v50  ;;  %v3958_v43 = vxor.u32 2147483648, %v12232_v53  ;;  %v7248_v37 = vand.u32 3, %v12022_v49 }
 0x45e   : > { %v7154_v40 = vsel %vm3846_vm14, nan, %v7153_v15  ;;  %vm3953_vm11 = vcmp.lt.s32.totalorder %v3952_v58, 2  ;;  %vm3954_vm4 = vcmp.eq.s32.totalorder %v3952_v58, 0  ;;  %vm3957_vm1 = vcmp.eq.s32.totalorder %v3952_v58, 2 }
 0x45f   : > { %v7288_v39 = vsel %vm12227_vm15, %v3857_v6, %v7154_v40  ;;  %v3956_v61 = vsel %vm3954_vm4, %v12232_v53, %v3955_v56  ;;  %v3959_v49 = vsel %vm3957_vm1, %v3958_v43, %v12244_v50  ;;  %vm7249_vm8 = vcmp.lt.s32.totalorder %v7248_v37, 2 }
 0x460   : > { %v7320_v1 = vsel %vm12250_vm13, %v11464_v54, %v7288_v39  ;;  %v3960_v59 = vsel %vm3953_vm11, %v3956_v61, %v3959_v49  ;;  %vm7250_vm14 = vcmp.eq.s32.totalorder %v7248_v37, 0  ;;  %vm7253_vm0 = vcmp.eq.s32.totalorder %v7248_v37, 2  ;;  %v7693_v54 = vld [vmem:[%s13112_s4 + $0x28] sm:$0xff] }
 0x461   : > { %8716 = vmatprep.mubr.msk.f32.mxu1 %vm7334_vm7, %v7320_v1  ;;  %v3961_v44 = vsel %vm3950_vm6, nan, %v3960_v59  ;;  %v7252_v63 = vsel %vm7250_vm14, %v12232_v53, %v3955_v56  ;;  %v7255_v4 = vsel %vm7253_vm0, %v3958_v43, %v12244_v50  ;;  %v8791_v10 = vpack.c.bf16 %v7689_v60, %v7688_v25 }
 0x462   : > { %v7256_v55 = vsel %vm7249_vm8, %v7252_v63, %v7255_v4  ;;  %v8795_v8 = vpack.c.bf16 %v7691_v46, %v7690_v20  ;;  %v8799_v11 = vpack.c.bf16 %v7693_v54, %v7692_v48  ;;  %v8803_v47 = vpack.c.bf16 %v7695_v7, %v7694_v52 }
 0x463   : > { %v7257_v16 = vsel %vm3950_vm6, nan, %v7256_v55  ;;  %8792 = vmatprep.subr.bf16.mxu0 %v8791_v10 }
 0x464   : > { %v7289_v53 = vsel %vm12227_vm15, %v3961_v44, %v7257_v16  ;;  %8794 = vmatpush3.bf16.msra.mxu0 %v8791_v10  ;;  %vm7703_vm15 = vcmask 523264  }
 0x465   : > { %v7321_v50 = vsel %vm12250_vm13, %v11263_v29, %v7289_v53  ;;  %8796 = vmatprep.subr.bf16.mxu0 %v8795_v8  ;;  %v12916_v29 = vld [vmem:[%s13111_s3] ss:$0 sm:$0xff] }
 0x466   : > { %8717 = vmatmul.mubr.msk.f32.gmra.mrb[46].mxu1 %vm7334_vm7, %v7321_v50 }
 0x468   : > { %8798 = vmatpush3.bf16.msra.mxu0 %v8795_v8 }
 0x469   : > { %8800 = vmatprep.subr.bf16.mxu0 %v8799_v11 }
 0x46c   : > { %8802 = vmatpush3.bf16.msra.mxu0 %v8799_v11 }
 0x46d   : > { %8804 = vmatprep.subr.bf16.mxu0 %v8803_v47 }
 0x470   : > { %8806 = vmatpush3.bf16.msra.mxu0 %v8803_v47 }
 0x493   : > { %v8673_v2 = vpop.f32.mrb[16].mxu1 }
 0x494   : > { %v7503_v21 = vadd.f32 %v8673_v2, %v12916_v29  ;;  %v7497_v12 = vpop.f32.mrb[17].mxu1 }
 0x495   : > { %v7498_v26 = vadd.f32 %v12916_v29, %v7497_v12 }
 0x496   : > { %v7657_v38 = vmax.f32 %v7503_v21, 0.0 }
 0x497   : > { %v7656_v9 = vmax.f32 %v7498_v26, 0.0 }
 0x499   : > { %8735 = vmatprep.mubr.msk.f32.mxu0 %vm7703_vm15, %v7656_v9 }
 0x49a   : > { %8736 = vmatmul.mubr.msk.f32.vlgmr.msra.gmra.mrb[16].mxu0 %vm7703_vm15, %v7657_v38 }
 0x4a4   : > { %v8676_v18 = vpop.f32.mrb[18].mxu1 }
 0x4a5   : > { %v7513_v51 = vadd.f32 %v8676_v18, %v12916_v29  ;;  %v7507_v19 = vpop.f32.mrb[19].mxu1 }
 0x4a6   : > { %v7508_v35 = vadd.f32 %v12916_v29, %v7507_v19 }
 0x4a7   : > { %v7659_v5 = vmax.f32 %v7513_v51, 0.0 }
 0x4a8   : > { %v7658_v30 = vmax.f32 %v7508_v35, 0.0 }
 0x4aa   : > { %8738 = vmatprep.mubr.msk.f32.mxu0 %vm7703_vm15, %v7658_v30 }
 0x4ab   : > { %8739 = vmatmul.mubr.msk.f32.gmra.mrb[18].mxu0 %vm7703_vm15, %v7659_v5 }
 0x4b1   : > { %v8679_v14 = vpop.f32.mrb[20].mxu1 }
 0x4b2   : > { %v7523_v17 = vadd.f32 %v8679_v14, %v12916_v29  ;;  %v7517_v34 = vpop.f32.mrb[21].mxu1 }
 0x4b3   : > { %v7518_v27 = vadd.f32 %v12916_v29, %v7517_v34 }
 0x4b4   : > { %v7661_v41 = vmax.f32 %v7523_v17, 0.0 }
 0x4b5   : > { %v7660_v31 = vmax.f32 %v7518_v27, 0.0 }
 0x4b7   : > { %8741 = vmatprep.mubr.msk.f32.mxu0 %vm7703_vm15, %v7660_v31 }
 0x4b8   : > { %8742 = vmatmul.mubr.msk.f32.gmra.mrb[20].mxu0 %vm7703_vm15, %v7661_v41 }
 0x4bb   : > { %v8682_v0 = vpop.f32.mrb[22].mxu1 }
 0x4bc   : > { %v7533_v42 = vadd.f32 %v8682_v0, %v12916_v29  ;;  %v7527_v3 = vpop.f32.mrb[23].mxu1 }
 0x4bd   : > { %v7528_v45 = vadd.f32 %v12916_v29, %v7527_v3 }
 0x4be   : > { %v7663_v13 = vmax.f32 %v7533_v42, 0.0 }
 0x4bf   : > { %v7662_v28 = vmax.f32 %v7528_v45, 0.0 }
 0x4c1   : > { %8744 = vmatprep.mubr.msk.f32.mxu0 %vm7703_vm15, %v7662_v28 }
 0x4c2   : > { %8745 = vmatmul.mubr.msk.f32.gmra.mrb[22].mxu0 %vm7703_vm15, %v7663_v13 }
 0x4c7   : > { %v8685_v57 = vpop.f32.mrb[24].mxu1 }
 0x4c8   : > { %v7543_v33 = vadd.f32 %v8685_v57, %v12916_v29  ;;  %v7537_v62 = vpop.f32.mrb[25].mxu1 }
 0x4c9   : > { %v7538_v23 = vadd.f32 %v12916_v29, %v7537_v62 }
 0x4ca   : > { %v7665_v36 = vmax.f32 %v7543_v33, 0.0 }
 0x4cb   : > { %v7664_v22 = vmax.f32 %v7538_v23, 0.0 }
 0x4cd   : > { %8747 = vmatprep.mubr.msk.f32.mxu0 %vm7703_vm15, %v7664_v22 }
 0x4ce   : > { %8748 = vmatmul.mubr.msk.f32.gmra.mrb[24].mxu0 %vm7703_vm15, %v7665_v36 }
 0x4d1   : > { %v8688_v6 = vpop.f32.mrb[26].mxu1 }
 0x4d2   : > { %v7553_v32 = vadd.f32 %v8688_v6, %v12916_v29  ;;  %v7547_v24 = vpop.f32.mrb[27].mxu1 }
 0x4d3   : > { %v7548_v58 = vadd.f32 %v12916_v29, %v7547_v24 }
 0x4d4   : > { %v7667_v56 = vmax.f32 %v7553_v32, 0.0 }
 0x4d5   : > { %v7666_v15 = vmax.f32 %v7548_v58, 0.0  ;;  %v12988_v58 = vld [vmem:[%s13113_s5] ss:$0 sm:$0xff] }
 0x4d7   : > { %8750 = vmatprep.mubr.msk.f32.mxu0 %vm7703_vm15, %v7666_v15 }
 0x4d8   : > { %8751 = vmatmul.mubr.msk.f32.gmra.mrb[26].mxu0 %vm7703_vm15, %v7667_v56 }
 0x4db   : > { %v8691_v43 = vpop.f32.mrb[28].mxu1 }
 0x4dc   : > { %v7563_v37 = vadd.f32 %v8691_v43, %v12916_v29  ;;  %v7557_v40 = vpop.f32.mrb[29].mxu1 }
 0x4dd   : > { %v7558_v25 = vadd.f32 %v12916_v29, %v7557_v40 }
 0x4de   : > { %v7669_v39 = vmax.f32 %v7563_v37, 0.0 }
 0x4df   : > { %v7668_v60 = vmax.f32 %v7558_v25, 0.0 }
 0x4e1   : > { %8753 = vmatprep.mubr.msk.f32.mxu0 %vm7703_vm15, %v7668_v60 }
 0x4e2   : > { %8754 = vmatmul.mubr.msk.f32.gmra.mrb[28].mxu0 %vm7703_vm15, %v7669_v39 }
 0x4e5   : > { %v8694_v61 = vpop.f32.mrb[30].mxu1 }
 0x4e6   : > { %v7573_v49 = vadd.f32 %v8694_v61, %v12916_v29  ;;  %v7567_v20 = vpop.f32.mrb[31].mxu1 }
 0x4e7   : > { %v7568_v46 = vadd.f32 %v12916_v29, %v7567_v20 }
 0x4e8   : > { %v7671_v59 = vmax.f32 %v7573_v49, 0.0 }
 0x4e9   : > { %v7670_v1 = vmax.f32 %v7568_v46, 0.0 }
 0x4eb   : > { %8756 = vmatprep.mubr.msk.f32.mxu0 %vm7703_vm15, %v7670_v1 }
 0x4ec   : > { %8757 = vmatmul.mubr.msk.f32.gmra.mrb[30].mxu0 %vm7703_vm15, %v7671_v59 }
 0x4f1   : > { %v8697_v44 = vpop.f32.mrb[32].mxu1 }
 0x4f2   : > { %v7583_v63 = vadd.f32 %v8697_v44, %v12916_v29  ;;  %v7577_v4 = vpop.f32.mrb[33].mxu1 }
 0x4f3   : > { %v7578_v10 = vadd.f32 %v12916_v29, %v7577_v4 }
 0x4f4   : > { %v7673_v8 = vmax.f32 %v7583_v63, 0.0 }
 0x4f5   : > { %v7672_v55 = vmax.f32 %v7578_v10, 0.0 }
 0x4f7   : > { %8759 = vmatprep.mubr.msk.f32.mxu0 %vm7703_vm15, %v7672_v55 }
 0x4f8   : > { %8760 = vmatmul.mubr.msk.f32.gmra.mrb[32].mxu0 %vm7703_vm15, %v7673_v8 }
 0x4fb   : > { %v8700_v48 = vpop.f32.mrb[34].mxu1 }
 0x4fc   : > { %v7593_v54 = vadd.f32 %v8700_v48, %v12916_v29  ;;  %v7587_v16 = vpop.f32.mrb[35].mxu1 }
 0x4fd   : > { %v7588_v53 = vadd.f32 %v12916_v29, %v7587_v16 }
 0x4fe   : > { %v7675_v11 = vmax.f32 %v7593_v54, 0.0 }
 0x4ff   : > { %v7674_v50 = vmax.f32 %v7588_v53, 0.0 }
 0x501   : > { %8762 = vmatprep.mubr.msk.f32.mxu0 %vm7703_vm15, %v7674_v50 }
 0x502   : > { %8763 = vmatmul.mubr.msk.f32.gmra.mrb[34].mxu0 %vm7703_vm15, %v7675_v11 }
 0x505   : > { %v8703_v52 = vpop.f32.mrb[36].mxu1 }
 0x506   : > { %v7603_v7 = vadd.f32 %v8703_v52, %v12916_v29  ;;  %v7597_v47 = vpop.f32.mrb[37].mxu1 }
 0x507   : > { %v7598_v2 = vadd.f32 %v12916_v29, %v7597_v47 }
 0x508   : > { %v7677_v12 = vmax.f32 %v7603_v7, 0.0 }
 0x509   : > { %v7676_v21 = vmax.f32 %v7598_v2, 0.0 }
 0x50b   : > { %8765 = vmatprep.mubr.msk.f32.mxu0 %vm7703_vm15, %v7676_v21 }
 0x50c   : > { %8766 = vmatmul.mubr.msk.f32.gmra.mrb[36].mxu0 %vm7703_vm15, %v7677_v12 }
 0x50f   : > { %v8706_v26 = vpop.f32.mrb[38].mxu1 }
 0x510   : > { %v7613_v9 = vadd.f32 %v8706_v26, %v12916_v29  ;;  %v7607_v38 = vpop.f32.mrb[39].mxu1 }
 0x511   : > { %v7608_v18 = vadd.f32 %v12916_v29, %v7607_v38 }
 0x512   : > { %v7679_v19 = vmax.f32 %v7613_v9, 0.0 }
 0x513   : > { %v7678_v51 = vmax.f32 %v7608_v18, 0.0 }
 0x515   : > { %8768 = vmatprep.mubr.msk.f32.mxu0 %vm7703_vm15, %v7678_v51 }
 0x516   : > { %8769 = vmatmul.mubr.msk.f32.gmra.mrb[38].mxu0 %vm7703_vm15, %v7679_v19 }
 0x51b   : > { %v8709_v35 = vpop.f32.mrb[40].mxu1 }
 0x51c   : > { %v7623_v30 = vadd.f32 %v8709_v35, %v12916_v29  ;;  %v7617_v5 = vpop.f32.mrb[41].mxu1 }
 0x51d   : > { %v7618_v14 = vadd.f32 %v12916_v29, %v7617_v5 }
 0x51e   : > { %v7681_v34 = vmax.f32 %v7623_v30, 0.0 }
 0x51f   : > { %v7680_v17 = vmax.f32 %v7618_v14, 0.0 }
 0x521   : > { %8771 = vmatprep.mubr.msk.f32.mxu0 %vm7703_vm15, %v7680_v17 }
 0x522   : > { %8772 = vmatmul.mubr.msk.f32.gmra.mrb[40].mxu0 %vm7703_vm15, %v7681_v34 }
 0x525   : > { %v8712_v27 = vpop.f32.mrb[42].mxu1 }
 0x526   : > { %v7633_v31 = vadd.f32 %v8712_v27, %v12916_v29  ;;  %v7627_v41 = vpop.f32.mrb[43].mxu1 }
 0x527   : > { %v7628_v0 = vadd.f32 %v12916_v29, %v7627_v41 }
 0x528   : > { %v7683_v3 = vmax.f32 %v7633_v31, 0.0 }
 0x529   : > { %v7682_v42 = vmax.f32 %v7628_v0, 0.0 }
 0x52b   : > { %8774 = vmatprep.mubr.msk.f32.mxu0 %vm7703_vm15, %v7682_v42 }
 0x52c   : > { %8775 = vmatmul.mubr.msk.f32.gmra.mrb[42].mxu0 %vm7703_vm15, %v7683_v3 }
 0x52f   : > { %v8715_v45 = vpop.f32.mrb[44].mxu1 }
 0x530   : > { %v7643_v28 = vadd.f32 %v8715_v45, %v12916_v29  ;;  %v7637_v13 = vpop.f32.mrb[45].mxu1 }
 0x531   : > { %v7638_v57 = vadd.f32 %v12916_v29, %v7637_v13 }
 0x532   : > { %v7685_v62 = vmax.f32 %v7643_v28, 0.0 }
 0x533   : > { %v7684_v33 = vmax.f32 %v7638_v57, 0.0 }
 0x535   : > { %8777 = vmatprep.mubr.msk.f32.mxu0 %vm7703_vm15, %v7684_v33 }
 0x536   : > { %8778 = vmatmul.mubr.msk.f32.gmra.mrb[44].mxu0 %vm7703_vm15, %v7685_v62 }
 0x539   : > { %v8718_v23 = vpop.f32.mrb[46].mxu1 }
 0x53a   : > { %v7653_v22 = vadd.f32 %v8718_v23, %v12916_v29  ;;  %v7647_v36 = vpop.f32.mrb[47].mxu1 }
 0x53b   : > { %v7648_v6 = vadd.f32 %v12916_v29, %v7647_v36 }
 0x53c   : > { %v7687_v24 = vmax.f32 %v7653_v22, 0.0 }
 0x53d   : > { %v7686_v32 = vmax.f32 %v7648_v6, 0.0 }
 0x53f   : > { %8780 = vmatprep.mubr.msk.f32.mxu0 %vm7703_vm15, %v7686_v32 }
 0x540   : > { %8781 = vmatmul.mubr.msk.f32.gmra.mrb[46].mxu0 %vm7703_vm15, %v7687_v24 }
 0x56d   : > { %v8737_v15 = vpop.f32.mrb[16].mxu0 }
 0x56e   : > { %v7872_v56 = vadd.f32 %v8737_v15, %v12988_v58  ;;  %v7866_v43 = vpop.f32.mrb[17].mxu0 }
 0x56f   : > { %v7867_v29 = vadd.f32 %v12988_v58, %v7866_v43 }
 0x570   : > { %8026 = vst [vmem:[%s12992_s18 + $0x8] sm:$0xff] %v7872_v56 }
 0x571   : > { %8025 = vst [vmem:[%s12992_s18] sm:$0xff] %v7867_v29 }
 0x57e   : > { %v8740_v37 = vpop.f32.mrb[18].mxu0 }
 0x57f   : > { %v7882_v40 = vadd.f32 %v8740_v37, %v12988_v58  ;;  %v7876_v25 = vpop.f32.mrb[19].mxu0 }
 0x580   : > { %v7877_v60 = vadd.f32 %v12988_v58, %v7876_v25 }
 0x581   : > { %8028 = vst [vmem:[%s12992_s18 + $0x18] sm:$0xff] %v7882_v40 }
 0x582   : > { %8027 = vst [vmem:[%s12992_s18 + $0x10] sm:$0xff] %v7877_v60 }
 0x58b   : > { %v8743_v39 = vpop.f32.mrb[20].mxu0 }
 0x58c   : > { %v7892_v61 = vadd.f32 %v8743_v39, %v12988_v58  ;;  %v7886_v49 = vpop.f32.mrb[21].mxu0 }
 0x58d   : > { %v7887_v20 = vadd.f32 %v12988_v58, %v7886_v49 }
 0x58e   : > { %8030 = vst [vmem:[%s12992_s18 + $0x28] sm:$0xff] %v7892_v61 }
 0x58f   : > { %8029 = vst [vmem:[%s12992_s18 + $0x20] sm:$0xff] %v7887_v20 }
 0x595   : > { %v8746_v46 = vpop.f32.mrb[22].mxu0 }
 0x596   : > { %v7902_v1 = vadd.f32 %v8746_v46, %v12988_v58  ;;  %v7896_v59 = vpop.f32.mrb[23].mxu0 }
 0x597   : > { %v7897_v44 = vadd.f32 %v12988_v58, %v7896_v59 }
 0x598   : > { %8032 = vst [vmem:[%s12992_s18 + $0x38] sm:$0xff] %v7902_v1 }
 0x599   : > { %8031 = vst [vmem:[%s12992_s18 + $0x30] sm:$0xff] %v7897_v44 }
 0x5a1   : > { %v8749_v63 = vpop.f32.mrb[24].mxu0 }
 0x5a2   : > { %v7912_v4 = vadd.f32 %v8749_v63, %v12988_v58  ;;  %v7906_v10 = vpop.f32.mrb[25].mxu0 }
 0x5a3   : > { %v7907_v55 = vadd.f32 %v12988_v58, %v7906_v10 }
 0x5a4   : > { %8034 = vst [vmem:[%s12992_s18 + $0x48] sm:$0xff] %v7912_v4 }
 0x5a5   : > { %8033 = vst [vmem:[%s12992_s18 + $0x40] sm:$0xff] %v7907_v55 }
 0x5ab   : > { %v8752_v8 = vpop.f32.mrb[26].mxu0 }
 0x5ac   : > { %v7922_v48 = vadd.f32 %v8752_v8, %v12988_v58  ;;  %v7916_v54 = vpop.f32.mrb[27].mxu0 }
 0x5ad   : > { %v7917_v16 = vadd.f32 %v12988_v58, %v7916_v54 }
 0x5ae   : > { %8036 = vst [vmem:[%s12992_s18 + $0x58] sm:$0xff] %v7922_v48 }
 0x5af   : > { %8035 = vst [vmem:[%s12992_s18 + $0x50] sm:$0xff] %v7917_v16 }
 0x5b5   : > { %v8755_v53 = vpop.f32.mrb[28].mxu0 }
 0x5b6   : > { %v7932_v50 = vadd.f32 %v8755_v53, %v12988_v58  ;;  %v7926_v11 = vpop.f32.mrb[29].mxu0 }
 0x5b7   : > { %v7927_v52 = vadd.f32 %v12988_v58, %v7926_v11 }
 0x5b8   : > { %8038 = vst [vmem:[%s12992_s18 + $0x68] sm:$0xff] %v7932_v50 }
 0x5b9   : > { %8037 = vst [vmem:[%s12992_s18 + $0x60] sm:$0xff] %v7927_v52 }
 0x5bf   : > { %v8758_v7 = vpop.f32.mrb[30].mxu0 }
 0x5c0   : > { %v7942_v47 = vadd.f32 %v8758_v7, %v12988_v58  ;;  %v7936_v2 = vpop.f32.mrb[31].mxu0 }
 0x5c1   : > { %v7937_v21 = vadd.f32 %v12988_v58, %v7936_v2 }
 0x5c2   : > { %8040 = vst [vmem:[%s12992_s18 + $0x78] sm:$0xff] %v7942_v47 }
 0x5c3   : > { %8039 = vst [vmem:[%s12992_s18 + $0x70] sm:$0xff] %v7937_v21 }
 0x5cb   : > { %v8761_v12 = vpop.f32.mrb[32].mxu0 }
 0x5cc   : > { %v7952_v26 = vadd.f32 %v8761_v12, %v12988_v58  ;;  %v7946_v9 = vpop.f32.mrb[33].mxu0 }
 0x5cd   : > { %v7947_v38 = vadd.f32 %v12988_v58, %v7946_v9 }
 0x5ce   : > { %8042 = vst [vmem:[%s12992_s18 + $0x88] sm:$0xff] %v7952_v26 }
 0x5cf   : > { %8041 = vst [vmem:[%s12992_s18 + $0x80] sm:$0xff] %v7947_v38 }
 0x5d5   : > { %v8764_v18 = vpop.f32.mrb[34].mxu0 }
 0x5d6   : > { %v7962_v51 = vadd.f32 %v8764_v18, %v12988_v58  ;;  %v7956_v19 = vpop.f32.mrb[35].mxu0 }
 0x5d7   : > { %v7957_v35 = vadd.f32 %v12988_v58, %v7956_v19 }
 0x5d8   : > { %8044 = vst [vmem:[%s12992_s18 + $0x98] sm:$0xff] %v7962_v51 }
 0x5d9   : > { %8043 = vst [vmem:[%s12992_s18 + $0x90] sm:$0xff] %v7957_v35 }
 0x5df   : > { %v8767_v30 = vpop.f32.mrb[36].mxu0 }
 0x5e0   : > { %v7972_v5 = vadd.f32 %v8767_v30, %v12988_v58  ;;  %v7966_v14 = vpop.f32.mrb[37].mxu0 }
 0x5e1   : > { %v7967_v17 = vadd.f32 %v12988_v58, %v7966_v14 }
 0x5e2   : > { %8046 = vst [vmem:[%s12992_s18 + $0xa8] sm:$0xff] %v7972_v5 }
 0x5e3   : > { %8045 = vst [vmem:[%s12992_s18 + $0xa0] sm:$0xff] %v7967_v17 }
 0x5e9   : > { %v8770_v34 = vpop.f32.mrb[38].mxu0 }
 0x5ea   : > { %v7982_v27 = vadd.f32 %v8770_v34, %v12988_v58  ;;  %v7976_v31 = vpop.f32.mrb[39].mxu0 }
 0x5eb   : > { %v7977_v41 = vadd.f32 %v12988_v58, %v7976_v31 }
 0x5ec   : > { %8048 = vst [vmem:[%s12992_s18 + $0xb8] sm:$0xff] %v7982_v27 }
 0x5ed   : > { %8047 = vst [vmem:[%s12992_s18 + $0xb0] sm:$0xff] %v7977_v41 }
 0x5f5   : > { %v8773_v0 = vpop.f32.mrb[40].mxu0 }
 0x5f6   : > { %v7992_v42 = vadd.f32 %v8773_v0, %v12988_v58  ;;  %v7986_v3 = vpop.f32.mrb[41].mxu0 }
 0x5f7   : > { %v7987_v45 = vadd.f32 %v12988_v58, %v7986_v3 }
 0x5f8   : > { %8050 = vst [vmem:[%s12992_s18 + $0xc8] sm:$0xff] %v7992_v42 }
 0x5f9   : > { %8049 = vst [vmem:[%s12992_s18 + $0xc0] sm:$0xff] %v7987_v45 }
 0x5ff   : > { %v8776_v28 = vpop.f32.mrb[42].mxu0 }
 0x600   : > { %v8002_v13 = vadd.f32 %v8776_v28, %v12988_v58  ;;  %v7996_v57 = vpop.f32.mrb[43].mxu0 }
 0x601   : > { %v7997_v33 = vadd.f32 %v12988_v58, %v7996_v57 }
 0x602   : > { %8052 = vst [vmem:[%s12992_s18 + $0xd8] sm:$0xff] %v8002_v13 }
 0x603   : > { %8051 = vst [vmem:[%s12992_s18 + $0xd0] sm:$0xff] %v7997_v33 }
 0x609   : > { %v8779_v62 = vpop.f32.mrb[44].mxu0 }
 0x60a   : > { %v8012_v23 = vadd.f32 %v8779_v62, %v12988_v58  ;;  %v8006_v22 = vpop.f32.mrb[45].mxu0 }
 0x60b   : > { %v8007_v36 = vadd.f32 %v12988_v58, %v8006_v22 }
 0x60c   : > { %8054 = vst [vmem:[%s12992_s18 + $0xe8] sm:$0xff] %v8012_v23 }
 0x60d   : > { %8053 = vst [vmem:[%s12992_s18 + $0xe0] sm:$0xff] %v8007_v36 }
 0x613   : > { %v8782_v6 = vpop.f32.mrb[46].mxu0 }
 0x614   : > { %v8022_v32 = vadd.f32 %v8782_v6, %v12988_v58  ;;  %v8016_v24 = vpop.f32.mrb[47].mxu0 }
 0x615   : > { %v8017_v15 = vadd.f32 %v12988_v58, %v8016_v24 }
 0x616   : > { %8056 = vst [vmem:[%s12992_s18 + $0xf8] sm:$0xff] %v8022_v32 }
 0x617   : > { %8055 = vst [vmem:[%s12992_s18 + $0xf0] sm:$0xff] %v8017_v15 }
 0x618   : > { %9125 = shalt.err (!%p9122_p3)
}
 0x619   : > { %s9126_s13 = scalar_lea.hbm %s13058_s29, 4096  ;;  %s9130_s16 = scalar_lea.hbm %s13114_s6, 32768 }
 0x61a   : > { %p9127_p4 = scmp.ne.s32.totalorder %s13058_s29, %s9126_s13  ;;  %p9131_p9 = scmp.lt.u32.totalorder %s13058_s29, %s13114_s6 }
 0x61b   : > { %p9132_p10 = scmp.lt.u32.totalorder %s9130_s16, %s9126_s13  ;;  %p9134_p12 = scmp.lt.u32.totalorder %s9126_s13, %s13058_s29 }
 0x61c   : > { %p9128_p7 = pnand %p9127_p4, %p9258_p5 }
 0x61d   : > { %p9133_p11 = por %p9132_p10, %p9131_p9 }
 0x61e   : > { %p9129_p8 = pneg %p9128_p7 }
 0x61f   : > { %p9135_p13 = por %p9134_p12, %p9133_p11 }
 0x621   : > { %p9136_p0 = pnand %p9135_p13, %p9129_p8 }
 0x623   : > { %9139 = shalt.err (!%p9136_p0)
}
 0x624   : > { %s9183_s19 = smov 128   ;;  %s9184_s26 = smov 8  }
 0x625   : > { %8937 = dma.vmem_to_hbm [thread:$0]  (%p9258_p5), %s13060_s20, 4096, %s13058_s29, %s13067_s25, %s9183_s19, %s9183_s19, %s9184_s26  }
 0x626 PF: > { %p8943_p1 = scmp.ge.s32.totalorder %s9174_s24, 2  ;;  %s8086_s28 = sand.u32 1, %s9162_s21  }
 0x627   : > { %s8087_s9 = scalar_lea.sflag [#allocation3], %s8086_s28 }
 0x628   : > { %p8940_p2 = pnand %p8943_p1, %p9262_p6 }
 0x62a   : > { %9157 = dma.done.wait (!%p8940_p2), %s8087_s9, 4096  }
 0x62b   : > { %9159 = vsyncadd (!%p8940_p2), %s8087_s9, 4294963200  ;;  %p16_p3 = scmp.ge.s32.totalorder %s9245_s27, 10   ;;  %s13646_s21 = smov %s9166_s22 }
 0x62c   : > { %s13647_s22 = smov %s9170_s23  ;;  %s13648_s23 = smov %s9256_s30 }
 0x62d   : > { %s13649_s24 = smov %s9245_s27  ;;  %18 = sbr.rel (!%p16_p3) target bundleno = 3 (0x3), region = 79 }
 0x634   :  { %8092 = vsyncpa [#allocation3], 1 }
 0x635   :  { %8094 = vsyncpa [#allocation3 + $0x1], 1 }

</bundles_post_ra>
